<compile_context>
chip_gen: v7x
topology: tpu7x:2x2x1
jax: 0.10.0
libtpu: 0.0.40
codegen_flags: <defaults>
</compile_context>

<pallas_src>
import jax
import jax.numpy as jnp
from jax.experimental import pallas as pl
from jax.experimental.pallas import tpu as pltpu


def bahdanau_kernel(q_ref, k_ref, wa_wt_ref, wa_b_ref, ua_wt_ref, ua_b_ref,
                    va_w_ref, va_b_ref, ctx_ref, wts_ref):
    TB, S, H = k_ref.shape

    q = q_ref[...]                                    # (TB, H)    matmul dtype
    k = k_ref[...]                                    # (TB, S, H) matmul dtype

    # Wa(query): one (TB,H)@(H,H) MXU matmul for the whole batch block.
    wa_q = jnp.dot(q, wa_wt_ref[...],
                   preferred_element_type=jnp.float32) + wa_b_ref[...]   # (TB,H) f32

    # Ua(keys): flatten batch*seq rows so the MXU sees M = TB*S (free collapse
    # while S is a multiple of 8).
    ua_k = jnp.dot(k.reshape(TB * S, H), ua_wt_ref[...],
                   preferred_element_type=jnp.float32) + ua_b_ref[...]   # (TB*S,H)
    ua_k = ua_k.reshape(TB, S, H)

    # tanh stays in f32 (v5e has no bf16 VPU/EUP); EUP slot.
    t = jnp.tanh(wa_q[:, None, :] + ua_k)             # (TB, S, H) f32

    # Va scores: M=1 per batch would waste >99% of the MXU, so do it as a VPU
    # multiply + XLU lane-reduce over H. (The Va bias cancels in the softmax
    # but is kept for fidelity; it is a single broadcast add.)
    scores = jnp.sum(t * va_w_ref[...], axis=-1) + va_b_ref[...]         # (TB, S)

    # Numerically stable softmax over S (the lane axis); exact divide -- the
    # denominator is only TB scalars, far off the critical path.
    m = jnp.max(scores, axis=-1, keepdims=True)       # (TB, 1)
    e = jnp.exp(scores - m)                           # (TB, S)
    w = e / jnp.sum(e, axis=-1, keepdims=True)        # (TB, S) f32

    # context = weights @ keys. With S << 128 a batched MXU matmul runs at
    # M=1/K=S (~1% utilization); a VPU multiply + sublane reduce over S is
    # effectively free in the memory-bound steady state.
    kf = k.astype(jnp.float32)
    ctx = jnp.sum(w[:, :, None] * kf, axis=1)         # (TB, H) f32

    # Dense 2-D stores (no singleton q axis -> full, unmasked vreg stores).
    ctx_ref[...] = ctx.astype(ctx_ref.dtype)          # (TB, H)
    wts_ref[...] = w.astype(wts_ref.dtype)            # (TB, S)


def bahdanau_attention(query, keys, params, *, block_b=128,
                       matmul_dtype=jnp.bfloat16):
    """query: (B,1,H), keys: (B,S,H). Returns (context (B,1,H), weights (B,1,S))."""
    B, Q, H = query.shape
    assert Q == 1
    S = keys.shape[1]

    # Batch tile: a multiple of 8 sublanes; pad B up so ragged batches work.
    tb = max(8, min(int(block_b), B))
    tb = -(-tb // 8) * 8
    grid_b = -(-B // tb)
    Bp = grid_b * tb

    q2d = query.reshape(B, H).astype(matmul_dtype)    # drop the singleton q axis
    k3d = keys.astype(matmul_dtype)                   # bf16 keys halve HBM traffic
    if Bp != B:
        q2d = jnp.pad(q2d, ((0, Bp - B), (0, 0)))
        k3d = jnp.pad(k3d, ((0, Bp - B), (0, 0), (0, 0)))

    # Pre-transpose Linear weights (out,in)->(in,out); biases as row vectors.
    wa_wt = params["wa_w"].T.astype(matmul_dtype)     # (H, H) MXU operand
    ua_wt = params["ua_w"].T.astype(matmul_dtype)     # (H, H) MXU operand
    wa_b = params["wa_b"].reshape(1, H).astype(jnp.float32)
    ua_b = params["ua_b"].reshape(1, H).astype(jnp.float32)
    va_w = params["va_w"].reshape(1, H).astype(jnp.float32)   # VPU operand: f32
    va_b = params["va_b"].reshape(1, 1).astype(jnp.float32)

    const = lambda *shape: pl.BlockSpec(shape, lambda b: (0,) * len(shape))

    itm = jnp.dtype(matmul_dtype).itemsize
    cost = pl.CostEstimate(
        flops=2 * Bp * H * H + 2 * Bp * S * H * H + 4 * Bp * S * H,
        transcendentals=Bp * S * H + Bp * S,
        bytes_accessed=(Bp * H + Bp * S * H + 2 * H * H) * itm
                       + (Bp * H + Bp * S) * 4,
    )

    context2d, weights2d = pl.pallas_call(
        bahdanau_kernel,
        out_shape=(
            jax.ShapeDtypeStruct((Bp, H), jnp.float32),
            jax.ShapeDtypeStruct((Bp, S), jnp.float32),
        ),
        grid_spec=pltpu.PrefetchScalarGridSpec(
            num_scalar_prefetch=0,
            grid=(grid_b,),
            in_specs=[
                pl.BlockSpec((tb, H), lambda b: (b, 0)),        # query block
                pl.BlockSpec((tb, S, H), lambda b: (b, 0, 0)),  # keys block
                const(H, H),      # Wa^T
                const(1, H),      # Wa bias
                const(H, H),      # Ua^T
                const(1, H),      # Ua bias
                const(1, H),      # Va weight row
                const(1, 1),      # Va bias
            ],
            out_specs=[
                pl.BlockSpec((tb, H), lambda b: (b, 0)),        # context
                pl.BlockSpec((tb, S), lambda b: (b, 0)),        # weights
            ],
        ),
        compiler_params=pltpu.CompilerParams(
            dimension_semantics=("parallel",),
            # Explicit headroom under v7x's 64 MiB physical VMEM; well above
            # what the default tile needs, below v5e/v6e physical limits.
            vmem_limit_bytes=48 * 1024 * 1024,
        ),
        cost_estimate=cost,
    )(q2d, k3d, wa_wt, wa_b, ua_wt, ua_b, va_w, va_b)

    context = context2d[:B].reshape(B, 1, H)
    weights = weights2d[:B].reshape(B, 1, S)
    return context, weights


def bahdanau_reference(query, keys, params):
    """Pure-JAX replica of the PyTorch forward, for checking."""
    wa = query @ params["wa_w"].T + params["wa_b"]                   # (B, 1, H)
    ua = keys @ params["ua_w"].T + params["ua_b"]                    # (B, S, H)
    scores = jnp.tanh(wa + ua) @ params["va_w"].T + params["va_b"]   # (B, S, 1)
    scores = jnp.transpose(scores, (0, 2, 1))                        # (B, 1, S)
    weights = jax.nn.softmax(scores, axis=-1)
    context = jnp.einsum("bos,bsh->boh", weights, keys)
    return context, weights


if __name__ == "__main__":
    # hidden_size = 128 matches the PyTorch module. B=256 gives an even
    # 2-step grid at the default block_b=128 (both v7x TensorCores busy).
    B, S, H = 256, 8, 128

    key = jax.random.PRNGKey(0)
    ks = jax.random.split(key, 8)
    query = jax.random.normal(ks[0], (B, 1, H), dtype=jnp.float32)
    keys = jax.random.normal(ks[1], (B, S, H), dtype=jnp.float32)

    params = {
        "wa_w": 0.1 * jax.random.normal(ks[2], (H, H), dtype=jnp.float32),
        "wa_b": 0.1 * jax.random.normal(ks[3], (H,), dtype=jnp.float32),
        "ua_w": 0.1 * jax.random.normal(ks[4], (H, H), dtype=jnp.float32),
        "ua_b": 0.1 * jax.random.normal(ks[5], (H,), dtype=jnp.float32),
        "va_w": 0.1 * jax.random.normal(ks[6], (1, H), dtype=jnp.float32),
        "va_b": 0.1 * jax.random.normal(ks[7], (1,), dtype=jnp.float32),
    }

    ctx_ref, wts_ref = bahdanau_reference(query, keys, params)

    # 1) Default fast path: bf16 MXU operands, block_b=128 (grid of 2).
    context, weights = bahdanau_attention(query, keys, params)
    context = jax.block_until_ready(context)
    weights = jax.block_until_ready(weights)
    assert context.shape == (B, 1, H) and weights.shape == (B, 1, S)
    # bf16 query/keys/weight operands shift the result slightly vs f32.
    assert jnp.allclose(context, ctx_ref, atol=5e-2, rtol=5e-2)
    assert jnp.allclose(weights, wts_ref, atol=5e-2, rtol=5e-2)

    # 2) Exact f32 path + ragged batch (B not a multiple of the block).
    Br = 50
    ctx32, wts32 = bahdanau_attention(query[:Br], keys[:Br], params,
                                      block_b=32, matmul_dtype=jnp.float32)
    ctx32 = jax.block_until_ready(ctx32)
    wts32 = jax.block_until_ready(wts32)
    assert ctx32.shape == (Br, 1, H) and wts32.shape == (Br, 1, S)
    assert jnp.allclose(ctx32, ctx_ref[:Br], atol=2e-3, rtol=2e-3)
    assert jnp.allclose(wts32, wts_ref[:Br], atol=2e-3, rtol=2e-3)

    print("KERNEL_OK")
</pallas_src>

<mosaic_0001>
module attributes {stable_mosaic.version = 11 : i64} {
  func.func @bahdanau_kernel(%arg0: i32, %arg1: memref<128x128xbf16, #tpu.memory_space<vmem>>, %arg2: memref<128x8x128xbf16, #tpu.memory_space<vmem>>, %arg3: memref<128x128xbf16, #tpu.memory_space<vmem>>, %arg4: memref<1x128xf32, #tpu.memory_space<vmem>>, %arg5: memref<128x128xbf16, #tpu.memory_space<vmem>>, %arg6: memref<1x128xf32, #tpu.memory_space<vmem>>, %arg7: memref<1x128xf32, #tpu.memory_space<vmem>>, %arg8: memref<1x1xf32, #tpu.memory_space<vmem>>, %arg9: memref<128x128xf32, #tpu.memory_space<vmem>>, %arg10: memref<128x8xf32, #tpu.memory_space<vmem>>) attributes {dimension_semantics = [#tpu.dimension_semantics<parallel>], iteration_bounds = array<i64: 2>, scalar_prefetch = 0 : i64, scratch_operands = 0 : i64, tpu.core_type = #tpu.core_type<tc>, window_params = [{transform_indices = @transform_0, window_bounds = array<i64: 128, 128>}, {transform_indices = @transform_1, window_bounds = array<i64: 128, 8, 128>}, {pipeline_mode = #tpu.pipeline_mode<synchronous>, transform_indices = @transform_2, window_bounds = array<i64: 128, 128>}, {pipeline_mode = #tpu.pipeline_mode<synchronous>, transform_indices = @transform_3, window_bounds = array<i64: 1, 128>}, {pipeline_mode = #tpu.pipeline_mode<synchronous>, transform_indices = @transform_4, window_bounds = array<i64: 128, 128>}, {pipeline_mode = #tpu.pipeline_mode<synchronous>, transform_indices = @transform_5, window_bounds = array<i64: 1, 128>}, {pipeline_mode = #tpu.pipeline_mode<synchronous>, transform_indices = @transform_6, window_bounds = array<i64: 1, 128>}, {pipeline_mode = #tpu.pipeline_mode<synchronous>, transform_indices = @transform_7, window_bounds = array<i64: 1, 1>}, {transform_indices = @transform_8, window_bounds = array<i64: 128, 128>}, {transform_indices = @transform_9, window_bounds = array<i64: 128, 8>}]} {
    %c0 = arith.constant 0 : index
    %c0_0 = arith.constant 0 : index
    %0 = vector.load %arg1[%c0, %c0_0] : memref<128x128xbf16, #tpu.memory_space<vmem>>, vector<128x128xbf16>
    %c0_1 = arith.constant 0 : index
    %c0_2 = arith.constant 0 : index
    %c0_3 = arith.constant 0 : index
    %1 = vector.load %arg2[%c0_1, %c0_2, %c0_3] : memref<128x8x128xbf16, #tpu.memory_space<vmem>>, vector<128x8x128xbf16>
    %c0_4 = arith.constant 0 : index
    %c0_5 = arith.constant 0 : index
    %2 = vector.load %arg3[%c0_4, %c0_5] : memref<128x128xbf16, #tpu.memory_space<vmem>>, vector<128x128xbf16>
    %cst = arith.constant dense<0.000000e+00> : vector<128x128xf32>
    %3 = tpu.matmul %0, %2, %cst {dimension_numbers = #tpu.dot_dimension_numbers<[1], [0], [0], [1], [0, 0, 1, 1], [], []>} : vector<128x128xbf16>, vector<128x128xbf16>, vector<128x128xf32> -> vector<128x128xf32>
    %c0_6 = arith.constant 0 : index
    %c0_7 = arith.constant 0 : index
    %4 = vector.load %arg4[%c0_6, %c0_7] : memref<1x128xf32, #tpu.memory_space<vmem>>, vector<1x128xf32>
    %5 = vector.broadcast %4 : vector<1x128xf32> to vector<128x128xf32>
    %6 = arith.addf %3, %5 : vector<128x128xf32>
    %7 = vector.shape_cast %1 : vector<128x8x128xbf16> to vector<1024x128xbf16>
    %c0_8 = arith.constant 0 : index
    %c0_9 = arith.constant 0 : index
    %8 = vector.load %arg5[%c0_8, %c0_9] : memref<128x128xbf16, #tpu.memory_space<vmem>>, vector<128x128xbf16>
    %cst_10 = arith.constant dense<0.000000e+00> : vector<1024x128xf32>
    %9 = tpu.matmul %7, %8, %cst_10 {dimension_numbers = #tpu.dot_dimension_numbers<[1], [0], [0], [1], [0, 0, 1, 1], [], []>} : vector<1024x128xbf16>, vector<128x128xbf16>, vector<1024x128xf32> -> vector<1024x128xf32>
    %c0_11 = arith.constant 0 : index
    %c0_12 = arith.constant 0 : index
    %10 = vector.load %arg6[%c0_11, %c0_12] : memref<1x128xf32, #tpu.memory_space<vmem>>, vector<1x128xf32>
    %11 = vector.broadcast %10 : vector<1x128xf32> to vector<1024x128xf32>
    %12 = arith.addf %9, %11 : vector<1024x128xf32>
    %13 = vector.shape_cast %12 : vector<1024x128xf32> to vector<128x8x128xf32>
    %14 = vector.shape_cast %6 : vector<128x128xf32> to vector<128x1x128xf32>
    %15 = vector.broadcast %14 : vector<128x1x128xf32> to vector<128x8x128xf32>
    %16 = arith.addf %15, %13 : vector<128x8x128xf32>
    %17 = math.tanh %16 : vector<128x8x128xf32>
    %c0_13 = arith.constant 0 : index
    %c0_14 = arith.constant 0 : index
    %18 = vector.load %arg7[%c0_13, %c0_14] : memref<1x128xf32, #tpu.memory_space<vmem>>, vector<1x128xf32>
    %19 = vector.shape_cast %18 : vector<1x128xf32> to vector<1x1x128xf32>
    %20 = vector.broadcast %19 : vector<1x1x128xf32> to vector<128x8x128xf32>
    %21 = arith.mulf %17, %20 : vector<128x8x128xf32>
    %cst_15 = arith.constant dense<0.000000e+00> : vector<128x8xf32>
    %22 = vector.multi_reduction <add>, %21, %cst_15 [2] : vector<128x8x128xf32> to vector<128x8xf32>
    %c0_16 = arith.constant 0 : index
    %c0_17 = arith.constant 0 : index
    %23 = vector.load %arg8[%c0_16, %c0_17] : memref<1x1xf32, #tpu.memory_space<vmem>>, vector<1x1xf32>
    %24 = vector.broadcast %23 : vector<1x1xf32> to vector<128x8xf32>
    %25 = arith.addf %22, %24 : vector<128x8xf32>
    %cst_18 = arith.constant dense<0xFF800000> : vector<128xf32>
    %26 = vector.multi_reduction <maximumf>, %25, %cst_18 [1] : vector<128x8xf32> to vector<128xf32>
    %27 = vector.shape_cast %26 : vector<128xf32> to vector<128x1xf32>
    %28 = vector.broadcast %27 : vector<128x1xf32> to vector<128x8xf32>
    %29 = arith.subf %25, %28 : vector<128x8xf32>
    %30 = math.exp %29 : vector<128x8xf32>
    %cst_19 = arith.constant dense<0.000000e+00> : vector<128xf32>
    %31 = vector.multi_reduction <add>, %30, %cst_19 [1] : vector<128x8xf32> to vector<128xf32>
    %32 = vector.shape_cast %31 : vector<128xf32> to vector<128x1xf32>
    %33 = vector.broadcast %32 : vector<128x1xf32> to vector<128x8xf32>
    %34 = arith.divf %30, %33 : vector<128x8xf32>
    %35 = arith.extf %1 : vector<128x8x128xbf16> to vector<128x8x128xf32>
    %36 = vector.shape_cast %34 : vector<128x8xf32> to vector<128x8x1xf32>
    %37 = vector.broadcast %36 : vector<128x8x1xf32> to vector<128x8x128xf32>
    %38 = arith.mulf %37, %35 : vector<128x8x128xf32>
    %cst_20 = arith.constant dense<0.000000e+00> : vector<128x128xf32>
    %39 = vector.multi_reduction <add>, %38, %cst_20 [1] : vector<128x8x128xf32> to vector<128x128xf32>
    %c0_21 = arith.constant 0 : index
    %c0_22 = arith.constant 0 : index
    %40 = vector.load %arg9[%c0_21, %c0_22] : memref<128x128xf32, #tpu.memory_space<vmem>>, vector<128x128xf32>
    tpu.vector_store %arg9[%c0_21, %c0_22], %39 {strides = array<i32>} : memref<128x128xf32, #tpu.memory_space<vmem>>, vector<128x128xf32>,
    %c0_23 = arith.constant 0 : index
    %c0_24 = arith.constant 0 : index
    %41 = vector.load %arg10[%c0_23, %c0_24] : memref<128x8xf32, #tpu.memory_space<vmem>>, vector<128x8xf32>
    tpu.vector_store %arg10[%c0_23, %c0_24], %34 {strides = array<i32>} : memref<128x8xf32, #tpu.memory_space<vmem>>, vector<128x8xf32>,
    return
  }
  func.func @transform_0(%arg0: i32) -> (i32, i32) {
    %c0_i32 = arith.constant 0 : i32
    %c0_i32_0 = arith.constant 0 : i32
    return %arg0, %c0_i32 : i32, i32
  }
  func.func @transform_1(%arg0: i32) -> (i32, i32, i32) {
    %c0_i32 = arith.constant 0 : i32
    %c0_i32_0 = arith.constant 0 : i32
    %c0_i32_1 = arith.constant 0 : i32
    return %arg0, %c0_i32, %c0_i32_0 : i32, i32, i32
  }
  func.func @transform_2(%arg0: i32) -> (i32, i32) {
    %c0_i32 = arith.constant 0 : i32
    %c0_i32_0 = arith.constant 0 : i32
    %c0_i32_1 = arith.constant 0 : i32
    return %c0_i32, %c0_i32_0 : i32, i32
  }
  func.func @transform_3(%arg0: i32) -> (i32, i32) {
    %c0_i32 = arith.constant 0 : i32
    %c0_i32_0 = arith.constant 0 : i32
    %c0_i32_1 = arith.constant 0 : i32
    return %c0_i32, %c0_i32_0 : i32, i32
  }
  func.func @transform_4(%arg0: i32) -> (i32, i32) {
    %c0_i32 = arith.constant 0 : i32
    %c0_i32_0 = arith.constant 0 : i32
    %c0_i32_1 = arith.constant 0 : i32
    return %c0_i32, %c0_i32_0 : i32, i32
  }
  func.func @transform_5(%arg0: i32) -> (i32, i32) {
    %c0_i32 = arith.constant 0 : i32
    %c0_i32_0 = arith.constant 0 : i32
    %c0_i32_1 = arith.constant 0 : i32
    return %c0_i32, %c0_i32_0 : i32, i32
  }
  func.func @transform_6(%arg0: i32) -> (i32, i32) {
    %c0_i32 = arith.constant 0 : i32
    %c0_i32_0 = arith.constant 0 : i32
    %c0_i32_1 = arith.constant 0 : i32
    return %c0_i32, %c0_i32_0 : i32, i32
  }
  func.func @transform_7(%arg0: i32) -> (i32, i32) {
    %c0_i32 = arith.constant 0 : i32
    %c0_i32_0 = arith.constant 0 : i32
    %c0_i32_1 = arith.constant 0 : i32
    return %c0_i32, %c0_i32_0 : i32, i32
  }
  func.func @transform_8(%arg0: i32) -> (i32, i32) {
    %c0_i32 = arith.constant 0 : i32
    %c0_i32_0 = arith.constant 0 : i32
    return %arg0, %c0_i32 : i32, i32
  }
  func.func @transform_9(%arg0: i32) -> (i32, i32) {
    %c0_i32 = arith.constant 0 : i32
    %c0_i32_0 = arith.constant 0 : i32
    return %arg0, %c0_i32 : i32, i32
  }
}

</mosaic_0001>

<bundles_post_ra>
// kernel: tpu_custom_call.1
= control target key start
LH: loop header
LB: loop body
LE: loop exit
PB: predicated region body
PF: predicated region fallthrough
CT: control target
= control target key end

     0   :  { %s18747_s0 = inlined_call_operand.hbm [shape: bf16[256,128], index: 0, kind: input, shape index: {}]   ;;  %s18748_s1 = inlined_call_operand.hbm [shape: bf16[256,8,128], index: 1, kind: input, shape index: {}]   ;;  %s18749_s2 = inlined_call_operand.hbm [shape: bf16[128,128], index: 2, kind: input, shape index: {}]   ;;  %s18750_s3 = inlined_call_operand.vmem [shape: f32[1,128], index: 3, kind: input, shape index: {}]   ;;  %s18751_s4 = inlined_call_operand.hbm [shape: bf16[128,128], index: 4, kind: input, shape index: {}]   ;;  %s18752_s5 = inlined_call_operand.vmem [shape: f32[1,128], index: 5, kind: input, shape index: {}]   ;;  %s18753_s6 = inlined_call_operand.vmem [shape: f32[1,128], index: 6, kind: input, shape index: {}]   ;;  %s18754_s7 = inlined_call_operand.<no memory space> [shape: f32[1,1], index: 7, kind: input, shape index: {}]   ;;  %s18755_s8 = inlined_call_operand.hbm [shape: f32[256,128], index: 8, kind: output, shape index: {0}]   ;;  %s18756_s9 = inlined_call_operand.vmem [shape: f32[256,8], index: 9, kind: output, shape index: {1}]  }
   0x1   :  { %19076 = sst [smem:[#allocation168_spill]] %s18747_s0  ;;  %v15_v0 = vstv %s18754_s7 }
   0x2   :  { %19077 = sst [smem:[#allocation169_spill]] %s18749_s2  ;;  %16 = vst [vmem:[#allocation2] sm:$0x1] %v15_v0 }
   0x3   :  { %19078 = sst [smem:[#allocation170_spill]] %s18751_s4 }
   0x4   :  { %17 = vsyncpa [#allocation4], 0 }
   0x5   :  { %19 = vsyncpa [#allocation4 + $0x1], 0 }
   0x6   :  { %20 = vsyncpa [#allocation7], 0 }
   0x7   :  { %22 = vsyncpa [#allocation7 + $0x1], 0 }
   0x8   :  { %23 = vsyncpa [#allocation10], 0 }
   0x9   :  { %24 = vsyncpa [#allocation5], 0 }
   0xa   :  { %26 = vsyncpa [#allocation5 + $0x1], 0  ;;  %s12484_s11 = smov 0   ;;  %s12486_s12 = smov 0  }
   0xb   :  { %s12488_s13 = smov 0   ;;  %s12490_s14 = smov 0  }
   0xc LB: > { %19079 = sst [smem:[#allocation17_spill]] %s12414_s13  ;;  %s12505_s7 = sadd.s32 4294967295, %s12418_s14   ;;  %s12418_s14 = sphi %s12490_s14, %s20002_s14   ;;  %s12414_s13 = sphi %s12488_s13, %s20004_s13   ;;  %s12410_s12 = sphi %s12486_s12, %s20006_s12   ;;  %s12406_s11 = sphi %s12484_s11, %s20005_s11  }
   0xd   : > { %s10758_s15 = sadd.s32 4294967294, %s12418_s14   ;;  %p52_p0 = scmp.ne.s32.totalorder %s12410_s12, %s12406_s11 }
   0xe   : > { %p18757_p1 = scmp.eq.s32.totalorder %s12505_s7, 0  ;;  %p234_p3 = scmp.eq.s32.totalorder %s10758_s15, 1 }
   0xf   : > { %p10759_p5 = scmp.ge.s32.totalorder %s12418_s14, 1  ;;  %p267_p7 = scmp.lt.s32.totalorder %s12418_s14, 3 }
  0x10   : > { %p12514_p4 = por %p18757_p1, %p52_p0  ;;  %p12519_p6 = por %p234_p3, %p52_p0 }
  0x11   : > { %p12524_p8 = pnand %p10759_p5, %p267_p7  ;;  %s12420_s19 = smov [#allocation8]  }
  0x12   : > { %s19080_s16 = scalar_select %p12514_p4, 1, 0 }
  0x13   : > { %s19081_s17 = scalar_select %p12519_p6, 1, 0 }
  0x14   : > { %s279_s20 = sshll.u32 %s12420_s19, 4  ;;  %p11171_p9 = pneg %p12524_p8  ;;  %s12528_s20 = int_to_ptr.vmem [resolvable:$true] %s279_s20 }
  0x15   : > { %s12421_s22 = smov [#allocation9]   ;;  %s19084_s2 = sld [smem:[#allocation169_spill]] }
  0x16   : > { %p12535_p11 = pnand %p11171_p9, %p18757_p1  ;;  %s295_s23 = sshll.u32 %s12421_s22, 4  ;;  %s12539_s23 = int_to_ptr.vmem [resolvable:$true] %s295_s23 }
  0x18   : > { %p12226_p13 = pneg %p12535_p11 }
  0x1b   : > { %s12224_s26 = scalar_lea.hbm %s19084_s2, 1024 }
  0x1c   : > { %p12225_p12 = scmp.ne.s32.totalorder %s19084_s2, %s12224_s26  ;;  %p12231_p5 = scmp.lt.u32.totalorder %s12224_s26, %s19084_s2 }
  0x1e   : > { %p12227_p0 = pnand %p12226_p13, %p12225_p12 }
  0x20   : > { %p12228_p3 = pneg %p12227_p0 }
  0x22   : > { %p12233_p7 = pnand %p12231_p5, %p12228_p3 }
  0x24   : > { %12236 = shalt.err (!%p12233_p7)
}
  0x25   : > { %s12237_s10 = scalar_lea.vmem %s12528_s20, 1024  ;;  %p12245_p2 = scmp.lt.s32.totalorder %s12528_s20, %s12528_s20 }
  0x26   : > { %p12238_p9 = scmp.ne.s32.totalorder %s12528_s20, %s12237_s10  ;;  %p12246_p12 = scmp.lt.s32.totalorder %s12237_s10, %s12237_s10 }
  0x28   : > { %p12240_p10 = pnand %p12238_p9, %p12226_p13  ;;  %p12247_p0 = por %p12246_p12, %p12245_p2 }
  0x2a   : > { %p12241_p1 = pneg %p12240_p10 }
  0x2c   : > { %p12248_p6 = pnand %p12247_p0, %p12241_p1 }
  0x2e   : > { %12251 = shalt.err (!%p12248_p6)
}
  0x2f   : > { %s18758_s15 = smov 64   ;;  %s18760_s19 = smov 4  }
  0x30   : > { %11174 = dma.hbm_to_vmem [thread:$0]  (!%p12535_p11), %s19084_s2, 1024, %s12528_s20, [#allocation7], %s18758_s15, %s18758_s15, %s18760_s19  }
  0x31   : > { %s19085_s4 = sld [smem:[#allocation170_spill]] }
  0x37   : > { %s12252_s27 = scalar_lea.hbm %s19085_s4, 1024 }
  0x38   : > { %p12253_p1 = scmp.ne.s32.totalorder %s19085_s4, %s12252_s27  ;;  %p12259_p10 = scmp.lt.u32.totalorder %s12252_s27, %s19085_s4 }
  0x3a   : > { %p12255_p2 = pnand %p12253_p1, %p12226_p13 }
  0x3c   : > { %p12256_p6 = pneg %p12255_p2 }
  0x3e   : > { %p12261_p3 = pnand %p12259_p10, %p12256_p6 }
  0x40   : > { %12264 = shalt.err (!%p12261_p3)
}
  0x41   : > { %s12265_s20 = scalar_lea.vmem %s12539_s23, 1024  ;;  %p12273_p12 = scmp.lt.s32.totalorder %s12539_s23, %s12539_s23 }
  0x42   : > { %p12266_p5 = scmp.ne.s32.totalorder %s12539_s23, %s12265_s20  ;;  %p12274_p0 = scmp.lt.s32.totalorder %s12265_s20, %s12265_s20 }
  0x44   : > { %p12268_p7 = pnand %p12266_p5, %p12226_p13  ;;  %p12275_p1 = por %p12274_p0, %p12273_p12 }
  0x46   : > { %p12269_p9 = pneg %p12268_p7 }
  0x48   : > { %p12276_p2 = pnand %p12275_p1, %p12269_p9 }
  0x4a   : > { %12279 = shalt.err (!%p12276_p2)
}
  0x4b   : > { %11177 = dma.hbm_to_vmem [thread:$0]  (!%p12535_p11), %s19085_s4, 1024, %s12539_s23, [#allocation10], %s18758_s15, %s18758_s15, %s18760_s19  }
  0x4c   : > { %s12600_s21 = sadd.s32 1, %s12418_s14   ;;  %s39_s25 = sadd.s32 1, %s12414_s13 }
  0x4d   : > { %19086 = sst [smem:[#allocation18_spill]] %s12600_s21  ;;  %s36_s26 = ssub.s32 %s12418_s14, %s12600_s21 }
  0x4e   : > { %p46_p13 = scmp.ne.s32.totalorder %s12414_s13, %s12410_s12  ;;  %p37_p6 = scmp.eq.s32.totalorder %s36_s26, 0 }
  0x4f   : > { %p47_p10 = scmp.eq.s32.totalorder %s12418_s14, 0  ;;  %p19087_p3 = scmp.eq.s32.totalorder %s12505_s7, 1 }
  0x50   : > { %p11191_p7 = scmp.lt.s32.totalorder %s12418_s14, 2  ;;  %s12619_s29 = sand.u32 1, %s12414_s13  }
  0x51   : > { %p12610_p5 = por %p19087_p3, %p46_p13  ;;  %p48_p9 = por %p47_p10, %p46_p13 }
  0x52   : > { %s12616_s28 = scalar_select %p37_p6, %s12414_s13, %s39_s25  }
  0x53   : > { %s19088_s27 = scalar_select %p12610_p5, 1, 0 }
  0x54   : > { %19089 = sst [smem:[#allocation19_spill]] %s12616_s28  ;;  %s10763_s23 = sshll.u32 %s12619_s29, 6 }
  0x55   : > { %s10874_s30 = sshll.u32 %s12418_s14, 10  ;;  %s19090_s0 = sld [smem:[#allocation168_spill]] }
  0x56   : > { %s322_s24 = scalar_lea.vmem [#allocation3], %s10763_s23  ;;  %p12630_p11 = pnand %p11191_p7, %p48_p9 }
  0x57   : > { %s329_s25 = sshll.u32 %s322_s24, 4  ;;  %s10766_s19 = sshll.u32 %s12619_s29, 9  ;;  %s12628_s25 = int_to_ptr.vmem [resolvable:$true] %s329_s25 }
  0x58   : > { %s319_s2 = scalar_lea.sflag [#allocation4], %s12619_s29  ;;  %p12282_p0 = pneg %p12630_p11 }
  0x5b   : > { %s12626_s22 = scalar_lea.hbm %s19090_s0, %s10874_s30  ;;  %s12285_s20 = scalar_lea.hbm %s19090_s0, 2048 }
  0x5c   : > { %s12280_s10 = scalar_lea.hbm %s12626_s22, 1024  ;;  %p12286_p13 = scmp.lt.u32.totalorder %s12626_s22, %s19090_s0 }
  0x5d   : > { %p12281_p12 = scmp.ne.s32.totalorder %s12626_s22, %s12280_s10  ;;  %p12287_p6 = scmp.lt.u32.totalorder %s12285_s20, %s12280_s10 }
  0x5e   : > { %p12289_p3 = scmp.lt.u32.totalorder %s12280_s10, %s12626_s22 }
  0x5f   : > { %p12283_p1 = pnand %p12282_p0, %p12281_p12  ;;  %p12288_p10 = por %p12287_p6, %p12286_p13 }
  0x61   : > { %p12284_p2 = pneg %p12283_p1  ;;  %p12290_p7 = por %p12289_p3, %p12288_p10 }
  0x63   : > { %p12291_p9 = pnand %p12290_p7, %p12284_p2 }
  0x65   : > { %12294 = shalt.err (!%p12291_p9)
}
  0x66   : > { %s12295_s15 = scalar_lea.vmem %s12628_s25, 1024  ;;  %s12424_s23 = smov [#allocation3]  }
  0x67   : > { %p12296_p12 = scmp.ne.s32.totalorder %s12628_s25, %s12295_s15  ;;  %s12300_s30 = sshll.u32 %s12424_s23, 4  ;;  %s12301_s30 = int_to_ptr.vmem [resolvable:$false] %s12300_s30 }
  0x68   : > { %s12302_s4 = scalar_lea.vmem %s12301_s30, 2048  ;;  %p12303_p4 = scmp.lt.s32.totalorder %s12628_s25, %s12301_s30 }
  0x69   : > { %p12298_p1 = pnand %p12296_p12, %p12282_p0  ;;  %p12304_p13 = scmp.lt.s32.totalorder %s12302_s4, %s12295_s15 }
  0x6b   : > { %p12299_p5 = pneg %p12298_p1  ;;  %p12305_p6 = por %p12304_p13, %p12303_p4 }
  0x6d   : > { %p12306_p10 = pnand %p12305_p6, %p12299_p5 }
  0x6f   : > { %12309 = shalt.err (!%p12306_p10)
}
  0x70   : > { %s19092_s10 = smov 4   ;;  %s19093_s20 = smov 64  }
  0x71   : > { %11181 = dma.hbm_to_vmem [thread:$0]  (!%p12630_p11), %s12626_s22, 1024, %s12628_s25, %s319_s2, %s19093_s20, %s19093_s20, %s19092_s10  }
  0x72   : > { %s10875_s24 = sshll.u32 %s12418_s14, 13  ;;  %s343_s4 = scalar_lea.vmem [#allocation6], %s10766_s19 }
  0x73   : > { %s12671_s30 = scalar_lea.hbm %s18748_s1, %s10875_s24  ;;  %s350_s0 = sshll.u32 %s343_s4, 4  ;;  %s12675_s0 = int_to_ptr.vmem [resolvable:$true] %s350_s0 }
  0x74   : > { %s19094_s28 = sand.u32 1, %s12418_s14   ;;  %s12310_s21 = scalar_lea.hbm %s12671_s30, 8192 }
  0x75   : > { %s12679_s13 = scalar_lea.sflag [#allocation7], %s19094_s28  ;;  %p12311_p4 = scmp.ne.s32.totalorder %s12671_s30, %s12310_s21 }
  0x76   : > { %s12315_s29 = scalar_lea.hbm %s18748_s1, 16384  ;;  %p12316_p3 = scmp.lt.u32.totalorder %s12671_s30, %s18748_s1 }
  0x77   : > { %p12313_p5 = pnand %p12311_p4, %p12282_p0  ;;  %p12317_p7 = scmp.lt.u32.totalorder %s12315_s29, %s12310_s21 }
  0x78   : > { %p12319_p12 = scmp.lt.u32.totalorder %s12310_s21, %s12671_s30 }
  0x79   : > { %p12314_p2 = pneg %p12313_p5  ;;  %p12318_p9 = por %p12317_p7, %p12316_p3 }
  0x7b   : > { %p12320_p1 = por %p12319_p12, %p12318_p9 }
  0x7d   : > { %p12321_p13 = pnand %p12320_p1, %p12314_p2 }
  0x7f   : > { %12324 = shalt.err (!%p12321_p13)
}
  0x80   : > { %s12325_s19 = scalar_lea.vmem %s12675_s0, 8192  ;;  %s12425_s28 = smov [#allocation6]  }
  0x81   : > { %p12326_p6 = scmp.ne.s32.totalorder %s12675_s0, %s12325_s19  ;;  %s12330_s23 = sshll.u32 %s12425_s28, 4  ;;  %s12331_s23 = int_to_ptr.vmem [resolvable:$false] %s12330_s23 }
  0x82   : > { %s12332_s15 = scalar_lea.vmem %s12331_s23, 16384  ;;  %p12333_p5 = scmp.lt.s32.totalorder %s12675_s0, %s12331_s23 }
  0x83   : > { %p12328_p10 = pnand %p12326_p6, %p12282_p0  ;;  %p12334_p3 = scmp.lt.s32.totalorder %s12332_s15, %s12325_s19 }
  0x85   : > { %p12329_p4 = pneg %p12328_p10  ;;  %p12335_p7 = por %p12334_p3, %p12333_p5 }
  0x87   : > { %p12336_p9 = pnand %p12335_p7, %p12329_p4 }
  0x89   : > { %12339 = shalt.err (!%p12336_p9)
}
  0x8a   : > { %11184 = dma.hbm_to_vmem [thread:$0]  (!%p12630_p11), %s12671_s30, 8192, %s12675_s0, %s12679_s13, %s19093_s20, %s19093_s20, %s19092_s10  }
  0x8b   : > { %362 = sbr.rel (%p12524_p8) target bundleno = 1880 (0x758), region = 52 }
  0x92   : > { %s12711_s21 = sand.u32 1, %s12410_s12   ;;  %p19095_p0 = scmp.ne.s32.totalorder %s19080_s16, 0 }
  0x93   : > { %s10770_s4 = sshll.u32 %s12711_s21, 6  ;;  %s365_s2 = scalar_lea.sflag [#allocation4], %s12711_s21 }
  0x94   : > { %s12715_s22 = scalar_lea.vmem [#allocation3], %s10770_s4 }
  0x95   : > { %12385 = dma.done.wait (%p19095_p0), %s365_s2, 1024  }
  0x96   : > { %12387 = vsyncadd (%p19095_p0), %s365_s2, 4294966272  ;;  %s373_s0 = sand.u32 1, %s12505_s7   ;;  %s10771_s13 = sshll.u32 %s12711_s21, 9 }
  0x97   : > { %s374_s18 = scalar_lea.sflag [#allocation7], %s373_s0  ;;  %s12723_s26 = scalar_lea.vmem [#allocation6], %s10771_s13 }
  0x98   : > { %12389 = dma.done.wait (%p19095_p0), %s374_s18, 8192  }
  0x99   : > { %12391 = vsyncadd (%p19095_p0), %s374_s18, 4294959104  ;;  %p19096_p8 = scmp.eq.s32.totalorder %s12505_s7, 0 }
  0x9b   : > { %12393 = dma.done.wait (%p19096_p8), [#allocation7], 1024   ;;  %p19097_p11 = pmov %p19096_p8 }
  0x9c   : > { %p19098_p2 = pmov %p19096_p8 }
  0x9d   : > { %12395 = vsyncadd (%p19097_p11), [#allocation7], 4294966272 }
  0x9e   : > { %12397 = dma.done.wait (%p19098_p2), [#allocation10], 1024   ;;  %p19099_p12 = pmov %p19098_p2 }
  0x9f   : > { %v11237_v1 = vld [vmem:[#allocation8] sm:$0xff]   ;;  %v11239_v3 = vld [vmem:[#allocation8 + $0x8] sm:$0xff]   ;;  %v11241_v5 = vld [vmem:[#allocation8 + $0x10] sm:$0xff]   ;;  %vm4667_vm0 = vcmask 1041409   ;;  %vm4669_vm1 = vcmask 1042434   ;;  %vm4671_vm2 = vcmask 1043459  }
  0xa0   : > { %12399 = vsyncadd (%p19099_p12), [#allocation10], 4294966272  ;;  %v11238_v2 = vld [vmem:[#allocation9] sm:$0xff]   ;;  %10965 = vmatprep.subr.bf16.mxu0 %v11237_v1  ;;  %v11240_v4 = vld [vmem:[#allocation9 + $0x8] sm:$0xff]   ;;  %vm4673_vm3 = vcmask 1044484   ;;  %vm4675_vm4 = vcmask 1045509  }
  0xa1   : > { %11141 = vmatprep.subr.bf16.mxu1 %v11238_v2  ;;  %10966 = vmatpush3.bf16.msra.mxu0 %v11237_v1  ;;  %v11242_v6 = vld [vmem:[#allocation9 + $0x10] sm:$0xff]   ;;  %v11243_v7 = vld [vmem:[#allocation8 + $0x18] sm:$0xff]   ;;  %v11245_v9 = vld [vmem:[#allocation8 + $0x20] sm:$0xff]   ;;  %vm4677_vm5 = vcmask 1046534   ;;  %vm4679_vm6 = vcmask 1047559   ;;  %vm4802_vm7 = vcmask 64512  }
  0xa2   : > { %11149 = vmatpush3.bf16.msra.mxu1 %v11238_v2  ;;  %10967 = vmatprep.subr.bf16.mxu0 %v11239_v3  ;;  %v11244_v8 = vld [vmem:[#allocation9 + $0x18] sm:$0xff]   ;;  %v11246_v10 = vld [vmem:[#allocation9 + $0x20] sm:$0xff]   ;;  %v11247_v11 = vld [vmem:[#allocation8 + $0x28] sm:$0xff]   ;;  %s10775_s2 = sshll.u32 %s12505_s7, 4  ;;  %s10774_s10 = sshll.u32 %s12711_s21, 7 }
  0xa3   : > { %11142 = vmatprep.subr.bf16.mxu1 %v11240_v4  ;;  %v12737_v12 = vld [vmem:[#allocation9 + $0x28] sm:$0xff]   ;;  %v11253_v13 = vld [vmem:[%s12715_s22] sm:$0xff]   ;;  %v11249_v15 = vld [vmem:[#allocation8 + $0x30] sm:$0xff]   ;;  %p17665_p1 = scmp.lt.s32.totalorder %s10775_s2, 31  ;;  %s17757_s20 = scalar_lea.vmem [#allocation11], %s10774_s10 }
  0xa4   : > { %v512_v14 = vld [vmem:[%s12723_s26 + $0xe0] sm:$0xff]   ;;  %10981 = vmatprep.mubr.bf16.mxu0 %v11253_v13  ;;  %v11250_v16 = vld [vmem:[#allocation9 + $0x30] sm:$0xff]   ;;  %v11251_v17 = vld [vmem:[#allocation8 + $0x38] sm:$0xff]   ;;  %s10614_s30 = sshll.u32 %s17757_s20, 4  ;;  %p19999_p6 = scmp.ne.s32.totalorder %s19088_s27, 0  ;;  %s18698_s30 = int_to_ptr.vmem [resolvable:$true] %s10614_s30 }
  0xa5   : > { %10968 = vmatpush3.bf16.msra.mxu0 %v11239_v3  ;;  %11069 = vmatprep.mubr.bf16.mxu1 %v512_v14  ;;  %v11252_v18 = vld [vmem:[#allocation9 + $0x38] sm:$0xff]   ;;  %v514_v19 = vld [vmem:[%s12723_s26 + $0xe8] sm:$0xff]   ;;  %v516_v21 = vld [vmem:[%s12723_s26 + $0xf0] sm:$0xff]   ;;  %v12426_v3 = vmov 0   ;;  %s20008_s2 = smov (!%p17665_p1, %s10775_s2), 31  ;;  %s12340_s19 = scalar_lea.vmem %s18698_s30, 2048 }
  0xa6   : > { %11150 = vmatpush3.bf16.msra.mxu1 %v11240_v4  ;;  %10969 = vmatprep.subr.bf16.mxu0 %v11241_v5  ;;  %v11255_v20 = vld [vmem:[%s12715_s22 + $0x8] sm:$0xff]   ;;  %v11257_v22 = vld [vmem:[%s12715_s22 + $0x10] sm:$0xff]   ;;  %v518_v23 = vld [vmem:[%s12723_s26 + $0xf8] sm:$0xff]   ;;  %s10776_s0 = sshll.u32 %s20008_s2, 3  ;;  %p12341_p13 = scmp.ne.s32.totalorder %s18698_s30, %s12340_s19 }
  0xa7   : > { %11143 = vmatprep.subr.bf16.mxu1 %v11242_v6  ;;  %v11259_v24 = vld [vmem:[%s12715_s22 + $0x18] sm:$0xff]   ;;  %v520_v25 = vld [vmem:[%s12723_s26 + $0x100] sm:$0xff]   ;;  %v522_v27 = vld [vmem:[%s12723_s26 + $0x108] sm:$0xff]   ;;  %11235 = vset.pattern.permute.xlu0 %v12426_v3  ;;  %s17711_s16 = scalar_lea.vmem %s18756_s9, %s10776_s0  ;;  %s12428_s28 = smov [#allocation11]  }
  0xa8   : > { %v11261_v26 = vld [vmem:[%s12715_s22 + $0x20] sm:$0xff]   ;;  %v11263_v28 = vld [vmem:[%s12715_s22 + $0x28] sm:$0xff]   ;;  %v524_v29 = vld [vmem:[%s12723_s26 + $0x110] sm:$0xff]   ;;  %11236 = vset.pattern.permute.xlu1 %v12426_v3  ;;  %p12342_p10 = pnand %p12341_p13, %p19999_p6  ;;  %s12344_s23 = sshll.u32 %s12428_s28, 4  ;;  %s12345_s23 = int_to_ptr.vmem [resolvable:$false] %s12344_s23 }
  0xa9   : > { %10970 = vmatpush3.bf16.msra.mxu0 %v11241_v5  ;;  %v11265_v30 = vld [vmem:[%s12715_s22 + $0x30] sm:$0xff]   ;;  %v526_v31 = vld [vmem:[%s12723_s26 + $0x118] sm:$0xff]   ;;  %v456_v32 = vld [vmem:[%s12723_s26] sm:$0xff]   ;;  %s12346_s15 = scalar_lea.vmem %s12345_s23, 4096  ;;  %p12347_p5 = scmp.lt.s32.totalorder %s18698_s30, %s12345_s23 }
  0xaa   : > { %11151 = vmatpush3.bf16.msra.mxu1 %v11242_v6  ;;  %10971 = vmatprep.subr.bf16.mxu0 %v11243_v7  ;;  %v11267_v33 = vld [vmem:[%s12715_s22 + $0x38] sm:$0xff]   ;;  %v528_v34 = vld [vmem:[%s12723_s26 + $0x120] sm:$0xff]   ;;  %v458_v35 = vld [vmem:[%s12723_s26 + $0x8] sm:$0xff]   ;;  %p12343_p4 = pneg %p12342_p10  ;;  %p12348_p3 = scmp.lt.s32.totalorder %s12346_s15, %s12340_s19 }
  0xab   : > { %11144 = vmatprep.subr.bf16.mxu1 %v11244_v8  ;;  %v530_v36 = vld [vmem:[%s12723_s26 + $0x128] sm:$0xff]   ;;  %v460_v37 = vld [vmem:[%s12723_s26 + $0x10] sm:$0xff]   ;;  %v462_v39 = vld [vmem:[%s12723_s26 + $0x18] sm:$0xff]  }
  0xac   : > { %v532_v38 = vld [vmem:[%s12723_s26 + $0x130] sm:$0xff]   ;;  %v534_v40 = vld [vmem:[%s12723_s26 + $0x138] sm:$0xff]   ;;  %v464_v41 = vld [vmem:[%s12723_s26 + $0x20] sm:$0xff]   ;;  %p12349_p7 = por %p12348_p3, %p12347_p5 }
  0xad   : > { %10972 = vmatpush3.bf16.msra.mxu0 %v11243_v7  ;;  %v536_v42 = vld [vmem:[%s12723_s26 + $0x140] sm:$0xff]   ;;  %v466_v43 = vld [vmem:[%s12723_s26 + $0x28] sm:$0xff]   ;;  %v468_v45 = vld [vmem:[%s12723_s26 + $0x30] sm:$0xff]  }
  0xae   : > { %11152 = vmatpush3.bf16.msra.mxu1 %v11244_v8  ;;  %10973 = vmatprep.subr.bf16.mxu0 %v11245_v9  ;;  %v538_v44 = vld [vmem:[%s12723_s26 + $0x148] sm:$0xff]   ;;  %v540_v46 = vld [vmem:[%s12723_s26 + $0x150] sm:$0xff]   ;;  %v470_v47 = vld [vmem:[%s12723_s26 + $0x38] sm:$0xff]   ;;  %p12350_p9 = pnand %p12349_p7, %p12343_p4 }
  0xaf   : > { %11145 = vmatprep.subr.bf16.mxu1 %v11246_v10  ;;  %v542_v48 = vld [vmem:[%s12723_s26 + $0x158] sm:$0xff]   ;;  %v472_v49 = vld [vmem:[%s12723_s26 + $0x40] sm:$0xff]   ;;  %v474_v51 = vld [vmem:[%s12723_s26 + $0x48] sm:$0xff]  }
  0xb0   : > { %v544_v50 = vld [vmem:[%s12723_s26 + $0x160] sm:$0xff]   ;;  %v546_v52 = vld [vmem:[%s12723_s26 + $0x168] sm:$0xff]   ;;  %v476_v53 = vld [vmem:[%s12723_s26 + $0x50] sm:$0xff]  }
  0xb1   : > { %10974 = vmatpush3.bf16.msra.mxu0 %v11245_v9  ;;  %v548_v54 = vld [vmem:[%s12723_s26 + $0x170] sm:$0xff]   ;;  %v478_v55 = vld [vmem:[%s12723_s26 + $0x58] sm:$0xff]   ;;  %v480_v57 = vld [vmem:[%s12723_s26 + $0x60] sm:$0xff]  }
  0xb2   : > { %11153 = vmatpush3.bf16.msra.mxu1 %v11246_v10  ;;  %10975 = vmatprep.subr.bf16.mxu0 %v11247_v11  ;;  %v550_v56 = vld [vmem:[%s12723_s26 + $0x178] sm:$0xff]   ;;  %v552_v58 = vld [vmem:[%s12723_s26 + $0x180] sm:$0xff]   ;;  %v482_v59 = vld [vmem:[%s12723_s26 + $0x68] sm:$0xff]  }
  0xb3   : > { %11146 = vmatprep.subr.bf16.mxu1 %v12737_v12  ;;  %v554_v60 = vld [vmem:[%s12723_s26 + $0x188] sm:$0xff]   ;;  %v484_v61 = vld [vmem:[%s12723_s26 + $0x70] sm:$0xff]   ;;  %v486_v63 = vld [vmem:[%s12723_s26 + $0x78] sm:$0xff]  }
  0xb4   : > { %v556_v62 = vld [vmem:[%s12723_s26 + $0x190] sm:$0xff]   ;;  %v558_v0 = vld [vmem:[%s12723_s26 + $0x198] sm:$0xff]   ;;  %v488_v1 = vld [vmem:[%s12723_s26 + $0x80] sm:$0xff]  }
  0xb5   : > { %10976 = vmatpush3.bf16.msra.mxu0 %v11247_v11  ;;  %v490_v5 = vld [vmem:[%s12723_s26 + $0x88] sm:$0xff]   ;;  %v492_v7 = vld [vmem:[%s12723_s26 + $0x90] sm:$0xff]   ;;  %v494_v9 = vld [vmem:[%s12723_s26 + $0x98] sm:$0xff]  }
  0xb6   : > { %11154 = vmatpush3.bf16.msra.mxu1 %v12737_v12  ;;  %10977 = vmatprep.subr.bf16.mxu0 %v11249_v15  ;;  %v496_v11 = vld [vmem:[%s12723_s26 + $0xa0] sm:$0xff]   ;;  %v498_v13 = vld [vmem:[%s12723_s26 + $0xa8] sm:$0xff]  }
  0xb7   : > { %11147 = vmatprep.subr.bf16.mxu1 %v11250_v16  ;;  %v570_v14 = vld [vmem:[%s12723_s26 + $0x1c8] sm:$0xff]  }
  0xb9   : > { %10978 = vmatpush3.bf16.msra.mxu0 %v11249_v15  ;;  %v500_v15 = vld [vmem:[%s12723_s26 + $0xb0] sm:$0xff]  }
  0xba   : > { %11155 = vmatpush3.bf16.msra.mxu1 %v11250_v16  ;;  %10979 = vmatprep.subr.bf16.mxu0 %v11251_v17 }
  0xbb   : > { %11148 = vmatprep.subr.bf16.mxu1 %v11252_v18 }
  0xbd   : > { %10980 = vmatpush3.bf16.msra.mxu0 %v11251_v17  ;;  %v502_v17 = vld [vmem:[%s12723_s26 + $0xb8] sm:$0xff]  }
  0xbe   : > { %11156 = vmatpush3.bf16.msra.mxu1 %v11252_v18  ;;  %10997 = vmatprep.subr.bf16.mxu0 %v11238_v2 }
  0xc0   : > { %10982 = vmatmul.mubr.bf16.vlgmr.msra.gmra.mrb[0].mxu0 %v11255_v20  ;;  %v576_v20 = vld [vmem:[%s12723_s26 + $0x1e0] sm:$0xff]  }
  0xc1   : > { %11070 = vmatmul.mubr.bf16.vlgmr.msra.gmra.mrb[0].mxu1 %v514_v19  ;;  %10998 = vmatpush3.bf16.msra.mxu0 %v11238_v2  ;;  %v560_v2 = vld [vmem:[%s12723_s26 + $0x1a0] sm:$0xff]  }
  0xc2   : > { %10999 = vmatprep.subr.bf16.mxu0 %v11240_v4  ;;  %10985 = vmatprep.mubr.bf16.mxu0 %v11257_v22  ;;  %v504_v19 = vld [vmem:[%s12723_s26 + $0xc0] sm:$0xff]   ;;  %v578_v22 = vld [vmem:[%s12723_s26 + $0x1e8] sm:$0xff]  }
  0xc3   : > { %11073 = vmatprep.mubr.bf16.mxu1 %v516_v21  ;;  %v506_v21 = vld [vmem:[%s12723_s26 + $0xc8] sm:$0xff]  }
  0xc5   : > { %11000 = vmatpush3.bf16.msra.mxu0 %v11240_v4  ;;  %v10868_v4 = vld [vmem:[#allocation2] ss:$0 sm:$0xff] }
  0xc6   : > { %11001 = vmatprep.subr.bf16.mxu0 %v11242_v6  ;;  %3894 = vperm.xlu0 %11235, %v10868_v4  }
  0xc8   : > { %10986 = vmatmul.mubr.bf16.gmra.mrb[4].mxu0 %v11259_v24  ;;  %v580_v24 = vld [vmem:[%s12723_s26 + $0x1f0] sm:$0xff]  }
  0xc9   : > { %11074 = vmatmul.mubr.bf16.gmra.mrb[4].mxu1 %v518_v23  ;;  %11002 = vmatpush3.bf16.msra.mxu0 %v11242_v6  ;;  %v562_v6 = vld [vmem:[%s12723_s26 + $0x1a8] sm:$0xff]   ;;  %v508_v23 = vld [vmem:[%s12723_s26 + $0xd0] sm:$0xff]  }
  0xca   : > { %11003 = vmatprep.subr.bf16.mxu0 %v11244_v8  ;;  %10989 = vmatprep.mubr.bf16.mxu0 %v11261_v26  ;;  %v582_v26 = vld [vmem:[%s12723_s26 + $0x1f8] sm:$0xff]  }
  0xcb   : > { %11077 = vmatprep.mubr.bf16.mxu1 %v520_v25  ;;  %v510_v25 = vld [vmem:[%s12723_s26 + $0xd8] sm:$0xff]  }
  0xcd   : > { %11004 = vmatpush3.bf16.msra.mxu0 %v11244_v8  ;;  %v564_v8 = vld [vmem:[%s12723_s26 + $0x1b0] sm:$0xff]  }
  0xce   : > { %11005 = vmatprep.subr.bf16.mxu0 %v11246_v10 }
  0xd0   : > { %10990 = vmatmul.mubr.bf16.gmra.mrb[8].mxu0 %v11263_v28 }
  0xd1   : > { %11078 = vmatmul.mubr.bf16.gmra.mrb[8].mxu1 %v522_v27  ;;  %11006 = vmatpush3.bf16.msra.mxu0 %v11246_v10  ;;  %v566_v10 = vld [vmem:[%s12723_s26 + $0x1b8] sm:$0xff]  }
  0xd2   : > { %11007 = vmatprep.subr.bf16.mxu0 %v12737_v12  ;;  %10993 = vmatprep.mubr.bf16.mxu0 %v11265_v30  ;;  %v12818_v27 = vld [vmem:[%s18750_s3] ss:$0 sm:$0xff] }
  0xd3   : > { %11081 = vmatprep.mubr.bf16.mxu1 %v524_v29 }
  0xd5   : > { %11008 = vmatpush3.bf16.msra.mxu0 %v12737_v12  ;;  %v568_v12 = vld [vmem:[%s12723_s26 + $0x1c0] sm:$0xff]  }
  0xd6   : > { %11009 = vmatprep.subr.bf16.mxu0 %v11250_v16 }
  0xd8   : > { %10994 = vmatmul.mubr.bf16.gmra.mrb[12].mxu0 %v11267_v33 }
  0xd9   : > { %11082 = vmatmul.mubr.bf16.gmra.mrb[12].mxu1 %v526_v31  ;;  %11010 = vmatpush3.bf16.msra.mxu0 %v11250_v16  ;;  %v572_v16 = vld [vmem:[%s12723_s26 + $0x1d0] sm:$0xff]  }
  0xda   : > { %11011 = vmatprep.subr.bf16.mxu0 %v11252_v18  ;;  %11013 = vmatprep.mubr.bf16.mxu0 %v456_v32 }
  0xdb   : > { %11085 = vmatprep.mubr.bf16.mxu1 %v528_v34 }
  0xdd   : > { %11012 = vmatpush3.bf16.msra.mxu0 %v11252_v18  ;;  %v574_v18 = vld [vmem:[%s12723_s26 + $0x1d8] sm:$0xff]  }
  0xe0   : > { %11014 = vmatmul.mubr.bf16.vlgmr.msra.gmra.mrb[16].mxu0 %v458_v35 }
  0xe1   : > { %11086 = vmatmul.mubr.bf16.gmra.mrb[16].mxu1 %v530_v36  ;;  %11017 = vmatprep.mubr.bf16.mxu0 %v460_v37 }
  0xe2   : > { %11089 = vmatprep.mubr.bf16.mxu1 %v532_v38 }
  0xe8   : > { %11018 = vmatmul.mubr.bf16.gmra.mrb[20].mxu0 %v462_v39  ;;  %v12427_v39 = vmov 1966171168  }
  0xe9   : > { %11090 = vmatmul.mubr.bf16.gmra.mrb[20].mxu1 %v534_v40  ;;  %11021 = vmatprep.mubr.bf16.mxu0 %v464_v41  ;;  %v1818_v40 = vunpack.c.l.s4 %v12427_v39  ;;  %v18767_v41 = vlaneseq }
  0xea   : > { %11093 = vmatprep.mubr.bf16.mxu1 %v536_v42 }
  0xf0   : > { %11022 = vmatmul.mubr.bf16.gmra.mrb[24].mxu0 %v466_v43 }
  0xf1   : > { %11094 = vmatmul.mubr.bf16.gmra.mrb[24].mxu1 %v538_v44  ;;  %11025 = vmatprep.mubr.bf16.mxu0 %v468_v45  ;;  %v1819_v45 = vunpack.c.0.s8 %v1818_v40 }
  0xf2   : > { %11097 = vmatprep.mubr.bf16.mxu1 %v540_v46  ;;  %v12830_v46 = vshrl.u32 %v18767_v41, 7 }
  0xf4   : > { %19100 = vst [vmem:[#allocation20_spill] sm:$0xff] %v12830_v46 }
  0xf8   : > { %11026 = vmatmul.mubr.bf16.gmra.mrb[28].mxu0 %v470_v47 }
  0xf9   : > { %11098 = vmatmul.mubr.bf16.gmra.mrb[28].mxu1 %v542_v48  ;;  %11029 = vmatprep.mubr.bf16.mxu0 %v472_v49 }
  0xfa   : > { %11101 = vmatprep.mubr.bf16.mxu1 %v544_v50 }
 0x100   : > { %11030 = vmatmul.mubr.bf16.gmra.mrb[32].mxu0 %v474_v51 }
 0x101   : > { %11102 = vmatmul.mubr.bf16.gmra.mrb[32].mxu1 %v546_v52  ;;  %11033 = vmatprep.mubr.bf16.mxu0 %v476_v53 }
 0x102   : > { %11105 = vmatprep.mubr.bf16.mxu1 %v548_v54 }
 0x108   : > { %11034 = vmatmul.mubr.bf16.gmra.mrb[36].mxu0 %v478_v55  ;;  %v12840_v55 = vsub.s32 %v1819_v45, %v12830_v46 }
 0x109   : > { %11106 = vmatmul.mubr.bf16.gmra.mrb[36].mxu1 %v550_v56  ;;  %11037 = vmatprep.mubr.bf16.mxu0 %v480_v57 }
 0x10a   : > { %11109 = vmatprep.mubr.bf16.mxu1 %v552_v58  ;;  %v12846_v58 = vld [vmem:[%s18752_s5] ss:$0 sm:$0xff] }
 0x110   : > { %11038 = vmatmul.mubr.bf16.gmra.mrb[40].mxu0 %v482_v59 }
 0x111   : > { %11110 = vmatmul.mubr.bf16.gmra.mrb[40].mxu1 %v554_v60  ;;  %11041 = vmatprep.mubr.bf16.mxu0 %v484_v61 }
 0x112   : > { %11113 = vmatprep.mubr.bf16.mxu1 %v556_v62 }
 0x118   : > { %11042 = vmatmul.mubr.bf16.gmra.mrb[44].mxu0 %v486_v63 }
 0x119   : > { %11114 = vmatmul.mubr.bf16.gmra.mrb[44].mxu1 %v558_v0  ;;  %11045 = vmatprep.mubr.bf16.mxu0 %v488_v1 }
 0x11a   : > { %11117 = vmatprep.mubr.bf16.mxu1 %v560_v2  ;;  %v12856_v2 = vsub.s32 0, %v12830_v46 }
 0x11c   : > { %19101 = vst [vmem:[#allocation21_spill] sm:$0xff] %v12856_v2 }
 0x120   : > { %11046 = vmatmul.mubr.bf16.gmra.mrb[48].mxu0 %v490_v5 }
 0x121   : > { %11118 = vmatmul.mubr.bf16.gmra.mrb[48].mxu1 %v562_v6  ;;  %11049 = vmatprep.mubr.bf16.mxu0 %v492_v7 }
 0x122   : > { %11121 = vmatprep.mubr.bf16.mxu1 %v564_v8 }
 0x128   : > { %11050 = vmatmul.mubr.bf16.gmra.mrb[52].mxu0 %v494_v9 }
 0x129   : > { %11122 = vmatmul.mubr.bf16.gmra.mrb[52].mxu1 %v566_v10  ;;  %11053 = vmatprep.mubr.bf16.mxu0 %v496_v11 }
 0x12a   : > { %11125 = vmatprep.mubr.bf16.mxu1 %v568_v12 }
 0x130   : > { %11054 = vmatmul.mubr.bf16.gmra.mrb[56].mxu0 %v498_v13 }
 0x131   : > { %11126 = vmatmul.mubr.bf16.gmra.mrb[56].mxu1 %v570_v14  ;;  %11057 = vmatprep.mubr.bf16.mxu0 %v500_v15 }
 0x132   : > { %11129 = vmatprep.mubr.bf16.mxu1 %v572_v16 }
 0x138   : > { %11058 = vmatmul.mubr.bf16.gmra.mrb[60].mxu0 %v502_v17 }
 0x139   : > { %11130 = vmatmul.mubr.bf16.gmra.mrb[60].mxu1 %v574_v18  ;;  %11061 = vmatprep.mubr.bf16.mxu0 %v504_v19 }
 0x13a   : > { %11133 = vmatprep.mubr.bf16.mxu1 %v576_v20 }
 0x140   : > { %11062 = vmatmul.mubr.bf16.gmra.mrb[64].mxu0 %v506_v21 }
 0x141   : > { %11134 = vmatmul.mubr.bf16.gmra.mrb[64].mxu1 %v578_v22  ;;  %11065 = vmatprep.mubr.bf16.mxu0 %v508_v23 }
 0x142   : > { %11137 = vmatprep.mubr.bf16.mxu1 %v580_v24 }
 0x148   : > { %11066 = vmatmul.mubr.bf16.gmra.mrb[68].mxu0 %v510_v25 }
 0x149   : > { %11138 = vmatmul.mubr.bf16.gmra.mrb[68].mxu1 %v582_v26 }
 0x193   : > { %v10983_v28 = vpop.f32.mrb[0].mxu0 }
 0x194   : > { %v12821_v29 = vadd.f32 %v10983_v28, %v12818_v27  ;;  %v737_v30 = vpop.f32.mrb[1].mxu0  ;;  %v11071_v31 = vpop.f32.mrb[0].mxu1 }
 0x195   : > { %v10984_v32 = vpop.f32.mrb[2].mxu0  ;;  %v1513_v33 = vpop.f32.mrb[1].mxu1  ;;  %v738_v11 = vadd.f32 %v12818_v27, %v737_v30  ;;  %v1522_v13 = vadd.f32 %v11071_v31, %v12846_v58 }
 0x196   : > { %v12824_v34 = vadd.f32 %v10984_v32, %v12818_v27  ;;  %v740_v35 = vpop.f32.mrb[3].mxu0  ;;  %v11072_v36 = vpop.f32.mrb[2].mxu1  ;;  %v1514_v7 = vadd.f32 %v12846_v58, %v1513_v33  ;;  %v1914_v30 = vcombine.high %v12821_v29, %v12821_v29 }
 0x197   : > { %v12827_v37 = vadd.f32 %v12818_v27, %v740_v35  ;;  %v1516_v38 = vpop.f32.mrb[3].mxu1  ;;  %v1525_v33 = vadd.f32 %v11072_v36, %v12846_v58 }
 0x198   : > { %v1517_v17 = vadd.f32 %v12846_v58, %v1516_v38 }
 0x19b   : > { %v10987_v42 = vpop.f32.mrb[4].mxu0 }
 0x19c   : > { %v753_v43 = vpop.f32.mrb[5].mxu0  ;;  %v11075_v44 = vpop.f32.mrb[4].mxu1  ;;  %v12833_v47 = vadd.f32 %v10987_v42, %v12818_v27 }
 0x19d   : > { %v12836_v48 = vadd.f32 %v12818_v27, %v753_v43  ;;  %v10988_v49 = vpop.f32.mrb[6].mxu0  ;;  %v1529_v50 = vpop.f32.mrb[5].mxu1  ;;  %v1538_v18 = vadd.f32 %v11075_v44, %v12846_v58  ;;  %v1921_v43 = vrot.slane %v12821_v29, %v12840_v55  ;;  %v1823_v29 = vrot.slane %v738_v11, %v12840_v55 }
 0x19e   : > { %v765_v51 = vadd.f32 %v10988_v49, %v12818_v27  ;;  %v756_v52 = vpop.f32.mrb[7].mxu0  ;;  %v11076_v53 = vpop.f32.mrb[6].mxu1  ;;  %v1530_v21 = vadd.f32 %v12846_v58, %v1529_v50 }
 0x19f   : > { %v1532_v54 = vpop.f32.mrb[7].mxu1  ;;  %v12853_v1 = vadd.f32 %v12818_v27, %v756_v52  ;;  %v1541_v45 = vadd.f32 %v11076_v53, %v12846_v58 }
 0x1a0   : > { %v2159_v56 = vcombine.high %v765_v51, %v765_v51  ;;  %v2166_v57 = vrot.slane %v765_v51, %v12840_v55  ;;  %v1816_v51 = vcombine.high %v738_v11, %v738_v11 }
 0x1a2   : > { %v2173_v60 = vrot.slane %v2159_v56, %v12840_v55  ;;  %v2174_v63 = vcombine.high %v2166_v57, %v2166_v57  ;;  %v2182_v0 = vrot.slane %v2166_v57, %v12840_v55  ;;  %v1533_v56 = vadd.f32 %v12846_v58, %v1532_v54 }
 0x1a3   : > { %v10991_v59 = vpop.f32.mrb[8].mxu0  ;;  %v12933_v11 = vrot.slane %v1816_v51, %v12840_v55 }
 0x1a4   : > { %v769_v61 = vpop.f32.mrb[9].mxu0  ;;  %v12849_v62 = vpop.f32.mrb[8].mxu1  ;;  %v2175_v5 = vcombine.high %v2173_v60, %v2173_v60  ;;  %v2189_v6 = vrot.slane %v2173_v60, %v12840_v55  ;;  %v12863_v8 = vadd.f32 %v10991_v59, %v12818_v27  ;;  %v2196_v12 = vrot.slane %v2174_v63, %v12840_v55 }
 0x1a5   : > { %v10992_v3 = vpop.f32.mrb[10].mxu0  ;;  %v12858_v4 = vpop.f32.mrb[9].mxu1  ;;  %v2204_v14 = vcombine.high %v2182_v0, %v2182_v0  ;;  %v2827_v16 = vrot.slane %v2182_v0, %v12856_v2  ;;  %v1963_v60 = vcombine.high %v12824_v34, %v12824_v34  ;;  %v770_v54 = vadd.f32 %v12818_v27, %v769_v61 }
 0x1a6   : > { %v12865_v9 = vpop.f32.mrb[11].mxu0  ;;  %v12867_v10 = vpop.f32.mrb[10].mxu1  ;;  %v2205_v19 = vcombine.high %v2189_v6, %v2189_v6  ;;  %v2843_v22 = vrot.slane %v2189_v6, %v12856_v2  ;;  %v2203_v23 = vrot.slane %v2175_v5, %v12840_v55  ;;  %v2206_v25 = vcombine.high %v2196_v12, %v2196_v12 }
 0x1a7   : > { %v12872_v15 = vpop.f32.mrb[11].mxu1  ;;  %v2835_v20 = vrot.slane %v2204_v14, %v12856_v2  ;;  %v12881_v24 = vadd.f32 %v2827_v16, %v1514_v7  ;;  %v2831_v26 = vrot.slane %v2196_v12, %v12856_v2  ;;  %v12925_v5 = vrot.slane %v1914_v30, %v12840_v55 }
 0x1a8   : > { %v2851_v28 = vrot.slane %v2205_v19, %v12856_v2  ;;  %v2839_v35 = vrot.slane %v2206_v25, %v12856_v2  ;;  %v12903_v44 = vadd.f32 %v2843_v22, %v1530_v21  ;;  %v2207_v49 = vcombine.high %v2203_v23, %v2203_v23 }
 0x1a9   : > { %v12887_v31 = vadd.f32 %v2835_v20, %v1522_v13  ;;  %v12893_v38 = vadd.f32 %v2831_v26, %v1517_v17  ;;  %v2847_v63 = vrot.slane %v2203_v23, %v12856_v2  ;;  %19102 = vst [vmem:[#allocation22_spill] sm:$0xff] %v12925_v5  ;;  %v1929_v6 = vcombine.high %v1921_v43, %v1921_v43 }
 0x1aa   : > { %v12895_v39 = vadd.f32 %v2851_v28, %v1538_v18  ;;  %v12910_v52 = vadd.f32 %v2839_v35, %v1525_v33  ;;  %v2855_v53 = vrot.slane %v2207_v49, %v12856_v2  ;;  %v1970_v7 = vrot.slane %v12824_v34, %v12840_v55 }
 0x1ab   : > { %v12889_v32 = vpop.f32.mrb[12].mxu0  ;;  %v12935_v13 = vadd.f32 %v2847_v63, %v1533_v56  ;;  %v2208_v14 = vcombine.high %v770_v54, %v770_v54  ;;  %v2215_v16 = vrot.slane %v770_v54, %v12840_v55  ;;  %v12939_v17 = vrot.slane %v1921_v43, %v12840_v55 }
 0x1ac   : > { %v12897_v40 = vpop.f32.mrb[12].mxu1  ;;  %v12899_v42 = vpop.f32.mrb[13].mxu0  ;;  %v12930_v12 = vadd.f32 %v2855_v53, %v1541_v45  ;;  %v1831_v18 = vcombine.high %v1823_v29, %v1823_v29  ;;  %v12942_v61 = vrot.slane %v1963_v60, %v12840_v55  ;;  %v12945_v19 = vadd.f32 %v10992_v3, %v12818_v27 }
 0x1ad   : > { %v12906_v50 = vpop.f32.mrb[13].mxu1  ;;  %v12908_v36 = vpop.f32.mrb[14].mxu0  ;;  %19103 = vst [vmem:[#allocation23_spill] sm:$0xff] %v12939_v17  ;;  %v12952_v21 = vrot.slane %v1823_v29, %v12840_v55  ;;  %v2223_v22 = vcombine.high %v2215_v16, %v2215_v16  ;;  %v2231_v23 = vrot.slane %v2215_v16, %v12840_v55  ;;  %v12961_v28 = vrot.slane %v12925_v5, %v12840_v55 }
 0x1ae   : > { %v12913_v57 = vpop.f32.mrb[14].mxu1  ;;  %v12915_v59 = vpop.f32.mrb[15].mxu0  ;;  %19104 = vst [vmem:[#allocation24_spill] sm:$0xff] %v12942_v61  ;;  %v1978_v3 = vcombine.high %v1970_v7, %v1970_v7  ;;  %v1865_v30 = vcombine.high %v12827_v37, %v12827_v37  ;;  %v12966_v33 = vrot.slane %v2208_v14, %v12840_v55  ;;  %v12973_v45 = vrot.slane %v1929_v6, %v12840_v55 }
 0x1af   : > { %v12922_v0 = vpop.f32.mrb[15].mxu1  ;;  %19105 = vst [vmem:[#allocation25_spill] sm:$0xff] %v12961_v28  ;;  %v1554_v51 = vadd.f32 %v12849_v62, %v12846_v58  ;;  %v2253_v56 = vcombine.high %v2231_v23, %v2231_v23  ;;  %v12985_v53 = vrot.slane %v12933_v11, %v12840_v55  ;;  %v12988_v63 = vrot.slane %v1831_v18, %v12840_v55 }
 0x1b0   : > { %19106 = vst [vmem:[#allocation26_spill] sm:$0xff] %v12973_v45  ;;  %v2245_v6 = vrot.slane %v2223_v22, %v12840_v55  ;;  %v12996_v62 = vrot.slane %v1970_v7, %v12840_v55  ;;  %v1872_v16 = vrot.slane %v12827_v37, %v12840_v55  ;;  %v1546_v20 = vadd.f32 %v12846_v58, %v12858_v4 }
 0x1b1   : > { %v2867_v41 = vrot.slane %v2253_v56, %v12856_v2  ;;  %v13005_v18 = vrot.slane %v12942_v61, %v12840_v55  ;;  %v13008_v54 = vrot.slane %v1978_v3, %v12840_v55  ;;  %v13011_v22 = vrot.slane %v1865_v30, %v12840_v55 }
 0x1b2   : > { %19107 = vst [vmem:[#allocation27_spill] sm:$0xff] %v12996_v62  ;;  %v2238_v7 = vrot.slane %v12966_v33, %v12840_v55  ;;  %v2110_v37 = vcombine.high %v12833_v47, %v12833_v47  ;;  %v2012_v56 = vcombine.high %v12836_v48, %v12836_v48  ;;  %v2859_v49 = vrot.slane %v2231_v23, %v12856_v2 }
 0x1b3   : > { %v12947_v34 = vpop.f32.mrb[16].mxu0  ;;  %19108 = vst [vmem:[#allocation28_spill] sm:$0xff] %v13005_v18  ;;  %19109 = vst [vmem:[#allocation29_spill] sm:$0xff] %v13008_v54  ;;  %v13019_v4 = vadd.f32 %v2867_v41, %v1554_v51  ;;  %v1557_v3 = vadd.f32 %v12867_v10, %v12846_v58  ;;  %v2255_v46 = vcombine.high %v2245_v6, %v2245_v6  ;;  %11389 = vtanh.f32 %v12881_v24 }
 0x1b4   : > { %v12955_v25 = vpop.f32.mrb[16].mxu1  ;;  %v12957_v26 = vpop.f32.mrb[17].mxu0  ;;  %19110 = vst [vmem:[#allocation30_spill] sm:$0xff] %v13011_v22  ;;  %v1549_v30 = vadd.f32 %v12846_v58, %v12872_v15  ;;  %v2863_v61 = vrot.slane %v2245_v6, %v12856_v2  ;;  %v1880_v54 = vcombine.high %v1872_v16, %v1872_v16  ;;  %v13029_v62 = vadd.f32 %v2859_v49, %v1546_v20 }
 0x1b5   : > { %v12968_v35 = vpop.f32.mrb[17].mxu1  ;;  %v12970_v43 = vpop.f32.mrb[18].mxu0  ;;  %v13033_v41 = vadd.f32 %v12889_v32, %v12818_v27  ;;  %v1570_v23 = vadd.f32 %v12897_v40, %v12846_v58  ;;  %v2871_v15 = vrot.slane %v2255_v46, %v12856_v2  ;;  %v2254_v6 = vcombine.high %v2238_v7, %v2238_v7 }
 0x1b6   : > { %v12979_v29 = vpop.f32.mrb[18].mxu1  ;;  %v12981_v60 = vpop.f32.mrb[19].mxu0  ;;  %v13042_v5 = vadd.f32 %v2863_v61, %v1549_v30  ;;  %v13046_v20 = vadd.f32 %v12818_v27, %v12899_v42  ;;  %v13057_v40 = vrot.slane %v12833_v47, %v12840_v55  ;;  %v13060_v46 = vrot.slane %v2110_v37, %v12840_v55 }
 0x1b7   : > { %v12993_v14 = vpop.f32.mrb[19].mxu1  ;;  %19111 = vst [vmem:[#allocation31_spill] sm:$0xff] %v13033_v41  ;;  %v13053_v41 = vrot.slane %v1872_v16, %v12840_v55  ;;  %v2019_v61 = vrot.slane %v12836_v48, %v12840_v55  ;;  %v13069_v28 = vrot.slane %v2012_v56, %v12840_v55  ;;  %v773_v16 = vadd.f32 %v12818_v27, %v12865_v9 }
 0x1b8   : > { %19112 = vst [vmem:[#allocation32_spill] sm:$0xff] %v13046_v20  ;;  %19113 = vst [vmem:[#allocation33_spill] sm:$0xff] %v13057_v40  ;;  %v13073_v45 = vadd.f32 %v2871_v15, %v1557_v3  ;;  %v2883_v47 = vrot.slane %v2254_v6, %v12856_v2  ;;  %v13082_v48 = vrot.slane %v13011_v22, %v12840_v55  ;;  %11391 = vtanh.f32 %v12893_v38 }
 0x1b9   : > { %19114 = vst [vmem:[#allocation34_spill] sm:$0xff] %v13060_v46  ;;  %19115 = vst [vmem:[#allocation35_spill] sm:$0xff] %v13069_v28  ;;  %v13085_v17 = vrot.slane %v1880_v54, %v12840_v55  ;;  %v1562_v56 = vadd.f32 %v12846_v58, %v12906_v50  ;;  %v2061_v9 = vcombine.high %v12853_v1, %v12853_v1  ;;  %11393 = vtanh.f32 %v12887_v31 }
 0x1ba   : > { %19116 = vst [vmem:[#allocation36_spill] sm:$0xff] %v13082_v48  ;;  %v2224_v3 = vcombine.high %v12966_v33, %v12966_v33  ;;  %v13093_v15 = vadd.f32 %v2883_v47, %v1570_v23  ;;  %v2875_v6 = vrot.slane %v2238_v7, %v12856_v2  ;;  %v13100_v54 = vrot.slane %v13057_v40, %v12840_v55 }
 0x1bb   : > { %v13027_v18 = vpop.f32.mrb[20].mxu0  ;;  %v2027_v22 = vcombine.high %v2019_v61, %v2019_v61  ;;  %v13105_v50 = vrot.slane %v13060_v46, %v12840_v55  ;;  %v13110_v23 = vrot.slane %v2019_v61, %v12840_v55  ;;  %v2264_v7 = vrot.slane %v773_v16, %v12840_v55 }
 0x1bc   : > { %v13037_v51 = vpop.f32.mrb[20].mxu1  ;;  %v13039_v10 = vpop.f32.mrb[21].mxu0  ;;  %19117 = vst [vmem:[#allocation37_spill] sm:$0xff] %v13100_v54  ;;  %v13117_v37 = vrot.slane %v13069_v28, %v12840_v55  ;;  %v13121_v24 = vrot.slane %v12853_v1, %v12840_v55  ;;  %v13123_v46 = vadd.f32 %v2875_v6, %v1562_v56  ;;  %v13127_v33 = vadd.f32 %v12908_v36, %v12818_v27 }
 0x1bd   : > { %v13048_v49 = vpop.f32.mrb[21].mxu1  ;;  %v13050_v32 = vpop.f32.mrb[22].mxu0  ;;  %19118 = vst [vmem:[#allocation38_spill] sm:$0xff] %v13105_v50  ;;  %19119 = vst [vmem:[#allocation39_spill] sm:$0xff] %v13110_v23  ;;  %v13134_v54 = vrot.slane %v2061_v9, %v12840_v55  ;;  %v2252_v40 = vrot.slane %v2224_v3, %v12840_v55  ;;  %v13140_v1 = vadd.f32 %v12818_v27, %v12915_v59  ;;  %11395 = vtanh.f32 %v12910_v52 }
 0x1be   : > { %v13064_v30 = vpop.f32.mrb[22].mxu1  ;;  %v13066_v42 = vpop.f32.mrb[23].mxu0  ;;  %19120 = vst [vmem:[#allocation40_spill] sm:$0xff] %v13117_v37  ;;  %19121 = vst [vmem:[#allocation41_spill] sm:$0xff] %v13121_v24  ;;  %v2257_v36 = vcombine.high %v773_v16, %v773_v16  ;;  %v1861_v9 = vcombine.high %v12952_v21, %v12952_v21  ;;  %v2272_v28 = vcombine.high %v2264_v7, %v2264_v7  ;;  %11397 = vtanh.f32 %v12895_v39  ;;  %v13202_v39 = vld [vmem:[%s18753_s6] ss:$0 sm:$0xff] }
 0x1bf   : > { %v13076_v20 = vpop.f32.mrb[23].mxu1  ;;  %19122 = vst [vmem:[#allocation42_spill] sm:$0xff] %v13127_v33  ;;  %19123 = vst [vmem:[#allocation43_spill] sm:$0xff] %v13134_v54  ;;  %v1565_v33 = vadd.f32 %v12846_v58, %v12922_v0  ;;  %v1573_v27 = vadd.f32 %v12913_v57, %v12846_v58  ;;  %v2256_v59 = vcombine.high %v2252_v40, %v2252_v40  ;;  %11399 = vtanh.f32 %v12903_v44 }
 0x1c0   : > { %19124 = vst [vmem:[#allocation44_spill] sm:$0xff] %v13140_v1  ;;  %v2879_v37 = vrot.slane %v2252_v40, %v12856_v2  ;;  %v13161_v31 = vrot.slane %v2027_v22, %v12840_v55  ;;  %v2280_v16 = vrot.slane %v2264_v7, %v12840_v55  ;;  %v1298_v1 = vadd.f32 %v12947_v34, %v12846_v58 }
 0x1c1   : > { %v13172_v57 = vrot.slane %v13121_v24, %v12840_v55  ;;  %v2887_v22 = vrot.slane %v2256_v59, %v12856_v2  ;;  %v13178_v40 = vrot.slane %v13134_v54, %v12840_v55  ;;  %v13181_v7 = vrot.slane %v2257_v36, %v12840_v55  ;;  %v11390_v54 = vpop.eup %11389 }
 0x1c2   : > { %19125 = vst [vmem:[#allocation45_spill] sm:$0xff] %v13161_v31  ;;  %v13183_v0 = vadd.f32 %v2879_v37, %v1565_v33  ;;  %v2611_v34 = vrot.slane %v1861_v9, %v12856_v2  ;;  %v2306_v48 = vcombine.high %v12863_v8, %v12863_v8  ;;  %v2294_v52 = vrot.slane %v2272_v28, %v12840_v55 }
 0x1c3   : > { %v13113_v47 = vpop.f32.mrb[24].mxu0  ;;  %19126 = vst [vmem:[#allocation46_spill] sm:$0xff] %v13172_v57  ;;  %19127 = vst [vmem:[#allocation47_spill] sm:$0xff] %v13178_v40  ;;  %v13190_v57 = vadd.f32 %v2887_v22, %v1573_v27  ;;  %v1586_v37 = vadd.f32 %v12955_v25, %v12846_v58  ;;  %v2302_v33 = vcombine.high %v2280_v16, %v2280_v16  ;;  %11401 = vtanh.f32 %v12935_v13 }
 0x1c4   : > { %v13129_v61 = vpop.f32.mrb[24].mxu1  ;;  %v13131_v50 = vpop.f32.mrb[25].mxu0  ;;  %v13195_v36 = vadd.f32 %v2611_v34, %v1298_v1  ;;  %v1290_v44 = vadd.f32 %v12846_v58, %v12957_v26  ;;  %v2603_v1 = vrot.slane %v12952_v21, %v12856_v2  ;;  %v1578_v25 = vadd.f32 %v12846_v58, %v12968_v35 }
 0x1c5   : > { %v13142_v56 = vpop.f32.mrb[25].mxu1  ;;  %v13144_v6 = vpop.f32.mrb[26].mxu0  ;;  %v13221_v34 = vrot.slane %v13181_v7, %v12840_v55  ;;  %v2899_v40 = vrot.slane %v2302_v33, %v12856_v2  ;;  %v2891_v13 = vrot.slane %v2280_v16, %v12856_v2  ;;  %v1589_v26 = vadd.f32 %v12979_v29, %v12846_v58 }
 0x1c6   : > { %v13151_v38 = vpop.f32.mrb[26].mxu1  ;;  %v13153_v3 = vpop.f32.mrb[27].mxu0  ;;  %19128 = vst [vmem:[#allocation48_spill] sm:$0xff] %v13195_v36  ;;  %v13231_v24 = vadd.f32 %v2603_v1, %v1290_v44  ;;  %v1863_v29 = vcombine.high %v12988_v63, %v12988_v63  ;;  %v1293_v44 = vadd.f32 %v12846_v58, %v12981_v60  ;;  %v13248_v1 = vrot.slane %v12863_v8, %v12840_v55 }
 0x1c7   : > { %v13158_v23 = vpop.f32.mrb[27].mxu1  ;;  %v11392_v35 = vpop.eup %11391  ;;  %v13238_v16 = vadd.f32 %v2899_v40, %v1586_v37  ;;  %v13240_v36 = vadd.f32 %v2891_v13, %v1578_v25  ;;  %v1581_v40 = vadd.f32 %v12846_v58, %v12993_v14  ;;  %11403 = vtanh.f32 %v12930_v12 }
 0x1c8   : > { %v11394_v33 = vpop.eup %11393  ;;  %v2615_v37 = vrot.slane %v1863_v29, %v12856_v2  ;;  %v2895_v25 = vrot.slane %v2294_v52, %v12856_v2  ;;  %v3560_v60 = vmul.f32 %v11392_v35, %v13202_v39  ;;  %v13260_v8 = vrot.slane %v2306_v48, %v12840_v55 }
 0x1c9   : > { %19133 = vst [vmem:[#allocation53_spill] sm:$0xff] %v13240_v36  ;;  %v11396_v13 = vpop.eup %11395  ;;  %v2303_v48 = vcombine.high %v13221_v34, %v13221_v34  ;;  %11405 = vtanh.f32 %v13019_v4 }
 0x1ca   : > { %v13271_v12 = vadd.f32 %v2895_v25, %v1581_v40  ;;  %3745 = vadd.xlane.f32.xlu1 %v3560_v60  ;;  %v11398_v29 = vpop.eup %11397  ;;  %v3562_v25 = vmul.f32 %v11396_v13, %v13202_v39  ;;  %v1306_v60 = vadd.f32 %v12846_v58, %v13039_v10  ;;  %v2907_v13 = vrot.slane %v13221_v34, %v12856_v2 }
 0x1cb   : > { %v13192_v59 = vpop.f32.mrb[28].mxu0  ;;  %v11400_v40 = vpop.eup %11399  ;;  %11407 = vtanh.f32 %v13029_v62  ;;  %v19139_v62 = vcombine.high %v12933_v11, %v12933_v11  ;;  %v1317_v11 = vadd.f32 %v13050_v32, %v12846_v58 }
 0x1cc   : > { %v13204_v9 = vpop.f32.mrb[28].mxu1  ;;  %v13206_v28 = vpop.f32.mrb[29].mxu0  ;;  %19136 = vst [vmem:[#allocation56_spill] sm:$0xff] %v13271_v12  ;;  %v3563_v34 = vmul.f32 %v11400_v40, %v13202_v39  ;;  %11409 = vtanh.f32 %v13042_v5 }
 0x1cd   : > { %19129 = vst [vmem:[#allocation49_spill] sm:$0xff] %v13204_v9  ;;  %19130 = vst [vmem:[#allocation50_spill] sm:$0xff] %v13206_v28  ;;  %v13215_v27 = vpop.f32.mrb[29].mxu1  ;;  %v13217_v22 = vpop.f32.mrb[30].mxu0  ;;  %v1301_v28 = vadd.f32 %v12970_v43, %v12846_v58  ;;  %v2607_v43 = vrot.slane %v12988_v63, %v12856_v2  ;;  %v3561_v63 = vmul.f32 %v11394_v33, %v13202_v39  ;;  %11411 = vtanh.f32 %v13073_v45 }
 0x1ce   : > { %19131 = vst [vmem:[#allocation51_spill] sm:$0xff] %v13215_v27  ;;  %19132 = vst [vmem:[#allocation52_spill] sm:$0xff] %v13217_v22  ;;  %v13227_v31 = vpop.f32.mrb[30].mxu1  ;;  %v13229_v21 = vpop.f32.mrb[31].mxu0  ;;  %v2304_v27 = vcombine.high %v2294_v52, %v2294_v52  ;;  %v3559_v22 = vmul.f32 %v11390_v54, %v13202_v39  ;;  %v1602_v52 = vadd.f32 %v13037_v51, %v12846_v58  ;;  %3749 = vadd.xlane.f32.xlu1 %v3562_v25 }
 0x1cf   : > { %v13236_v9 = vpop.f32.mrb[31].mxu1  ;;  %v13269_v14 = vadd.f32 %v2615_v37, %v1301_v28  ;;  %v2321_v33 = vcombine.high %v13248_v1, %v13248_v1  ;;  %v2273_v28 = vcombine.high %v13181_v7, %v13181_v7  ;;  %v1862_v51 = vcombine.high %v12985_v53, %v12985_v53  ;;  %v11402_v12 = vpop.eup %11401 }
 0x1d0   : > { %v2903_v54 = vrot.slane %v2304_v27, %v12856_v2  ;;  %3743 = vadd.xlane.f32.xlu0 %v3559_v22  ;;  %v13264_v22 = vadd.f32 %v2607_v43, %v1293_v44  ;;  %v1314_v44 = vadd.f32 %v13027_v18, %v12846_v58  ;;  %v2915_v37 = vrot.slane %v2303_v48, %v12856_v2 }
 0x1d1   : > { %v2619_v7 = vrot.slane %v12985_v53, %v12856_v2  ;;  %v1594_v48 = vadd.f32 %v12846_v58, %v13048_v49  ;;  %v13313_v53 = vrot.slane %v13248_v1, %v12840_v55  ;;  %v2301_v49 = vrot.slane %v2273_v28, %v12840_v55  ;;  %v11404_v5 = vpop.eup %11403 }
 0x1d2   : > { %v13262_v27 = vadd.f32 %v2903_v54, %v1589_v26  ;;  %19135 = vst [vmem:[#allocation55_spill] sm:$0xff] %v13264_v22  ;;  %v2627_v22 = vrot.slane %v1862_v51, %v12856_v2  ;;  %v13316_v10 = vadd.f32 %v2915_v37, %v1602_v52  ;;  %v1860_v1 = vrot.slane %v19139_v62, %v12840_v55 }
 0x1d3   : > { %v13267_v36 = vpop.f32.mrb[32].mxu0  ;;  %v13318_v4 = vadd.f32 %v2619_v7, %v1306_v60  ;;  %v1605_v52 = vadd.f32 %v13064_v30, %v12846_v58  ;;  %v1597_v28 = vadd.f32 %v12846_v58, %v13076_v20  ;;  %v2911_v40 = vrot.slane %v2301_v49, %v12856_v2 }
 0x1d4   : > { %19134 = vst [vmem:[#allocation54_spill] sm:$0xff] %v13262_v27  ;;  %v13277_v35 = vpop.f32.mrb[32].mxu1  ;;  %v13279_v26 = vpop.f32.mrb[33].mxu0  ;;  %3747 = vadd.xlane.f32.xlu0 %v3561_v63  ;;  %v13320_v51 = vadd.f32 %v2627_v22, %v1314_v44  ;;  %v1309_v22 = vadd.f32 %v12846_v58, %v13066_v42  ;;  %v2305_v44 = vcombine.high %v2301_v49, %v2301_v49  ;;  %11413 = vtanh.f32 %v13123_v46 }
 0x1d5   : > { %v13289_v54 = vpop.f32.mrb[33].mxu1  ;;  %v13291_v43 = vpop.f32.mrb[34].mxu0  ;;  %v1864_v25 = vcombine.high %v1860_v1, %v1860_v1  ;;  %v2623_v60 = vrot.slane %v1860_v1, %v12856_v2  ;;  %v3564_v42 = vmul.f32 %v11402_v12, %v13202_v39  ;;  %v1618_v12 = vadd.f32 %v13129_v61, %v12846_v58 }
 0x1d6   : > { %v13299_v63 = vpop.f32.mrb[34].mxu1  ;;  %v13301_v18 = vpop.f32.mrb[35].mxu0  ;;  %v2919_v20 = vrot.slane %v2305_v44, %v12856_v2  ;;  %v2351_v45 = vcombine.high %v13313_v53, %v13313_v53  ;;  %v2923_v46 = vrot.slane %v13313_v53, %v12856_v2  ;;  %11415 = vtanh.f32 %v13183_v0 }
 0x1d7   : > { %19137 = vst [vmem:[#allocation57_spill] sm:$0xff] %v13301_v18  ;;  %v13309_v27 = vpop.f32.mrb[35].mxu1  ;;  %v13322_v18 = vadd.f32 %v2907_v13, %v1594_v48  ;;  %v13352_v48 = vadd.f32 %v2911_v40, %v1597_v28  ;;  %v3565_v13 = vmul.f32 %v11398_v29, %v13202_v39  ;;  %v13360_v62 = vadd.f32 %v2623_v60, %v1309_v22 }
 0x1d8   : > { %19138 = vst [vmem:[#allocation58_spill] sm:$0xff] %v13309_v27  ;;  %3751 = vadd.xlane.f32.xlu0 %v3563_v34  ;;  %v2631_v34 = vrot.slane %v1864_v25, %v12856_v2  ;;  %3753 = vadd.xlane.f32.xlu1 %v3564_v42  ;;  %v2343_v29 = vrot.slane %v2321_v33, %v12840_v55  ;;  %v11406_v27 = vpop.eup %11405  ;;  %11417 = vtanh.f32 %v13093_v15 }
 0x1d9   : > { %19140 = vst [vmem:[#allocation59_spill] sm:$0xff] %v13352_v48  ;;  %v2355_v28 = vcombine.high %v12945_v19, %v12945_v19  ;;  %v13373_v40 = vadd.f32 %v2919_v20, %v1605_v52  ;;  %v3566_v22 = vmul.f32 %v11404_v5, %v13202_v39  ;;  %v2931_v60 = vrot.slane %v2351_v45, %v12856_v2  ;;  %v11408_v20 = vpop.eup %11407 }
 0x1da   : > { %v13378_v61 = vadd.f32 %v2631_v34, %v1317_v11  ;;  %v1330_v42 = vadd.f32 %v13113_v47, %v12846_v58  ;;  %v1910_v33 = vcombine.high %v13053_v41, %v13053_v41  ;;  %v1322_v52 = vadd.f32 %v12846_v58, %v13131_v50 }
 0x1db   : > { %v13340_v37 = vpop.f32.mrb[36].mxu0  ;;  %v2635_v5 = vrot.slane %v13053_v41, %v12856_v2  ;;  %v1610_v11 = vadd.f32 %v12846_v58, %v13142_v56  ;;  %v13396_v47 = vadd.f32 %v2931_v60, %v1618_v12  ;;  %v1333_v41 = vadd.f32 %v13144_v6, %v12846_v58  ;;  %v11410_v12 = vpop.eup %11409 }
 0x1dc   : > { %v13346_v7 = vpop.f32.mrb[36].mxu1  ;;  %v13348_v30 = vpop.f32.mrb[37].mxu0  ;;  %3755 = vadd.xlane.f32.xlu0 %v3565_v13  ;;  %v13394_v13 = vrot.slane %v12945_v19, %v12840_v55  ;;  %3757 = vadd.xlane.f32.xlu1 %v3566_v22  ;;  %v2643_v34 = vrot.slane %v1910_v33, %v12856_v2  ;;  %v1912_v56 = vcombine.high %v13085_v17, %v13085_v17  ;;  %11419 = vtanh.f32 %v13190_v57 }
 0x1dd   : > { %v13355_v49 = vpop.f32.mrb[37].mxu1  ;;  %v13357_v32 = vpop.f32.mrb[38].mxu0  ;;  %19141 = vst [vmem:[#allocation60_spill] sm:$0xff] %v13396_v47  ;;  %v13402_v50 = vadd.f32 %v2635_v5, %v1322_v52  ;;  %v13412_v22 = vadd.f32 %v2923_v46, %v1610_v11  ;;  %v1621_v53 = vadd.f32 %v13151_v38, %v12846_v58  ;;  %v2353_v60 = vcombine.high %v2343_v29, %v2343_v29 }
 0x1de   : > { %v13366_v1 = vpop.f32.mrb[38].mxu1  ;;  %v13368_v44 = vpop.f32.mrb[39].mxu0  ;;  %v13410_v45 = vadd.f32 %v2643_v34, %v1330_v42  ;;  %v2647_v6 = vrot.slane %v1912_v56, %v12856_v2  ;;  %v3567_v52 = vmul.f32 %v11408_v20, %v13202_v39  ;;  %v1325_v42 = vadd.f32 %v12846_v58, %v13153_v3 }
 0x1df   : > { %v13376_v25 = vpop.f32.mrb[39].mxu1  ;;  %19142 = vst [vmem:[#allocation61_spill] sm:$0xff] %v13402_v50  ;;  %19144 = vst [vmem:[#allocation63_spill] sm:$0xff] %v13412_v22  ;;  %v2336_v38 = vrot.slane %v13260_v8, %v12840_v55  ;;  %v2935_v34 = vrot.slane %v2353_v60, %v12856_v2  ;;  %v2639_v46 = vrot.slane %v13085_v17, %v12856_v2  ;;  %v11412_v3 = vpop.eup %11411  ;;  %v19151_v17 = vld [vmem:[#allocation49_spill] sm:$0xff] }
 0x1e0   : > { %19143 = vst [vmem:[#allocation62_spill] sm:$0xff] %v13410_v45  ;;  %v1613_v15 = vadd.f32 %v12846_v58, %v13158_v23  ;;  %v13441_v22 = vrot.slane %v2355_v28, %v12840_v55  ;;  %v13443_v50 = vadd.f32 %v2647_v6, %v1333_v41  ;;  %3759 = vadd.xlane.f32.xlu0 %v3567_v52  ;;  %v19150_v52 = vld [vmem:[#allocation48_spill] sm:$0xff] }
 0x1e1   : > { %v2927_v45 = vrot.slane %v2343_v29, %v12856_v2  ;;  %v3568_v60 = vmul.f32 %v11410_v12, %v13202_v39  ;;  %v13452_v23 = vadd.f32 %v2935_v34, %v1621_v53  ;;  %v13454_v48 = vadd.f32 %v2639_v46, %v1325_v42  ;;  %v19149_v12 = vld [vmem:[#allocation36_spill] sm:$0xff]  ;;  %v19152_v34 = vld [vmem:[#allocation50_spill] sm:$0xff] }
 0x1e2   : > { %19145 = vst [vmem:[#allocation64_spill] sm:$0xff] %v13443_v50  ;;  %v3569_v41 = vmul.f32 %v11406_v27, %v13202_v39  ;;  %v1346_v29 = vadd.f32 %v13192_v59, %v12846_v58  ;;  %v1911_v6 = vcombine.high %v19149_v12, %v19149_v12  ;;  %11421 = vtanh.f32 %v19150_v52 }
 0x1e3   : > { %v13408_v19 = vpop.f32.mrb[40].mxu0  ;;  %19146 = vst [vmem:[#allocation65_spill] sm:$0xff] %v13452_v23  ;;  %19147 = vst [vmem:[#allocation66_spill] sm:$0xff] %v13454_v48  ;;  %v13456_v28 = vadd.f32 %v2927_v45, %v1613_v15  ;;  %3761 = vadd.xlane.f32.xlu1 %v3568_v60  ;;  %v1634_v57 = vadd.f32 %v19151_v17, %v12846_v58  ;;  %v2352_v53 = vcombine.high %v2336_v38, %v2336_v38  ;;  %v11414_v45 = vpop.eup %11413  ;;  %v19153_v15 = vld [vmem:[#allocation51_spill] sm:$0xff]  ;;  %v19157_v48 = vld [vmem:[#allocation30_spill] sm:$0xff] }
 0x1e4   : > { %v13416_v0 = vpop.f32.mrb[40].mxu1  ;;  %v13418_v33 = vpop.f32.mrb[41].mxu0  ;;  %v1338_v42 = vadd.f32 %v12846_v58, %v19152_v34  ;;  %3763 = vadd.xlane.f32.xlu0 %v3569_v41  ;;  %v2659_v46 = vrot.slane %v1911_v6, %v12856_v2  ;;  %v3570_v27 = vmul.f32 %v11412_v3, %v13202_v39  ;;  %v2651_v59 = vrot.slane %v19149_v12, %v12856_v2 }
 0x1e5   : > { %v13425_v5 = vpop.f32.mrb[41].mxu1  ;;  %v13427_v11 = vpop.f32.mrb[42].mxu0  ;;  %19148 = vst [vmem:[#allocation67_spill] sm:$0xff] %v13456_v28  ;;  %v1626_v60 = vadd.f32 %v12846_v58, %v19153_v15  ;;  %v13478_v17 = vrot.slane %v13394_v13, %v12840_v55  ;;  %11423 = vtanh.f32 %v13238_v16  ;;  %v2947_v41 = vrot.slane %v2352_v53, %v12856_v2 }
 0x1e6   : > { %v13436_v56 = vpop.f32.mrb[42].mxu1  ;;  %v13438_v20 = vpop.f32.mrb[43].mxu0  ;;  %v2939_v6 = vrot.slane %v2336_v38, %v12856_v2  ;;  %11425 = vtanh.f32 %v13231_v24  ;;  %v13488_v15 = vadd.f32 %v2659_v46, %v1346_v29  ;;  %v13490_v28 = vadd.f32 %v2651_v59, %v1338_v42  ;;  %v19162_v59 = vld [vmem:[#allocation52_spill] sm:$0xff] }
 0x1e7   : > { %v13447_v47 = vpop.f32.mrb[43].mxu1  ;;  %v11416_v12 = vpop.eup %11415  ;;  %3765 = vadd.xlane.f32.xlu1 %v3570_v27  ;;  %v19158_v16 = vcombine.high %v19157_v48, %v19157_v48  ;;  %v13500_v50 = vadd.f32 %v2947_v41, %v1634_v57  ;;  %v19161_v24 = vcombine.high %v13260_v8, %v13260_v8  ;;  %v3571_v42 = vmul.f32 %v11414_v45, %v13202_v39 }
 0x1e8   : > { %19155 = vst [vmem:[#allocation48_spill] sm:$0xff] %v13488_v15  ;;  %19156 = vst [vmem:[#allocation49_spill] sm:$0xff] %v13490_v28  ;;  %v11418_v48 = vpop.eup %11417  ;;  %v1341_v57 = vadd.f32 %v12846_v58, %v13229_v21  ;;  %v1637_v8 = vadd.f32 %v13227_v31, %v12846_v58  ;;  %v3572_v15 = vmul.f32 %v11416_v12, %v13202_v39  ;;  %11427 = vtanh.f32 %v13269_v14  ;;  %v19170_v12 = vld [vmem:[#allocation23_spill] sm:$0xff] }
 0x1e9   : > { %v1909_v23 = vrot.slane %v19158_v16, %v12840_v55  ;;  %19159 = vst [vmem:[#allocation50_spill] sm:$0xff] %v13500_v50  ;;  %v2350_v29 = vrot.slane %v19161_v24, %v12840_v55  ;;  %v1349_v16 = vadd.f32 %v19162_v59, %v12846_v58  ;;  %3767 = vadd.xlane.f32.xlu0 %v3571_v42  ;;  %v19164_v59 = vld [vmem:[#allocation41_spill] sm:$0xff]  ;;  %v11420_v31 = vpop.eup %11419 }
 0x1ea   : > { %v13537_v42 = vrot.slane %v13441_v22, %v12840_v55  ;;  %v1650_v14 = vadd.f32 %v13277_v35, %v12846_v58 }
 0x1eb   : > { %v13474_v52 = vpop.f32.mrb[44].mxu0  ;;  %v1913_v28 = vcombine.high %v1909_v23, %v1909_v23  ;;  %v2354_v45 = vcombine.high %v2350_v29, %v2350_v29  ;;  %v2943_v24 = vrot.slane %v2350_v29, %v12856_v2  ;;  %3769 = vadd.xlane.f32.xlu1 %v3572_v15 }
 0x1ec   : > { %v13483_v34 = vpop.f32.mrb[44].mxu1  ;;  %v13485_v3 = vpop.f32.mrb[45].mxu0 }
 0x1ed   : > { %19154 = vst [vmem:[#allocation36_spill] sm:$0xff] %v13485_v3  ;;  %v13496_v53 = vpop.f32.mrb[45].mxu1  ;;  %v13498_v38 = vpop.f32.mrb[46].mxu0  ;;  %v13502_v3 = vadd.f32 %v2939_v6, %v1626_v60  ;;  %v2655_v60 = vrot.slane %v1909_v23, %v12856_v2  ;;  %v1629_v6 = vadd.f32 %v12846_v58, %v13236_v9  ;;  %v2663_v21 = vrot.slane %v1913_v28, %v12856_v2 }
 0x1ee   : > { %v13509_v46 = vpop.f32.mrb[46].mxu1  ;;  %v13511_v27 = vpop.f32.mrb[47].mxu0  ;;  %v2951_v9 = vrot.slane %v2354_v45, %v12856_v2  ;;  %v1362_v28 = vadd.f32 %v13267_v36, %v12846_v58  ;;  %v19171_v45 = vcombine.high %v13394_v13, %v13394_v13  ;;  %v2400_v36 = vcombine.high %v13478_v17, %v13478_v17 }
 0x1ef   : > { %19160 = vst [vmem:[#allocation51_spill] sm:$0xff] %v13502_v3  ;;  %v13518_v41 = vpop.f32.mrb[47].mxu1  ;;  %v19165_v3 = vcombine.high %v19164_v59, %v19164_v59  ;;  %v13532_v23 = vadd.f32 %v2655_v60, %v1341_v57  ;;  %v13540_v29 = vadd.f32 %v2943_v24, %v1629_v6  ;;  %v1959_v57 = vcombine.high %v19170_v12, %v19170_v12  ;;  %v11422_v59 = vpop.eup %11421  ;;  %v19173_v24 = vld [vmem:[#allocation32_spill] sm:$0xff] }
 0x1f0   : > { %19163 = vst [vmem:[#allocation30_spill] sm:$0xff] %v13518_v41  ;;  %v3573_v41 = vmul.f32 %v11418_v48, %v13202_v39  ;;  %v2392_v6 = vrot.slane %v19171_v45, %v12840_v55  ;;  %v13556_v48 = vadd.f32 %v2951_v9, %v1637_v8  ;;  %v3574_v13 = vmul.f32 %v11420_v31, %v13202_v39  ;;  %v11424_v9 = vpop.eup %11423  ;;  %v19176_v45 = vld [vmem:[#allocation53_spill] sm:$0xff] }
 0x1f1   : > { %v13529_v50 = vrot.slane %v19165_v3, %v12840_v55  ;;  %19167 = vst [vmem:[#allocation41_spill] sm:$0xff] %v13532_v23  ;;  %19168 = vst [vmem:[#allocation68_spill] sm:$0xff] %v13540_v29  ;;  %v13544_v3 = vadd.f32 %v2663_v21, %v1349_v16  ;;  %v2404_v21 = vcombine.high %v19173_v24, %v19173_v24  ;;  %11429 = vtanh.f32 %v19176_v45  ;;  %v19180_v45 = vld [vmem:[#allocation26_spill] sm:$0xff] }
 0x1f2   : > { %19172 = vst [vmem:[#allocation23_spill] sm:$0xff] %v13556_v48  ;;  %3771 = vadd.xlane.f32.xlu0 %v3573_v41  ;;  %v2675_v29 = vrot.slane %v1959_v57, %v12856_v2  ;;  %v1354_v41 = vadd.f32 %v12846_v58, %v13279_v26  ;;  %v2667_v23 = vrot.slane %v19170_v12, %v12856_v2  ;;  %v11426_v26 = vpop.eup %11425 }
 0x1f3   : > { %19166 = vst [vmem:[#allocation52_spill] sm:$0xff] %v13529_v50  ;;  %19169 = vst [vmem:[#allocation69_spill] sm:$0xff] %v13544_v3  ;;  %v13550_v60 = vpop.f32.mrb[48].mxu0  ;;  %v2963_v50 = vrot.slane %v2400_v36, %v12856_v2  ;;  %v1642_v57 = vadd.f32 %v12846_v58, %v13289_v54  ;;  %3773 = vadd.xlane.f32.xlu1 %v3574_v13  ;;  %v1365_v36 = vadd.f32 %v13291_v43, %v12846_v58  ;;  %v19183_v13 = vld [vmem:[#allocation54_spill] sm:$0xff] }
 0x1f4   : > { %v13562_v15 = vpop.f32.mrb[48].mxu1  ;;  %v13564_v16 = vpop.f32.mrb[49].mxu0  ;;  %v13586_v3 = vadd.f32 %v2675_v29, %v1362_v28  ;;  %v1961_v12 = vcombine.high %v19180_v45, %v19180_v45  ;;  %v1653_v29 = vadd.f32 %v13299_v63, %v12846_v58  ;;  %v2402_v28 = vcombine.high %v2392_v6, %v2392_v6 }
 0x1f5   : > { %v13572_v8 = vpop.f32.mrb[49].mxu1  ;;  %v13574_v35 = vpop.f32.mrb[50].mxu0  ;;  %v13596_v54 = vadd.f32 %v2963_v50, %v1650_v14  ;;  %11431 = vtanh.f32 %v19183_v13  ;;  %v3577_v43 = vmul.f32 %v11424_v9, %v13202_v39  ;;  %v19186_v50 = vld [vmem:[#allocation57_spill] sm:$0xff]  ;;  %v2671_v14 = vrot.slane %v19180_v45, %v12856_v2 }
 0x1f6   : > { %19174 = vst [vmem:[#allocation32_spill] sm:$0xff] %v13572_v8  ;;  %19175 = vst [vmem:[#allocation70_spill] sm:$0xff] %v13574_v35  ;;  %v13582_v48 = vpop.f32.mrb[50].mxu1  ;;  %v13584_v31 = vpop.f32.mrb[51].mxu0  ;;  %v2955_v35 = vrot.slane %v13478_v17, %v12856_v2  ;;  %v2679_v17 = vrot.slane %v1961_v12, %v12856_v2  ;;  %v13615_v63 = vrot.slane %v19173_v24, %v12840_v55 }
 0x1f7   : > { %19177 = vst [vmem:[#allocation53_spill] sm:$0xff] %v13582_v48  ;;  %19178 = vst [vmem:[#allocation71_spill] sm:$0xff] %v13584_v31  ;;  %v13594_v8 = vpop.f32.mrb[51].mxu1  ;;  %v13598_v48 = vadd.f32 %v2667_v23, %v1354_v41  ;;  %v19185_v31 = vld [vmem:[#allocation55_spill] sm:$0xff]  ;;  %v1357_v23 = vadd.f32 %v12846_v58, %v19186_v50  ;;  %3779 = vadd.xlane.f32.xlu0 %v3577_v43  ;;  %v2371_v12 = vcombine.high %v13441_v22, %v13441_v22 }
 0x1f8   : > { %19179 = vst [vmem:[#allocation72_spill] sm:$0xff] %v13586_v3  ;;  %19181 = vst [vmem:[#allocation26_spill] sm:$0xff] %v13594_v8  ;;  %v13603_v3 = vadd.f32 %v2955_v35, %v1642_v57  ;;  %11433 = vtanh.f32 %v19185_v31  ;;  %v2967_v8 = vrot.slane %v2402_v28, %v12856_v2  ;;  %v13617_v41 = vadd.f32 %v2679_v17, %v1365_v36  ;;  %v19187_v35 = vld [vmem:[#allocation58_spill] sm:$0xff]  ;;  %v11428_v17 = vpop.eup %11427 }
 0x1f9   : > { %19182 = vst [vmem:[#allocation73_spill] sm:$0xff] %v13598_v48  ;;  %v1645_v9 = vadd.f32 %v12846_v58, %v19187_v35  ;;  %v2959_v57 = vrot.slane %v2392_v6, %v12856_v2  ;;  %v13628_v45 = vadd.f32 %v2671_v14, %v1357_v23  ;;  %v3505_v24 = vmul.f32 %v11422_v59, %v13202_v39  ;;  %v19190_v6 = vld [vmem:[#allocation56_spill] sm:$0xff]  ;;  %v19192_v23 = vld [vmem:[#allocation25_spill] sm:$0xff] }
 0x1fa   : > { %19184 = vst [vmem:[#allocation54_spill] sm:$0xff] %v13603_v3  ;;  %v13626_v28 = vadd.f32 %v2967_v8, %v1653_v29  ;;  %v13636_v43 = vrot.slane %v2404_v21, %v12840_v55  ;;  %11435 = vtanh.f32 %v19190_v6  ;;  %v3503_v22 = vmul.f32 %v11426_v26, %v13202_v39 }
 0x1fb   : > { %v13622_v31 = vpop.f32.mrb[52].mxu0  ;;  %19189 = vst [vmem:[#allocation57_spill] sm:$0xff] %v13628_v45  ;;  %v13639_v50 = vadd.f32 %v2959_v57, %v1645_v9  ;;  %3635 = vadd.xlane.f32.xlu1 %v3505_v24  ;;  %v1378_v59 = vadd.f32 %v13340_v37, %v12846_v58  ;;  %v1960_v14 = vcombine.high %v19192_v23, %v19192_v23  ;;  %11437 = vtanh.f32 %v13320_v51  ;;  %v11430_v6 = vpop.eup %11429 }
 0x1fc   : > { %19188 = vst [vmem:[#allocation55_spill] sm:$0xff] %v13626_v28  ;;  %v13631_v13 = vpop.f32.mrb[52].mxu1  ;;  %v13633_v36 = vpop.f32.mrb[53].mxu0  ;;  %v1666_v21 = vadd.f32 %v13346_v7, %v12846_v58  ;;  %v2401_v35 = vcombine.high %v13537_v42, %v13537_v42  ;;  %v2419_v57 = vcombine.high %v13615_v63, %v13615_v63  ;;  %3631 = vadd.xlane.f32.xlu0 %v3503_v22  ;;  %11439 = vtanh.f32 %v13316_v10  ;;  %v19194_v22 = vld [vmem:[#allocation22_spill] sm:$0xff] }
 0x1fd   : > { %19191 = vst [vmem:[#allocation58_spill] sm:$0xff] %v13639_v50  ;;  %v13642_v8 = vpop.f32.mrb[53].mxu1  ;;  %v13644_v29 = vpop.f32.mrb[54].mxu0  ;;  %v1370_v37 = vadd.f32 %v12846_v58, %v13348_v30  ;;  %v2683_v24 = vrot.slane %v19192_v23, %v12856_v2  ;;  %v2691_v50 = vrot.slane %v1960_v14, %v12856_v2  ;;  %v3506_v45 = vmul.f32 %v11428_v17, %v13202_v39 }
 0x1fe   : > { %v13654_v9 = vpop.f32.mrb[54].mxu1  ;;  %v13656_v26 = vpop.f32.mrb[55].mxu0  ;;  %v2979_v3 = vrot.slane %v2401_v35, %v12856_v2  ;;  %v1658_v48 = vadd.f32 %v12846_v58, %v13355_v49  ;;  %v2971_v30 = vrot.slane %v13537_v42, %v12856_v2  ;;  %v19195_v23 = vcombine.high %v19194_v22, %v19194_v22  ;;  %v13692_v42 = vld [vmem:[%s18752_s5] ss:$0 sm:$0xff] }
 0x1ff   : > { %v13665_v7 = vpop.f32.mrb[55].mxu1  ;;  %v13673_v51 = vadd.f32 %v2683_v24, %v1370_v37  ;;  %11441 = vtanh.f32 %v13378_v61  ;;  %v13682_v14 = vadd.f32 %v2691_v50, %v1378_v59  ;;  %3637 = vadd.xlane.f32.xlu1 %v3506_v45  ;;  %v2399_v58 = vrot.slane %v2371_v12, %v12840_v55  ;;  %v11432_v10 = vpop.eup %11431 }
 0x200   : > { %v1958_v28 = vrot.slane %v19195_v23, %v12840_v55  ;;  %v13684_v17 = vadd.f32 %v2979_v3, %v1666_v21  ;;  %v13687_v49 = vadd.f32 %v2971_v30, %v1658_v48  ;;  %v1381_v35 = vadd.f32 %v13692_v42, %v13357_v32 }
 0x201   : > { %19193 = vst [vmem:[#allocation56_spill] sm:$0xff] %v13673_v51  ;;  %19196 = vst [vmem:[#allocation25_spill] sm:$0xff] %v13682_v14  ;;  %v3575_v61 = vmul.f32 %v11430_v6, %v13202_v39  ;;  %v1669_v12 = vadd.f32 %v13692_v42, %v13366_v1  ;;  %v2403_v45 = vcombine.high %v2399_v58, %v2399_v58  ;;  %11443 = vtanh.f32 %v13373_v40 }
 0x202   : > { %19197 = vst [vmem:[#allocation22_spill] sm:$0xff] %v13684_v17  ;;  %19198 = vst [vmem:[#allocation74_spill] sm:$0xff] %v13687_v49  ;;  %v1962_v37 = vcombine.high %v1958_v28, %v1958_v28  ;;  %v11434_v3 = vpop.eup %11433  ;;  %v1373_v48 = vadd.f32 %v13692_v42, %v13368_v44  ;;  %v2687_v59 = vrot.slane %v1958_v28, %v12856_v2  ;;  %11445 = vtanh.f32 %v13318_v4 }
 0x203   : > { %v13697_v50 = vpop.f32.mrb[56].mxu0  ;;  %v2427_v32 = vrot.slane %v13615_v63, %v12840_v55  ;;  %3775 = vadd.xlane.f32.xlu0 %v3575_v61  ;;  %v1661_v30 = vadd.f32 %v13692_v42, %v13376_v25  ;;  %v2975_v1 = vrot.slane %v2399_v58, %v12856_v2  ;;  %v13719_v28 = vrot.slane %v2419_v57, %v12840_v55 }
 0x204   : > { %v13704_v21 = vpop.f32.mrb[56].mxu1  ;;  %v13706_v24 = vpop.f32.mrb[57].mxu0  ;;  %v2695_v6 = vrot.slane %v1962_v37, %v12856_v2  ;;  %v2983_v23 = vrot.slane %v2403_v45, %v12856_v2  ;;  %v13722_v49 = vadd.f32 %v2687_v59, %v1373_v48  ;;  %v3578_v63 = vmul.f32 %v11432_v10, %v13202_v39  ;;  %v19202_v45 = vld [vmem:[#allocation44_spill] sm:$0xff] }
 0x205   : > { %v13714_v22 = vpop.f32.mrb[57].mxu1  ;;  %v13716_v44 = vpop.f32.mrb[58].mxu0  ;;  %v13732_v51 = vadd.f32 %v2975_v1, %v1661_v30  ;;  %v3504_v57 = vmul.f32 %v11434_v3, %v13202_v39  ;;  %v13739_v48 = vrot.slane %v19202_v45, %v12840_v55  ;;  %v1394_v59 = vadd.f32 %v13692_v42, %v13408_v19 }
 0x206   : > { %19199 = vst [vmem:[#allocation75_spill] sm:$0xff] %v13722_v49  ;;  %v13725_v37 = vpop.f32.mrb[58].mxu1  ;;  %v13727_v61 = vpop.f32.mrb[59].mxu0  ;;  %v13730_v58 = vadd.f32 %v2695_v6, %v1381_v35  ;;  %v13741_v10 = vadd.f32 %v2983_v23, %v1669_v12  ;;  %3781 = vadd.xlane.f32.xlu1 %v3578_v63  ;;  %v19204_v49 = vld [vmem:[#allocation27_spill] sm:$0xff]  ;;  %v1682_v3 = vadd.f32 %v13692_v42, %v13416_v0  ;;  %11447 = vtanh.f32 %v13360_v62 }
 0x207   : > { %v11436_v25 = vpop.eup %11435  ;;  %19201 = vst [vmem:[#allocation77_spill] sm:$0xff] %v13732_v51  ;;  %v13735_v17 = vpop.f32.mrb[59].mxu1  ;;  %v2008_v40 = vcombine.high %v19204_v49, %v19204_v49  ;;  %3633 = vadd.xlane.f32.xlu0 %v3504_v57  ;;  %v2449_v6 = vcombine.high %v2427_v32, %v2427_v32  ;;  %v1386_v30 = vadd.f32 %v13692_v42, %v13418_v33  ;;  %v19207_v51 = vld [vmem:[#allocation29_spill] sm:$0xff]  ;;  %11449 = vtanh.f32 %v13322_v18 }
 0x208   : > { %19200 = vst [vmem:[#allocation76_spill] sm:$0xff] %v13730_v58  ;;  %19203 = vst [vmem:[#allocation44_spill] sm:$0xff] %v13741_v10  ;;  %v11438_v35 = vpop.eup %11437  ;;  %v3576_v1 = vmul.f32 %v11436_v25, %v13202_v39  ;;  %v2699_v19 = vrot.slane %v19204_v49, %v12856_v2  ;;  %v1674_v23 = vadd.f32 %v13692_v42, %v13425_v5 }
 0x209   : > { %v2707_v12 = vrot.slane %v2008_v40, %v12856_v2  ;;  %v11440_v63 = vpop.eup %11439  ;;  %v2995_v4 = vrot.slane %v2449_v6, %v12856_v2  ;;  %v2987_v0 = vrot.slane %v2427_v32, %v12856_v2  ;;  %v1397_v33 = vadd.f32 %v13692_v42, %v13427_v11 }
 0x20a   : > { %v11442_v40 = vpop.eup %11441  ;;  %3777 = vadd.xlane.f32.xlu1 %v3576_v1  ;;  %v13767_v49 = vadd.f32 %v2699_v19, %v1386_v30  ;;  %v2010_v5 = vcombine.high %v19207_v51, %v19207_v51  ;;  %v1685_v62 = vadd.f32 %v13692_v42, %v13436_v56  ;;  %v3509_v30 = vmul.f32 %v11438_v35, %v13202_v39 }
 0x20b   : > { %v13763_v57 = vpop.f32.mrb[60].mxu0  ;;  %v13765_v25 = vadd.f32 %v2707_v12, %v1394_v59  ;;  %v13777_v10 = vadd.f32 %v2995_v4, %v1682_v3  ;;  %v13779_v11 = vadd.f32 %v2987_v0, %v1674_v23  ;;  %v2451_v59 = vcombine.high %v13719_v28, %v13719_v28 }
 0x20c   : > { %19206 = vst [vmem:[#allocation78_spill] sm:$0xff] %v13767_v49  ;;  %v13773_v6 = vpop.f32.mrb[60].mxu1  ;;  %v13775_v32 = vpop.f32.mrb[61].mxu0  ;;  %v2711_v56 = vrot.slane %v2010_v5, %v12856_v2  ;;  %v1389_v19 = vadd.f32 %v13692_v42, %v13438_v20  ;;  %v2703_v3 = vrot.slane %v19207_v51, %v12856_v2  ;;  %v2434_v35 = vrot.slane %v13636_v43, %v12840_v55 }
 0x20d   : > { %19205 = vst [vmem:[#allocation27_spill] sm:$0xff] %v13765_v25  ;;  %19208 = vst [vmem:[#allocation29_spill] sm:$0xff] %v13777_v10  ;;  %v13784_v12 = vpop.f32.mrb[61].mxu1  ;;  %v13786_v1 = vpop.f32.mrb[62].mxu0  ;;  %v2999_v0 = vrot.slane %v2451_v59, %v12856_v2  ;;  %3643 = vadd.xlane.f32.xlu0 %v3509_v30  ;;  %v1677_v18 = vadd.f32 %v13692_v42, %v13447_v47  ;;  %v2991_v5 = vrot.slane %v13719_v28, %v12856_v2  ;;  %v19212_v59 = vld [vmem:[#allocation59_spill] sm:$0xff] }
 0x20e   : > { %19209 = vst [vmem:[#allocation79_spill] sm:$0xff] %v13779_v11  ;;  %v13794_v23 = vpop.f32.mrb[62].mxu1  ;;  %v13796_v4 = vpop.f32.mrb[63].mxu0  ;;  %v2420_v51 = vcombine.high %v13636_v43, %v13636_v43  ;;  %v13809_v11 = vadd.f32 %v2711_v56, %v1397_v33  ;;  %v13811_v49 = vadd.f32 %v2703_v3, %v1389_v19  ;;  %v3510_v10 = vmul.f32 %v11442_v40, %v13202_v39  ;;  %v19215_v40 = vld [vmem:[#allocation28_spill] sm:$0xff]  ;;  %v19219_v43 = vld [vmem:[#allocation62_spill] sm:$0xff] }
 0x20f   : > { %v13805_v20 = vpop.f32.mrb[63].mxu1  ;;  %v11444_v25 = vpop.eup %11443  ;;  %11451 = vtanh.f32 %v19212_v59  ;;  %v13815_v30 = vadd.f32 %v2999_v0, %v1685_v62  ;;  %v13817_v47 = vadd.f32 %v2991_v5, %v1677_v18  ;;  %v3581_v28 = vmul.f32 %v11440_v63, %v13202_v39  ;;  %v19216_v62 = vld [vmem:[#allocation60_spill] sm:$0xff] }
 0x210   : > { %19210 = vst [vmem:[#allocation80_spill] sm:$0xff] %v13809_v11  ;;  %19211 = vst [vmem:[#allocation81_spill] sm:$0xff] %v13811_v49  ;;  %v2453_v58 = vcombine.high %v19202_v45, %v19202_v45  ;;  %3645 = vadd.xlane.f32.xlu1 %v3510_v10  ;;  %v1410_v33 = vadd.f32 %v13692_v42, %v13474_v52  ;;  %v2009_v56 = vcombine.high %v19215_v40, %v19215_v40  ;;  %v11446_v19 = vpop.eup %11445  ;;  %v19217_v0 = vld [vmem:[#allocation36_spill] sm:$0xff] }
 0x211   : > { %19213 = vst [vmem:[#allocation59_spill] sm:$0xff] %v13815_v30  ;;  %19214 = vst [vmem:[#allocation82_spill] sm:$0xff] %v13817_v47  ;;  %11453 = vtanh.f32 %v19216_v62  ;;  %3787 = vadd.xlane.f32.xlu0 %v3581_v28  ;;  %v1698_v63 = vadd.f32 %v13692_v42, %v13483_v34  ;;  %v2450_v3 = vcombine.high %v2434_v35, %v2434_v35  ;;  %v11448_v34 = vpop.eup %11447  ;;  %v19224_v11 = vld [vmem:[#allocation24_spill] sm:$0xff] }
 0x212   : > { %v1402_v45 = vadd.f32 %v13692_v42, %v19217_v0  ;;  %v2723_v10 = vrot.slane %v2009_v56, %v12856_v2  ;;  %v3582_v52 = vmul.f32 %v11444_v25, %v13202_v39  ;;  %v2715_v5 = vrot.slane %v19215_v40, %v12856_v2 }
 0x213   : > { %v13833_v18 = vpop.f32.mrb[64].mxu0  ;;  %v1690_v59 = vadd.f32 %v13692_v42, %v13496_v53  ;;  %v13847_v0 = vrot.slane %v13739_v48, %v12840_v55  ;;  %11455 = vtanh.f32 %v19219_v43  ;;  %v3011_v56 = vrot.slane %v2450_v3, %v12856_v2  ;;  %v19221_v53 = vld [vmem:[#allocation64_spill] sm:$0xff] }
 0x214   : > { %v13841_v28 = vpop.f32.mrb[64].mxu1  ;;  %v13843_v62 = vpop.f32.mrb[65].mxu0  ;;  %v3003_v25 = vrot.slane %v2434_v35, %v12856_v2  ;;  %11457 = vtanh.f32 %v19221_v53  ;;  %v13857_v49 = vadd.f32 %v2723_v10, %v1410_v33  ;;  %3789 = vadd.xlane.f32.xlu1 %v3582_v52  ;;  %v13859_v30 = vadd.f32 %v2715_v5, %v1402_v45 }
 0x215   : > { %19218 = vst [vmem:[#allocation28_spill] sm:$0xff] %v13843_v62  ;;  %v13852_v47 = vpop.f32.mrb[65].mxu1  ;;  %v13854_v40 = vpop.f32.mrb[66].mxu0  ;;  %v19225_v14 = vcombine.high %v19224_v11, %v19224_v11  ;;  %v13869_v35 = vadd.f32 %v3011_v56, %v1698_v63  ;;  %v2448_v53 = vrot.slane %v2420_v51, %v12840_v55  ;;  %v3507_v33 = vmul.f32 %v11446_v19, %v13202_v39  ;;  %v19228_v51 = vld [vmem:[#allocation30_spill] sm:$0xff] }
 0x216   : > { %19220 = vst [vmem:[#allocation60_spill] sm:$0xff] %v13852_v47  ;;  %19222 = vst [vmem:[#allocation36_spill] sm:$0xff] %v13857_v49  ;;  %v13865_v62 = vpop.f32.mrb[66].mxu1  ;;  %v13867_v3 = vpop.f32.mrb[67].mxu0  ;;  %v13871_v47 = vadd.f32 %v3003_v25, %v1690_v59  ;;  %v1413_v52 = vadd.f32 %v13692_v42, %v13498_v38  ;;  %v1701_v63 = vadd.f32 %v13692_v42, %v13509_v46 }
 0x217   : > { %19223 = vst [vmem:[#allocation62_spill] sm:$0xff] %v13859_v30  ;;  %v2007_v43 = vrot.slane %v19225_v14, %v12840_v55  ;;  %19226 = vst [vmem:[#allocation64_spill] sm:$0xff] %v13869_v35  ;;  %v13875_v10 = vpop.f32.mrb[67].mxu1  ;;  %v11450_v45 = vpop.eup %11449  ;;  %v1405_v14 = vadd.f32 %v13692_v42, %v13511_v27  ;;  %v2452_v59 = vcombine.high %v2448_v53, %v2448_v53  ;;  %3639 = vadd.xlane.f32.xlu0 %v3507_v33  ;;  %v19230_v30 = vld [vmem:[#allocation31_spill] sm:$0xff] }
 0x218   : > { %19227 = vst [vmem:[#allocation24_spill] sm:$0xff] %v13871_v47  ;;  %v1693_v19 = vadd.f32 %v13692_v42, %v19228_v51  ;;  %v3007_v56 = vrot.slane %v2448_v53, %v12856_v2  ;;  %v13888_v25 = vrot.slane %v2453_v58, %v12840_v55  ;;  %v3508_v27 = vmul.f32 %v11448_v34, %v13202_v39  ;;  %v19233_v58 = vld [vmem:[#allocation65_spill] sm:$0xff] }
 0x219   : > { %v2011_v11 = vcombine.high %v2007_v43, %v2007_v43  ;;  %v2719_v5 = vrot.slane %v2007_v43, %v12856_v2  ;;  %v11452_v43 = vpop.eup %11451  ;;  %v2502_v46 = vcombine.high %v19230_v30, %v19230_v30  ;;  %v3015_v33 = vrot.slane %v2452_v59, %v12856_v2 }
 0x21a   : > { %v13897_v35 = vadd.f32 %v3007_v56, %v1693_v19  ;;  %v3579_v51 = vmul.f32 %v11450_v45, %v13202_v39  ;;  %11459 = vtanh.f32 %v19233_v58  ;;  %3641 = vadd.xlane.f32.xlu1 %v3508_v27  ;;  %v1426_v34 = vadd.f32 %v13692_v42, %v13550_v60 }
 0x21b   : > { %v2727_v38 = vrot.slane %v2011_v11, %v12856_v2  ;;  %v13891_v47 = vadd.f32 %v2719_v5, %v1405_v14  ;;  %v13900_v53 = vpop.f32.mrb[68].mxu0  ;;  %v19235_v11 = vld [vmem:[#allocation39_spill] sm:$0xff]  ;;  %v11454_v19 = vpop.eup %11453  ;;  %v19238_v45 = vcombine.high %v13739_v48, %v13739_v48  ;;  %v13917_v58 = vadd.f32 %v3015_v33, %v1701_v63 }
 0x21c   : > { %19231 = vst [vmem:[#allocation31_spill] sm:$0xff] %v13897_v35  ;;  %19232 = vst [vmem:[#allocation83_spill] sm:$0xff] %v13900_v53  ;;  %v2057_v14 = vcombine.high %v19235_v11, %v19235_v11  ;;  %v13909_v5 = vpop.f32.mrb[68].mxu1  ;;  %v13911_v59 = vpop.f32.mrb[69].mxu0  ;;  %3783 = vadd.xlane.f32.xlu0 %v3579_v51  ;;  %v2498_v60 = vcombine.high %v13847_v0, %v13847_v0  ;;  %v13929_v35 = vrot.slane %v13888_v25, %v12840_v55 }
 0x21d   : > { %19229 = vst [vmem:[#allocation30_spill] sm:$0xff] %v13891_v47  ;;  %v13903_v49 = vadd.f32 %v2727_v38, %v1413_v52  ;;  %19236 = vst [vmem:[#allocation39_spill] sm:$0xff] %v13909_v5  ;;  %v2490_v56 = vrot.slane %v19238_v45, %v12840_v55  ;;  %v1714_v52 = vadd.f32 %v13692_v42, %v13562_v15  ;;  %v13923_v38 = vpop.f32.mrb[69].mxu1  ;;  %v13925_v27 = vpop.f32.mrb[70].mxu0  ;;  %v19244_v47 = vld [vmem:[#allocation61_spill] sm:$0xff] }
 0x21e   : > { %19237 = vst [vmem:[#allocation84_spill] sm:$0xff] %v13911_v59  ;;  %19239 = vst [vmem:[#allocation85_spill] sm:$0xff] %v13917_v58  ;;  %v2739_v48 = vrot.slane %v2057_v14, %v12856_v2  ;;  %v3580_v63 = vmul.f32 %v11452_v43, %v13202_v39  ;;  %v1418_v33 = vadd.f32 %v13692_v42, %v13564_v16  ;;  %v13935_v51 = vpop.f32.mrb[70].mxu1  ;;  %v13937_v15 = vpop.f32.mrb[71].mxu0  ;;  %11461 = vtanh.f32 %v19244_v47 }
 0x21f   : > { %19234 = vst [vmem:[#allocation65_spill] sm:$0xff] %v13903_v49  ;;  %19240 = vst [vmem:[#allocation86_spill] sm:$0xff] %v13923_v38  ;;  %v11456_v45 = vpop.eup %11455  ;;  %v3027_v58 = vrot.slane %v2498_v60, %v12856_v2  ;;  %v2731_v49 = vrot.slane %v19235_v11, %v12856_v2  ;;  %v13945_v38 = vpop.f32.mrb[71].mxu1  ;;  %v3019_v16 = vrot.slane %v13847_v0, %v12856_v2 }
 0x220   : > { %19241 = vst [vmem:[#allocation87_spill] sm:$0xff] %v13925_v27  ;;  %19242 = vst [vmem:[#allocation88_spill] sm:$0xff] %v13935_v51  ;;  %v19245_v27 = vld [vmem:[#allocation32_spill] sm:$0xff]  ;;  %v11458_v43 = vpop.eup %11457  ;;  %v13947_v59 = vadd.f32 %v2739_v48, %v1426_v34  ;;  %3785 = vadd.xlane.f32.xlu1 %v3580_v63  ;;  %v19249_v51 = vld [vmem:[#allocation45_spill] sm:$0xff]  ;;  %v2500_v53 = vcombine.high %v2490_v56, %v2490_v56  ;;  %v3513_v63 = vmul.f32 %v11456_v45, %v13202_v39 }
 0x221   : > { %19243 = vst [vmem:[#allocation89_spill] sm:$0xff] %v13937_v15  ;;  %v1706_v14 = vadd.f32 %v13692_v42, %v19245_v27  ;;  %19246 = vst [vmem:[#allocation61_spill] sm:$0xff] %v13945_v38  ;;  %v19248_v15 = vld [vmem:[#allocation70_spill] sm:$0xff]  ;;  %v2059_v60 = vcombine.high %v19249_v51, %v19249_v51  ;;  %v13955_v5 = vadd.f32 %v3027_v58, %v1714_v52  ;;  %v19250_v27 = vld [vmem:[#allocation53_spill] sm:$0xff] }
 0x222   : > { %19247 = vst [vmem:[#allocation32_spill] sm:$0xff] %v13947_v59  ;;  %v1429_v47 = vadd.f32 %v13692_v42, %v19248_v15  ;;  %v13957_v11 = vadd.f32 %v2731_v49, %v1418_v33  ;;  %v1717_v38 = vadd.f32 %v13692_v42, %v19250_v27  ;;  %v19251_v34 = vld [vmem:[#allocation66_spill] sm:$0xff]  ;;  %v19252_v15 = vld [vmem:[#allocation63_spill] sm:$0xff]  ;;  %v3031_v59 = vrot.slane %v2500_v53, %v12856_v2 }
 0x223   : > { %11463 = vtanh.f32 %v19251_v34  ;;  %v13962_v48 = vadd.f32 %v3019_v16, %v1706_v14  ;;  %v2743_v0 = vrot.slane %v2059_v60, %v12856_v2  ;;  %v19253_v58 = vld [vmem:[#allocation71_spill] sm:$0xff]  ;;  %v2735_v52 = vrot.slane %v19249_v51, %v12856_v2  ;;  %3651 = vadd.xlane.f32.xlu0 %v3513_v63  ;;  %v19254_v14 = vld [vmem:[#allocation26_spill] sm:$0xff] }
 0x224   : > { %11465 = vtanh.f32 %v19252_v15  ;;  %v1421_v49 = vadd.f32 %v13692_v42, %v19253_v58  ;;  %v2509_v33 = vrot.slane %v19230_v30, %v12840_v55  ;;  %v1709_v16 = vadd.f32 %v13692_v42, %v19254_v14  ;;  %v11460_v15 = vpop.eup %11459  ;;  %v19257_v58 = vld [vmem:[#allocation48_spill] sm:$0xff] }
 0x225   : > { %v13974_v27 = vadd.f32 %v2743_v0, %v1429_v47  ;;  %v3023_v45 = vrot.slane %v2490_v56, %v12856_v2  ;;  %v13980_v60 = vrot.slane %v2502_v46, %v12840_v55  ;;  %v13982_v53 = vadd.f32 %v3031_v59, %v1717_v38  ;;  %v19255_v47 = vld [vmem:[#allocation67_spill] sm:$0xff] }
 0x226   : > { %v13984_v34 = vadd.f32 %v2735_v52, %v1421_v49  ;;  %v3514_v51 = vmul.f32 %v11458_v43, %v13202_v39  ;;  %v2469_v30 = vcombine.high %v13888_v25, %v13888_v25  ;;  %11467 = vtanh.f32 %v19255_v47  ;;  %v13995_v56 = vld [vmem:[%s18753_s6] ss:$0 sm:$0xff]  ;;  %v19256_v39 = vld [vmem:[#allocation40_spill] sm:$0xff] }
 0x227   : > { %v13990_v0 = vadd.f32 %v3023_v45, %v1709_v16  ;;  %v3585_v46 = vmul.f32 %v13995_v56, %v11454_v19  ;;  %v1442_v59 = vadd.f32 %v13692_v42, %v13622_v31  ;;  %v2058_v38 = vcombine.high %v19256_v39, %v19256_v39  ;;  %v19258_v45 = vld [vmem:[#allocation50_spill] sm:$0xff]  ;;  %v19259_v47 = vld [vmem:[#allocation35_spill] sm:$0xff] }
 0x228   : > { %3653 = vadd.xlane.f32.xlu1 %v3514_v51  ;;  %v1730_v25 = vadd.f32 %v13692_v42, %v13631_v13  ;;  %v2499_v43 = vcombine.high %v13929_v35, %v13929_v35  ;;  %v2517_v63 = vcombine.high %v2509_v33, %v2509_v33  ;;  %11469 = vtanh.f32 %v19257_v58  ;;  %v11462_v31 = vpop.eup %11461 }
 0x229   : > { %3795 = vadd.xlane.f32.xlu0 %v3585_v46  ;;  %v1434_v19 = vadd.f32 %v13692_v42, %v13633_v36  ;;  %v2747_v49 = vrot.slane %v19256_v39, %v12856_v2  ;;  %v2755_v52 = vrot.slane %v2058_v38, %v12856_v2  ;;  %v3586_v13 = vmul.f32 %v13995_v56, %v11460_v15  ;;  %v19261_v38 = vld [vmem:[#allocation69_spill] sm:$0xff] }
 0x22a   : > { %v3043_v14 = vrot.slane %v2499_v43, %v12856_v2  ;;  %v1722_v16 = vadd.f32 %v13692_v42, %v13642_v8  ;;  %11471 = vtanh.f32 %v19258_v45  ;;  %v3035_v36 = vrot.slane %v13929_v35, %v12856_v2 }
 0x22b   : > { %v14017_v51 = vadd.f32 %v2747_v49, %v1434_v19  ;;  %v19260_v46 = vcombine.high %v19259_v47, %v19259_v47  ;;  %11473 = vtanh.f32 %v19261_v38  ;;  %v14026_v43 = vadd.f32 %v2755_v52, %v1442_v59 }
 0x22c   : > { %v14028_v15 = vadd.f32 %v3043_v14, %v1730_v25  ;;  %3797 = vadd.xlane.f32.xlu1 %v3586_v13  ;;  %v2497_v8 = vrot.slane %v2469_v30, %v12840_v55  ;;  %v14031_v19 = vadd.f32 %v3035_v36, %v1722_v16  ;;  %v1445_v35 = vadd.f32 %v13692_v42, %v13644_v29 }
 0x22d   : > { %v2056_v39 = vrot.slane %v19260_v46, %v12840_v55  ;;  %v11464_v58 = vpop.eup %11463  ;;  %v3511_v45 = vmul.f32 %v13995_v56, %v11462_v31  ;;  %v1733_v46 = vadd.f32 %v13692_v42, %v13654_v9  ;;  %v1437_v25 = vadd.f32 %v13692_v42, %v13656_v26 }
 0x22e   : > { %v11466_v47 = vpop.eup %11465  ;;  %v2501_v59 = vcombine.high %v2497_v8, %v2497_v8  ;;  %v2525_v30 = vrot.slane %v2509_v33, %v12840_v55  ;;  %v1725_v29 = vadd.f32 %v13692_v42, %v13665_v7  ;;  %v3039_v31 = vrot.slane %v2497_v8, %v12856_v2  ;;  %v19264_v7 = vld [vmem:[#allocation42_spill] sm:$0xff] }
 0x22f   : > { %v2060_v49 = vcombine.high %v2056_v39, %v2056_v39  ;;  %v2751_v52 = vrot.slane %v2056_v39, %v12856_v2  ;;  %3647 = vadd.xlane.f32.xlu0 %v3511_v45  ;;  %v2539_v13 = vrot.slane %v2517_v63, %v12840_v55  ;;  %v3512_v26 = vmul.f32 %v13995_v56, %v11464_v58  ;;  %v19262_v39 = vld [vmem:[#allocation23_spill] sm:$0xff]  ;;  %v19265_v58 = vld [vmem:[#allocation46_spill] sm:$0xff] }
 0x230   : > { %v3047_v9 = vrot.slane %v2501_v59, %v12856_v2  ;;  %v11468_v36 = vpop.eup %11467  ;;  %11475 = vtanh.f32 %v19262_v39  ;;  %v14054_v38 = vadd.f32 %v3039_v31, %v1725_v29  ;;  %v14059_v8 = vrot.slane %v19264_v7, %v12840_v55 }
 0x231   : > { %v2759_v14 = vrot.slane %v2060_v49, %v12856_v2  ;;  %v14048_v16 = vadd.f32 %v2751_v52, %v1437_v25  ;;  %v3583_v49 = vmul.f32 %v13995_v56, %v11466_v47  ;;  %3649 = vadd.xlane.f32.xlu1 %v3512_v26  ;;  %v1458_v45 = vadd.f32 %v13692_v42, %v13697_v50  ;;  %v19267_v26 = vld [vmem:[#allocation41_spill] sm:$0xff] }
 0x232   : > { %19263 = vst [vmem:[#allocation70_spill] sm:$0xff] %v14054_v38  ;;  %v14061_v63 = vadd.f32 %v3047_v9, %v1733_v46  ;;  %v2106_v59 = vcombine.high %v19265_v58, %v19265_v58  ;;  %v11470_v25 = vpop.eup %11469  ;;  %v1746_v47 = vadd.f32 %v13692_v42, %v13704_v21  ;;  %v2547_v52 = vcombine.high %v2525_v30, %v2525_v30 }
 0x233   : > { %v14052_v33 = vadd.f32 %v2759_v14, %v1445_v35  ;;  %v19266_v35 = vld [vmem:[#allocation49_spill] sm:$0xff]  ;;  %3791 = vadd.xlane.f32.xlu0 %v3583_v49  ;;  %v1450_v14 = vadd.f32 %v13692_v42, %v13706_v24  ;;  %v3584_v29 = vmul.f32 %v13995_v56, %v11468_v36  ;;  %v2763_v50 = vrot.slane %v19265_v58, %v12856_v2  ;;  %v19268_v58 = vld [vmem:[#allocation52_spill] sm:$0xff] }
 0x234   : > { %11477 = vtanh.f32 %v19266_v35  ;;  %v2771_v46 = vrot.slane %v2106_v59, %v12856_v2  ;;  %v1738_v31 = vadd.f32 %v13692_v42, %v13714_v22  ;;  %v11472_v9 = vpop.eup %11471  ;;  %v3059_v39 = vrot.slane %v2547_v52, %v12856_v2 }
 0x235   : > { %11479 = vtanh.f32 %v19267_v26  ;;  %v3051_v21 = vrot.slane %v2525_v30, %v12856_v2  ;;  %v1461_v24 = vadd.f32 %v13692_v42, %v13716_v44  ;;  %v11474_v49 = vpop.eup %11473  ;;  %3793 = vadd.xlane.f32.xlu1 %v3584_v29  ;;  %v14085_v36 = vadd.f32 %v2763_v50, %v1450_v14  ;;  %v19269_v44 = vld [vmem:[#allocation51_spill] sm:$0xff] }
 0x236   : > { %v14083_v59 = vadd.f32 %v2771_v46, %v1458_v45  ;;  %v2108_v35 = vcombine.high %v19268_v58, %v19268_v58  ;;  %v1749_v22 = vadd.f32 %v13692_v42, %v13725_v37  ;;  %v14091_v26 = vadd.f32 %v3059_v39, %v1746_v47 }
 0x237   : > { %v14093_v52 = vadd.f32 %v3051_v21, %v1738_v31  ;;  %v2549_v30 = vcombine.high %v2539_v13, %v2539_v13  ;;  %v3517_v38 = vmul.f32 %v13995_v56, %v11470_v25  ;;  %11481 = vtanh.f32 %v19269_v44 }
 0x238   : > { %v2775_v45 = vrot.slane %v2108_v35, %v12856_v2  ;;  %v1453_v14 = vadd.f32 %v13692_v42, %v13727_v61  ;;  %v2767_v46 = vrot.slane %v19268_v58, %v12856_v2  ;;  %v2532_v37 = vrot.slane %v13980_v60, %v12840_v55  ;;  %v19270_v58 = vld [vmem:[#allocation68_spill] sm:$0xff] }
 0x239   : > { %v3063_v47 = vrot.slane %v2549_v30, %v12856_v2  ;;  %3659 = vadd.xlane.f32.xlu0 %v3517_v38  ;;  %v1741_v29 = vadd.f32 %v13692_v42, %v13735_v17  ;;  %v3055_v25 = vrot.slane %v2539_v13, %v12856_v2  ;;  %v2518_v50 = vcombine.high %v13980_v60, %v13980_v60 }
 0x23a   : > { %v14110_v31 = vadd.f32 %v2775_v45, %v1461_v24  ;;  %v14112_v61 = vadd.f32 %v2767_v46, %v1453_v14  ;;  %v3518_v39 = vmul.f32 %v13995_v56, %v11474_v49  ;;  %v11476_v21 = vpop.eup %11475  ;;  %11483 = vtanh.f32 %v19270_v58  ;;  %v19271_v49 = vld [vmem:[#allocation47_spill] sm:$0xff] }
 0x23b   : > { %v14116_v35 = vadd.f32 %v3063_v47, %v1749_v22  ;;  %v14118_v38 = vadd.f32 %v3055_v25, %v1741_v29  ;;  %v3589_v17 = vmul.f32 %v13995_v56, %v11472_v9  ;;  %v2551_v13 = vcombine.high %v19264_v7, %v19264_v7  ;;  %v19272_v22 = vld [vmem:[#allocation72_spill] sm:$0xff] }
 0x23c   : > { %v2566_v60 = vcombine.high %v14059_v8, %v14059_v8  ;;  %3661 = vadd.xlane.f32.xlu1 %v3518_v39  ;;  %v1474_v24 = vadd.f32 %v13692_v42, %v13763_v57  ;;  %v2107_v30 = vcombine.high %v19271_v49, %v19271_v49  ;;  %11485 = vtanh.f32 %v19272_v22 }
 0x23d   : > { %3803 = vadd.xlane.f32.xlu0 %v3589_v17  ;;  %v1762_v9 = vadd.f32 %v13692_v42, %v13773_v6  ;;  %v2548_v45 = vcombine.high %v2532_v37, %v2532_v37  ;;  %v1466_v7 = vadd.f32 %v13692_v42, %v13775_v32  ;;  %v3590_v46 = vmul.f32 %v13995_v56, %v11476_v21 }
 0x23e   : > { %v11478_v44 = vpop.eup %11477  ;;  %v2787_v14 = vrot.slane %v2107_v30, %v12856_v2  ;;  %v2779_v57 = vrot.slane %v19271_v49, %v12856_v2  ;;  %v1754_v47 = vadd.f32 %v13692_v42, %v13784_v12  ;;  %v14142_v25 = vrot.slane %v14059_v8, %v12840_v55  ;;  %v19273_v12 = vld [vmem:[#allocation43_spill] sm:$0xff] }
 0x23f   : > { %v11480_v29 = vpop.eup %11479  ;;  %11487 = vtanh.f32 %v13596_v54  ;;  %v3075_v6 = vrot.slane %v2548_v45, %v12856_v2  ;;  %v3067_v32 = vrot.slane %v2532_v37, %v12856_v2  ;;  %v19274_v58 = vcombine.high %v19273_v12, %v19273_v12 }
 0x240   : > { %11489 = vtanh.f32 %v13617_v41  ;;  %v14148_v39 = vadd.f32 %v2787_v14, %v1474_v24  ;;  %3805 = vadd.xlane.f32.xlu1 %v3590_v46  ;;  %v14150_v21 = vadd.f32 %v2779_v57, %v1466_v7  ;;  %v2546_v54 = vrot.slane %v2518_v50, %v12840_v55 }
 0x241   : > { %v2105_v17 = vrot.slane %v19274_v58, %v12840_v55  ;;  %v14156_v8 = vadd.f32 %v3075_v6, %v1762_v9  ;;  %v14158_v49 = vadd.f32 %v3067_v32, %v1754_v47  ;;  %v3515_v37 = vmul.f32 %v13995_v56, %v11478_v44  ;;  %v11482_v30 = vpop.eup %11481  ;;  %v19275_v47 = vld [vmem:[#allocation33_spill] sm:$0xff] }
 0x242   : > { %v1477_v41 = vadd.f32 %v13692_v42, %v13786_v1  ;;  %v1469_v22 = vadd.f32 %v13692_v42, %v13796_v4  ;;  %v1765_v9 = vadd.f32 %v13692_v42, %v13794_v23  ;;  %v2550_v7 = vcombine.high %v2546_v54, %v2546_v54 }
 0x243   : > { %v2109_v24 = vcombine.high %v2105_v17, %v2105_v17  ;;  %v2783_v45 = vrot.slane %v2105_v17, %v12856_v2  ;;  %3655 = vadd.xlane.f32.xlu0 %v3515_v37  ;;  %v1757_v50 = vadd.f32 %v13692_v42, %v13805_v20  ;;  %v3071_v44 = vrot.slane %v2546_v54, %v12856_v2  ;;  %v19278_v17 = vld [vmem:[#allocation37_spill] sm:$0xff] }
 0x244   : > { %v14173_v14 = vrot.slane %v2551_v13, %v12840_v55  ;;  %v3516_v4 = vmul.f32 %v13995_v56, %v11480_v29  ;;  %v11484_v57 = vpop.eup %11483  ;;  %v19276_v23 = vcombine.high %v19275_v47, %v19275_v47  ;;  %v3079_v32 = vrot.slane %v2550_v7, %v12856_v2  ;;  %v19277_v13 = vld [vmem:[#allocation55_spill] sm:$0xff] }
 0x245   : > { %v2791_v1 = vrot.slane %v2109_v24, %v12856_v2  ;;  %v14176_v46 = vadd.f32 %v2783_v45, %v1469_v22  ;;  %v14184_v20 = vadd.f32 %v3071_v44, %v1757_v50  ;;  %v3587_v12 = vmul.f32 %v13995_v56, %v11482_v30  ;;  %v19279_v50 = vld [vmem:[#allocation28_spill] sm:$0xff]  ;;  %v19280_v44 = vld [vmem:[#allocation73_spill] sm:$0xff] }
 0x246   : > { %v2147_v6 = vrot.slane %v19276_v23, %v12840_v55  ;;  %11491 = vtanh.f32 %v19277_v13  ;;  %3657 = vadd.xlane.f32.xlu1 %v3516_v4  ;;  %v1490_v29 = vadd.f32 %v13692_v42, %v13833_v18  ;;  %v2155_v54 = vcombine.high %v19278_v17, %v19278_v17  ;;  %v11486_v37 = vpop.eup %11485  ;;  %v19281_v4 = vld [vmem:[#allocation60_spill] sm:$0xff] }
 0x247   : > { %v14188_v58 = vadd.f32 %v2791_v1, %v1477_v41  ;;  %v2588_v24 = vrot.slane %v2566_v60, %v12840_v55  ;;  %v14195_v22 = vadd.f32 %v3079_v32, %v1765_v9  ;;  %3799 = vadd.xlane.f32.xlu0 %v3587_v12  ;;  %v1778_v30 = vadd.f32 %v13692_v42, %v13841_v28 }
 0x248   : > { %v2596_v41 = vcombine.high %v14142_v25, %v14142_v25  ;;  %v14203_v45 = vrot.slane %v14173_v14, %v12840_v55  ;;  %v2803_v18 = vrot.slane %v2155_v54, %v12856_v2  ;;  %v3588_v7 = vmul.f32 %v13995_v56, %v11484_v57 }
 0x249   : > { %v1482_v60 = vadd.f32 %v13692_v42, %v19279_v50  ;;  %v11488_v9 = vpop.eup %11487  ;;  %11493 = vtanh.f32 %v19280_v44  ;;  %v2795_v28 = vrot.slane %v19278_v17, %v12856_v2  ;;  %v1770_v47 = vadd.f32 %v13692_v42, %v19281_v4  ;;  %v19282_v44 = vld [vmem:[#allocation57_spill] sm:$0xff] }
 0x24a   : > { %v3091_v1 = vrot.slane %v2596_v41, %v12856_v2  ;;  %v11490_v23 = vpop.eup %11489  ;;  %v14215_v32 = vadd.f32 %v2803_v18, %v1490_v29  ;;  %3801 = vadd.xlane.f32.xlu1 %v3588_v7  ;;  %v3083_v57 = vrot.slane %v14142_v25, %v12856_v2  ;;  %v1493_v12 = vadd.f32 %v13692_v42, %v13854_v40  ;;  %v19283_v7 = vld [vmem:[#allocation54_spill] sm:$0xff] }
 0x24b   : > { %v2157_v13 = vcombine.high %v2147_v6, %v2147_v6  ;;  %v14223_v41 = vadd.f32 %v2795_v28, %v1482_v60  ;;  %v1781_v17 = vadd.f32 %v13692_v42, %v13865_v62  ;;  %v2598_v50 = vcombine.high %v2588_v24, %v2588_v24 }
 0x24c   : > { %v14221_v54 = vadd.f32 %v3091_v1, %v1778_v30  ;;  %11495 = vtanh.f32 %v19282_v44  ;;  %v14228_v29 = vadd.f32 %v3083_v57, %v1770_v47  ;;  %v3521_v25 = vmul.f32 %v13995_v56, %v11486_v37  ;;  %v19284_v1 = vld [vmem:[#allocation34_spill] sm:$0xff] }
 0x24d   : > { %v2807_v18 = vrot.slane %v2157_v13, %v12856_v2  ;;  %11497 = vtanh.f32 %v19283_v7  ;;  %v3095_v40 = vrot.slane %v2598_v50, %v12856_v2  ;;  %v1485_v30 = vadd.f32 %v13692_v42, %v13867_v3  ;;  %v19285_v47 = vld [vmem:[#allocation58_spill] sm:$0xff]  ;;  %v19289_v7 = vld [vmem:[#allocation39_spill] sm:$0xff] }
 0x24e   : > { %v2799_v60 = vrot.slane %v2147_v6, %v12856_v2  ;;  %v2126_v62 = vcombine.high %v19284_v1, %v19284_v1  ;;  %3667 = vadd.xlane.f32.xlu0 %v3521_v25  ;;  %v1773_v4 = vadd.f32 %v13692_v42, %v13875_v10  ;;  %v3087_v37 = vrot.slane %v2588_v24, %v12856_v2  ;;  %v19287_v24 = vld [vmem:[#allocation83_spill] sm:$0xff] }
 0x24f   : > { %v14239_v28 = vadd.f32 %v2807_v18, %v1493_v12  ;;  %11499 = vtanh.f32 %v19285_v47  ;;  %v14245_v57 = vadd.f32 %v3095_v40, %v1781_v17  ;;  %v3522_v3 = vmul.f32 %v13995_v56, %v11490_v23  ;;  %v19286_v12 = vld [vmem:[#allocation25_spill] sm:$0xff]  ;;  %v19288_v17 = vld [vmem:[#allocation38_spill] sm:$0xff] }
 0x250   : > { %v14247_v13 = vadd.f32 %v2799_v60, %v1485_v30  ;;  %v11492_v6 = vpop.eup %11491  ;;  %v2567_v50 = vcombine.high %v14173_v14, %v14173_v14  ;;  %11501 = vtanh.f32 %v19286_v12  ;;  %v14253_v44 = vadd.f32 %v3087_v37, %v1773_v4  ;;  %v19290_v14 = vld [vmem:[#allocation84_spill] sm:$0xff]  ;;  %v19291_v47 = vld [vmem:[#allocation86_spill] sm:$0xff] }
 0x251   : > { %v3593_v10 = vmul.f32 %v13995_v56, %v11488_v9  ;;  %3669 = vadd.xlane.f32.xlu1 %v3522_v3  ;;  %v1506_v18 = vadd.f32 %v13692_v42, %v19287_v24  ;;  %v2156_v25 = vcombine.high %v19288_v17, %v19288_v17  ;;  %v1794_v23 = vadd.f32 %v13692_v42, %v19289_v7  ;;  %v19292_v12 = vld [vmem:[#allocation76_spill] sm:$0xff] }
 0x252   : > { %v2597_v40 = vcombine.high %v14203_v45, %v14203_v45  ;;  %v1498_v30 = vadd.f32 %v13692_v42, %v19290_v14  ;;  %v2811_v9 = vrot.slane %v19288_v17, %v12856_v2  ;;  %v3594_v37 = vmul.f32 %v13995_v56, %v11492_v6  ;;  %v19294_v17 = vld [vmem:[#allocation22_spill] sm:$0xff] }
 0x253   : > { %3811 = vadd.xlane.f32.xlu0 %v3593_v10  ;;  %v11494_v60 = vpop.eup %11493  ;;  %v2819_v1 = vrot.slane %v2156_v25, %v12856_v2  ;;  %v1786_v3 = vadd.f32 %v13692_v42, %v19291_v47  ;;  %11503 = vtanh.f32 %v19292_v12  ;;  %v3099_v10 = vrot.slane %v14203_v45, %v12856_v2  ;;  %v19297_v12 = vld [vmem:[#allocation87_spill] sm:$0xff] }
 0x254   : > { %v3107_v4 = vrot.slane %v2597_v40, %v12856_v2  ;;  %v14274_v24 = vadd.f32 %v2811_v9, %v1498_v30  ;;  %v2154_v7 = vrot.slane %v2126_v62, %v12840_v55  ;;  %11505 = vtanh.f32 %v19294_v17  ;;  %v19298_v62 = vld [vmem:[#allocation88_spill] sm:$0xff] }
 0x255   : > { %v14280_v14 = vadd.f32 %v2819_v1, %v1506_v18  ;;  %3813 = vadd.xlane.f32.xlu1 %v3594_v37  ;;  %v2595_v6 = vrot.slane %v2567_v50, %v12840_v55  ;;  %v14285_v47 = vadd.f32 %v3099_v10, %v1786_v3  ;;  %v1509_v30 = vadd.f32 %v13692_v42, %v19297_v12  ;;  %v19299_v1 = vld [vmem:[#allocation89_spill] sm:$0xff]  ;;  %v19300_v55 = vld [vmem:[#allocation44_spill] sm:$0xff] }
 0x256   : > { %19293 = vst [vmem:[#allocation45_spill] sm:$0xff] %v14274_v24  ;;  %v14282_v25 = vadd.f32 %v3107_v4, %v1794_v23  ;;  %v11496_v40 = vpop.eup %11495  ;;  %v2158_v9 = vcombine.high %v2154_v7, %v2154_v7  ;;  %v3519_v45 = vmul.f32 %v13995_v56, %v11494_v60  ;;  %v1797_v17 = vadd.f32 %v13692_v42, %v19298_v62  ;;  %v19301_v37 = vld [vmem:[#allocation61_spill] sm:$0xff]  ;;  %v19302_v12 = vld [vmem:[#allocation56_spill] sm:$0xff] }
 0x257   : > { %19296 = vst [vmem:[#allocation66_spill] sm:$0xff] %v14285_v47  ;;  %v11498_v24 = vpop.eup %11497  ;;  %v2599_v18 = vcombine.high %v2595_v6, %v2595_v6  ;;  %v1501_v23 = vadd.f32 %v13692_v42, %v19299_v1  ;;  %v2815_v4 = vrot.slane %v2154_v7, %v12856_v2  ;;  %11507 = vtanh.f32 %v19300_v55 }
 0x258   : > { %19295 = vst [vmem:[#allocation53_spill] sm:$0xff] %v14282_v25  ;;  %v2823_v50 = vrot.slane %v2158_v9, %v12856_v2  ;;  %3663 = vadd.xlane.f32.xlu0 %v3519_v45  ;;  %v1789_v3 = vadd.f32 %v13692_v42, %v19301_v37  ;;  %v3103_v60 = vrot.slane %v2595_v6, %v12856_v2  ;;  %11509 = vtanh.f32 %v19302_v12  ;;  %v14310_v45 = vpop.permute.xlu0 %3894  ;;  %v19306_v6 = vld [vmem:[#allocation75_spill] sm:$0xff]  ;;  %v14324_v12 = vpop.xlane.xlu1 %3745 }
 0x259   : > { %v11500_v10 = vpop.eup %11499  ;;  %v3111_v62 = vrot.slane %v2599_v18, %v12856_v2  ;;  %v14302_v47 = vadd.f32 %v2815_v4, %v1501_v23  ;;  %v3520_v1 = vmul.f32 %v13995_v56, %v11496_v40  ;;  %v3591_v9 = vmul.f32 %v13995_v56, %v11498_v24  ;;  %v19307_v18 = vld [vmem:[#allocation74_spill] sm:$0xff]  ;;  %v19308_v24 = vld [vmem:[#allocation77_spill] sm:$0xff] }
 0x25a   : > { %v11502_v7 = vpop.eup %11501  ;;  %v14305_v25 = vadd.f32 %v2823_v50, %v1509_v30  ;;  %v14307_v55 = vadd.f32 %v3103_v60, %v1789_v3  ;;  %11511 = vtanh.f32 %v19306_v6  ;;  %v3592_v23 = vmul.f32 %v13995_v56, %v11500_v10  ;;  %v19318_v2 = vld [vmem:[#allocation82_spill] sm:$0xff] }
 0x25b   : > { %19303 = vst [vmem:[#allocation63_spill] sm:$0xff] %v14302_v47  ;;  %v14312_v42 = vadd.f32 %v3111_v62, %v1797_v17  ;;  %3665 = vadd.xlane.f32.xlu1 %v3520_v1  ;;  %11513 = vtanh.f32 %v19307_v18  ;;  %v3525_v30 = vmul.f32 %v13995_v56, %v11502_v7  ;;  %v19309_v17 = vld [vmem:[#allocation27_spill] sm:$0xff]  ;;  %v19310_v1 = vld [vmem:[#allocation80_spill] sm:$0xff]  ;;  %v19311_v7 = vld [vmem:[#allocation29_spill] sm:$0xff] }
 0x25c   : > { %19304 = vst [vmem:[#allocation71_spill] sm:$0xff] %v14307_v55  ;;  %3807 = vadd.xlane.f32.xlu0 %v3591_v9  ;;  %11515 = vtanh.f32 %v19308_v24  ;;  %v19321_v55 = vld [vmem:[#allocation65_spill] sm:$0xff] }
 0x25d   : > { %19305 = vst [vmem:[#allocation26_spill] sm:$0xff] %v14312_v42  ;;  %v11504_v40 = vpop.eup %11503  ;;  %v14318_v50 = vpop.xlane.xlu0 %3743  ;;  %11517 = vtanh.f32 %v19309_v17 }
 0x25e   : > { %v11506_v4 = vpop.eup %11505  ;;  %v3526_v37 = vmul.f32 %v13995_v56, %v11504_v40  ;;  %11519 = vtanh.f32 %v19310_v1  ;;  %v19314_v1 = vld [vmem:[#allocation81_spill] sm:$0xff] }
 0x25f   : > { %3809 = vadd.xlane.f32.xlu1 %v3592_v23  ;;  %v3597_v60 = vmul.f32 %v13995_v56, %v11506_v4  ;;  %11521 = vtanh.f32 %v19311_v7  ;;  %v14332_v23 = vpop.xlane.xlu1 %3749  ;;  %v19313_v4 = vld [vmem:[#allocation78_spill] sm:$0xff]  ;;  %v19316_v7 = vld [vmem:[#allocation79_spill] sm:$0xff] }
 0x260   : > { %3675 = vadd.xlane.f32.xlu0 %v3525_v30  ;;  %v19312_v30 = vld [vmem:[#allocation59_spill] sm:$0xff] }
 0x261   : > { %v11508_v3 = vpop.eup %11507  ;;  %v14326_v62 = vpop.xlane.xlu0 %3747  ;;  %11523 = vtanh.f32 %v19312_v30 }
 0x262   : > { %v11510_v10 = vpop.eup %11509  ;;  %v3598_v9 = vmul.f32 %v13995_v56, %v11508_v3  ;;  %11525 = vtanh.f32 %v19313_v4 }
 0x263   : > { %3677 = vadd.xlane.f32.xlu1 %v3526_v37  ;;  %v3523_v18 = vmul.f32 %v13995_v56, %v11510_v10  ;;  %11527 = vtanh.f32 %v19314_v1 }
 0x264   : > { %3819 = vadd.xlane.f32.xlu0 %v3597_v60  ;;  %v11512_v6 = vpop.eup %11511  ;;  %11529 = vtanh.f32 %v19316_v7 }
 0x265   : > { %v11514_v40 = vpop.eup %11513  ;;  %v3524_v24 = vmul.f32 %v13995_v56, %v11512_v6  ;;  %v14337_v17 = vpop.xlane.xlu0 %3751  ;;  %11531 = vtanh.f32 %v19318_v2 }
 0x266   : > { %v11516_v37 = vpop.eup %11515  ;;  %v3595_v60 = vmul.f32 %v13995_v56, %v11514_v40  ;;  %v14341_v10 = vpop.xlane.xlu1 %3753  ;;  %v19319_v40 = vld [vmem:[#allocation36_spill] sm:$0xff] }
 0x267   : > { %3821 = vadd.xlane.f32.xlu1 %v3598_v9  ;;  %v11518_v3 = vpop.eup %11517  ;;  %19315 = vst [vmem:[#allocation67_spill] sm:$0xff] %v14341_v10  ;;  %v3596_v9 = vmul.f32 %v13995_v56, %v11516_v37  ;;  %11533 = vtanh.f32 %v19319_v40  ;;  %v19328_v10 = vld [vmem:[#allocation31_spill] sm:$0xff] }
 0x268   : > { %3671 = vadd.xlane.f32.xlu0 %v3523_v18  ;;  %v11520_v18 = vpop.eup %11519  ;;  %v3529_v30 = vmul.f32 %v13995_v56, %v11518_v3  ;;  %11535 = vtanh.f32 %v19321_v55  ;;  %v19322_v3 = vld [vmem:[#allocation64_spill] sm:$0xff] }
 0x269   : > { %v11522_v6 = vpop.eup %11521  ;;  %v14346_v4 = vpop.xlane.xlu0 %3755  ;;  %11537 = vtanh.f32 %v19322_v3 }
 0x26a   : > { %19317 = vst [vmem:[#allocation40_spill] sm:$0xff] %v14346_v4  ;;  %v3601_v7 = vmul.f32 %v13995_v56, %v11522_v6  ;;  %v19323_v4 = vld [vmem:[#allocation85_spill] sm:$0xff]  ;;  %v19324_v6 = vld [vmem:[#allocation62_spill] sm:$0xff] }
 0x26b   : > { %3673 = vadd.xlane.f32.xlu1 %v3524_v24  ;;  %v3530_v24 = vmul.f32 %v13995_v56, %v11520_v18  ;;  %v11524_v1 = vpop.eup %11523  ;;  %11539 = vtanh.f32 %v19323_v4 }
 0x26c   : > { %3815 = vadd.xlane.f32.xlu0 %v3595_v60  ;;  %v14351_v60 = vpop.xlane.xlu1 %3757  ;;  %v11526_v37 = vpop.eup %11525  ;;  %11541 = vtanh.f32 %v19324_v6 }
 0x26d   : > { %19320 = vst [vmem:[#allocation48_spill] sm:$0xff] %v14351_v60  ;;  %v14357_v2 = vpop.xlane.xlu0 %3759  ;;  %v3527_v40 = vmul.f32 %v13995_v56, %v11526_v37  ;;  %v19326_v37 = vld [vmem:[#allocation30_spill] sm:$0xff] }
 0x26e   : > { %11543 = vtanh.f32 %v19326_v37 }
 0x26f   : > { %3817 = vadd.xlane.f32.xlu1 %v3596_v9  ;;  %v3602_v9 = vmul.f32 %v13995_v56, %v11524_v1 }
 0x270   : > { %3683 = vadd.xlane.f32.xlu0 %v3529_v30  ;;  %v11528_v30 = vpop.eup %11527  ;;  %v14360_v60 = vpop.xlane.xlu1 %3761 }
 0x271   : > { %v11530_v18 = vpop.eup %11529  ;;  %v3528_v55 = vmul.f32 %v13995_v56, %v11528_v30 }
 0x272   : > { %v3599_v1 = vmul.f32 %v13995_v56, %v11530_v18  ;;  %v19329_v18 = vld [vmem:[#allocation32_spill] sm:$0xff] }
 0x273   : > { %3685 = vadd.xlane.f32.xlu1 %v3530_v24  ;;  %v14365_v24 = vpop.xlane.xlu0 %3763 }
 0x274   : > { %3827 = vadd.xlane.f32.xlu0 %v3601_v7  ;;  %v11532_v7 = vpop.eup %11531  ;;  %v14368_v42 = vpop.xlane.xlu1 %3765 }
 0x275   : > { %v11534_v3 = vpop.eup %11533  ;;  %19325 = vst [vmem:[#allocation50_spill] sm:$0xff] %v14368_v42  ;;  %v3600_v4 = vmul.f32 %v13995_v56, %v11532_v7 }
 0x276   : > { %v3533_v6 = vmul.f32 %v13995_v56, %v11534_v3 }
 0x277   : > { %3829 = vadd.xlane.f32.xlu1 %v3602_v9  ;;  %v19327_v9 = vld [vmem:[#allocation24_spill] sm:$0xff]  ;;  %v14374_v30 = vpop.xlane.xlu0 %3767 }
 0x278   : > { %3679 = vadd.xlane.f32.xlu0 %v3527_v40  ;;  %11545 = vtanh.f32 %v19327_v9  ;;  %v11536_v40 = vpop.eup %11535  ;;  %v14379_v37 = vpop.xlane.xlu1 %3769 }
 0x279   : > { %v11538_v47 = vpop.eup %11537  ;;  %11547 = vtanh.f32 %v19328_v10 }
 0x27a   : > { %11549 = vtanh.f32 %v19329_v18  ;;  %v3605_v9 = vmul.f32 %v13995_v56, %v11538_v47 }
 0x27b   : > { %3681 = vadd.xlane.f32.xlu1 %v3528_v55  ;;  %v3534_v55 = vmul.f32 %v13995_v56, %v11536_v40  ;;  %11551 = vtanh.f32 %v13974_v27 }
 0x27c   : > { %3823 = vadd.xlane.f32.xlu0 %v3599_v1  ;;  %v11540_v1 = vpop.eup %11539  ;;  %11553 = vtanh.f32 %v13955_v5 }
 0x27d   : > { %v11542_v7 = vpop.eup %11541  ;;  %v3606_v10 = vmul.f32 %v13995_v56, %v11540_v1  ;;  %11555 = vtanh.f32 %v13982_v53 }
 0x27e   : > { %v11544_v3 = vpop.eup %11543  ;;  %11557 = vtanh.f32 %v13957_v11 }
 0x27f   : > { %3825 = vadd.xlane.f32.xlu1 %v3600_v4  ;;  %v14382_v42 = vpop.xlane.xlu0 %3771  ;;  %v3531_v4 = vmul.f32 %v13995_v56, %v11542_v7  ;;  %v3532_v47 = vmul.f32 %v13995_v56, %v11544_v3  ;;  %11559 = vtanh.f32 %v13984_v34 }
 0x280   : > { %3691 = vadd.xlane.f32.xlu0 %v3533_v6  ;;  %v14388_v40 = vpop.xlane.xlu1 %3773  ;;  %11561 = vtanh.f32 %v13962_v48 }
 0x281   : > { %11563 = vtanh.f32 %v13990_v0 }
 0x282   : > { %v11546_v6 = vpop.eup %11545  ;;  %11565 = vtanh.f32 %v14026_v43 }
 0x283   : > { %3693 = vadd.xlane.f32.xlu1 %v3534_v55  ;;  %v11548_v18 = vpop.eup %11547  ;;  %v3603_v5 = vmul.f32 %v13995_v56, %v11546_v6  ;;  %11567 = vtanh.f32 %v14052_v33 }
 0x284   : > { %3835 = vadd.xlane.f32.xlu0 %v3605_v9  ;;  %v14393_v27 = vpop.xlane.xlu0 %3779  ;;  %v11550_v55 = vpop.eup %11549  ;;  %v3604_v53 = vmul.f32 %v13995_v56, %v11548_v18  ;;  %11569 = vtanh.f32 %v14028_v15 }
 0x285   : > { %v11552_v11 = vpop.eup %11551  ;;  %v3537_v7 = vmul.f32 %v13995_v56, %v11550_v55  ;;  %11571 = vtanh.f32 %v14061_v63 }
 0x286   : > { %v3538_v34 = vmul.f32 %v13995_v56, %v11552_v11  ;;  %11573 = vtanh.f32 %v14017_v51 }
 0x287   : > { %3837 = vadd.xlane.f32.xlu1 %v3606_v10  ;;  %v11554_v10 = vpop.eup %11553  ;;  %11575 = vtanh.f32 %v14048_v16 }
 0x288   : > { %3687 = vadd.xlane.f32.xlu0 %v3531_v4  ;;  %v14397_v1 = vpop.xlane.xlu1 %3635  ;;  %v11556_v4 = vpop.eup %11555  ;;  %v3609_v48 = vmul.f32 %v13995_v56, %v11554_v10  ;;  %11577 = vtanh.f32 %v14031_v19 }
 0x289   : > { %v14401_v9 = vpop.xlane.xlu0 %3631  ;;  %v11558_v6 = vpop.eup %11557  ;;  %v3610_v0 = vmul.f32 %v13995_v56, %v11556_v4 }
 0x28a   : > { %v11560_v18 = vpop.eup %11559 }
 0x28b   : > { %3689 = vadd.xlane.f32.xlu1 %v3532_v47  ;;  %v11562_v55 = vpop.eup %11561  ;;  %v3536_v33 = vmul.f32 %v13995_v56, %v11560_v18 }
 0x28c   : > { %3831 = vadd.xlane.f32.xlu0 %v3603_v5  ;;  %v14405_v3 = vpop.xlane.xlu1 %3637  ;;  %v3535_v5 = vmul.f32 %v13995_v56, %v11558_v6  ;;  %v11564_v11 = vpop.eup %11563  ;;  %v3607_v15 = vmul.f32 %v13995_v56, %v11562_v55  ;;  %v19330_v6 = vld [vmem:[#allocation70_spill] sm:$0xff] }
 0x28d   : > { %v11566_v10 = vpop.eup %11565  ;;  %11579 = vtanh.f32 %v19330_v6 }
 0x28e   : > { %v11568_v4 = vpop.eup %11567  ;;  %v3541_v51 = vmul.f32 %v13995_v56, %v11566_v10  ;;  %11581 = vtanh.f32 %v14083_v59 }
 0x28f   : > { %3833 = vadd.xlane.f32.xlu1 %v3604_v53  ;;  %v3542_v16 = vmul.f32 %v13995_v56, %v11568_v4  ;;  %11583 = vtanh.f32 %v14110_v31 }
 0x290   : > { %3699 = vadd.xlane.f32.xlu0 %v3537_v7  ;;  %v14410_v47 = vpop.xlane.xlu0 %3775  ;;  %11585 = vtanh.f32 %v14091_v26 }
 0x291   : > { %11587 = vtanh.f32 %v14116_v35 }
 0x292   : > { %11589 = vtanh.f32 %v14085_v36 }
 0x293   : > { %3701 = vadd.xlane.f32.xlu1 %v3538_v34  ;;  %v14416_v43 = vpop.xlane.xlu1 %3781  ;;  %v3608_v34 = vmul.f32 %v13995_v56, %v11564_v11  ;;  %11591 = vtanh.f32 %v14112_v61 }
 0x294   : > { %3843 = vadd.xlane.f32.xlu0 %v3609_v48  ;;  %v14418_v53 = vpop.xlane.xlu0 %3633  ;;  %v11570_v48 = vpop.eup %11569  ;;  %11593 = vtanh.f32 %v14093_v52 }
 0x295   : > { %v11572_v19 = vpop.eup %11571  ;;  %11595 = vtanh.f32 %v14118_v38 }
 0x296   : > { %v11574_v55 = vpop.eup %11573  ;;  %v3614_v11 = vmul.f32 %v13995_v56, %v11572_v19  ;;  %11597 = vtanh.f32 %v14148_v39 }
 0x297   : > { %3845 = vadd.xlane.f32.xlu1 %v3610_v0  ;;  %v14424_v7 = vpop.xlane.xlu1 %3777  ;;  %v3539_v59 = vmul.f32 %v13995_v56, %v11574_v55  ;;  %11599 = vtanh.f32 %v14188_v58 }
 0x298   : > { %3695 = vadd.xlane.f32.xlu0 %v3535_v5  ;;  %v3613_v5 = vmul.f32 %v13995_v56, %v11570_v48  ;;  %11601 = vtanh.f32 %v14156_v8 }
 0x299   : > { %11603 = vtanh.f32 %v14195_v22 }
 0x29a   : > { %v14429_v63 = vpop.xlane.xlu0 %3643  ;;  %11605 = vtanh.f32 %v14150_v21 }
 0x29b   : > { %3697 = vadd.xlane.f32.xlu1 %v3536_v33 }
 0x29c   : > { %3839 = vadd.xlane.f32.xlu0 %v3607_v15  ;;  %v11576_v15 = vpop.eup %11575  ;;  %11607 = vtanh.f32 %v14176_v46 }
 0x29d   : > { %v14433_v0 = vpop.xlane.xlu1 %3645  ;;  %v11578_v10 = vpop.eup %11577  ;;  %v3540_v31 = vmul.f32 %v13995_v56, %v11576_v15  ;;  %11609 = vtanh.f32 %v14158_v49  ;;  %v19331_v49 = vlaneseq }
 0x29e   : > { %v14437_v18 = vpop.xlane.xlu0 %3787  ;;  %v11580_v4 = vpop.eup %11579  ;;  %11611 = vtanh.f32 %v14184_v20  ;;  %v14502_v20 = vadd.f32 %v14310_v45, %v14324_v12 }
 0x29f   : > { %3841 = vadd.xlane.f32.xlu1 %v3608_v34  ;;  %v11582_v48 = vpop.eup %11581  ;;  %v3612_v35 = vmul.f32 %v13995_v56, %v11580_v4  ;;  %11613 = vtanh.f32 %v14215_v32 }
 0x2a0   : > { %3707 = vadd.xlane.f32.xlu0 %v3541_v51  ;;  %v3611_v51 = vmul.f32 %v13995_v56, %v11578_v10  ;;  %v3545_v36 = vmul.f32 %v13995_v56, %v11582_v48 }
 0x2a1   : > { %v14441_v33 = vpop.xlane.xlu1 %3789 }
 0x2a3   : > { %3709 = vadd.xlane.f32.xlu1 %v3542_v16  ;;  %v11584_v16 = vpop.eup %11583  ;;  %11615 = vtanh.f32 %v14239_v28 }
 0x2a4   : > { %3851 = vadd.xlane.f32.xlu0 %v3613_v5  ;;  %v14446_v34 = vpop.xlane.xlu0 %3639  ;;  %v11586_v19 = vpop.eup %11585  ;;  %v3546_v61 = vmul.f32 %v13995_v56, %v11584_v16  ;;  %11617 = vtanh.f32 %v14221_v54  ;;  %v14519_v54 = vadd.f32 %v14310_v45, %v14326_v62 }
 0x2a5   : > { %v11588_v55 = vpop.eup %11587  ;;  %11619 = vtanh.f32 %v14223_v41 }
 0x2a6   : > { %v11590_v15 = vpop.eup %11589  ;;  %19335 = vst [vmem:[#allocation23_spill] sm:$0xff] %v14519_v54  ;;  %11621 = vtanh.f32 %v14245_v57 }
 0x2a7   : > { %3853 = vadd.xlane.f32.xlu1 %v3614_v11  ;;  %v14452_v26 = vpop.xlane.xlu1 %3641  ;;  %v3617_v11 = vmul.f32 %v13995_v56, %v11586_v19  ;;  %v11592_v10 = vpop.eup %11591  ;;  %v3543_v39 = vmul.f32 %v13995_v56, %v11590_v15  ;;  %v4154_v15 = vand.u32 127, %v19331_v49  ;;  %11623 = vtanh.f32 %v14228_v29 }
 0x2a8   : > { %3703 = vadd.xlane.f32.xlu0 %v3539_v59  ;;  %v3618_v59 = vmul.f32 %v13995_v56, %v11588_v55  ;;  %v11594_v4 = vpop.eup %11593  ;;  %v3544_v58 = vmul.f32 %v13995_v56, %v11592_v10  ;;  %11625 = vtanh.f32 %v14247_v13  ;;  %v14555_v49 = vadd.f32 %v14310_v45, %v14360_v60 }
 0x2a9   : > { %v14455_v6 = vpop.xlane.xlu0 %3783  ;;  %v11596_v8 = vpop.eup %11595  ;;  %v3615_v48 = vmul.f32 %v13995_v56, %v11594_v4  ;;  %11627 = vtanh.f32 %v14253_v44  ;;  %v14568_v60 = vadd.f32 %v14310_v45, %v14357_v2 }
 0x2aa   : > { %v3616_v22 = vmul.f32 %v13995_v56, %v11596_v8  ;;  %19338 = vst [vmem:[#allocation46_spill] sm:$0xff] %v14555_v49 }
 0x2ab   : > { %3705 = vadd.xlane.f32.xlu1 %v3540_v31  ;;  %19340 = vst [vmem:[#allocation49_spill] sm:$0xff] %v14568_v60 }
 0x2ac   : > { %3847 = vadd.xlane.f32.xlu0 %v3611_v51 }
 0x2ad   : > { %v14460_v5 = vpop.xlane.xlu1 %3785 }
 0x2af   : > { %3849 = vadd.xlane.f32.xlu1 %v3612_v35  ;;  %v11598_v35 = vpop.eup %11597 }
 0x2b0   : > { %3715 = vadd.xlane.f32.xlu0 %v3545_v36  ;;  %v14466_v52 = vpop.xlane.xlu0 %3651  ;;  %v11600_v36 = vpop.eup %11599  ;;  %v3549_v21 = vmul.f32 %v13995_v56, %v11598_v35 }
 0x2b1   : > { %v11602_v19 = vpop.eup %11601  ;;  %v3550_v46 = vmul.f32 %v13995_v56, %v11600_v36  ;;  %v14538_v36 = vadd.f32 %v14310_v45, %v14332_v23  ;;  %v14551_v23 = vadd.f32 %v14310_v45, %v14337_v17 }
 0x2b3   : > { %3717 = vadd.xlane.f32.xlu1 %v3546_v61  ;;  %19337 = vst [vmem:[#allocation42_spill] sm:$0xff] %v14551_v23 }
 0x2b4   : > { %3859 = vadd.xlane.f32.xlu0 %v3617_v11  ;;  %v11604_v11 = vpop.eup %11603 }
 0x2b5   : > { %v14471_v38 = vpop.xlane.xlu1 %3653  ;;  %v11606_v10 = vpop.eup %11605  ;;  %v3622_v32 = vmul.f32 %v13995_v56, %v11604_v11  ;;  %v19336_v11 = vld [vmem:[#allocation45_spill] sm:$0xff] }
 0x2b6   : > { %v14474_v31 = vpop.xlane.xlu0 %3795  ;;  %v11608_v4 = vpop.eup %11607  ;;  %v3547_v35 = vmul.f32 %v13995_v56, %v11606_v10  ;;  %11629 = vtanh.f32 %v19336_v11 }
 0x2b7   : > { %3861 = vadd.xlane.f32.xlu1 %v3618_v59  ;;  %v3621_v59 = vmul.f32 %v13995_v56, %v11602_v19  ;;  %v14528_v56 = vld [vmem:[%s18753_s6] ss:$0 sm:$0xff]  ;;  %11631 = vtanh.f32 %v14280_v14 }
 0x2b8   : > { %3711 = vadd.xlane.f32.xlu0 %v3543_v39  ;;  %v3548_v41 = vmul.f32 %v14528_v56, %v11608_v4  ;;  %11633 = vtanh.f32 %v14305_v25  ;;  %v19339_v4 = vld [vmem:[#allocation53_spill] sm:$0xff]  ;;  %v14573_v25 = vadd.f32 %v14310_v45, %v14365_v24 }
 0x2b9   : > { %v14479_v51 = vpop.xlane.xlu1 %3797  ;;  %11635 = vtanh.f32 %v19339_v4 }
 0x2ba   : > { %19342 = vst [vmem:[#allocation41_spill] sm:$0xff] %v14573_v25 }
 0x2bb   : > { %3713 = vadd.xlane.f32.xlu1 %v3544_v58  ;;  %v19332_v58 = vld [vmem:[#allocation20_spill] sm:$0xff] }
 0x2bc   : > { %3855 = vadd.xlane.f32.xlu0 %v3615_v48  ;;  %v14483_v16 = vpop.xlane.xlu0 %3647  ;;  %v14507_v8 = vsub.s32 %v4154_v15, %v19332_v58  ;;  %v14511_v48 = vadd.f32 %v14310_v45, %v14318_v50 }
 0x2be   : > { %v14488_v61 = vpop.xlane.xlu1 %3649  ;;  %19333 = vst [vmem:[#allocation35_spill] sm:$0xff] %v14507_v8  ;;  %19334 = vst [vmem:[#allocation69_spill] sm:$0xff] %v14511_v48  ;;  %v4386_v12 = vrot.slane %v14502_v20, %v14507_v8  ;;  %v4382_v57 = vrot.slane %v14511_v48, %v14507_v8  ;;  %v4394_v10 = vrot.slane %v14538_v36, %v14507_v8 }
 0x2bf   : > { %3857 = vadd.xlane.f32.xlu1 %v3616_v22  ;;  %v11610_v22 = vpop.eup %11609  ;;  %v4418_v2 = vrot.slane %v14555_v49, %v14507_v8 }
 0x2c0   : > { %3723 = vadd.xlane.f32.xlu0 %v3549_v21  ;;  %v14491_v55 = vpop.xlane.xlu0 %3791  ;;  %v11612_v62 = vpop.eup %11611  ;;  %v3619_v29 = vmul.f32 %v14528_v56, %v11610_v22  ;;  %v4723_v13 = vsel %vm4667_vm0, %v4386_v12, %v4382_v57 }
 0x2c1   : > { %v11614_v19 = vpop.eup %11613  ;;  %v3620_v44 = vmul.f32 %v14528_v56, %v11612_v62  ;;  %v19343_v62 = vld [vmem:[#allocation67_spill] sm:$0xff] }
 0x2c2   : > { %v14497_v39 = vpop.xlane.xlu1 %3793  ;;  %v3553_v14 = vmul.f32 %v14528_v56, %v11614_v19  ;;  %v14581_v57 = vadd.f32 %v14310_v45, %v19343_v62  ;;  %v19347_v62 = vld [vmem:[#allocation50_spill] sm:$0xff] }
 0x2c3   : > { %3725 = vadd.xlane.f32.xlu1 %v3550_v46  ;;  %v4390_v46 = vrot.slane %v14519_v54, %v14507_v8 }
 0x2c4   : > { %3867 = vadd.xlane.f32.xlu0 %v3621_v59  ;;  %v11616_v59 = vpop.eup %11615 }
 0x2c5   : > { %v4724_v17 = vsel %vm4669_vm1, %v4390_v46, %v4723_v13  ;;  %v19344_v46 = vld [vmem:[#allocation63_spill] sm:$0xff] }
 0x2c6   : > { %v14514_v28 = vpop.xlane.xlu0 %3659  ;;  %v4725_v24 = vsel %vm4671_vm2, %v4394_v10, %v4724_v17  ;;  %v19349_v17 = vld [vmem:[#allocation71_spill] sm:$0xff] }
 0x2c7   : > { %3869 = vadd.xlane.f32.xlu1 %v3622_v32  ;;  %v11618_v32 = vpop.eup %11617 }
 0x2c8   : > { %3719 = vadd.xlane.f32.xlu0 %v3547_v35  ;;  %v19341_v35 = vld [vmem:[#allocation66_spill] sm:$0xff]  ;;  %v11620_v12 = vpop.eup %11619  ;;  %v3625_v11 = vmul.f32 %v14528_v56, %v11618_v32  ;;  %v4422_v32 = vrot.slane %v14573_v25, %v14507_v8 }
 0x2c9   : > { %v14531_v50 = vpop.xlane.xlu1 %3661  ;;  %11637 = vtanh.f32 %v19341_v35  ;;  %v11622_v19 = vpop.eup %11621  ;;  %v4414_v35 = vrot.slane %v14568_v60, %v14507_v8 }
 0x2ca   : > { %v14541_v21 = vpop.xlane.xlu0 %3803  ;;  %11639 = vtanh.f32 %v19344_v46  ;;  %v11624_v13 = vpop.eup %11623  ;;  %v3626_v25 = vmul.f32 %v14528_v56, %v11622_v19 }
 0x2cb   : > { %3721 = vadd.xlane.f32.xlu1 %v3548_v41  ;;  %v4398_v41 = vrot.slane %v14551_v23, %v14507_v8  ;;  %v11626_v10 = vpop.eup %11625 }
 0x2cc   : > { %3863 = vadd.xlane.f32.xlu0 %v3619_v29  ;;  %v3554_v29 = vmul.f32 %v14528_v56, %v11616_v59  ;;  %v14598_v59 = vadd.f32 %v14310_v45, %v19347_v62  ;;  %v11628_v62 = vpop.eup %11627 }
 0x2cd   : > { %v14558_v15 = vpop.xlane.xlu1 %3805 }
 0x2ce   : > { %19348 = vst [vmem:[#allocation52_spill] sm:$0xff] %v14598_v59 }
 0x2cf   : > { %3865 = vadd.xlane.f32.xlu1 %v3620_v44  ;;  %v19345_v44 = vld [vmem:[#allocation26_spill] sm:$0xff] }
 0x2d0   : > { %3731 = vadd.xlane.f32.xlu0 %v3553_v14  ;;  %v14575_v22 = vpop.xlane.xlu0 %3655  ;;  %11641 = vtanh.f32 %v19345_v44  ;;  %v19346_v14 = vld [vmem:[#allocation40_spill] sm:$0xff]  ;;  %v14607_v44 = vadd.f32 %v14310_v45, %v14418_v53  ;;  %v14622_v53 = vpop.eup %11629 }
 0x2d1   : > { %v14592_v4 = vadd.f32 %v14310_v45, %v19346_v14  ;;  %11643 = vtanh.f32 %v19349_v17  ;;  %v14611_v14 = vadd.f32 %v14310_v45, %v14424_v7  ;;  %v4730_v17 = vsel %vm4667_vm0, %v4418_v2, %v4414_v35  ;;  %v19355_v35 = vld [vmem:[#allocation48_spill] sm:$0xff] }
 0x2d2   : > { %19350 = vst [vmem:[#allocation51_spill] sm:$0xff] %v14607_v44  ;;  %v14626_v7 = vadd.f32 %v14310_v45, %v14374_v30  ;;  %v3551_v2 = vmul.f32 %v14528_v56, %v11620_v12  ;;  %v14641_v60 = vadd.f32 %v14310_v45, %v19355_v35  ;;  %v4426_v30 = vrot.slane %v14598_v59, %v14507_v8 }
 0x2d3   : > { %3733 = vadd.xlane.f32.xlu1 %v3554_v29  ;;  %v14600_v46 = vpop.xlane.xlu1 %3657  ;;  %19351 = vst [vmem:[#allocation68_spill] sm:$0xff] %v14611_v14  ;;  %v14614_v29 = vsel %vm4673_vm3, %v4398_v41, %v4725_v24  ;;  %v14634_v41 = vadd.f32 %v14310_v45, %v14410_v47  ;;  %v11632_v24 = vpop.eup %11631  ;;  %v4731_v47 = vsel %vm4669_vm1, %v4422_v32, %v4730_v17 }
 0x2d4   : > { %3875 = vadd.xlane.f32.xlu0 %v3625_v11  ;;  %v14620_v23 = vpop.xlane.xlu0 %3799  ;;  %19352 = vst [vmem:[#allocation47_spill] sm:$0xff] %v14626_v7  ;;  %v14630_v11 = vadd.f32 %v14310_v45, %v14401_v9  ;;  %v3552_v9 = vmul.f32 %v14528_v56, %v11626_v10  ;;  %v11634_v54 = vpop.eup %11633  ;;  %v4162_v12 = vrot.slane %v14607_v44, %v14507_v8 }
 0x2d5   : > { %19354 = vst [vmem:[#allocation43_spill] sm:$0xff] %v14634_v41  ;;  %v4450_v48 = vrot.slane %v14611_v14, %v14507_v8  ;;  %v3623_v35 = vmul.f32 %v14528_v56, %v11624_v13  ;;  %v11636_v49 = vpop.eup %11635  ;;  %v14660_v10 = vadd.f32 %v14310_v45, %v14393_v27  ;;  %v14664_v32 = vadd.f32 %v14310_v45, %v14397_v1 }
 0x2d6   : > { %19353 = vst [vmem:[#allocation72_spill] sm:$0xff] %v14630_v11  ;;  %v3624_v17 = vmul.f32 %v14528_v56, %v11628_v62  ;;  %v4430_v13 = vrot.slane %v14626_v7, %v14507_v8  ;;  %v4158_v14 = vrot.slane %v14630_v11, %v14507_v8  ;;  %v3557_v27 = vmul.f32 %v14528_v56, %v11632_v24 }
 0x2d7   : > { %3877 = vadd.xlane.f32.xlu1 %v3626_v25  ;;  %v14651_v19 = vpop.xlane.xlu1 %3801  ;;  %v14656_v25 = vadd.f32 %v14310_v45, %v14379_v37  ;;  %19356 = vst [vmem:[#allocation33_spill] sm:$0xff] %v14660_v10  ;;  %19357 = vst [vmem:[#allocation55_spill] sm:$0xff] %v14664_v32  ;;  %v4446_v37 = vrot.slane %v14634_v41, %v14507_v8  ;;  %v4732_v44 = vsel %vm4671_vm2, %v4426_v30, %v4731_v47 }
 0x2d8   : > { %3727 = vadd.xlane.f32.xlu0 %v3551_v2  ;;  %v14667_v2 = vpop.eup %11637  ;;  %v14679_v1 = vadd.f32 %v14310_v45, %v14446_v34  ;;  %v14683_v62 = vadd.f32 %v14310_v45, %v14455_v6  ;;  %v3558_v11 = vmul.f32 %v14528_v56, %v11634_v54  ;;  %v14690_v41 = vadd.f32 %v14310_v45, %v14405_v3 }
 0x2d9   : > { %v11640_v59 = vpop.eup %11639  ;;  %v14694_v24 = vadd.f32 %v14310_v45, %v14416_v43  ;;  %v4668_v34 = vsel %vm4667_vm0, %v4162_v12, %v4158_v14  ;;  %v4737_v30 = vsel %vm4667_vm0, %v4450_v48, %v4446_v37  ;;  %v14702_v54 = vadd.f32 %v14310_v45, %v14382_v42 }
 0x2da   : > { %19358 = vst [vmem:[#allocation37_spill] sm:$0xff] %v14679_v1  ;;  %19359 = vst [vmem:[#allocation28_spill] sm:$0xff] %v14683_v62  ;;  %v11642_v6 = vpop.eup %11641  ;;  %v4454_v3 = vrot.slane %v14660_v10, %v14507_v8  ;;  %v4166_v43 = vrot.slane %v14664_v32, %v14507_v8  ;;  %v4733_v14 = vsel %vm4673_vm3, %v4430_v13, %v4732_v44 }
 0x2db   : > { %3729 = vadd.xlane.f32.xlu1 %v3552_v9  ;;  %v14685_v7 = vpop.xlane.xlu0 %3667  ;;  %19360 = vst [vmem:[#allocation73_spill] sm:$0xff] %v14690_v41  ;;  %v4434_v9 = vrot.slane %v14656_v25, %v14507_v8  ;;  %v14708_v47 = vpop.eup %11643  ;;  %v14713_v48 = vadd.f32 %v14310_v45, %v14452_v26  ;;  %v14717_v12 = vadd.f32 %v14310_v45, %v14460_v5 }
 0x2dc   : > { %3871 = vadd.xlane.f32.xlu0 %v3623_v35  ;;  %v4670_v35 = vsel %vm4669_vm1, %v4166_v43, %v4668_v34  ;;  %v4738_v37 = vsel %vm4669_vm1, %v4454_v3, %v4737_v30  ;;  %v4174_v10 = vrot.slane %v14679_v1, %v14507_v8  ;;  %v4462_v44 = vrot.slane %v14683_v62, %v14507_v8 }
 0x2dd   : > { %v4170_v5 = vrot.slane %v14690_v41, %v14507_v8  ;;  %v4458_v13 = vrot.slane %v14694_v24, %v14507_v8  ;;  %v3629_v34 = vmul.f32 %v14528_v56, %v11636_v49  ;;  %v4438_v30 = vrot.slane %v14702_v54, %v14507_v8 }
 0x2de   : > { %v14719_v42 = vpop.xlane.xlu1 %3669  ;;  %v14738_v3 = vadd.f32 %v14310_v45, %v14388_v40  ;;  %v4734_v62 = vsel %vm4675_vm4, %v4434_v9, %v4733_v14  ;;  %v4178_v49 = vrot.slane %v14713_v48, %v14507_v8  ;;  %v4466_v41 = vrot.slane %v14717_v12, %v14507_v8 }
 0x2df   : > { %3873 = vadd.xlane.f32.xlu1 %v3624_v17  ;;  %v19361_v17 = vrot.slane %v14581_v57, %v14507_v8  ;;  %v4739_v1 = vsel %vm4671_vm2, %v4458_v13, %v4738_v37  ;;  %v14756_v32 = vadd.f32 %v14310_v45, %v14429_v63  ;;  %v3630_v37 = vmul.f32 %v14528_v56, %v11642_v6 }
 0x2e0   : > { %v14727_v26 = vpop.xlane.xlu0 %3811  ;;  %3739 = vadd.xlane.f32.xlu0 %v3557_v27  ;;  %v4672_v27 = vsel %vm4671_vm2, %v4170_v5, %v4670_v35  ;;  %v4740_v14 = vsel %vm4673_vm3, %v4462_v44, %v4739_v1  ;;  %v4410_v35 = vrot.slane %v14641_v60, %v14507_v8  ;;  %v3555_v5 = vmul.f32 %v14528_v56, %v14622_v53 }
 0x2e1   : > { %v4727_v43 = vsel %vm4675_vm4, %v19361_v17, %v14614_v29  ;;  %v14760_v29 = vadd.f32 %v14310_v45, %v14437_v18  ;;  %v4674_v9 = vsel %vm4673_vm3, %v4174_v10, %v4672_v27  ;;  %v4442_v63 = vrot.slane %v14738_v3, %v14507_v8 }
 0x2e2   : > { %v14752_v40 = vpop.xlane.xlu1 %3813  ;;  %v14773_v18 = vadd.f32 %v14310_v45, %v14488_v61  ;;  %v4735_v44 = vsel %vm4677_vm5, %v4438_v30, %v4734_v62  ;;  %v14782_v6 = vadd.f32 %v14310_v45, %v14433_v0  ;;  %v14786_v53 = vadd.f32 %v14310_v45, %v14441_v33 }
 0x2e3   : > { %3741 = vadd.xlane.f32.xlu1 %v3558_v11  ;;  %v19362_v11 = vrot.slane %v14592_v4, %v14507_v8  ;;  %v4676_v13 = vsel %vm4675_vm4, %v4178_v49, %v4674_v9  ;;  %v4741_v61 = vsel %vm4675_vm4, %v4466_v41, %v4740_v14  ;;  %v4470_v17 = vrot.slane %v14760_v29, %v14507_v8 }
 0x2e4   : > { %3883 = vadd.xlane.f32.xlu0 %v3629_v34  ;;  %v4182_v34 = vrot.slane %v14756_v32, %v14507_v8  ;;  %v14796_v62 = vadd.f32 %v14310_v45, %v14483_v16  ;;  %v3556_v33 = vmul.f32 %v14528_v56, %v11640_v59  ;;  %v3627_v30 = vmul.f32 %v14528_v56, %v14667_v2 }
 0x2e5   : > { %v3664_v10 = vpop.xlane.xlu0 %3663  ;;  %v4728_v1 = vsel %vm4677_vm5, %v19362_v11, %v4727_v43  ;;  %v4194_v43 = vrot.slane %v14773_v18, %v14507_v8  ;;  %v4736_v49 = vsel %vm4679_vm6, %v4442_v63, %v4735_v44  ;;  %v4742_v9 = vsel %vm4677_vm5, %v4470_v17, %v4741_v61 }
 0x2e6   : > { %v4729_v41 = vsel %vm4679_vm6, %v4410_v35, %v4728_v1  ;;  %v4678_v16 = vsel %vm4677_vm5, %v4182_v34, %v4676_v13  ;;  %v4186_v14 = vrot.slane %v14782_v6, %v14507_v8  ;;  %v4474_v59 = vrot.slane %v14786_v53, %v14507_v8 }
 0x2e7   : > { %3885 = vadd.xlane.f32.xlu1 %v3630_v37  ;;  %v14813_v2 = vadd.f32 %v14310_v45, %v14466_v52  ;;  %v14817_v35 = vadd.f32 %v14310_v45, %v14497_v39  ;;  %v4190_v37 = vrot.slane %v14796_v62, %v14507_v8  ;;  %v14825_v63 = vadd.f32 %v14310_v45, %v14491_v55 }
 0x2e8   : > { %v3666_v0 = vpop.xlane.xlu1 %3665  ;;  %3735 = vadd.xlane.f32.xlu0 %v3555_v5  ;;  %v3628_v5 = vmul.f32 %v14528_v56, %v14708_v47  ;;  %v4824_v52 = vsel %vm4802_vm7, %v4729_v41, -inf  ;;  %v4680_v1 = vsel %vm4679_vm6, %v4186_v14, %v4678_v16  ;;  %v4743_v39 = vsel %vm4679_vm6, %v4474_v59, %v4742_v9 }
 0x2e9   : > { %v3808_v27 = vpop.xlane.xlu0 %3807  ;;  %v14832_v44 = vadd.f32 %v14310_v45, %v14471_v38  ;;  %v4681_v13 = vsel %vm4667_vm0, %v4194_v43, %v4190_v37  ;;  %v14837_v56 = vadd.f32 %v14310_v45, %v14575_v22  ;;  %v4827_v47 = vsel %vm4802_vm7, %v4736_v49, -inf }
 0x2ea   : > { %v4198_v61 = vrot.slane %v14813_v2, %v14507_v8  ;;  %v14846_v34 = vadd.f32 %v14310_v45, %v14474_v31  ;;  %v4482_v38 = vrot.slane %v14817_v35, %v14507_v8  ;;  %v14851_v17 = vadd.f32 %v14310_v45, %v3666_v0 }
 0x2eb   : > { %3737 = vadd.xlane.f32.xlu1 %v3556_v33  ;;  %v14855_v22 = vadd.f32 %v14310_v45, %v14479_v51  ;;  %v14862_v41 = vsel %vm4802_vm7, %v4743_v39, -inf  ;;  %v4478_v43 = vrot.slane %v14825_v63, %v14507_v8  ;;  %v14869_v0 = vadd.f32 %v14310_v45, %v14600_v46 }
 0x2ec   : > { %v3810_v11 = vpop.xlane.xlu1 %3809  ;;  %3879 = vadd.xlane.f32.xlu0 %v3627_v30  ;;  %19363 = vst [vmem:[#allocation60_spill] sm:$0xff] %v14846_v34  ;;  %v4803_v30 = vsel %vm4802_vm7, %v4680_v1, -inf  ;;  %v4682_v31 = vsel %vm4669_vm1, %v4198_v61, %v4681_v13  ;;  %v14872_v51 = vadd.f32 %v14310_v45, %v3664_v10  ;;  %v4202_v16 = vrot.slane %v14832_v44, %v14507_v8 }
 0x2ed   : > { %v14839_v55 = vpop.xlane.xlu0 %3675  ;;  %v14858_v33 = vadd.f32 %v14310_v45, %v3810_v11  ;;  %v4206_v9 = vrot.slane %v14837_v56, %v14507_v8  ;;  %v14882_v14 = vadd.f32 %v14310_v45, %v14620_v23  ;;  %v14885_v59 = vadd.f32 %v14310_v45, %v3808_v27 }
 0x2ee   : > { %19364 = vst [vmem:[#allocation57_spill] sm:$0xff] %v14872_v51  ;;  %v4486_v10 = vrot.slane %v14846_v34, %v14507_v8  ;;  %v4744_v37 = vsel %vm4667_vm0, %v4482_v38, %v4478_v43  ;;  %v4226_v11 = vrot.slane %v14851_v17, %v14507_v8  ;;  %v4490_v23 = vrot.slane %v14855_v22, %v14507_v8 }
 0x2ef   : > { %3881 = vadd.xlane.f32.xlu1 %v3628_v5  ;;  %19365 = vst [vmem:[#allocation54_spill] sm:$0xff] %v14885_v59  ;;  %v14892_v5 = vadd.f32 %v14310_v45, %v14514_v28  ;;  %v4683_v1 = vsel %vm4671_vm2, %v4202_v16, %v4682_v31  ;;  %v14901_v27 = vadd.f32 %v14310_v45, %v14685_v7 }
 0x2f0   : > { %v14874_v49 = vpop.xlane.xlu1 %3677  ;;  %v4514_v39 = vrot.slane %v14858_v33, %v14507_v8  ;;  %v4210_v28 = vrot.slane %v14869_v0, %v14507_v8  ;;  %v14909_v13 = vadd.f32 %v14310_v45, %v14651_v19  ;;  %v14913_v61 = vadd.f32 %v14310_v45, %v14727_v26 }
 0x2f1   : > { %v3820_v46 = vpop.xlane.xlu0 %3819  ;;  %19366 = vst [vmem:[#allocation34_spill] sm:$0xff] %v14901_v27  ;;  %v4222_v38 = vrot.slane %v14872_v51, %v14507_v8  ;;  %v4745_v31 = vsel %vm4669_vm1, %v4486_v10, %v4744_v37  ;;  %v4684_v43 = vsel %vm4673_vm3, %v4206_v9, %v4683_v1  ;;  %v4510_v16 = vrot.slane %v14885_v59, %v14507_v8 }
 0x2f2   : > { %19367 = vst [vmem:[#allocation58_spill] sm:$0xff] %v14913_v61  ;;  %v4214_v34 = vrot.slane %v14892_v5, %v14507_v8  ;;  %v14927_v26 = vadd.f32 %v14310_v45, %v14719_v42  ;;  %v14935_v9 = vadd.f32 %v14310_v45, %v14531_v50  ;;  %v4230_v37 = vrot.slane %v14901_v27, %v14507_v8 }
 0x2f3   : > { %4825 = vmax.xlane.f32.xlu1 %v4824_v52  ;;  %v4494_v52 = vrot.slane %v14882_v14, %v14507_v8  ;;  %v4688_v51 = vsel %vm4667_vm0, %v4226_v11, %v4222_v38  ;;  %v14941_v1 = vadd.f32 %v14310_v45, %v14752_v40  ;;  %v4751_v59 = vsel %vm4667_vm0, %v4514_v39, %v4510_v16 }
 0x2f4   : > { %v3822_v7 = vpop.xlane.xlu1 %3821  ;;  %v4746_v42 = vsel %vm4671_vm2, %v4490_v23, %v4745_v31  ;;  %v4498_v11 = vrot.slane %v14909_v13, %v14507_v8  ;;  %v4518_v38 = vrot.slane %v14913_v61, %v14507_v8  ;;  %v14952_v27 = vadd.f32 %v14310_v45, %v14541_v21 }
 0x2f5   : > { %v3672_v19 = vpop.xlane.xlu0 %3671  ;;  %v4747_v40 = vsel %vm4673_vm3, %v4494_v52, %v4746_v42  ;;  %v4689_v39 = vsel %vm4669_vm1, %v4230_v37, %v4688_v51  ;;  %v4234_v31 = vrot.slane %v14927_v26, %v14507_v8  ;;  %v4218_v21 = vrot.slane %v14935_v9, %v14507_v8 }
 0x2f6   : > { %v14931_v10 = vadd.f32 %v14310_v45, %v3672_v19  ;;  %v4685_v19 = vsel %vm4675_vm4, %v4210_v28, %v4684_v43  ;;  %19369 = vst [vmem:[#allocation83_spill] sm:$0xff] %v14952_v27  ;;  %v4752_v16 = vsel %vm4669_vm1, %v4518_v38, %v4751_v59  ;;  %v14971_v51 = vadd.f32 %v14310_v45, %v14558_v15 }
 0x2f7   : > { %4828 = vmax.xlane.f32.xlu1 %v4827_v47  ;;  %v4522_v52 = vrot.slane %v14941_v1, %v14507_v8  ;;  %v4686_v37 = vsel %vm4677_vm5, %v4214_v34, %v4685_v19  ;;  %v14977_v59 = vadd.f32 %v14310_v45, %v3820_v46  ;;  %v4690_v42 = vsel %vm4671_vm2, %v4234_v31, %v4689_v39 }
 0x2f8   : > { %19368 = vst [vmem:[#allocation25_spill] sm:$0xff] %v14931_v10  ;;  %v3674_v50 = vpop.xlane.xlu1 %3673  ;;  %v4238_v28 = vrot.slane %v14931_v10, %v14507_v8  ;;  %v14984_v15 = vadd.f32 %v14310_v45, %v3822_v7  ;;  %v4502_v19 = vrot.slane %v14952_v27, %v14507_v8  ;;  %v14996_v39 = vadd.f32 %v14310_v45, %v14839_v55 }
 0x2f9   : > { %v14957_v47 = vadd.f32 %v14310_v45, %v3674_v50  ;;  %v3816_v23 = vpop.xlane.xlu0 %3815  ;;  %19371 = vst [vmem:[#allocation39_spill] sm:$0xff] %v14977_v59  ;;  %v4687_v31 = vsel %vm4679_vm6, %v4218_v21, %v4686_v37 }
 0x2fa   : > { %v14965_v43 = vadd.f32 %v14310_v45, %v3816_v23  ;;  %v4748_v23 = vsel %vm4675_vm4, %v4498_v11, %v4747_v40  ;;  %19372 = vst [vmem:[#allocation84_spill] sm:$0xff] %v14996_v39  ;;  %v4691_v11 = vsel %vm4673_vm3, %v4238_v28, %v4690_v42  ;;  %v15011_v28 = vadd.f32 %v14310_v45, %v14874_v49 }
 0x2fb   : > { %4804 = vmax.xlane.f32.xlu1 %v4803_v30  ;;  %v4242_v61 = vrot.slane %v14957_v47, %v14507_v8  ;;  %v4753_v30 = vsel %vm4671_vm2, %v4522_v52, %v4752_v16  ;;  %v4506_v16 = vrot.slane %v14971_v51, %v14507_v8  ;;  %v4534_v52 = vrot.slane %v14977_v59, %v14507_v8 }
 0x2fc   : > { %19370 = vst [vmem:[#allocation38_spill] sm:$0xff] %v14965_v43  ;;  %v4526_v38 = vrot.slane %v14965_v43, %v14507_v8  ;;  %v3818_v50 = vpop.xlane.xlu1 %3817  ;;  %v4749_v55 = vsel %vm4677_vm5, %v4502_v19, %v4748_v23  ;;  %v4538_v42 = vrot.slane %v14984_v15, %v14507_v8  ;;  %v4246_v37 = vrot.slane %v14996_v39, %v14507_v8 }
 0x2fd   : > { %v14990_v34 = vadd.f32 %v14310_v45, %v3818_v50  ;;  %v3684_v46 = vpop.xlane.xlu0 %3683  ;;  %v4692_v21 = vsel %vm4675_vm4, %v4242_v61, %v4691_v11  ;;  %v4750_v49 = vsel %vm4679_vm6, %v4506_v16, %v4749_v55  ;;  %v4250_v61 = vrot.slane %v15011_v28, %v14507_v8 }
 0x2fe   : > { %v4754_v7 = vsel %vm4673_vm3, %v4526_v38, %v4753_v30  ;;  %v4806_v30 = vsel %vm4802_vm7, %v4687_v31, -inf  ;;  %v4693_v10 = vsel %vm4677_vm5, %v4246_v37, %v4692_v21 }
 0x2ff   : > { %v4530_v40 = vrot.slane %v14990_v34, %v14507_v8  ;;  %4831 = vmax.xlane.f32.xlu1 %v14862_v41 }
 0x300   : > { %v3686_v50 = vpop.xlane.xlu1 %3685 }
 0x301   : > { %v3828_v38 = vpop.xlane.xlu0 %3827  ;;  %v4755_v41 = vsel %vm4675_vm4, %v4530_v40, %v4754_v7  ;;  %v4833_v7 = vsel %vm4802_vm7, %v4750_v49, -inf  ;;  %v4694_v40 = vsel %vm4679_vm6, %v4250_v61, %v4693_v10  ;;  %v15042_v10 = vadd.f32 %v14310_v45, %v3684_v46 }
 0x302   : > { %v4756_v59 = vsel %vm4677_vm5, %v4534_v52, %v4755_v41  ;;  %v15050_v61 = vadd.f32 %v14310_v45, %v3686_v50 }
 0x303   : > { %4807 = vmax.xlane.f32.xlu1 %v4806_v30  ;;  %v4757_v23 = vsel %vm4679_vm6, %v4538_v42, %v4756_v59  ;;  %v4809_v59 = vsel %vm4802_vm7, %v4694_v40, -inf  ;;  %19376 = vst [vmem:[#allocation87_spill] sm:$0xff] %v15042_v10  ;;  %v4262_v46 = vrot.slane %v15042_v10, %v14507_v8  ;;  %v15058_v40 = vadd.f32 %v14310_v45, %v3828_v38 }
 0x304   : > { %v3830_v19 = vpop.xlane.xlu1 %3829  ;;  %v4836_v43 = vsel %vm4802_vm7, %v4757_v23, -inf  ;;  %19378 = vst [vmem:[#allocation89_spill] sm:$0xff] %v15050_v61 }
 0x305   : > { %4837 = vmax.xlane.f32.xlu0 %v4836_v43  ;;  %v3680_v11 = vpop.xlane.xlu0 %3679  ;;  %19379 = vst [vmem:[#allocation44_spill] sm:$0xff] %v15058_v40  ;;  %v4550_v38 = vrot.slane %v15058_v40, %v14507_v8 }
 0x306   : > { %v15034_v42 = vadd.f32 %v14310_v45, %v3680_v11 }
 0x307   : > { %4834 = vmax.xlane.f32.xlu1 %v4833_v7 }
 0x308   : > { %v3682_v31 = vpop.xlane.xlu1 %3681  ;;  %19374 = vst [vmem:[#allocation76_spill] sm:$0xff] %v15034_v42  ;;  %v4254_v30 = vrot.slane %v15034_v42, %v14507_v8 }
 0x309   : > { %v3824_v52 = vpop.xlane.xlu0 %3823  ;;  %v15031_v16 = vadd.f32 %v14310_v45, %v3682_v31 }
 0x30a   : > { %v15047_v23 = vadd.f32 %v14310_v45, %v3824_v52 }
 0x30b   : > { %19373 = vst [vmem:[#allocation86_spill] sm:$0xff] %v15031_v16  ;;  %4810 = vmax.xlane.f32.xlu1 %v4809_v59  ;;  %v4258_v43 = vrot.slane %v15031_v16, %v14507_v8 }
 0x30c   : > { %v3826_v55 = vpop.xlane.xlu1 %3825  ;;  %19377 = vst [vmem:[#allocation88_spill] sm:$0xff] %v15047_v23  ;;  %v4542_v52 = vrot.slane %v15047_v23, %v14507_v8 }
 0x30d   : > { %v3692_v41 = vpop.xlane.xlu0 %3691  ;;  %v15039_v21 = vadd.f32 %v14310_v45, %v3826_v55  ;;  %v4695_v11 = vsel %vm4667_vm0, %v4258_v43, %v4254_v30  ;;  %v4266_v43 = vrot.slane %v15050_v61, %v14507_v8  ;;  %v15069_v30 = vadd.f32 %v14310_v45, %v3830_v19 }
 0x30e   : > { %v4696_v55 = vsel %vm4669_vm1, %v4262_v46, %v4695_v11  ;;  %v15075_v42 = vadd.f32 %v14310_v45, %v3692_v41 }
 0x30f   : > { %19375 = vst [vmem:[#allocation22_spill] sm:$0xff] %v15039_v21  ;;  %v4546_v7 = vrot.slane %v15039_v21, %v14507_v8  ;;  %19381 = vst [vmem:[#allocation56_spill] sm:$0xff] %v15069_v30 }
 0x310   : > { %v3694_v37 = vpop.xlane.xlu1 %3693  ;;  %19382 = vst [vmem:[#allocation75_spill] sm:$0xff] %v15075_v42 }
 0x311   : > { %v3836_v49 = vpop.xlane.xlu0 %3835  ;;  %v4758_v10 = vsel %vm4667_vm0, %v4546_v7, %v4542_v52  ;;  %v15078_v23 = vadd.f32 %v14310_v45, %v3694_v37  ;;  %v4554_v37 = vrot.slane %v15069_v30, %v14507_v8 }
 0x312   : > { %v4759_v7 = vsel %vm4669_vm1, %v4550_v38, %v4758_v10 }
 0x313   : > { %19383 = vst [vmem:[#allocation74_spill] sm:$0xff] %v15078_v23 }
 0x314   : > { %v3838_v31 = vpop.xlane.xlu1 %3837 }
 0x315   : > { %v3688_v59 = vpop.xlane.xlu0 %3687  ;;  %v15105_v38 = vadd.f32 %v14310_v45, %v3838_v31 }
 0x316   : > { %v15064_v50 = vadd.f32 %v14310_v45, %v3688_v59  ;;  %v4697_v59 = vsel %vm4671_vm2, %v4266_v43, %v4696_v55  ;;  %v4278_v55 = vrot.slane %v15075_v42, %v14507_v8  ;;  %v4282_v43 = vrot.slane %v15078_v23, %v14507_v8 }
 0x317   : > { %19387 = vst [vmem:[#allocation29_spill] sm:$0xff] %v15105_v38 }
 0x318   : > { %19380 = vst [vmem:[#allocation61_spill] sm:$0xff] %v15064_v50  ;;  %v4270_v11 = vrot.slane %v15064_v50, %v14507_v8  ;;  %v3690_v46 = vpop.xlane.xlu1 %3689 }
 0x319   : > { %v15084_v19 = vadd.f32 %v14310_v45, %v3690_v46  ;;  %v3832_v21 = vpop.xlane.xlu0 %3831  ;;  %v15100_v46 = vadd.f32 %v14310_v45, %v3836_v49 }
 0x31a   : > { %v4698_v52 = vsel %vm4673_vm3, %v4270_v11, %v4697_v59  ;;  %v15089_v41 = vadd.f32 %v14310_v45, %v3832_v21  ;;  %v4760_v11 = vsel %vm4671_vm2, %v4554_v37, %v4759_v7  ;;  %v4570_v37 = vrot.slane %v15105_v38, %v14507_v8 }
 0x31b   : > { %19384 = vst [vmem:[#allocation77_spill] sm:$0xff] %v15084_v19  ;;  %v4274_v40 = vrot.slane %v15084_v19, %v14507_v8  ;;  %19386 = vst [vmem:[#allocation80_spill] sm:$0xff] %v15100_v46  ;;  %v4566_v31 = vrot.slane %v15100_v46, %v14507_v8 }
 0x31c   : > { %19385 = vst [vmem:[#allocation27_spill] sm:$0xff] %v15089_v41  ;;  %v4558_v10 = vrot.slane %v15089_v41, %v14507_v8  ;;  %v3834_v21 = vpop.xlane.xlu1 %3833 }
 0x31d   : > { %v15109_v59 = vadd.f32 %v14310_v45, %v3834_v21  ;;  %v3700_v50 = vpop.xlane.xlu0 %3699  ;;  %v4699_v42 = vsel %vm4675_vm4, %v4274_v40, %v4698_v52 }
 0x31e   : > { %v4761_v30 = vsel %vm4673_vm3, %v4558_v10, %v4760_v11  ;;  %v4700_v49 = vsel %vm4677_vm5, %v4278_v55, %v4699_v42 }
 0x31f   : > { %19388 = vst [vmem:[#allocation59_spill] sm:$0xff] %v15109_v59  ;;  %v4562_v39 = vrot.slane %v15109_v59, %v14507_v8  ;;  %v4701_v41 = vsel %vm4679_vm6, %v4282_v43, %v4700_v49 }
 0x320   : > { %v3702_v23 = vpop.xlane.xlu1 %3701  ;;  %v4812_v7 = vsel %vm4802_vm7, %v4701_v41, -inf }
 0x321   : > { %4813 = vmax.xlane.f32.xlu1 %v4812_v7  ;;  %v3844_v40 = vpop.xlane.xlu0 %3843  ;;  %v4762_v52 = vsel %vm4675_vm4, %v4562_v39, %v4761_v30 }
 0x322   : > { %v4763_v42 = vsel %vm4677_vm5, %v4566_v31, %v4762_v52  ;;  %v15138_v31 = vadd.f32 %v14310_v45, %v3700_v50 }
 0x323   : > { %v4764_v55 = vsel %vm4679_vm6, %v4570_v37, %v4763_v42 }
 0x324   : > { %v3846_v10 = vpop.xlane.xlu1 %3845  ;;  %v4839_v43 = vsel %vm4802_vm7, %v4764_v55, -inf  ;;  %19392 = vst [vmem:[#allocation82_spill] sm:$0xff] %v15138_v31  ;;  %v4294_v50 = vrot.slane %v15138_v31, %v14507_v8 }
 0x325   : > { %4840 = vmax.xlane.f32.xlu1 %v4839_v43  ;;  %v3696_v21 = vpop.xlane.xlu0 %3695  ;;  %v15146_v43 = vadd.f32 %v14310_v45, %v3702_v23 }
 0x326   : > { %v15130_v7 = vadd.f32 %v14310_v45, %v3696_v21 }
 0x327   : > { %19394 = vst [vmem:[#allocation65_spill] sm:$0xff] %v15146_v43 }
 0x328   : > { %v3698_v11 = vpop.xlane.xlu1 %3697  ;;  %19390 = vst [vmem:[#allocation81_spill] sm:$0xff] %v15130_v7  ;;  %v4286_v52 = vrot.slane %v15130_v7, %v14507_v8 }
 0x329   : > { %v3840_v49 = vpop.xlane.xlu0 %3839  ;;  %v15127_v41 = vadd.f32 %v14310_v45, %v3698_v11  ;;  %v15154_v11 = vadd.f32 %v14310_v45, %v3844_v40 }
 0x32a   : > { %v15143_v42 = vadd.f32 %v14310_v45, %v3840_v49 }
 0x32b   : > { %19389 = vst [vmem:[#allocation78_spill] sm:$0xff] %v15127_v41  ;;  %v4290_v39 = vrot.slane %v15127_v41, %v14507_v8  ;;  %19395 = vst [vmem:[#allocation64_spill] sm:$0xff] %v15154_v11  ;;  %v4582_v40 = vrot.slane %v15154_v11, %v14507_v8 }
 0x32c   : > { %v3842_v46 = vpop.xlane.xlu1 %3841  ;;  %19393 = vst [vmem:[#allocation36_spill] sm:$0xff] %v15143_v42  ;;  %v4574_v49 = vrot.slane %v15143_v42, %v14507_v8 }
 0x32d   : > { %v3708_v38 = vpop.xlane.xlu0 %3707  ;;  %v15135_v30 = vadd.f32 %v14310_v45, %v3842_v46  ;;  %v4702_v21 = vsel %vm4667_vm0, %v4290_v39, %v4286_v52  ;;  %v4298_v39 = vrot.slane %v15146_v43, %v14507_v8  ;;  %v15165_v52 = vadd.f32 %v14310_v45, %v3846_v10 }
 0x32e   : > { %v4703_v59 = vsel %vm4669_vm1, %v4294_v50, %v4702_v21 }
 0x32f   : > { %19391 = vst [vmem:[#allocation79_spill] sm:$0xff] %v15135_v30  ;;  %v4578_v46 = vrot.slane %v15135_v30, %v14507_v8  ;;  %19397 = vst [vmem:[#allocation62_spill] sm:$0xff] %v15165_v52  ;;  %v15171_v30 = vadd.f32 %v14310_v45, %v3708_v38  ;;  %v4704_v50 = vsel %vm4671_vm2, %v4298_v39, %v4703_v59 }
 0x330   : > { %v3710_v37 = vpop.xlane.xlu1 %3709 }
 0x331   : > { %v3852_v55 = vpop.xlane.xlu0 %3851  ;;  %v4765_v31 = vsel %vm4667_vm0, %v4578_v46, %v4574_v49  ;;  %19398 = vst [vmem:[#allocation30_spill] sm:$0xff] %v15171_v30  ;;  %v15174_v42 = vadd.f32 %v14310_v45, %v3710_v37  ;;  %v4586_v37 = vrot.slane %v15165_v52, %v14507_v8  ;;  %v4310_v59 = vrot.slane %v15171_v30, %v14507_v8 }
 0x332   : > { %v4766_v46 = vsel %vm4669_vm1, %v4582_v40, %v4765_v31 }
 0x333   : > { %19399 = vst [vmem:[#allocation24_spill] sm:$0xff] %v15174_v42  ;;  %v4314_v39 = vrot.slane %v15174_v42, %v14507_v8 }
 0x334   : > { %v3854_v41 = vpop.xlane.xlu1 %3853 }
 0x335   : > { %v3704_v7 = vpop.xlane.xlu0 %3703  ;;  %v15201_v40 = vadd.f32 %v14310_v45, %v3854_v41 }
 0x336   : > { %v15160_v23 = vadd.f32 %v14310_v45, %v3704_v7 }
 0x337   : > { %19403 = vst [vmem:[#allocation20_spill] sm:$0xff] %v15201_v40 }
 0x338   : > { %19396 = vst [vmem:[#allocation85_spill] sm:$0xff] %v15160_v23  ;;  %v4302_v7 = vrot.slane %v15160_v23, %v14507_v8  ;;  %v3706_v21 = vpop.xlane.xlu1 %3705 }
 0x339   : > { %v15180_v10 = vadd.f32 %v14310_v45, %v3706_v21  ;;  %v3848_v43 = vpop.xlane.xlu0 %3847  ;;  %v15196_v21 = vadd.f32 %v14310_v45, %v3852_v55 }
 0x33a   : > { %v4705_v49 = vsel %vm4673_vm3, %v4302_v7, %v4704_v50  ;;  %v15185_v38 = vadd.f32 %v14310_v45, %v3848_v43  ;;  %v4767_v7 = vsel %vm4671_vm2, %v4586_v37, %v4766_v46  ;;  %v4602_v37 = vrot.slane %v15201_v40, %v14507_v8 }
 0x33b   : > { %19400 = vst [vmem:[#allocation31_spill] sm:$0xff] %v15180_v10  ;;  %v4306_v11 = vrot.slane %v15180_v10, %v14507_v8  ;;  %19402 = vst [vmem:[#allocation70_spill] sm:$0xff] %v15196_v21  ;;  %v4598_v41 = vrot.slane %v15196_v21, %v14507_v8 }
 0x33c   : > { %19401 = vst [vmem:[#allocation32_spill] sm:$0xff] %v15185_v38  ;;  %v4590_v31 = vrot.slane %v15185_v38, %v14507_v8  ;;  %v3850_v43 = vpop.xlane.xlu1 %3849 }
 0x33d   : > { %v15205_v50 = vadd.f32 %v14310_v45, %v3850_v43  ;;  %v3716_v23 = vpop.xlane.xlu0 %3715  ;;  %v4706_v30 = vsel %vm4675_vm4, %v4306_v11, %v4705_v49 }
 0x33e   : > { %v4768_v52 = vsel %vm4673_vm3, %v4590_v31, %v4767_v7  ;;  %v4707_v55 = vsel %vm4677_vm5, %v4310_v59, %v4706_v30 }
 0x33f   : > { %19404 = vst [vmem:[#allocation45_spill] sm:$0xff] %v15205_v50  ;;  %v4594_v42 = vrot.slane %v15205_v50, %v14507_v8  ;;  %v4708_v38 = vsel %vm4679_vm6, %v4314_v39, %v4707_v55 }
 0x340   : > { %v3718_v10 = vpop.xlane.xlu1 %3717  ;;  %v4815_v46 = vsel %vm4802_vm7, %v4708_v38, -inf }
 0x341   : > { %4816 = vmax.xlane.f32.xlu1 %v4815_v46  ;;  %v3860_v11 = vpop.xlane.xlu0 %3859  ;;  %v4769_v49 = vsel %vm4675_vm4, %v4594_v42, %v4768_v52 }
 0x342   : > { %v4770_v30 = vsel %vm4677_vm5, %v4598_v41, %v4769_v49  ;;  %v15234_v41 = vadd.f32 %v14310_v45, %v3716_v23 }
 0x343   : > { %v4771_v59 = vsel %vm4679_vm6, %v4602_v37, %v4770_v30 }
 0x344   : > { %v3862_v31 = vpop.xlane.xlu1 %3861  ;;  %v4842_v39 = vsel %vm4802_vm7, %v4771_v59, -inf  ;;  %19408 = vst [vmem:[#allocation63_spill] sm:$0xff] %v15234_v41  ;;  %v4326_v23 = vrot.slane %v15234_v41, %v14507_v8 }
 0x345   : > { %4843 = vmax.xlane.f32.xlu1 %v4842_v39  ;;  %v3712_v43 = vpop.xlane.xlu0 %3711  ;;  %v15242_v39 = vadd.f32 %v14310_v45, %v3718_v10 }
 0x346   : > { %v15226_v46 = vadd.f32 %v14310_v45, %v3712_v43 }
 0x347   : > { %19410 = vst [vmem:[#allocation40_spill] sm:$0xff] %v15242_v39 }
 0x348   : > { %v3714_v7 = vpop.xlane.xlu1 %3713  ;;  %19406 = vst [vmem:[#allocation66_spill] sm:$0xff] %v15226_v46  ;;  %v4318_v49 = vrot.slane %v15226_v46, %v14507_v8 }
 0x349   : > { %v3856_v55 = vpop.xlane.xlu0 %3855  ;;  %v15223_v38 = vadd.f32 %v14310_v45, %v3714_v7  ;;  %v15250_v7 = vadd.f32 %v14310_v45, %v3860_v11 }
 0x34a   : > { %v15239_v30 = vadd.f32 %v14310_v45, %v3856_v55 }
 0x34b   : > { %19405 = vst [vmem:[#allocation53_spill] sm:$0xff] %v15223_v38  ;;  %v4322_v42 = vrot.slane %v15223_v38, %v14507_v8  ;;  %19411 = vst [vmem:[#allocation50_spill] sm:$0xff] %v15250_v7  ;;  %v4614_v11 = vrot.slane %v15250_v7, %v14507_v8 }
 0x34c   : > { %v3858_v21 = vpop.xlane.xlu1 %3857  ;;  %19409 = vst [vmem:[#allocation26_spill] sm:$0xff] %v15239_v30  ;;  %v4606_v55 = vrot.slane %v15239_v30, %v14507_v8 }
 0x34d   : > { %v3724_v40 = vpop.xlane.xlu0 %3723  ;;  %v15231_v52 = vadd.f32 %v14310_v45, %v3858_v21  ;;  %v4709_v43 = vsel %vm4667_vm0, %v4322_v42, %v4318_v49  ;;  %v4330_v42 = vrot.slane %v15242_v39, %v14507_v8  ;;  %v15261_v49 = vadd.f32 %v14310_v45, %v3862_v31 }
 0x34e   : > { %v4710_v50 = vsel %vm4669_vm1, %v4326_v23, %v4709_v43 }
 0x34f   : > { %19407 = vst [vmem:[#allocation67_spill] sm:$0xff] %v15231_v52  ;;  %v4610_v21 = vrot.slane %v15231_v52, %v14507_v8  ;;  %19413 = vst [vmem:[#allocation48_spill] sm:$0xff] %v15261_v49  ;;  %v15267_v52 = vadd.f32 %v14310_v45, %v3724_v40  ;;  %v4711_v23 = vsel %vm4671_vm2, %v4330_v42, %v4710_v50 }
 0x350   : > { %v3726_v37 = vpop.xlane.xlu1 %3725 }
 0x351   : > { %v3868_v59 = vpop.xlane.xlu0 %3867  ;;  %v4772_v41 = vsel %vm4667_vm0, %v4610_v21, %v4606_v55  ;;  %19414 = vst [vmem:[#allocation90_spill] sm:$0xff] %v15267_v52  ;;  %v15270_v30 = vadd.f32 %v14310_v45, %v3726_v37  ;;  %v4618_v37 = vrot.slane %v15261_v49, %v14507_v8  ;;  %v4342_v50 = vrot.slane %v15267_v52, %v14507_v8 }
 0x352   : > { %v4773_v21 = vsel %vm4669_vm1, %v4614_v11, %v4772_v41 }
 0x353   : > { %19415 = vst [vmem:[#allocation91_spill] sm:$0xff] %v15270_v30  ;;  %v4346_v42 = vrot.slane %v15270_v30, %v14507_v8 }
 0x354   : > { %v3870_v38 = vpop.xlane.xlu1 %3869 }
 0x355   : > { %v3720_v46 = vpop.xlane.xlu0 %3719  ;;  %v15297_v11 = vadd.f32 %v14310_v45, %v3870_v38 }
 0x356   : > { %v15256_v10 = vadd.f32 %v14310_v45, %v3720_v46 }
 0x357   : > { %19419 = vst [vmem:[#allocation95_spill] sm:$0xff] %v15297_v11 }
 0x358   : > { %19412 = vst [vmem:[#allocation71_spill] sm:$0xff] %v15256_v10  ;;  %v4334_v46 = vrot.slane %v15256_v10, %v14507_v8  ;;  %v3722_v43 = vpop.xlane.xlu1 %3721 }
 0x359   : > { %v15276_v31 = vadd.f32 %v14310_v45, %v3722_v43  ;;  %v3864_v39 = vpop.xlane.xlu0 %3863  ;;  %v15292_v43 = vadd.f32 %v14310_v45, %v3868_v59 }
 0x35a   : > { %v4712_v55 = vsel %vm4673_vm3, %v4334_v46, %v4711_v23  ;;  %v15281_v40 = vadd.f32 %v14310_v45, %v3864_v39  ;;  %v4774_v46 = vsel %vm4671_vm2, %v4618_v37, %v4773_v21  ;;  %v4634_v37 = vrot.slane %v15297_v11, %v14507_v8 }
 0x35b   : > { %19416 = vst [vmem:[#allocation92_spill] sm:$0xff] %v15276_v31  ;;  %v4338_v7 = vrot.slane %v15276_v31, %v14507_v8  ;;  %19418 = vst [vmem:[#allocation94_spill] sm:$0xff] %v15292_v43  ;;  %v4630_v38 = vrot.slane %v15292_v43, %v14507_v8 }
 0x35c   : > { %19417 = vst [vmem:[#allocation93_spill] sm:$0xff] %v15281_v40  ;;  %v4622_v41 = vrot.slane %v15281_v40, %v14507_v8  ;;  %v3866_v39 = vpop.xlane.xlu1 %3865 }
 0x35d   : > { %v15301_v23 = vadd.f32 %v14310_v45, %v3866_v39  ;;  %v3732_v10 = vpop.xlane.xlu0 %3731  ;;  %v4713_v52 = vsel %vm4675_vm4, %v4338_v7, %v4712_v55 }
 0x35e   : > { %v4775_v49 = vsel %vm4673_vm3, %v4622_v41, %v4774_v46  ;;  %v4714_v59 = vsel %vm4677_vm5, %v4342_v50, %v4713_v52 }
 0x35f   : > { %19420 = vst [vmem:[#allocation96_spill] sm:$0xff] %v15301_v23  ;;  %v4626_v30 = vrot.slane %v15301_v23, %v14507_v8  ;;  %v4715_v40 = vsel %vm4679_vm6, %v4346_v42, %v4714_v59 }
 0x360   : > { %v3734_v31 = vpop.xlane.xlu1 %3733  ;;  %v4818_v21 = vsel %vm4802_vm7, %v4715_v40, -inf }
 0x361   : > { %4819 = vmax.xlane.f32.xlu1 %v4818_v21  ;;  %v3876_v7 = vpop.xlane.xlu0 %3875  ;;  %v4776_v55 = vsel %vm4675_vm4, %v4626_v30, %v4775_v49  ;;  %v15327_v49 = vadd.f32 %v14310_v45, %v3732_v10 }
 0x362   : > { %v4777_v52 = vsel %vm4677_vm5, %v4630_v38, %v4776_v55  ;;  %v15386_v61 = vadd.f32 %v14310_v45, %v3876_v7 }
 0x363   : > { %v4778_v50 = vsel %vm4679_vm6, %v4634_v37, %v4777_v52  ;;  %19423 = vst [vmem:[#allocation99_spill] sm:$0xff] %v15327_v49  ;;  %v15332_v52 = vadd.f32 %v14310_v45, %v3734_v31 }
 0x364   : > { %v3878_v41 = vpop.xlane.xlu1 %3877  ;;  %v4845_v42 = vsel %vm4802_vm7, %v4778_v50, -inf  ;;  %19434 = vst [vmem:[#allocation110_spill] sm:$0xff] %v15386_v61 }
 0x365   : > { %4846 = vmax.xlane.f32.xlu1 %v4845_v42  ;;  %v3728_v39 = vpop.xlane.xlu0 %3727  ;;  %19424 = vst [vmem:[#allocation100_spill] sm:$0xff] %v15332_v52  ;;  %v4358_v42 = vrot.slane %v15327_v49, %v14507_v8  ;;  %v4362_v23 = vrot.slane %v15332_v52, %v14507_v8 }
 0x366   : > { %v15322_v21 = vadd.f32 %v14310_v45, %v3728_v39 }
 0x368   : > { %v3730_v46 = vpop.xlane.xlu1 %3729  ;;  %19422 = vst [vmem:[#allocation98_spill] sm:$0xff] %v15322_v21  ;;  %v4350_v37 = vrot.slane %v15322_v21, %v14507_v8 }
 0x369   : > { %v3872_v59 = vpop.xlane.xlu0 %3871  ;;  %v15319_v40 = vadd.f32 %v14310_v45, %v3730_v46 }
 0x36b   : > { %19421 = vst [vmem:[#allocation97_spill] sm:$0xff] %v15319_v40  ;;  %v4354_v30 = vrot.slane %v15319_v40, %v14507_v8 }
 0x36c   : > { %v3874_v43 = vpop.xlane.xlu1 %3873 }
 0x36d   : > { %v3740_v11 = vpop.xlane.xlu0 %3739  ;;  %v4716_v50 = vsel %vm4667_vm0, %v4354_v30, %v4350_v37 }
 0x36e   : > { %v4717_v40 = vsel %vm4669_vm1, %v4358_v42, %v4716_v50  ;;  %v15344_v21 = vadd.f32 %v14310_v45, %v3740_v11  ;;  %v15359_v11 = vadd.f32 %v14310_v45, %v3874_v43 }
 0x36f   : > { %v4718_v49 = vsel %vm4671_vm2, %v4362_v23, %v4717_v40  ;;  %v15366_v23 = vsub.s32 1, %v19332_v58  ;;  %v15369_v40 = vsub.s32 3, %v19332_v58 }
 0x370   : > { %v3742_v38 = vpop.xlane.xlu1 %3741  ;;  %19426 = vst [vmem:[#allocation102_spill] sm:$0xff] %v15344_v21  ;;  %19429 = vst [vmem:[#allocation105_spill] sm:$0xff] %v15359_v11 }
 0x371   : > { %v3884_v55 = vpop.xlane.xlu0 %3883  ;;  %v15349_v37 = vadd.f32 %v14310_v45, %v3742_v38  ;;  %19430 = vst [vmem:[#allocation106_spill] sm:$0xff] %v15366_v23  ;;  %19431 = vst [vmem:[#allocation107_spill] sm:$0xff] %v15369_v40 }
 0x373   : > { %19427 = vst [vmem:[#allocation103_spill] sm:$0xff] %v15349_v37  ;;  %v4378_v38 = vrot.slane %v15349_v37, %v14507_v8  ;;  %v15380_v37 = vsub.s32 5, %v19332_v58 }
 0x374   : > { %v3886_v39 = vpop.xlane.xlu1 %3885 }
 0x375   : > { %v3736_v46 = vpop.xlane.xlu0 %3735  ;;  %19433 = vst [vmem:[#allocation109_spill] sm:$0xff] %v15380_v37 }
 0x376   : > { %v15339_v10 = vadd.f32 %v14310_v45, %v3736_v46 }
 0x378   : > { %19425 = vst [vmem:[#allocation101_spill] sm:$0xff] %v15339_v10  ;;  %v4366_v31 = vrot.slane %v15339_v10, %v14507_v8  ;;  %v3738_v30 = vpop.xlane.xlu1 %3737  ;;  %v4374_v10 = vrot.slane %v15344_v21, %v14507_v8  ;;  %v4642_v21 = vrot.slane %v15359_v11, %v14507_v8 }
 0x379   : > { %v15353_v50 = vadd.f32 %v14310_v45, %v3738_v30 }
 0x37a   : > { %v4719_v42 = vsel %vm4673_vm3, %v4366_v31, %v4718_v49  ;;  %v15373_v31 = vadd.f32 %v14310_v45, %v3872_v59 }
 0x37b   : > { %19428 = vst [vmem:[#allocation104_spill] sm:$0xff] %v15353_v50  ;;  %v4370_v46 = vrot.slane %v15353_v50, %v14507_v8 }
 0x37c   : > { %v3882_v52 = vpop.xlane.xlu1 %3881  ;;  %19432 = vst [vmem:[#allocation108_spill] sm:$0xff] %v15373_v31 }
 0x37d   : > { %v4720_v49 = vsel %vm4675_vm4, %v4370_v46, %v4719_v42  ;;  %v3880_v42 = vpop.xlane.xlu0 %3879  ;;  %v4638_v46 = vrot.slane %v15373_v31, %v14507_v8  ;;  %v15408_v31 = vadd.f32 %v14310_v45, %v3878_v41 }
 0x37e   : > { %v4721_v43 = vsel %vm4677_vm5, %v4374_v10, %v4720_v49  ;;  %v15400_v7 = vadd.f32 %v14310_v45, %v3880_v42 }
 0x37f   : > { %v4722_v30 = vsel %vm4679_vm6, %v4378_v38, %v4721_v43  ;;  %v15395_v38 = vsub.s32 7, %v19332_v58  ;;  %v4779_v43 = vsel %vm4667_vm0, %v4642_v21, %v4638_v46  ;;  %v4650_v41 = vrot.slane %v15408_v31, %v14507_v8 }
 0x380   : > { %v15382_v50 = vpop.xlane.xlu1 %4825  ;;  %v4821_v19 = vsel %vm4802_vm7, %v4722_v30, -inf  ;;  %19436 = vst [vmem:[#allocation112_spill] sm:$0xff] %v15400_v7  ;;  %v4654_v42 = vrot.slane %v15400_v7, %v14507_v8  ;;  %v15424_v46 = vadd.f32 %v14310_v45, %v3884_v55  ;;  %v15437_v55 = vsub.s32 2, %v19332_v58  ;;  %v19442_v7 = vld [vmem:[#allocation69_spill] sm:$0xff] }
 0x381   : > { %v5098_v59 = vrot.slane %v15382_v50, %v15366_v23  ;;  %v5106_v10 = vrot.slane %v15382_v50, %v15369_v40  ;;  %4822 = vmax.xlane.f32.xlu1 %v4821_v19  ;;  %19435 = vst [vmem:[#allocation111_spill] sm:$0xff] %v15395_v38  ;;  %v5114_v30 = vrot.slane %v15382_v50, %v15380_v37 }
 0x382   : > { %v4646_v19 = vrot.slane %v15386_v61, %v14507_v8  ;;  %v5122_v21 = vrot.slane %v15382_v50, %v15395_v38  ;;  %19437 = vst [vmem:[#allocation113_spill] sm:$0xff] %v15424_v46  ;;  %19438 = vst [vmem:[#allocation114_spill] sm:$0xff] %v15437_v55 }
 0x383   : > { %v5564_v49 = vsub.f32 %v14502_v20, %v5098_v59  ;;  %v5566_v11 = vsub.f32 %v14538_v36, %v5106_v10  ;;  %v15412_v20 = vadd.f32 %v14310_v45, %v3882_v52  ;;  %v5568_v36 = vsub.f32 %v14581_v57, %v5114_v30 }
 0x384   : > { %v4780_v27 = vsel %vm4669_vm1, %v4646_v19, %v4779_v43  ;;  %v15421_v10 = vpop.xlane.xlu1 %4828  ;;  %v15427_v52 = vadd.f32 %v14310_v45, %v3886_v39  ;;  %v5570_v57 = vsub.f32 %v14641_v60, %v5122_v21  ;;  %v19439_v19 = vld [vmem:[#allocation21_spill] sm:$0xff] }
 0x385   : > { %v5749_v16 = vmul.f32 1.442695, %v5564_v49  ;;  %v5753_v59 = vmul.f32 1.442695, %v5566_v11  ;;  %v4781_v49 = vsel %vm4671_vm2, %v4650_v41, %v4780_v27  ;;  %v4658_v43 = vrot.slane %v15412_v20, %v14507_v8 }
 0x386   : > { %v5757_v11 = vmul.f32 1.442695, %v5568_v36  ;;  %v5130_v30 = vrot.slane %v15421_v10, %v15366_v23  ;;  %v5094_v45 = vrot.slane %v15382_v50, %v19439_v19  ;;  %v4662_v27 = vrot.slane %v15424_v46, %v14507_v8  ;;  %v19440_v36 = vld [vmem:[#allocation46_spill] sm:$0xff] }
 0x387   : > { %11645 = vpow2.f32 %v5749_v16  ;;  %v4782_v16 = vsel %vm4673_vm3, %v4654_v42, %v4781_v49  ;;  %v4666_v39 = vrot.slane %v15427_v52, %v14507_v8  ;;  %v5761_v60 = vmul.f32 1.442695, %v5570_v57 }
 0x388   : > { %11647 = vpow2.f32 %v5753_v59  ;;  %v4783_v21 = vsel %vm4675_vm4, %v4658_v43, %v4782_v16  ;;  %v5138_v42 = vrot.slane %v15421_v10, %v15369_v40  ;;  %v5572_v59 = vsub.f32 %v19440_v36, %v5130_v30 }
 0x389   : > { %11649 = vpow2.f32 %v5757_v11  ;;  %v4784_v41 = vsel %vm4677_vm5, %v4662_v27, %v4783_v21  ;;  %v15451_v49 = vsub.s32 4, %v19332_v58  ;;  %v5102_v46 = vrot.slane %v15382_v50, %v15437_v55  ;;  %v19444_v11 = vld [vmem:[#allocation52_spill] sm:$0xff] }
 0x38a   : > { %v5563_v61 = vsub.f32 %v19442_v7, %v5094_v45  ;;  %v4785_v57 = vsel %vm4679_vm6, %v4666_v39, %v4784_v41  ;;  %11651 = vpow2.f32 %v5761_v60  ;;  %v5146_v16 = vrot.slane %v15421_v10, %v15380_v37  ;;  %v19446_v45 = vld [vmem:[#allocation23_spill] sm:$0xff] }
 0x38b   : > { %19441 = vst [vmem:[#allocation46_spill] sm:$0xff] %v15451_v49  ;;  %v4848_v43 = vsel %vm4802_vm7, %v4785_v57, -inf  ;;  %v5574_v30 = vsub.f32 %v19444_v11, %v5138_v42  ;;  %v5765_v27 = vmul.f32 1.442695, %v5572_v59  ;;  %v15465_v21 = vsub.s32 6, %v19332_v58  ;;  %v19448_v59 = vld [vmem:[#allocation42_spill] sm:$0xff] }
 0x38c   : > { %4849 = vmax.xlane.f32.xlu1 %v4848_v43  ;;  %v5110_v7 = vrot.slane %v15382_v50, %v15451_v49  ;;  %v5565_v39 = vsub.f32 %v19446_v45, %v5102_v46  ;;  %v5747_v36 = vmul.f32 1.442695, %v5563_v61  ;;  %v5154_v60 = vrot.slane %v15421_v10, %v15395_v38  ;;  %v15479_v46 = vpop.xlane.xlu1 %4804 }
 0x38d   : > { %19445 = vst [vmem:[#allocation52_spill] sm:$0xff] %v15465_v21  ;;  %v5576_v57 = vsub.f32 %v14656_v25, %v5146_v16  ;;  %11653 = vpow2.f32 %v5765_v27  ;;  %v5769_v42 = vmul.f32 1.442695, %v5574_v30  ;;  %v5118_v58 = vrot.slane %v15382_v50, %v15465_v21 }
 0x38e   : > { %v5567_v43 = vsub.f32 %v19448_v59, %v5110_v7  ;;  %11655 = vpow2.f32 %v5747_v36  ;;  %v5751_v11 = vmul.f32 1.442695, %v5565_v39  ;;  %v5578_v45 = vsub.f32 %v14738_v3, %v5154_v60  ;;  %v19451_v39 = vld [vmem:[#allocation51_spill] sm:$0xff] }
 0x38f   : > { %11657 = vpow2.f32 %v5769_v42  ;;  %v4874_v25 = vrot.slane %v15479_v46, %v15366_v23  ;;  %v5569_v16 = vsub.f32 %v14592_v4, %v5118_v58  ;;  %v5126_v30 = vrot.slane %v15421_v10, %v19439_v19 }
 0x390   : > { %11659 = vpow2.f32 %v5751_v11  ;;  %v5755_v50 = vmul.f32 1.442695, %v5567_v43  ;;  %v5777_v7 = vmul.f32 1.442695, %v5578_v45  ;;  %v4898_v3 = vrot.slane %v15479_v46, %v15395_v38  ;;  %v15499_v58 = vpop.xlane.xlu1 %4831 }
 0x391   : > { %v15457_v8 = vpop.eup %11645  ;;  %v5508_v36 = vsub.f32 %v19451_v39, %v4874_v25  ;;  %v5759_v60 = vmul.f32 1.442695, %v5569_v16  ;;  %v5134_v4 = vrot.slane %v15421_v10, %v15437_v55  ;;  %v5162_v45 = vrot.slane %v15499_v58, %v15366_v23  ;;  %v19455_v16 = vld [vmem:[#allocation41_spill] sm:$0xff] }
 0x392   : > { %19443 = vst [vmem:[#allocation69_spill] sm:$0xff] %v15457_v8  ;;  %6191 = vperm.xlu0 %11235, %v15457_v8   ;;  %v15470_v41 = vpop.eup %11647  ;;  %v5142_v25 = vrot.slane %v15421_v10, %v15451_v49 }
 0x393   : > { %19447 = vst [vmem:[#allocation23_spill] sm:$0xff] %v15470_v41  ;;  %v15481_v61 = vpop.eup %11649  ;;  %v5637_v11 = vmul.f32 1.442695, %v5508_v36 }
 0x394   : > { %19449 = vst [vmem:[#allocation42_spill] sm:$0xff] %v15481_v61  ;;  %v15490_v27 = vpop.eup %11651 }
 0x395   : > { %19450 = vst [vmem:[#allocation115_spill] sm:$0xff] %v15490_v27 }
 0x396   : > { %6197 = vperm.xlu0 %11235, %v15470_v41   ;;  %v5773_v41 = vmul.f32 1.442695, %v5576_v57  ;;  %v19452_v57 = vld [vmem:[#allocation49_spill] sm:$0xff] }
 0x397   : > { %v5571_v42 = vsub.f32 %v19452_v57, %v5126_v30  ;;  %v15501_v59 = vpop.eup %11653 }
 0x398   : > { %11661 = vpow2.f32 %v5773_v41  ;;  %19453 = vst [vmem:[#allocation51_spill] sm:$0xff] %v15501_v59  ;;  %v15503_v43 = vpop.eup %11655  ;;  %v5514_v41 = vsub.f32 %v14782_v6, %v4898_v3  ;;  %v19458_v3 = vld [vmem:[#allocation68_spill] sm:$0xff] }
 0x399   : > { %11663 = vpow2.f32 %v5755_v50  ;;  %19454 = vst [vmem:[#allocation49_spill] sm:$0xff] %v15503_v43  ;;  %v5573_v50 = vsub.f32 %v19455_v16, %v5134_v4  ;;  %v5763_v30 = vmul.f32 1.442695, %v5571_v42  ;;  %v15513_v39 = vpop.eup %11657  ;;  %v5580_v36 = vsub.f32 %v19458_v3, %v5162_v45  ;;  %v19459_v4 = vld [vmem:[#allocation47_spill] sm:$0xff] }
 0x39a   : > { %6203 = vperm.xlu0 %11235, %v15481_v61   ;;  %11665 = vpow2.f32 %v5777_v7  ;;  %19456 = vst [vmem:[#allocation41_spill] sm:$0xff] %v15513_v39  ;;  %v15515_v57 = vpop.eup %11659  ;;  %v5649_v6 = vmul.f32 1.442695, %v5514_v41  ;;  %v5170_v7 = vrot.slane %v15499_v58, %v15369_v40  ;;  %v5575_v42 = vsub.f32 %v19459_v4, %v5142_v25 }
 0x39b   : > { %11667 = vpow2.f32 %v5759_v60  ;;  %19457 = vst [vmem:[#allocation116_spill] sm:$0xff] %v15515_v57  ;;  %v5150_v60 = vrot.slane %v15421_v10, %v15465_v21  ;;  %v5767_v16 = vmul.f32 1.442695, %v5573_v50  ;;  %v5178_v41 = vrot.slane %v15499_v58, %v15380_v37 }
 0x39c   : > { %11669 = vpow2.f32 %v5637_v11  ;;  %v5582_v11 = vsub.f32 %v14694_v24, %v5170_v7  ;;  %v5781_v45 = vmul.f32 1.442695, %v5580_v36  ;;  %v5771_v25 = vmul.f32 1.442695, %v5575_v42  ;;  %v15549_v42 = vpop.xlane.xlu1 %4807 }
 0x39d   : > { %6188 = vperm.xlu1 %11236, %v15503_v43   ;;  %11671 = vpow2.f32 %v5763_v30  ;;  %v5577_v10 = vsub.f32 %v14702_v54, %v5150_v60  ;;  %v4870_v50 = vrot.slane %v15479_v46, %v19439_v19  ;;  %v5584_v24 = vsub.f32 %v14717_v12, %v5178_v41  ;;  %v19464_v60 = vld [vmem:[#allocation72_spill] sm:$0xff] }
 0x39e   : > { %6209 = vperm.xlu0 %11235, %v15490_v27   ;;  %11673 = vpow2.f32 %v5649_v6  ;;  %v5186_v6 = vrot.slane %v15499_v58, %v15395_v38  ;;  %v5785_v7 = vmul.f32 1.442695, %v5582_v11  ;;  %v4878_v36 = vrot.slane %v15479_v46, %v15437_v55 }
 0x39f   : > { %11675 = vpow2.f32 %v5767_v16  ;;  %v5775_v54 = vmul.f32 1.442695, %v5577_v10  ;;  %v5507_v4 = vsub.f32 %v19464_v60, %v4870_v50  ;;  %v5789_v41 = vmul.f32 1.442695, %v5584_v24  ;;  %v19467_v10 = vld [vmem:[#allocation55_spill] sm:$0xff] }
 0x3a0   : > { %11677 = vpow2.f32 %v5781_v45  ;;  %v5586_v12 = vsub.f32 %v14786_v53, %v5186_v6  ;;  %v4906_v11 = vrot.slane %v15549_v42, %v15366_v23  ;;  %v4882_v45 = vrot.slane %v15479_v46, %v15369_v40 }
 0x3a1   : > { %6194 = vperm.xlu1 %11236, %v15515_v57   ;;  %11679 = vpow2.f32 %v5771_v25  ;;  %v5509_v25 = vsub.f32 %v19467_v10, %v4878_v36  ;;  %v5635_v50 = vmul.f32 1.442695, %v5507_v4  ;;  %v4914_v6 = vrot.slane %v15549_v42, %v15369_v40 }
 0x3a2   : > { %6215 = vperm.xlu0 %11235, %v15501_v59   ;;  %v15525_v59 = vpop.eup %11661  ;;  %11681 = vpow2.f32 %v5785_v7  ;;  %v5793_v53 = vmul.f32 1.442695, %v5586_v12  ;;  %v5516_v24 = vsub.f32 %v14773_v18, %v4906_v11  ;;  %v4886_v7 = vrot.slane %v15479_v46, %v15451_v49 }
 0x3a3   : > { %19460 = vst [vmem:[#allocation68_spill] sm:$0xff] %v15525_v59  ;;  %v15527_v27 = vpop.eup %11663  ;;  %11683 = vpow2.f32 %v5775_v54  ;;  %v19470_v54 = vld [vmem:[#allocation73_spill] sm:$0xff]  ;;  %v5639_v4 = vmul.f32 1.442695, %v5509_v25  ;;  %v4922_v12 = vrot.slane %v15549_v42, %v15380_v37  ;;  %v5518_v18 = vsub.f32 %v14832_v44, %v4914_v6 }
 0x3a4   : > { %19461 = vst [vmem:[#allocation47_spill] sm:$0xff] %v15527_v27  ;;  %v15537_v30 = vpop.eup %11665  ;;  %11685 = vpow2.f32 %v5789_v41  ;;  %v5510_v36 = vsub.f32 %v19470_v54, %v4882_v45  ;;  %v5653_v41 = vmul.f32 1.442695, %v5516_v24  ;;  %v4890_v11 = vrot.slane %v15479_v46, %v15380_v37  ;;  %v19473_v45 = vld [vmem:[#allocation37_spill] sm:$0xff] }
 0x3a5   : > { %6200 = vperm.xlu1 %11236, %v15527_v27   ;;  %19462 = vst [vmem:[#allocation117_spill] sm:$0xff] %v15537_v30  ;;  %v15539_v3 = vpop.eup %11667  ;;  %11687 = vpow2.f32 %v5635_v50  ;;  %v5511_v25 = vsub.f32 %v19473_v45, %v4886_v7  ;;  %v5520_v44 = vsub.f32 %v14869_v0, %v4922_v12  ;;  %v5657_v6 = vmul.f32 1.442695, %v5518_v18 }
 0x3a6   : > { %6221 = vperm.xlu0 %11235, %v15513_v39   ;;  %19463 = vst [vmem:[#allocation118_spill] sm:$0xff] %v15539_v3  ;;  %v15551_v16 = vpop.eup %11669  ;;  %11689 = vpow2.f32 %v5793_v53  ;;  %v5641_v50 = vmul.f32 1.442695, %v5510_v36  ;;  %v4930_v53 = vrot.slane %v15549_v42, %v15395_v38  ;;  %v4894_v24 = vrot.slane %v15479_v46, %v15465_v21 }
 0x3a7   : > { %19465 = vst [vmem:[#allocation72_spill] sm:$0xff] %v15551_v16  ;;  %11691 = vpow2.f32 %v5639_v4  ;;  %v5512_v7 = vsub.f32 %v14713_v48, %v4890_v11  ;;  %v5643_v36 = vmul.f32 1.442695, %v5511_v25  ;;  %v15599_v4 = vpop.xlane.xlu1 %4834  ;;  %v5661_v12 = vmul.f32 1.442695, %v5520_v44 }
 0x3a8   : > { %11693 = vpow2.f32 %v5653_v41  ;;  %v5522_v0 = vsub.f32 %v14935_v9, %v4930_v53  ;;  %v5194_v18 = vrot.slane %v15599_v4, %v15366_v23  ;;  %v5513_v48 = vsub.f32 %v14756_v32, %v4894_v24 }
 0x3a9   : > { %6206 = vperm.xlu1 %11236, %v15539_v3   ;;  %11695 = vpow2.f32 %v5641_v50  ;;  %v5645_v46 = vmul.f32 1.442695, %v5512_v7  ;;  %v5158_v41 = vrot.slane %v15499_v58, %v19439_v19  ;;  %v5202_v50 = vrot.slane %v15599_v4, %v15369_v40 }
 0x3aa   : > { %6227 = vperm.xlu0 %11235, %v15525_v59   ;;  %11697 = vpow2.f32 %v5657_v6  ;;  %v5665_v9 = vmul.f32 1.442695, %v5522_v0  ;;  %v5588_v53 = vsub.f32 %v14817_v35, %v5194_v18  ;;  %v5647_v32 = vmul.f32 1.442695, %v5513_v48  ;;  %v19480_v6 = vld [vmem:[#allocation43_spill] sm:$0xff]  ;;  %v19483_v48 = vld [vmem:[#allocation33_spill] sm:$0xff] }
 0x3ab   : > { %11699 = vpow2.f32 %v5643_v36  ;;  %v5166_v44 = vrot.slane %v15499_v58, %v15437_v55  ;;  %v5579_v24 = vsub.f32 %v19480_v6, %v5158_v41  ;;  %v5210_v0 = vrot.slane %v15599_v4, %v15380_v37 }
 0x3ac   : > { %11701 = vpow2.f32 %v5661_v12  ;;  %v5590_v35 = vsub.f32 %v14855_v22, %v5202_v50  ;;  %v5797_v12 = vmul.f32 1.442695, %v5588_v53  ;;  %v5174_v18 = vrot.slane %v15499_v58, %v15451_v49 }
 0x3ad   : > { %v5779_v41 = vmul.f32 1.442695, %v5579_v24  ;;  %v5592_v22 = vsub.f32 %v14909_v13, %v5210_v0  ;;  %v5182_v53 = vrot.slane %v15499_v58, %v15465_v21 }
 0x3ae   : > { %6233 = vperm.xlu0 %11235, %v15537_v30   ;;  %v15553_v30 = vpop.eup %11671  ;;  %11703 = vpow2.f32 %v5645_v46  ;;  %v5581_v46 = vsub.f32 %v19483_v48, %v5166_v44  ;;  %v5801_v50 = vmul.f32 1.442695, %v5590_v35  ;;  %v15649_v48 = vpop.xlane.xlu1 %4810 }
 0x3af   : > { %19466 = vst [vmem:[#allocation119_spill] sm:$0xff] %v15553_v30  ;;  %6212 = vperm.xlu1 %11236, %v15553_v30   ;;  %v15563_v60 = vpop.eup %11673  ;;  %11705 = vpow2.f32 %v5665_v9  ;;  %v5218_v9 = vrot.slane %v15599_v4, %v15395_v38  ;;  %v5805_v0 = vmul.f32 1.442695, %v5592_v22  ;;  %v4938_v35 = vrot.slane %v15649_v48, %v15366_v23 }
 0x3b0   : > { %19468 = vst [vmem:[#allocation55_spill] sm:$0xff] %v15563_v60  ;;  %v15565_v59 = vpop.eup %11675  ;;  %11707 = vpow2.f32 %v5647_v32  ;;  %v19486_v32 = vld [vmem:[#allocation28_spill] sm:$0xff]  ;;  %v5783_v24 = vmul.f32 1.442695, %v5581_v46  ;;  %v5585_v58 = vsub.f32 %v14760_v29, %v5182_v53 }
 0x3b1   : > { %19469 = vst [vmem:[#allocation120_spill] sm:$0xff] %v15565_v59  ;;  %v15575_v10 = vpop.eup %11677  ;;  %11709 = vpow2.f32 %v5797_v12  ;;  %v5583_v44 = vsub.f32 %v19486_v32, %v5174_v18  ;;  %v5594_v13 = vsub.f32 %v14971_v51, %v5218_v9  ;;  %v4902_v18 = vrot.slane %v15549_v42, %v19439_v19 }
 0x3b2   : > { %6023 = vperm.xlu0 %11235, %v15551_v16   ;;  %19471 = vst [vmem:[#allocation73_spill] sm:$0xff] %v15575_v10  ;;  %v15577_v16 = vpop.eup %11679  ;;  %11711 = vpow2.f32 %v5779_v41  ;;  %v4946_v9 = vrot.slane %v15649_v48, %v15369_v40  ;;  %v5524_v22 = vsub.f32 %v14851_v17, %v4938_v35  ;;  %v5791_v29 = vmul.f32 1.442695, %v5585_v58 }
 0x3b3   : > { %6218 = vperm.xlu1 %11236, %v15565_v59   ;;  %19472 = vst [vmem:[#allocation121_spill] sm:$0xff] %v15577_v16  ;;  %v15587_v54 = vpop.eup %11681  ;;  %11713 = vpow2.f32 %v5801_v50  ;;  %v5787_v12 = vmul.f32 1.442695, %v5583_v44  ;;  %v5809_v51 = vmul.f32 1.442695, %v5594_v13  ;;  %v4910_v50 = vrot.slane %v15549_v42, %v15437_v55 }
 0x3b4   : > { %19474 = vst [vmem:[#allocation37_spill] sm:$0xff] %v15587_v54  ;;  %v5515_v53 = vsub.f32 %v14796_v62, %v4902_v18  ;;  %v5526_v17 = vsub.f32 %v14927_v26, %v4946_v9  ;;  %v5669_v13 = vmul.f32 1.442695, %v5524_v22  ;;  %v4962_v18 = vrot.slane %v15649_v48, %v15395_v38 }
 0x3b5   : > { %v5517_v62 = vsub.f32 %v14813_v2, %v4910_v50  ;;  %v4926_v9 = vrot.slane %v15549_v42, %v15465_v21 }
 0x3b6   : > { %6041 = vperm.xlu0 %11235, %v15563_v60   ;;  %v15589_v60 = vpop.eup %11683  ;;  %11715 = vpow2.f32 %v5783_v24  ;;  %v4954_v24 = vrot.slane %v15649_v48, %v15380_v37  ;;  %v5651_v35 = vmul.f32 1.442695, %v5515_v53 }
 0x3b7   : > { %6224 = vperm.xlu1 %11236, %v15577_v16   ;;  %19475 = vst [vmem:[#allocation122_spill] sm:$0xff] %v15589_v60  ;;  %v15601_v45 = vpop.eup %11685  ;;  %11717 = vpow2.f32 %v5805_v0  ;;  %v4918_v0 = vrot.slane %v15549_v42, %v15451_v49  ;;  %v5655_v22 = vmul.f32 1.442695, %v5517_v62 }
 0x3b8   : > { %19476 = vst [vmem:[#allocation123_spill] sm:$0xff] %v15601_v45  ;;  %v5528_v26 = vsub.f32 %v14957_v47, %v4954_v24  ;;  %v5530_v24 = vsub.f32 %v15011_v28, %v4962_v18 }
 0x3b9   : > { %v5519_v2 = vsub.f32 %v14837_v56, %v4918_v0  ;;  %v5521_v56 = vsub.f32 %v14892_v5, %v4926_v9 }
 0x3ba   : > { %6239 = vperm.xlu0 %11235, %v15575_v10   ;;  %v5681_v18 = vmul.f32 1.442695, %v5530_v24  ;;  %v5206_v24 = vrot.slane %v15599_v4, %v15451_v49 }
 0x3bb   : > { %6230 = vperm.xlu1 %11236, %v15589_v60   ;;  %v5659_v42 = vmul.f32 1.442695, %v5519_v2  ;;  %v5663_v5 = vmul.f32 1.442695, %v5521_v56 }
 0x3be   : > { %6245 = vperm.xlu0 %11235, %v15587_v54   ;;  %v15603_v54 = vpop.eup %11687  ;;  %11719 = vpow2.f32 %v5787_v12 }
 0x3bf   : > { %19477 = vst [vmem:[#allocation124_spill] sm:$0xff] %v15603_v54  ;;  %6020 = vperm.xlu1 %11236, %v15603_v54   ;;  %v15613_v11 = vpop.eup %11689  ;;  %11721 = vpow2.f32 %v5809_v51  ;;  %v5673_v51 = vmul.f32 1.442695, %v5526_v17  ;;  %v5677_v17 = vmul.f32 1.442695, %v5528_v26  ;;  %v5198_v26 = vrot.slane %v15599_v4, %v15437_v55 }
 0x3c0   : > { %19478 = vst [vmem:[#allocation125_spill] sm:$0xff] %v15613_v11  ;;  %v15615_v25 = vpop.eup %11691  ;;  %11723 = vpow2.f32 %v5791_v29  ;;  %v15699_v29 = vpop.xlane.xlu0 %4837 }
 0x3c1   : > { %19479 = vst [vmem:[#allocation126_spill] sm:$0xff] %v15615_v25  ;;  %v15625_v7 = vpop.eup %11693  ;;  %11725 = vpow2.f32 %v5669_v13  ;;  %v5226_v47 = vrot.slane %v15699_v29, %v15366_v23  ;;  %v5190_v13 = vrot.slane %v15599_v4, %v19439_v19  ;;  %v5234_v28 = vrot.slane %v15699_v29, %v15369_v40 }
 0x3c2   : > { %6251 = vperm.xlu0 %11235, %v15601_v45   ;;  %19481 = vst [vmem:[#allocation43_spill] sm:$0xff] %v15625_v7  ;;  %v15627_v36 = vpop.eup %11695  ;;  %11727 = vpow2.f32 %v5651_v35 }
 0x3c3   : > { %6026 = vperm.xlu1 %11236, %v15615_v25   ;;  %19482 = vst [vmem:[#allocation127_spill] sm:$0xff] %v15627_v36  ;;  %v15637_v6 = vpop.eup %11697  ;;  %11729 = vpow2.f32 %v5673_v51  ;;  %v5596_v35 = vsub.f32 %v14858_v33, %v5226_v47  ;;  %v5587_v51 = vsub.f32 %v14825_v63, %v5190_v13  ;;  %v5242_v33 = vrot.slane %v15699_v29, %v15380_v37  ;;  %v19501_v63 = vld [vmem:[#allocation60_spill] sm:$0xff] }
 0x3c4   : > { %19484 = vst [vmem:[#allocation33_spill] sm:$0xff] %v15637_v6 }
 0x3c5   : > { %v5813_v47 = vmul.f32 1.442695, %v5596_v35  ;;  %v5795_v56 = vmul.f32 1.442695, %v5587_v51  ;;  %v15749_v51 = vpop.xlane.xlu1 %4813 }
 0x3c6   : > { %6257 = vperm.xlu0 %11235, %v15613_v11   ;;  %v15639_v11 = vpop.eup %11699  ;;  %11731 = vpow2.f32 %v5655_v22  ;;  %v5598_v22 = vsub.f32 %v14941_v1, %v5234_v28  ;;  %v5250_v1 = vrot.slane %v15699_v29, %v15395_v38  ;;  %v5600_v28 = vsub.f32 %v14990_v34, %v5242_v33 }
 0x3c7   : > { %6029 = vperm.xlu1 %11236, %v15627_v36   ;;  %19485 = vst [vmem:[#allocation128_spill] sm:$0xff] %v15639_v11 }
 0x3c8   : > { %v5817_v35 = vmul.f32 1.442695, %v5598_v22  ;;  %v5602_v34 = vsub.f32 %v14984_v15, %v5250_v1  ;;  %v5821_v33 = vmul.f32 1.442695, %v5600_v28  ;;  %v4970_v22 = vrot.slane %v15749_v51, %v15366_v23  ;;  %v19509_v28 = vld [vmem:[#allocation86_spill] sm:$0xff] }
 0x3c9   : > { %v4978_v1 = vrot.slane %v15749_v51, %v15369_v40 }
 0x3ca   : > { %6047 = vperm.xlu0 %11235, %v15625_v7   ;;  %v15651_v7 = vpop.eup %11701  ;;  %11733 = vpow2.f32 %v5677_v17  ;;  %v5589_v17 = vsub.f32 %v19501_v63, %v5198_v26  ;;  %v5825_v15 = vmul.f32 1.442695, %v5602_v34  ;;  %v4986_v34 = vrot.slane %v15749_v51, %v15380_v37 }
 0x3cb   : > { %6032 = vperm.xlu1 %11236, %v15639_v11   ;;  %19487 = vst [vmem:[#allocation28_spill] sm:$0xff] %v15651_v7 }
 0x3cc   : > { %v5799_v26 = vmul.f32 1.442695, %v5589_v17 }
 0x3ce   : > { %6053 = vperm.xlu0 %11235, %v15637_v6   ;;  %v15653_v6 = vpop.eup %11703  ;;  %11735 = vpow2.f32 %v5659_v42 }
 0x3cf   : > { %19488 = vst [vmem:[#allocation129_spill] sm:$0xff] %v15653_v6  ;;  %6035 = vperm.xlu1 %11236, %v15653_v6   ;;  %v15663_v46 = vpop.eup %11705  ;;  %11737 = vpow2.f32 %v5681_v18  ;;  %v5214_v18 = vrot.slane %v15599_v4, %v15465_v21 }
 0x3d0   : > { %19489 = vst [vmem:[#allocation130_spill] sm:$0xff] %v15663_v46  ;;  %v15665_v41 = vpop.eup %11707  ;;  %11739 = vpow2.f32 %v5663_v5  ;;  %v5591_v5 = vsub.f32 %v14882_v14, %v5206_v24  ;;  %v19506_v14 = vld [vmem:[#allocation83_spill] sm:$0xff]  ;;  %v4934_v24 = vrot.slane %v15649_v48, %v19439_v19 }
 0x3d1   : > { %19490 = vst [vmem:[#allocation131_spill] sm:$0xff] %v15665_v41  ;;  %v15675_v32 = vpop.eup %11709  ;;  %11741 = vpow2.f32 %v5813_v47  ;;  %v5593_v4 = vsub.f32 %v19506_v14, %v5214_v18 }
 0x3d2   : > { %6059 = vperm.xlu0 %11235, %v15651_v7   ;;  %19491 = vst [vmem:[#allocation132_spill] sm:$0xff] %v15675_v32  ;;  %v15677_v44 = vpop.eup %11711  ;;  %11743 = vpow2.f32 %v5795_v56  ;;  %v5803_v47 = vmul.f32 1.442695, %v5591_v5  ;;  %v4942_v5 = vrot.slane %v15649_v48, %v15437_v55 }
 0x3d3   : > { %6038 = vperm.xlu1 %11236, %v15665_v41   ;;  %19492 = vst [vmem:[#allocation133_spill] sm:$0xff] %v15677_v44  ;;  %v15687_v58 = vpop.eup %11713  ;;  %11745 = vpow2.f32 %v5817_v35  ;;  %v5532_v35 = vsub.f32 %v19509_v28, %v4970_v22  ;;  %v5807_v18 = vmul.f32 1.442695, %v5593_v4  ;;  %v4950_v4 = vrot.slane %v15649_v48, %v15451_v49 }
 0x3d4   : > { %19493 = vst [vmem:[#allocation134_spill] sm:$0xff] %v15687_v58  ;;  %v15689_v12 = vpop.eup %11715  ;;  %11747 = vpow2.f32 %v5799_v26  ;;  %v19510_v26 = vld [vmem:[#allocation57_spill] sm:$0xff] }
 0x3d5   : > { %19494 = vst [vmem:[#allocation135_spill] sm:$0xff] %v15689_v12  ;;  %v15701_v50 = vpop.eup %11717  ;;  %11749 = vpow2.f32 %v5821_v33  ;;  %v5523_v14 = vsub.f32 %v19510_v26, %v4934_v24  ;;  %v19513_v33 = vld [vmem:[#allocation89_spill] sm:$0xff]  ;;  %v5685_v28 = vmul.f32 1.442695, %v5532_v35 }
 0x3d6   : > { %6065 = vperm.xlu0 %11235, %v15663_v46   ;;  %19495 = vst [vmem:[#allocation136_spill] sm:$0xff] %v15701_v50  ;;  %v15703_v53 = vpop.eup %11719  ;;  %11751 = vpow2.f32 %v5803_v47  ;;  %v5534_v22 = vsub.f32 %v19513_v33, %v4978_v1  ;;  %v19514_v47 = vld [vmem:[#allocation34_spill] sm:$0xff]  ;;  %v19517_v1 = vld [vmem:[#allocation77_spill] sm:$0xff] }
 0x3d7   : > { %6236 = vperm.xlu1 %11236, %v15677_v44   ;;  %19496 = vst [vmem:[#allocation137_spill] sm:$0xff] %v15703_v53  ;;  %v15713_v0 = vpop.eup %11721  ;;  %11753 = vpow2.f32 %v5825_v15  ;;  %v5525_v24 = vsub.f32 %v19514_v47, %v4942_v5  ;;  %v5667_v26 = vmul.f32 1.442695, %v5523_v14  ;;  %v4994_v15 = vrot.slane %v15749_v51, %v15395_v38  ;;  %v19518_v5 = vld [vmem:[#allocation25_spill] sm:$0xff] }
 0x3d8   : > { %19497 = vst [vmem:[#allocation138_spill] sm:$0xff] %v15713_v0  ;;  %v15715_v62 = vpop.eup %11723  ;;  %11755 = vpow2.f32 %v5807_v18  ;;  %v5536_v35 = vsub.f32 %v19517_v1, %v4986_v34  ;;  %v5689_v33 = vmul.f32 1.442695, %v5534_v22  ;;  %v4958_v18 = vrot.slane %v15649_v48, %v15465_v21  ;;  %v19521_v34 = vld [vmem:[#allocation74_spill] sm:$0xff] }
 0x3d9   : > { %19498 = vst [vmem:[#allocation139_spill] sm:$0xff] %v15715_v62  ;;  %v15725_v9 = vpop.eup %11725  ;;  %11757 = vpow2.f32 %v5685_v28  ;;  %v5527_v14 = vsub.f32 %v19518_v5, %v4950_v4  ;;  %v5671_v47 = vmul.f32 1.442695, %v5525_v24  ;;  %v5538_v28 = vsub.f32 %v19521_v34, %v4994_v15  ;;  %v19522_v4 = vld [vmem:[#allocation84_spill] sm:$0xff] }
 0x3da   : > { %6263 = vperm.xlu0 %11235, %v15675_v32   ;;  %19499 = vst [vmem:[#allocation140_spill] sm:$0xff] %v15725_v9  ;;  %v15727_v2 = vpop.eup %11727  ;;  %11759 = vpow2.f32 %v5667_v26  ;;  %v5693_v22 = vmul.f32 1.442695, %v5536_v35  ;;  %v5222_v48 = vrot.slane %v15699_v29, %v19439_v19  ;;  %v5529_v24 = vsub.f32 %v19522_v4, %v4958_v18 }
 0x3db   : > { %6242 = vperm.xlu1 %11236, %v15689_v12   ;;  %19500 = vst [vmem:[#allocation141_spill] sm:$0xff] %v15727_v2  ;;  %v15737_v42 = vpop.eup %11729  ;;  %11761 = vpow2.f32 %v5689_v33  ;;  %v5675_v26 = vmul.f32 1.442695, %v5527_v14  ;;  %v5697_v15 = vmul.f32 1.442695, %v5538_v28  ;;  %v19525_v33 = vld [vmem:[#allocation22_spill] sm:$0xff]  ;;  %v5230_v18 = vrot.slane %v15699_v29, %v15437_v55 }
 0x3dc   : > { %19502 = vst [vmem:[#allocation60_spill] sm:$0xff] %v15737_v42  ;;  %v15739_v13 = vpop.eup %11731  ;;  %11763 = vpow2.f32 %v5671_v47  ;;  %v19526_v14 = vld [vmem:[#allocation54_spill] sm:$0xff]  ;;  %v5679_v4 = vmul.f32 1.442695, %v5529_v24 }
 0x3dd   : > { %19503 = vst [vmem:[#allocation142_spill] sm:$0xff] %v15739_v13  ;;  %v15751_v63 = vpop.eup %11733  ;;  %11765 = vpow2.f32 %v5693_v22  ;;  %v5595_v47 = vsub.f32 %v19526_v14, %v5222_v48  ;;  %v19529_v22 = vld [vmem:[#allocation56_spill] sm:$0xff]  ;;  %v5238_v48 = vrot.slane %v15699_v29, %v15451_v49  ;;  %v19530_v24 = vld [vmem:[#allocation58_spill] sm:$0xff] }
 0x3de   : > { %6269 = vperm.xlu0 %11235, %v15687_v58   ;;  %19504 = vst [vmem:[#allocation143_spill] sm:$0xff] %v15751_v63 }
 0x3df   : > { %6248 = vperm.xlu1 %11236, %v15703_v53   ;;  %v5811_v14 = vmul.f32 1.442695, %v5595_v47  ;;  %v19534_v47 = vld [vmem:[#allocation38_spill] sm:$0xff] }
 0x3e2   : > { %6275 = vperm.xlu0 %11235, %v15701_v50  }
 0x3e3   : > { %6254 = vperm.xlu1 %11236, %v15715_v62  }
 0x3e6   : > { %6281 = vperm.xlu0 %11235, %v15713_v0  }
 0x3e7   : > { %6044 = vperm.xlu1 %11236, %v15727_v2  }
 0x3ea   : > { %6071 = vperm.xlu0 %11235, %v15725_v9  }
 0x3eb   : > { %6050 = vperm.xlu1 %11236, %v15739_v13  }
 0x3ee   : > { %6077 = vperm.xlu0 %11235, %v15737_v42   ;;  %v15753_v42 = vpop.eup %11735  ;;  %11767 = vpow2.f32 %v5675_v26  ;;  %v5597_v26 = vsub.f32 %v19530_v24, %v5230_v18  ;;  %v5246_v18 = vrot.slane %v15699_v29, %v15465_v21  ;;  %v19538_v29 = vld [vmem:[#allocation39_spill] sm:$0xff] }
 0x3ef   : > { %19505 = vst [vmem:[#allocation144_spill] sm:$0xff] %v15753_v42  ;;  %6056 = vperm.xlu1 %11236, %v15753_v42   ;;  %v15763_v17 = vpop.eup %11737  ;;  %11769 = vpow2.f32 %v5697_v15 }
 0x3f0   : > { %19507 = vst [vmem:[#allocation83_spill] sm:$0xff] %v15763_v17  ;;  %v15765_v56 = vpop.eup %11739  ;;  %11771 = vpow2.f32 %v5679_v4  ;;  %v5599_v4 = vsub.f32 %v19534_v47, %v5238_v48  ;;  %v5815_v24 = vmul.f32 1.442695, %v5597_v26  ;;  %v5601_v48 = vsub.f32 %v19538_v29, %v5246_v18  ;;  %v19541_v18 = vld [vmem:[#allocation78_spill] sm:$0xff]  ;;  %v19542_v29 = vld [vmem:[#allocation76_spill] sm:$0xff] }
 0x3f1   : > { %19508 = vst [vmem:[#allocation145_spill] sm:$0xff] %v15765_v56 }
 0x3f2   : > { %6083 = vperm.xlu0 %11235, %v15751_v63   ;;  %v15775_v63 = vpop.eup %11741  ;;  %v5819_v26 = vmul.f32 1.442695, %v5599_v4 }
 0x3f3   : > { %6062 = vperm.xlu1 %11236, %v15765_v56   ;;  %19511 = vst [vmem:[#allocation86_spill] sm:$0xff] %v15775_v63  ;;  %v15777_v9 = vpop.eup %11743 }
 0x3f4   : > { %19512 = vst [vmem:[#allocation57_spill] sm:$0xff] %v15777_v9 }
 0x3f6   : > { %6089 = vperm.xlu0 %11235, %v15763_v17   ;;  %v15787_v17 = vpop.eup %11745 }
 0x3f7   : > { %6260 = vperm.xlu1 %11236, %v15777_v9   ;;  %19515 = vst [vmem:[#allocation89_spill] sm:$0xff] %v15787_v17  ;;  %v15789_v0 = vpop.eup %11747 }
 0x3f8   : > { %19516 = vst [vmem:[#allocation34_spill] sm:$0xff] %v15789_v0  ;;  %v15801_v50 = vpop.eup %11749 }
 0x3f9   : > { %19519 = vst [vmem:[#allocation77_spill] sm:$0xff] %v15801_v50 }
 0x3fa   : > { %6287 = vperm.xlu0 %11235, %v15775_v63   ;;  %v15799_v63 = vpop.xlane.xlu1 %4840 }
 0x3fb   : > { %6266 = vperm.xlu1 %11236, %v15789_v0   ;;  %v5258_v1 = vrot.slane %v15799_v63, %v15366_v23  ;;  %v5266_v35 = vrot.slane %v15799_v63, %v15369_v40  ;;  %v5274_v28 = vrot.slane %v15799_v63, %v15380_v37 }
 0x3fd   : > { %v5604_v34 = vsub.f32 %v19525_v33, %v5258_v1  ;;  %v5606_v1 = vsub.f32 %v19529_v22, %v5266_v35  ;;  %v5282_v35 = vrot.slane %v15799_v63, %v15395_v38 }
 0x3fe   : > { %6293 = vperm.xlu0 %11235, %v15787_v17   ;;  %v15803_v17 = vpop.eup %11751  ;;  %v15815_v0 = vpop.xlane.xlu1 %4816 }
 0x3ff   : > { %19520 = vst [vmem:[#allocation25_spill] sm:$0xff] %v15803_v17  ;;  %6272 = vperm.xlu1 %11236, %v15803_v17   ;;  %v15813_v5 = vpop.eup %11753  ;;  %v5829_v33 = vmul.f32 1.442695, %v5604_v34  ;;  %v19533_v34 = vld [vmem:[#allocation59_spill] sm:$0xff] }
 0x400   : > { %19523 = vst [vmem:[#allocation74_spill] sm:$0xff] %v15813_v5  ;;  %v5608_v22 = vsub.f32 %v19533_v34, %v5274_v28  ;;  %v19537_v28 = vld [vmem:[#allocation29_spill] sm:$0xff]  ;;  %v5002_v34 = vrot.slane %v15815_v0, %v15366_v23 }
 0x401   : > { %11773 = vpow2.f32 %v5829_v33 }
 0x402   : > { %6299 = vperm.xlu0 %11235, %v15801_v50   ;;  %v15817_v50 = vpop.eup %11755  ;;  %11775 = vpow2.f32 %v5811_v14  ;;  %v5837_v33 = vmul.f32 1.442695, %v5608_v22  ;;  %v4966_v14 = vrot.slane %v15749_v51, %v19439_v19  ;;  %v5010_v22 = vrot.slane %v15815_v0, %v15369_v40 }
 0x403   : > { %19524 = vst [vmem:[#allocation84_spill] sm:$0xff] %v15817_v50  ;;  %6278 = vperm.xlu1 %11236, %v15817_v50   ;;  %v15827_v17 = vpop.eup %11757  ;;  %v5540_v4 = vsub.f32 %v19541_v18, %v5002_v34  ;;  %v5018_v34 = vrot.slane %v15815_v0, %v15380_v37 }
 0x404   : > { %19527 = vst [vmem:[#allocation22_spill] sm:$0xff] %v15827_v17  ;;  %v15829_v58 = vpop.eup %11759 }
 0x405   : > { %19528 = vst [vmem:[#allocation54_spill] sm:$0xff] %v15829_v58  ;;  %v15841_v50 = vpop.eup %11761  ;;  %v5701_v18 = vmul.f32 1.442695, %v5540_v4  ;;  %v19549_v4 = vld [vmem:[#allocation31_spill] sm:$0xff] }
 0x406   : > { %6305 = vperm.xlu0 %11235, %v15813_v5   ;;  %v15835_v5 = vpop.xlane.xlu1 %4843  ;;  %19531 = vst [vmem:[#allocation56_spill] sm:$0xff] %v15841_v50  ;;  %v15843_v15 = vpop.eup %11763 }
 0x407   : > { %6068 = vperm.xlu1 %11236, %v15829_v58   ;;  %19532 = vst [vmem:[#allocation58_spill] sm:$0xff] %v15843_v15  ;;  %v15855_v9 = vpop.eup %11765 }
 0x408   : > { %19535 = vst [vmem:[#allocation59_spill] sm:$0xff] %v15855_v9  ;;  %v15859_v32 = vpop.eup %11767 }
 0x409   : > { %19536 = vst [vmem:[#allocation38_spill] sm:$0xff] %v15859_v32  ;;  %v15869_v47 = vpop.eup %11769 }
 0x40a   : > { %6095 = vperm.xlu0 %11235, %v15827_v17   ;;  %v5833_v17 = vmul.f32 1.442695, %v5606_v1  ;;  %v15849_v58 = vpop.xlane.xlu1 %4819  ;;  %v5610_v1 = vsub.f32 %v19537_v28, %v5282_v35  ;;  %19539 = vst [vmem:[#allocation29_spill] sm:$0xff] %v15869_v47  ;;  %v4974_v28 = vrot.slane %v15749_v51, %v15437_v55 }
 0x40b   : > { %6074 = vperm.xlu1 %11236, %v15843_v15  }
 0x40c   : > { %11777 = vpow2.f32 %v5833_v17  ;;  %v15875_v17 = vpop.eup %11771  ;;  %v5841_v35 = vmul.f32 1.442695, %v5610_v1 }
 0x40d   : > { %11779 = vpow2.f32 %v5815_v24  ;;  %19540 = vst [vmem:[#allocation39_spill] sm:$0xff] %v15875_v17  ;;  %v5823_v24 = vmul.f32 1.442695, %v5601_v48  ;;  %v15885_v56 = vpop.eup %11773  ;;  %v19545_v48 = vld [vmem:[#allocation65_spill] sm:$0xff] }
 0x40e   : > { %6101 = vperm.xlu0 %11235, %v15841_v50   ;;  %v15871_v15 = vpop.xlane.xlu1 %4846  ;;  %11781 = vpow2.f32 %v5837_v33  ;;  %19543 = vst [vmem:[#allocation78_spill] sm:$0xff] %v15885_v56  ;;  %v15891_v1 = vpop.eup %11775 }
 0x40f   : > { %6080 = vperm.xlu1 %11236, %v15859_v32   ;;  %11783 = vpow2.f32 %v5819_v26  ;;  %v5531_v32 = vsub.f32 %v19542_v29, %v4966_v14  ;;  %19544 = vst [vmem:[#allocation76_spill] sm:$0xff] %v15891_v1  ;;  %v5542_v26 = vsub.f32 %v19545_v48, %v5010_v22  ;;  %v4982_v14 = vrot.slane %v15749_v51, %v15451_v49  ;;  %v19546_v29 = vld [vmem:[#allocation87_spill] sm:$0xff] }
 0x410   : > { %11785 = vpow2.f32 %v5841_v35  ;;  %v5026_v22 = vrot.slane %v15815_v0, %v15395_v38  ;;  %v5544_v48 = vsub.f32 %v19549_v4, %v5018_v34  ;;  %v19553_v34 = vld [vmem:[#allocation24_spill] sm:$0xff]  ;;  %v5290_v4 = vrot.slane %v15835_v5, %v15366_v23 }
 0x411   : > { %v15857_v50 = vpop.permute.xlu0 %6191  ;;  %11787 = vpow2.f32 %v5823_v24  ;;  %v5705_v24 = vmul.f32 1.442695, %v5542_v26 }
 0x412   : > { %6107 = vperm.xlu0 %11235, %v15855_v9   ;;  %v15887_v46 = vpop.xlane.xlu1 %4822  ;;  %11789 = vpow2.f32 %v5701_v18  ;;  %v5546_v26 = vsub.f32 %v19553_v34, %v5026_v22  ;;  %v5709_v18 = vmul.f32 1.442695, %v5544_v48  ;;  %v19557_v34 = vld [vmem:[#allocation79_spill] sm:$0xff] }
 0x413   : > { %6086 = vperm.xlu1 %11236, %v15875_v17   ;;  %v5683_v17 = vmul.f32 1.442695, %v5531_v32  ;;  %v4990_v32 = vrot.slane %v15749_v51, %v15465_v21 }
 0x414   : > { %v5713_v48 = vmul.f32 1.442695, %v5546_v26 }
 0x415   : > { %v15873_v9 = vpop.permute.xlu0 %6197  ;;  %11791 = vpow2.f32 %v5683_v17 }
 0x416   : > { %6113 = vperm.xlu0 %11235, %v15869_v47   ;;  %v5533_v47 = vsub.f32 %v19546_v29, %v4974_v28  ;;  %v15901_v42 = vpop.eup %11777  ;;  %v19550_v28 = vld [vmem:[#allocation61_spill] sm:$0xff]  ;;  %11793 = vpow2.f32 %v5705_v24  ;;  %v5298_v24 = vrot.slane %v15835_v5, %v15369_v40 }
 0x417   : > { %6284 = vperm.xlu1 %11236, %v15891_v1   ;;  %19547 = vst [vmem:[#allocation65_spill] sm:$0xff] %v15901_v42  ;;  %v15905_v35 = vpop.eup %11779  ;;  %v5535_v29 = vsub.f32 %v19550_v28, %v4982_v14  ;;  %v5254_v28 = vrot.slane %v15799_v63, %v19439_v19 }
 0x418   : > { %19548 = vst [vmem:[#allocation87_spill] sm:$0xff] %v15905_v35  ;;  %v5687_v1 = vmul.f32 1.442695, %v5533_v47  ;;  %v15917_v13 = vpop.eup %11781  ;;  %v19554_v47 = vld [vmem:[#allocation75_spill] sm:$0xff] }
 0x419   : > { %v15889_v33 = vpop.permute.xlu0 %6203  ;;  %19551 = vst [vmem:[#allocation31_spill] sm:$0xff] %v15917_v13  ;;  %v15921_v2 = vpop.eup %11783  ;;  %v5537_v17 = vsub.f32 %v19554_v47, %v4990_v32  ;;  %v5691_v14 = vmul.f32 1.442695, %v5535_v29  ;;  %v5612_v32 = vsub.f32 %v19557_v34, %v5290_v4  ;;  %v5262_v47 = vrot.slane %v15799_v63, %v15437_v55  ;;  %v19561_v34 = vld [vmem:[#allocation62_spill] sm:$0xff] }
 0x41a   : > { %6311 = vperm.xlu0 %11235, %v15885_v56   ;;  %v15912_v56 = vpop.xlane.xlu1 %4849  ;;  %19552 = vst [vmem:[#allocation61_spill] sm:$0xff] %v15921_v2  ;;  %11795 = vpow2.f32 %v5687_v1  ;;  %v5306_v4 = vrot.slane %v15835_v5, %v15380_v37 }
 0x41b   : > { %6290 = vperm.xlu1 %11236, %v15905_v35   ;;  %v15933_v35 = vpop.eup %11785  ;;  %11797 = vpow2.f32 %v5709_v18  ;;  %v5695_v29 = vmul.f32 1.442695, %v5537_v17  ;;  %v5845_v17 = vmul.f32 1.442695, %v5612_v32  ;;  %v19565_v32 = vld [vmem:[#allocation45_spill] sm:$0xff] }
 0x41c   : > { %19555 = vst [vmem:[#allocation24_spill] sm:$0xff] %v15933_v35  ;;  %v15937_v22 = vpop.eup %11787  ;;  %11799 = vpow2.f32 %v5691_v14  ;;  %v5614_v14 = vsub.f32 %v19561_v34, %v5298_v24  ;;  %v5314_v24 = vrot.slane %v15835_v5, %v15395_v38  ;;  %v5616_v34 = vsub.f32 %v19565_v32, %v5306_v4  ;;  %v19569_v4 = vld [vmem:[#allocation20_spill] sm:$0xff] }
 0x41d   : > { %v15903_v7 = vpop.permute.xlu0 %6209  ;;  %19556 = vst [vmem:[#allocation75_spill] sm:$0xff] %v15937_v22  ;;  %v15949_v53 = vpop.eup %11789  ;;  %11801 = vpow2.f32 %v5713_v48  ;;  %v5034_v32 = vrot.slane %v15849_v58, %v15366_v23 }
 0x41e   : > { %6317 = vperm.xlu0 %11235, %v15901_v42   ;;  %v15928_v51 = vpop.permute.xlu1 %6188  ;;  %19559 = vst [vmem:[#allocation79_spill] sm:$0xff] %v15949_v53  ;;  %11803 = vpow2.f32 %v5695_v29  ;;  %v5849_v29 = vmul.f32 1.442695, %v5614_v14  ;;  %v5618_v14 = vsub.f32 %v19569_v4, %v5314_v24  ;;  %v19574_v4 = vld [vmem:[#allocation53_spill] sm:$0xff] }
 0x41f   : > { %6296 = vperm.xlu1 %11236, %v15921_v2   ;;  %v19558_v2 = vld [vmem:[#allocation88_spill] sm:$0xff]  ;;  %v15953_v26 = vpop.eup %11791  ;;  %11805 = vpow2.f32 %v5845_v17  ;;  %v5853_v17 = vmul.f32 1.442695, %v5616_v34 }
 0x420   : > { %v5603_v62 = vsub.f32 %v19558_v2, %v5254_v28  ;;  %19560 = vst [vmem:[#allocation88_spill] sm:$0xff] %v15953_v26  ;;  %v5270_v2 = vrot.slane %v15799_v63, %v15451_v49  ;;  %v19562_v28 = vld [vmem:[#allocation44_spill] sm:$0xff]  ;;  %v15965_v12 = vpop.eup %11793  ;;  %v5857_v34 = vmul.f32 1.442695, %v5618_v14 }
 0x421   : > { %v15919_v42 = vpop.permute.xlu0 %6215  ;;  %19563 = vst [vmem:[#allocation62_spill] sm:$0xff] %v15965_v12 }
 0x422   : > { %6323 = vperm.xlu0 %11235, %v15917_v13   ;;  %v15944_v1 = vpop.permute.xlu1 %6194  ;;  %v5827_v45 = vmul.f32 1.442695, %v5603_v62  ;;  %v5278_v62 = vrot.slane %v15799_v63, %v15465_v21 }
 0x423   : > { %6302 = vperm.xlu1 %11236, %v15937_v22   ;;  %v5605_v22 = vsub.f32 %v19562_v28, %v5262_v47  ;;  %v19566_v47 = vld [vmem:[#allocation27_spill] sm:$0xff] }
 0x424   : > { %v5607_v28 = vsub.f32 %v19566_v47, %v5270_v2  ;;  %11807 = vpow2.f32 %v5827_v45  ;;  %v19570_v45 = vld [vmem:[#allocation80_spill] sm:$0xff]  ;;  %v4998_v47 = vrot.slane %v15815_v0, %v19439_v19 }
 0x425   : > { %v15935_v13 = vpop.permute.xlu0 %6221  ;;  %v5831_v44 = vmul.f32 1.442695, %v5605_v22  ;;  %11809 = vpow2.f32 %v5849_v29  ;;  %v5609_v22 = vsub.f32 %v19570_v45, %v5278_v62  ;;  %v5042_v29 = vrot.slane %v15849_v58, %v15369_v40 }
 0x426   : > { %6329 = vperm.xlu0 %11235, %v15933_v35   ;;  %v15960_v35 = vpop.permute.xlu1 %6200  ;;  %v5835_v2 = vmul.f32 1.442695, %v5607_v28  ;;  %v5548_v62 = vsub.f32 %v19574_v4, %v5034_v32  ;;  %v5006_v45 = vrot.slane %v15815_v0, %v15437_v55  ;;  %v5050_v32 = vrot.slane %v15849_v58, %v15380_v37  ;;  %v19578_v4 = vld [vmem:[#allocation40_spill] sm:$0xff] }
 0x427   : > { %6092 = vperm.xlu1 %11236, %v15953_v26   ;;  %11811 = vpow2.f32 %v5831_v44  ;;  %v5839_v28 = vmul.f32 1.442695, %v5609_v22 }
 0x428   : > { %11813 = vpow2.f32 %v5853_v17  ;;  %v5717_v22 = vmul.f32 1.442695, %v5548_v62  ;;  %v19583_v62 = vld [vmem:[#allocation92_spill] sm:$0xff] }
 0x429   : > { %v15951_v18 = vpop.permute.xlu0 %6227  ;;  %11815 = vpow2.f32 %v5835_v2  ;;  %v5550_v2 = vsub.f32 %v19578_v4, %v5042_v29  ;;  %v5058_v29 = vrot.slane %v15849_v58, %v15395_v38  ;;  %v5552_v4 = vsub.f32 %v19583_v62, %v5050_v32  ;;  %v19588_v32 = vld [vmem:[#allocation91_spill] sm:$0xff] }
 0x42a   : > { %6119 = vperm.xlu0 %11235, %v15949_v53   ;;  %v15969_v53 = vpop.eup %11795  ;;  %v15976_v26 = vpop.permute.xlu1 %6206  ;;  %11817 = vpow2.f32 %v5857_v34  ;;  %v5322_v62 = vrot.slane %v15871_v15, %v15366_v23 }
 0x42b   : > { %19564 = vst [vmem:[#allocation44_spill] sm:$0xff] %v15969_v53  ;;  %6098 = vperm.xlu1 %11236, %v15969_v53   ;;  %v15981_v10 = vpop.eup %11797  ;;  %11819 = vpow2.f32 %v5839_v28  ;;  %v5721_v28 = vmul.f32 1.442695, %v5550_v2  ;;  %v5554_v2 = vsub.f32 %v19588_v32, %v5058_v29  ;;  %v19593_v32 = vld [vmem:[#allocation67_spill] sm:$0xff] }
 0x42c   : > { %19567 = vst [vmem:[#allocation45_spill] sm:$0xff] %v15981_v10  ;;  %v15985_v41 = vpop.eup %11799  ;;  %11821 = vpow2.f32 %v5717_v22  ;;  %v5725_v22 = vmul.f32 1.442695, %v5552_v4 }
 0x42d   : > { %v15967_v48 = vpop.permute.xlu0 %6233  ;;  %19568 = vst [vmem:[#allocation27_spill] sm:$0xff] %v15985_v41  ;;  %v15997_v53 = vpop.eup %11801  ;;  %v5729_v4 = vmul.f32 1.442695, %v5554_v2 }
 0x42e   : > { %6125 = vperm.xlu0 %11235, %v15965_v12   ;;  %v15992_v63 = vpop.permute.xlu1 %6212  ;;  %19571 = vst [vmem:[#allocation20_spill] sm:$0xff] %v15997_v53  ;;  %v16001_v24 = vpop.eup %11803 }
 0x42f   : > { %6104 = vperm.xlu1 %11236, %v15985_v41   ;;  %19573 = vst [vmem:[#allocation146_spill] sm:$0xff] %v16001_v24  ;;  %v19575_v41 = vld [vmem:[#allocation81_spill] sm:$0xff]  ;;  %v16013_v6 = vpop.eup %11805 }
 0x430   : > { %v5539_v11 = vsub.f32 %v19575_v41, %v4998_v47  ;;  %19576 = vst [vmem:[#allocation53_spill] sm:$0xff] %v16013_v6  ;;  %v16017_v14 = vpop.eup %11807  ;;  %v5014_v41 = vrot.slane %v15815_v0, %v15451_v49  ;;  %v19579_v47 = vld [vmem:[#allocation82_spill] sm:$0xff] }
 0x431   : > { %v15983_v12 = vpop.permute.xlu0 %6023  ;;  %19577 = vst [vmem:[#allocation81_spill] sm:$0xff] %v16017_v14  ;;  %v16029_v36 = vpop.eup %11809 }
 0x432   : > { %6131 = vperm.xlu0 %11235, %v15981_v10   ;;  %v16008_v44 = vpop.permute.xlu1 %6218  ;;  %v5699_v25 = vmul.f32 1.442695, %v5539_v11  ;;  %19580 = vst [vmem:[#allocation40_spill] sm:$0xff] %v16029_v36  ;;  %v5022_v11 = vrot.slane %v15815_v0, %v15465_v21 }
 0x433   : > { %6110 = vperm.xlu1 %11236, %v16001_v24   ;;  %v5541_v24 = vsub.f32 %v19579_v47, %v5006_v45  ;;  %v19584_v45 = vld [vmem:[#allocation85_spill] sm:$0xff] }
 0x434   : > { %v5543_v47 = vsub.f32 %v19584_v45, %v5014_v41  ;;  %11823 = vpow2.f32 %v5699_v25  ;;  %v19589_v25 = vld [vmem:[#allocation30_spill] sm:$0xff]  ;;  %v5286_v45 = vrot.slane %v15835_v5, %v19439_v19 }
 0x435   : > { %v15999_v10 = vpop.permute.xlu0 %6041  ;;  %v5703_v54 = vmul.f32 1.442695, %v5541_v24  ;;  %11825 = vpow2.f32 %v5721_v28  ;;  %v5545_v24 = vsub.f32 %v19589_v25, %v5022_v11  ;;  %v5330_v28 = vrot.slane %v15871_v15, %v15369_v40 }
 0x436   : > { %19572 = vst [vmem:[#allocation80_spill] sm:$0xff] %v15999_v10  ;;  %6137 = vperm.xlu0 %11235, %v15997_v53   ;;  %v16024_v53 = vpop.permute.xlu1 %6224  ;;  %v5707_v41 = vmul.f32 1.442695, %v5543_v47  ;;  %v5620_v11 = vsub.f32 %v19593_v32, %v5322_v62  ;;  %v5294_v25 = vrot.slane %v15835_v5, %v15437_v55  ;;  %v5338_v62 = vrot.slane %v15871_v15, %v15380_v37  ;;  %v19597_v32 = vld [vmem:[#allocation48_spill] sm:$0xff] }
 0x437   : > { %6308 = vperm.xlu1 %11236, %v16017_v14   ;;  %11827 = vpow2.f32 %v5703_v54  ;;  %v5711_v47 = vmul.f32 1.442695, %v5545_v24 }
 0x438   : > { %11829 = vpow2.f32 %v5725_v22  ;;  %v5861_v24 = vmul.f32 1.442695, %v5620_v11  ;;  %v19601_v11 = vld [vmem:[#allocation96_spill] sm:$0xff] }
 0x439   : > { %v16015_v17 = vpop.permute.xlu0 %6239  ;;  %11831 = vpow2.f32 %v5707_v41  ;;  %v5622_v41 = vsub.f32 %v19597_v32, %v5330_v28  ;;  %v5346_v28 = vrot.slane %v15871_v15, %v15395_v38  ;;  %v5624_v32 = vsub.f32 %v19601_v11, %v5338_v62  ;;  %v19605_v62 = vld [vmem:[#allocation95_spill] sm:$0xff] }
 0x43a   : > { %6335 = vperm.xlu0 %11235, %v16013_v6   ;;  %v16033_v6 = vpop.eup %11811  ;;  %v16040_v14 = vpop.permute.xlu1 %6230  ;;  %11833 = vpow2.f32 %v5729_v4  ;;  %v5066_v11 = vrot.slane %v15887_v46, %v15366_v23 }
 0x43b   : > { %19582 = vst [vmem:[#allocation147_spill] sm:$0xff] %v16033_v6  ;;  %6314 = vperm.xlu1 %11236, %v16033_v6   ;;  %v16045_v60 = vpop.eup %11813  ;;  %11835 = vpow2.f32 %v5711_v47  ;;  %v5865_v47 = vmul.f32 1.442695, %v5622_v41  ;;  %v5626_v41 = vsub.f32 %v19605_v62, %v5346_v28  ;;  %v19609_v62 = vld [vmem:[#allocation97_spill] sm:$0xff] }
 0x43c   : > { %19585 = vst [vmem:[#allocation92_spill] sm:$0xff] %v16045_v60  ;;  %v16049_v16 = vpop.eup %11815  ;;  %11837 = vpow2.f32 %v5861_v24  ;;  %v5869_v24 = vmul.f32 1.442695, %v5624_v32 }
 0x43d   : > { %v16031_v34 = vpop.permute.xlu0 %6245  ;;  %19587 = vst [vmem:[#allocation148_spill] sm:$0xff] %v16049_v16  ;;  %v16061_v6 = vpop.eup %11817  ;;  %v5873_v32 = vmul.f32 1.442695, %v5626_v41 }
 0x43e   : > { %19581 = vst [vmem:[#allocation82_spill] sm:$0xff] %v16031_v34  ;;  %6341 = vperm.xlu0 %11235, %v16029_v36   ;;  %v16056_v0 = vpop.permute.xlu1 %6020  ;;  %19590 = vst [vmem:[#allocation91_spill] sm:$0xff] %v16061_v6  ;;  %v16065_v29 = vpop.eup %11819 }
 0x43f   : > { %6320 = vperm.xlu1 %11236, %v16049_v16   ;;  %19592 = vst [vmem:[#allocation149_spill] sm:$0xff] %v16065_v29  ;;  %v19594_v16 = vld [vmem:[#allocation36_spill] sm:$0xff]  ;;  %v16077_v39 = vpop.eup %11821 }
 0x440   : > { %v5611_v59 = vsub.f32 %v19594_v16, %v5286_v45  ;;  %19595 = vst [vmem:[#allocation67_spill] sm:$0xff] %v16077_v39  ;;  %v16081_v2 = vpop.eup %11823  ;;  %v5302_v16 = vrot.slane %v15835_v5, %v15451_v49  ;;  %v19598_v45 = vld [vmem:[#allocation64_spill] sm:$0xff] }
 0x441   : > { %v16047_v36 = vpop.permute.xlu0 %6251  ;;  %19596 = vst [vmem:[#allocation36_spill] sm:$0xff] %v16081_v2  ;;  %v16093_v3 = vpop.eup %11825 }
 0x442   : > { %19586 = vst [vmem:[#allocation85_spill] sm:$0xff] %v16047_v36  ;;  %6347 = vperm.xlu0 %11235, %v16045_v60   ;;  %v16072_v54 = vpop.permute.xlu1 %6026  ;;  %v5843_v30 = vmul.f32 1.442695, %v5611_v59  ;;  %19599 = vst [vmem:[#allocation48_spill] sm:$0xff] %v16093_v3  ;;  %v5310_v59 = vrot.slane %v15835_v5, %v15465_v21 }
 0x443   : > { %6326 = vperm.xlu1 %11236, %v16065_v29   ;;  %v5613_v29 = vsub.f32 %v19598_v45, %v5294_v25  ;;  %v19602_v25 = vld [vmem:[#allocation32_spill] sm:$0xff] }
 0x444   : > { %v5615_v45 = vsub.f32 %v19602_v25, %v5302_v16  ;;  %11839 = vpow2.f32 %v5843_v30  ;;  %v19606_v30 = vld [vmem:[#allocation70_spill] sm:$0xff]  ;;  %v5030_v25 = vrot.slane %v15849_v58, %v19439_v19 }
 0x445   : > { %v16063_v60 = vpop.permute.xlu0 %6257  ;;  %v5847_v27 = vmul.f32 1.442695, %v5613_v29  ;;  %11841 = vpow2.f32 %v5865_v47  ;;  %v5617_v29 = vsub.f32 %v19606_v30, %v5310_v59  ;;  %v5074_v47 = vrot.slane %v15887_v46, %v15369_v40 }
 0x446   : > { %19591 = vst [vmem:[#allocation30_spill] sm:$0xff] %v16063_v60  ;;  %6353 = vperm.xlu0 %11235, %v16061_v6   ;;  %v16088_v6 = vpop.permute.xlu1 %6029  ;;  %v5851_v16 = vmul.f32 1.442695, %v5615_v45  ;;  %v5556_v59 = vsub.f32 %v19609_v62, %v5066_v11  ;;  %v5038_v30 = vrot.slane %v15849_v58, %v15437_v55  ;;  %v5082_v11 = vrot.slane %v15887_v46, %v15380_v37  ;;  %v19614_v62 = vld [vmem:[#allocation100_spill] sm:$0xff] }
 0x447   : > { %6116 = vperm.xlu1 %11236, %v16081_v2   ;;  %11843 = vpow2.f32 %v5847_v27  ;;  %v5855_v45 = vmul.f32 1.442695, %v5617_v29 }
 0x448   : > { %11845 = vpow2.f32 %v5869_v24  ;;  %v5733_v29 = vmul.f32 1.442695, %v5556_v59  ;;  %v19618_v59 = vld [vmem:[#allocation104_spill] sm:$0xff] }
 0x449   : > { %v16079_v22 = vpop.permute.xlu0 %6047  ;;  %11847 = vpow2.f32 %v5851_v16  ;;  %v5558_v16 = vsub.f32 %v19614_v62, %v5074_v47  ;;  %v5090_v47 = vrot.slane %v15887_v46, %v15395_v38  ;;  %v5560_v62 = vsub.f32 %v19618_v59, %v5082_v11  ;;  %v19622_v11 = vld [vmem:[#allocation103_spill] sm:$0xff] }
 0x44a   : > { %6143 = vperm.xlu0 %11235, %v16077_v39   ;;  %v16097_v39 = vpop.eup %11827  ;;  %v16104_v2 = vpop.permute.xlu1 %6032  ;;  %11849 = vpow2.f32 %v5873_v32  ;;  %v5354_v59 = vrot.slane %v15912_v56, %v15366_v23 }
 0x44b   : > { %19600 = vst [vmem:[#allocation64_spill] sm:$0xff] %v16097_v39  ;;  %6122 = vperm.xlu1 %11236, %v16097_v39   ;;  %v16109_v61 = vpop.eup %11829  ;;  %11851 = vpow2.f32 %v5855_v45  ;;  %v5737_v45 = vmul.f32 1.442695, %v5558_v16  ;;  %v5562_v16 = vsub.f32 %v19622_v11, %v5090_v47  ;;  %v19627_v11 = vld [vmem:[#allocation105_spill] sm:$0xff] }
 0x44c   : > { %19603 = vst [vmem:[#allocation96_spill] sm:$0xff] %v16109_v61  ;;  %v16113_v57 = vpop.eup %11831  ;;  %11853 = vpow2.f32 %v5733_v29  ;;  %v5741_v29 = vmul.f32 1.442695, %v5560_v62 }
 0x44d   : > { %v16095_v4 = vpop.permute.xlu0 %6053  ;;  %19604 = vst [vmem:[#allocation32_spill] sm:$0xff] %v16113_v57  ;;  %v16125_v39 = vpop.eup %11833  ;;  %v5745_v62 = vmul.f32 1.442695, %v5562_v16 }
 0x44e   : > { %6149 = vperm.xlu0 %11235, %v16093_v3   ;;  %v16120_v5 = vpop.permute.xlu1 %6035  ;;  %19607 = vst [vmem:[#allocation95_spill] sm:$0xff] %v16125_v39  ;;  %v16129_v28 = vpop.eup %11835 }
 0x44f   : > { %6128 = vperm.xlu1 %11236, %v16113_v57   ;;  %19608 = vst [vmem:[#allocation70_spill] sm:$0xff] %v16129_v28  ;;  %v19611_v57 = vld [vmem:[#allocation66_spill] sm:$0xff]  ;;  %v16141_v8 = vpop.eup %11837 }
 0x450   : > { %v5547_v43 = vsub.f32 %v19611_v57, %v5030_v25  ;;  %19612 = vst [vmem:[#allocation66_spill] sm:$0xff] %v16141_v8  ;;  %v16145_v41 = vpop.eup %11839  ;;  %v5046_v57 = vrot.slane %v15849_v58, %v15451_v49  ;;  %v19615_v25 = vld [vmem:[#allocation63_spill] sm:$0xff] }
 0x451   : > { %v16111_v3 = vpop.permute.xlu0 %6059  ;;  %19613 = vst [vmem:[#allocation150_spill] sm:$0xff] %v16145_v41  ;;  %v16157_v36 = vpop.eup %11841 }
 0x452   : > { %6155 = vperm.xlu0 %11235, %v16109_v61   ;;  %v16136_v27 = vpop.permute.xlu1 %6038  ;;  %v5715_v60 = vmul.f32 1.442695, %v5547_v43  ;;  %19616 = vst [vmem:[#allocation100_spill] sm:$0xff] %v16157_v36  ;;  %v5054_v43 = vrot.slane %v15849_v58, %v15465_v21 }
 0x453   : > { %6134 = vperm.xlu1 %11236, %v16129_v28   ;;  %19610 = vst [vmem:[#allocation97_spill] sm:$0xff] %v16136_v27  ;;  %v5549_v28 = vsub.f32 %v19615_v25, %v5038_v30  ;;  %v19619_v30 = vld [vmem:[#allocation71_spill] sm:$0xff] }
 0x454   : > { %v5551_v25 = vsub.f32 %v19619_v30, %v5046_v57  ;;  %11855 = vpow2.f32 %v5715_v60  ;;  %v19624_v60 = vld [vmem:[#allocation90_spill] sm:$0xff]  ;;  %v5318_v30 = vrot.slane %v15871_v15, %v19439_v19 }
 0x455   : > { %v16127_v61 = vpop.permute.xlu0 %6065  ;;  %v5719_v10 = vmul.f32 1.442695, %v5549_v28  ;;  %11857 = vpow2.f32 %v5737_v45  ;;  %v5553_v28 = vsub.f32 %v19624_v60, %v5054_v43  ;;  %v5362_v45 = vrot.slane %v15912_v56, %v15369_v40 }
 0x456   : > { %6161 = vperm.xlu0 %11235, %v16125_v39   ;;  %v16152_v39 = vpop.permute.xlu1 %6236  ;;  %v5723_v57 = vmul.f32 1.442695, %v5551_v25  ;;  %v5628_v43 = vsub.f32 %v19627_v11, %v5354_v59  ;;  %v5326_v60 = vrot.slane %v15871_v15, %v15437_v55  ;;  %v5370_v59 = vrot.slane %v15912_v56, %v15380_v37 }
 0x457   : > { %6332 = vperm.xlu1 %11236, %v16145_v41   ;;  %11859 = vpow2.f32 %v5719_v10  ;;  %v5727_v25 = vmul.f32 1.442695, %v5553_v28 }
 0x458   : > { %11861 = vpow2.f32 %v5741_v29  ;;  %v5877_v28 = vmul.f32 1.442695, %v5628_v43 }
 0x459   : > { %v16143_v24 = vpop.permute.xlu0 %6263  ;;  %11863 = vpow2.f32 %v5723_v57  ;;  %v5630_v57 = vsub.f32 %v15408_v31, %v5362_v45  ;;  %v5378_v31 = vrot.slane %v15912_v56, %v15395_v38  ;;  %v5632_v45 = vsub.f32 %v15412_v20, %v5370_v59 }
 0x45a   : > { %6359 = vperm.xlu0 %11235, %v16141_v8   ;;  %v16161_v8 = vpop.eup %11843  ;;  %v16168_v41 = vpop.permute.xlu1 %6242  ;;  %11865 = vpow2.f32 %v5745_v62 }
 0x45b   : > { %19617 = vst [vmem:[#allocation63_spill] sm:$0xff] %v16161_v8  ;;  %6338 = vperm.xlu1 %11236, %v16161_v8   ;;  %v16173_v34 = vpop.eup %11845  ;;  %11867 = vpow2.f32 %v5727_v25  ;;  %v5881_v43 = vmul.f32 1.442695, %v5630_v57  ;;  %v5634_v20 = vsub.f32 %v15427_v52, %v5378_v31  ;;  %v5885_v59 = vmul.f32 1.442695, %v5632_v45 }
 0x45c   : > { %19620 = vst [vmem:[#allocation104_spill] sm:$0xff] %v16173_v34  ;;  %v16177_v27 = vpop.eup %11847  ;;  %11869 = vpow2.f32 %v5877_v28  ;;  %v5070_v45 = vrot.slane %v15887_v46, %v15437_v55 }
 0x45d   : > { %v16159_v32 = vpop.permute.xlu0 %6269  ;;  %19621 = vst [vmem:[#allocation71_spill] sm:$0xff] %v16177_v27  ;;  %v16189_v8 = vpop.eup %11849  ;;  %v5889_v52 = vmul.f32 1.442695, %v5634_v20 }
 0x45e   : > { %6365 = vperm.xlu0 %11235, %v16157_v36   ;;  %v16184_v58 = vpop.permute.xlu1 %6248  ;;  %19625 = vst [vmem:[#allocation90_spill] sm:$0xff] %v16189_v8  ;;  %v16193_v47 = vpop.eup %11851 }
 0x45f   : > { %6344 = vperm.xlu1 %11236, %v16177_v27   ;;  %19623 = vst [vmem:[#allocation103_spill] sm:$0xff] %v16184_v58  ;;  %19626 = vst [vmem:[#allocation151_spill] sm:$0xff] %v16193_v47  ;;  %v19629_v27 = vld [vmem:[#allocation26_spill] sm:$0xff]  ;;  %v16205_v58 = vpop.eup %11853 }
 0x460   : > { %v5619_v23 = vsub.f32 %v19629_v27, %v5318_v30  ;;  %19630 = vst [vmem:[#allocation26_spill] sm:$0xff] %v16205_v58  ;;  %v16209_v16 = vpop.eup %11855  ;;  %v5334_v27 = vrot.slane %v15871_v15, %v15451_v49  ;;  %v19632_v30 = vld [vmem:[#allocation50_spill] sm:$0xff] }
 0x461   : > { %v16175_v36 = vpop.permute.xlu0 %6275  ;;  %19631 = vst [vmem:[#allocation152_spill] sm:$0xff] %v16209_v16  ;;  %v16221_v40 = vpop.eup %11857 }
 0x462   : > { %6371 = vperm.xlu0 %11235, %v16173_v34   ;;  %v16200_v10 = vpop.permute.xlu1 %6254  ;;  %19633 = vst [vmem:[#allocation50_spill] sm:$0xff] %v16221_v40 }
 0x463   : > { %6350 = vperm.xlu1 %11236, %v16193_v47   ;;  %19628 = vst [vmem:[#allocation105_spill] sm:$0xff] %v16200_v10  ;;  %v5859_v47 = vmul.f32 1.442695, %v5619_v23  ;;  %v5342_v23 = vrot.slane %v15871_v15, %v15465_v21  ;;  %v19638_v15 = vld [vmem:[#allocation94_spill] sm:$0xff]  ;;  %v19662_v10 = vld [vmem:[#allocation35_spill] sm:$0xff] }
 0x465   : > { %v16191_v34 = vpop.permute.xlu0 %6281  ;;  %11871 = vpow2.f32 %v5859_v47  ;;  %v5625_v28 = vsub.f32 %v19638_v15, %v5342_v23  ;;  %v5062_v47 = vrot.slane %v15887_v46, %v19439_v19 }
 0x466   : > { %6377 = vperm.xlu0 %11235, %v16189_v8   ;;  %v16216_v11 = vpop.permute.xlu1 %6044  ;;  %v5621_v8 = vsub.f32 %v19632_v30, %v5326_v60  ;;  %v19635_v60 = vld [vmem:[#allocation93_spill] sm:$0xff]  ;;  %11873 = vpow2.f32 %v5881_v43  ;;  %v19641_v43 = vld [vmem:[#allocation98_spill] sm:$0xff] }
 0x467   : > { %6140 = vperm.xlu1 %11236, %v16209_v16   ;;  %v5623_v30 = vsub.f32 %v19635_v60, %v5334_v27  ;;  %v5555_v23 = vsub.f32 %v19641_v43, %v5062_v47 }
 0x468   : > { %v5863_v16 = vmul.f32 1.442695, %v5621_v8 }
 0x469   : > { %v16207_v29 = vpop.permute.xlu0 %6071  ;;  %v5867_v8 = vmul.f32 1.442695, %v5623_v30  ;;  %v5731_v47 = vmul.f32 1.442695, %v5555_v23 }
 0x46a   : > { %6167 = vperm.xlu0 %11235, %v16205_v58   ;;  %v16225_v58 = vpop.eup %11859  ;;  %v16232_v25 = vpop.permute.xlu1 %6050  ;;  %11875 = vpow2.f32 %v5863_v16  ;;  %v5871_v16 = vmul.f32 1.442695, %v5625_v28  ;;  %v19644_v28 = vld [vmem:[#allocation99_spill] sm:$0xff] }
 0x46b   : > { %19634 = vst [vmem:[#allocation153_spill] sm:$0xff] %v16225_v58  ;;  %6146 = vperm.xlu1 %11236, %v16225_v58   ;;  %v16237_v37 = vpop.eup %11861  ;;  %11877 = vpow2.f32 %v5885_v59  ;;  %v5078_v59 = vrot.slane %v15887_v46, %v15451_v49 }
 0x46c   : > { %19636 = vst [vmem:[#allocation93_spill] sm:$0xff] %v16237_v37  ;;  %v16241_v38 = vpop.eup %11863  ;;  %11879 = vpow2.f32 %v5867_v8  ;;  %v5557_v8 = vsub.f32 %v19644_v28, %v5070_v45 }
 0x46d   : > { %v16223_v62 = vpop.permute.xlu0 %6077  ;;  %19637 = vst [vmem:[#allocation154_spill] sm:$0xff] %v16241_v38  ;;  %v16251_v27 = vpop.eup %11865  ;;  %11881 = vpow2.f32 %v5889_v52 }
 0x46e   : > { %6173 = vperm.xlu0 %11235, %v16221_v40   ;;  %v16246_v57 = vpop.permute.xlu1 %6056  ;;  %19639 = vst [vmem:[#allocation94_spill] sm:$0xff] %v16251_v27  ;;  %11883 = vpow2.f32 %v5871_v16  ;;  %v5086_v16 = vrot.slane %v15887_v46, %v15465_v21  ;;  %v5735_v45 = vmul.f32 1.442695, %v5557_v8 }
 0x46f   : > { %6152 = vperm.xlu1 %11236, %v16241_v38   ;;  %11885 = vpow2.f32 %v5731_v47 }
 0x470   : > { %11887 = vpow2.f32 %v5735_v45 }
 0x471   : > { %v16239_v40 = vpop.permute.xlu0 %6083 }
 0x472   : > { %6179 = vperm.xlu0 %11235, %v16237_v37   ;;  %v16255_v37 = vpop.eup %11867  ;;  %v16259_v31 = vpop.permute.xlu1 %6062 }
 0x473   : > { %19640 = vst [vmem:[#allocation155_spill] sm:$0xff] %v16255_v37  ;;  %6158 = vperm.xlu1 %11236, %v16255_v37   ;;  %v16264_v30 = vpop.eup %11869 }
 0x474   : > { %19642 = vst [vmem:[#allocation98_spill] sm:$0xff] %v16264_v30  ;;  %v16268_v38 = vpop.eup %11871 }
 0x475   : > { %v16253_v60 = vpop.permute.xlu0 %6089  ;;  %19643 = vst [vmem:[#allocation156_spill] sm:$0xff] %v16268_v38  ;;  %v16277_v43 = vpop.eup %11873 }
 0x476   : > { %6185 = vperm.xlu0 %11235, %v16251_v27   ;;  %v16272_v20 = vpop.permute.xlu1 %6260  ;;  %19645 = vst [vmem:[#allocation99_spill] sm:$0xff] %v16277_v43  ;;  %v16281_v37 = vpop.eup %11875 }
 0x477   : > { %6356 = vperm.xlu1 %11236, %v16268_v38   ;;  %19647 = vst [vmem:[#allocation158_spill] sm:$0xff] %v16281_v37  ;;  %v16290_v23 = vpop.eup %11877 }
 0x478   : > { %v16294_v58 = vpop.eup %11879 }
 0x479   : > { %v16266_v15 = vpop.permute.xlu0 %6287  ;;  %19651 = vst [vmem:[#allocation160_spill] sm:$0xff] %v16294_v58 }
 0x47a   : > { %6383 = vperm.xlu0 %11235, %v16264_v30   ;;  %v16285_v52 = vpop.permute.xlu1 %6266  ;;  %v19648_v30 = vld [vmem:[#allocation101_spill] sm:$0xff] }
 0x47b   : > { %6362 = vperm.xlu1 %11236, %v16281_v37   ;;  %v5559_v38 = vsub.f32 %v19648_v30, %v5078_v59  ;;  %19649 = vst [vmem:[#allocation101_spill] sm:$0xff] %v16290_v23  ;;  %v19652_v37 = vld [vmem:[#allocation102_spill] sm:$0xff]  ;;  %v5350_v30 = vrot.slane %v15912_v56, %v19439_v19  ;;  %v16303_v59 = vpop.eup %11881 }
 0x47c   : > { %19653 = vst [vmem:[#allocation102_spill] sm:$0xff] %v16303_v59  ;;  %v16307_v47 = vpop.eup %11883 }
 0x47d   : > { %v16279_v27 = vpop.permute.xlu0 %6293  ;;  %v5739_v46 = vmul.f32 1.442695, %v5559_v38  ;;  %19655 = vst [vmem:[#allocation162_spill] sm:$0xff] %v16307_v47  ;;  %v19656_v38 = vld [vmem:[#allocation108_spill] sm:$0xff]  ;;  %v16318_v19 = vpop.eup %11885 }
 0x47e   : > { %19646 = vst [vmem:[#allocation157_spill] sm:$0xff] %v16279_v27  ;;  %6389 = vperm.xlu0 %11235, %v16277_v43   ;;  %v16298_v43 = vpop.permute.xlu1 %6272  ;;  %v5561_v27 = vsub.f32 %v19652_v37, %v5086_v16  ;;  %v5358_v37 = vrot.slane %v15912_v56, %v15437_v55  ;;  %v5627_v16 = vsub.f32 %v19656_v38, %v5350_v30  ;;  %19658 = vst [vmem:[#allocation163_spill] sm:$0xff] %v16318_v19  ;;  %v16328_v55 = vpop.eup %11887  ;;  %v19661_v38 = vld [vmem:[#allocation112_spill] sm:$0xff] }
 0x47f   : > { %6368 = vperm.xlu1 %11236, %v16294_v58   ;;  %11889 = vpow2.f32 %v5739_v46  ;;  %v5374_v30 = vrot.slane %v15912_v56, %v15465_v21 }
 0x480   : > { %v5743_v58 = vmul.f32 1.442695, %v5561_v27  ;;  %v5875_v27 = vmul.f32 1.442695, %v5627_v16 }
 0x481   : > { %v16292_v28 = vpop.permute.xlu0 %6299 }
 0x482   : > { %19650 = vst [vmem:[#allocation159_spill] sm:$0xff] %v16292_v28  ;;  %6395 = vperm.xlu0 %11235, %v16290_v23   ;;  %v16311_v23 = vpop.permute.xlu1 %6278  ;;  %11891 = vpow2.f32 %v5743_v58 }
 0x483   : > { %6374 = vperm.xlu1 %11236, %v16307_v47   ;;  %v19659_v47 = vld [vmem:[#allocation110_spill] sm:$0xff]  ;;  %11893 = vpow2.f32 %v5875_v27  ;;  %v6674_v27 = vrot.slane %v15935_v13, %v19662_v10 }
 0x484   : > { %v5629_v46 = vsub.f32 %v19659_v47, %v5358_v37  ;;  %19660 = vst [vmem:[#allocation110_spill] sm:$0xff] %v16328_v55  ;;  %v6670_v47 = vrot.slane %v16008_v44, %v19662_v10  ;;  %v6666_v37 = vrot.slane %v15919_v42, %v19662_v10  ;;  %v6678_v44 = vrot.slane %v16024_v53, %v19662_v10 }
 0x485   : > { %v16305_v8 = vpop.permute.xlu0 %6305  ;;  %v6438_v42 = vrot.slane %v16216_v11, %v19662_v10  ;;  %v6686_v11 = vrot.slane %v16040_v14, %v19662_v10  ;;  %v6450_v14 = vrot.slane %v16095_v4, %v19662_v10  ;;  %v6462_v4 = vrot.slane %v16259_v31, %v19662_v10 }
 0x486   : > { %19654 = vst [vmem:[#allocation161_spill] sm:$0xff] %v16305_v8  ;;  %6401 = vperm.xlu0 %11235, %v16303_v59   ;;  %v5366_v8 = vrot.slane %v15912_v56, %v15451_v49  ;;  %v16323_v59 = vpop.permute.xlu1 %6068  ;;  %v6662_v49 = vrot.slane %v15992_v63, %v19662_v10  ;;  %v5879_v58 = vmul.f32 1.442695, %v5629_v46 }
 0x487   : > { %6164 = vperm.xlu1 %11236, %v16318_v19  }
 0x488   : > { %v6971_v63 = vsel %vm4667_vm0, %v6666_v37, %v6662_v49  ;;  %11895 = vpow2.f32 %v5879_v58  ;;  %v6442_v58 = vrot.slane %v16079_v22, %v19662_v10 }
 0x489   : > { %v16316_v45 = vpop.permute.xlu0 %6095  ;;  %v16344_v56 = vpop.eup %11889  ;;  %v6972_v46 = vsel %vm4669_vm1, %v6670_v47, %v6971_v63  ;;  %v6726_v63 = vrot.slane %v16272_v20, %v19662_v10 }
 0x48a   : > { %19657 = vst [vmem:[#allocation108_spill] sm:$0xff] %v16316_v45  ;;  %v5631_v45 = vsub.f32 %v19661_v38, %v5366_v8  ;;  %v16336_v19 = vpop.permute.xlu1 %6074  ;;  %19663 = vst [vmem:[#allocation112_spill] sm:$0xff] %v16344_v56  ;;  %v19664_v8 = vld [vmem:[#allocation113_spill] sm:$0xff]  ;;  %v6973_v37 = vsel %vm4671_vm2, %v6674_v27, %v6972_v46 }
 0x48b   : > { %6170 = vperm.xlu1 %11236, %v16328_v55   ;;  %v5633_v38 = vsub.f32 %v19664_v8, %v5374_v30  ;;  %v6974_v13 = vsel %vm4673_vm3, %v6678_v44, %v6973_v37  ;;  %v6682_v8 = vrot.slane %v15951_v18, %v19662_v10  ;;  %v6734_v44 = vrot.slane %v16285_v52, %v19662_v10 }
 0x48c   : > { %v5883_v21 = vmul.f32 1.442695, %v5631_v45  ;;  %v6446_v45 = vrot.slane %v16232_v25, %v19662_v10  ;;  %v16362_v30 = vpop.eup %11891  ;;  %v6922_v25 = vsel %vm4667_vm0, %v6442_v58, %v6438_v42  ;;  %v6730_v18 = vrot.slane %v16143_v24, %v19662_v10 }
 0x48d   : > { %v16326_v28 = vpop.permute.xlu0 %6101  ;;  %19665 = vst [vmem:[#allocation113_spill] sm:$0xff] %v16362_v30  ;;  %v5887_v47 = vmul.f32 1.442695, %v5633_v38  ;;  %v6454_v38 = vrot.slane %v16246_v57, %v19662_v10  ;;  %v6975_v57 = vsel %vm4675_vm4, %v6682_v8, %v6974_v13  ;;  %v6470_v24 = vrot.slane %v16323_v59, %v19662_v10 }
 0x48e   : > { %v16349_v55 = vpop.permute.xlu1 %6080  ;;  %11897 = vpow2.f32 %v5883_v21  ;;  %v6923_v22 = vsel %vm4669_vm1, %v6446_v45, %v6922_v25  ;;  %v16383_v21 = vpop.eup %11893  ;;  %v6976_v27 = vsel %vm4677_vm5, %v6686_v11, %v6975_v57  ;;  %v6985_v52 = vsel %vm4667_vm0, %v6730_v18, %v6726_v63 }
 0x48f   : > { %6176 = vperm.xlu1 %11236, %v16344_v56   ;;  %19666 = vst [vmem:[#allocation164_spill] sm:$0xff] %v16383_v21  ;;  %11899 = vpow2.f32 %v5887_v47  ;;  %v6924_v20 = vsel %vm4671_vm2, %v6450_v14, %v6923_v22  ;;  %v6458_v47 = vrot.slane %v16111_v3, %v19662_v10  ;;  %v6986_v13 = vsel %vm4669_vm1, %v6734_v44, %v6985_v52 }
 0x490   : > { %v6925_v45 = vsel %vm4673_vm3, %v6454_v38, %v6924_v20  ;;  %v6742_v11 = vrot.slane %v16298_v43, %v19662_v10  ;;  %v6478_v31 = vrot.slane %v16336_v19, %v19662_v10  ;;  %v6690_v25 = vrot.slane %v15967_v48, %v19662_v10 }
 0x491   : > { %v16342_v16 = vpop.permute.xlu0 %6107  ;;  %v6738_v59 = vrot.slane %v16159_v32, %v19662_v10  ;;  %v6474_v8 = vrot.slane %v16207_v29, %v19662_v10  ;;  %v6926_v22 = vsel %vm4675_vm4, %v6458_v47, %v6925_v45  ;;  %v6750_v14 = vrot.slane %v16311_v23, %v19662_v10 }
 0x492   : > { %v16368_v53 = vpop.permute.xlu1 %6086  ;;  %v16405_v37 = vpop.eup %11895  ;;  %v6977_v48 = vsel %vm4679_vm6, %v6690_v25, %v6976_v27  ;;  %v6927_v63 = vsel %vm4677_vm5, %v6462_v4, %v6926_v22  ;;  %v6486_v18 = vrot.slane %v16349_v55, %v19662_v10  ;;  %v6466_v57 = vrot.slane %v16127_v61, %v19662_v10 }
 0x493   : > { %6182 = vperm.xlu1 %11236, %v16362_v30   ;;  %19667 = vst [vmem:[#allocation165_spill] sm:$0xff] %v16405_v37  ;;  %v6987_v43 = vsel %vm4671_vm2, %v6738_v59, %v6986_v13  ;;  %v6929_v38 = vsel %vm4667_vm0, %v6474_v8, %v6470_v24  ;;  %v6746_v20 = vrot.slane %v16175_v36, %v19662_v10  ;;  %v7067_v23 = vsel %vm4802_vm7, %v6977_v48, 0.0 }
 0x494   : > { %v6988_v29 = vsel %vm4673_vm3, %v6742_v11, %v6987_v43  ;;  %v6930_v44 = vsel %vm4669_vm1, %v6478_v31, %v6929_v38  ;;  %v6482_v27 = vrot.slane %v16223_v62, %v19662_v10  ;;  %v6928_v55 = vsel %vm4679_vm6, %v6466_v57, %v6927_v63 }
 0x495   : > { %v16360_v49 = vpop.permute.xlu0 %6113  ;;  %v6989_v61 = vsel %vm4675_vm4, %v6746_v20, %v6988_v29  ;;  %v6494_v62 = vrot.slane %v16368_v53, %v19662_v10  ;;  %v6754_v13 = vrot.slane %v16191_v34, %v19662_v10  ;;  %v6490_v11 = vrot.slane %v16239_v40, %v19662_v10 }
 0x496   : > { %v16392_v42 = vpop.permute.xlu1 %6284  ;;  %v6931_v4 = vsel %vm4671_vm2, %v6482_v27, %v6930_v44  ;;  %v6990_v47 = vsel %vm4677_vm5, %v6750_v14, %v6989_v61  ;;  %v7046_v25 = vsel %vm4802_vm7, %v6928_v55, 0.0  ;;  %v6498_v34 = vrot.slane %v16253_v60, %v19662_v10 }
 0x497   : > { %6380 = vperm.xlu1 %11236, %v16383_v21   ;;  %v6932_v36 = vsel %vm4673_vm3, %v6486_v18, %v6931_v4  ;;  %v6991_v8 = vsel %vm4679_vm6, %v6754_v13, %v6990_v47  ;;  %v6630_v44 = vrot.slane %v15928_v51, %v19662_v10  ;;  %v6638_v60 = vrot.slane %v15944_v1, %v19662_v10  ;;  %v17046_v21 = vld [vmem:[%s12723_s26 + $0xe0] sm:$0xff]  }
 0x498   : > { %v16430_v32 = vpop.eup %11897  ;;  %v6933_v53 = vsel %vm4675_vm4, %v6490_v11, %v6932_v36  ;;  %v7073_v40 = vsel %vm4802_vm7, %v6991_v8, 0.0  ;;  %v6634_v57 = vrot.slane %v15857_v50, %v19662_v10  ;;  %v6646_v4 = vrot.slane %v15960_v35, %v19662_v10 }
 0x499   : > { %v16381_v46 = vpop.permute.xlu0 %6311  ;;  %19668 = vst [vmem:[#allocation166_spill] sm:$0xff] %v16430_v32  ;;  %v16453_v24 = vpop.eup %11899  ;;  %v6934_v22 = vsel %vm4677_vm5, %v6494_v62, %v6933_v53  ;;  %v6642_v51 = vrot.slane %v15873_v9, %v19662_v10  ;;  %v6406_v36 = vrot.slane %v16056_v0, %v19662_v10  ;;  %v6650_v47 = vrot.slane %v15889_v33, %v19662_v10 }
 0x49a   : > { %v16421_v3 = vpop.permute.xlu1 %6290  ;;  %19669 = vst [vmem:[#allocation167_spill] sm:$0xff] %v16453_v24  ;;  %v6935_v48 = vsel %vm4679_vm6, %v6498_v34, %v6934_v22  ;;  %v6964_v27 = vsel %vm4667_vm0, %v6634_v57, %v6630_v44  ;;  %v6654_v35 = vrot.slane %v15976_v26, %v19662_v10  ;;  %v6414_v13 = vrot.slane %v16072_v54, %v19662_v10  ;;  %v19671_v57 = vld [vmem:[#allocation103_spill] sm:$0xff] }
 0x49b   : > { %6386 = vperm.xlu1 %11236, %v16405_v37   ;;  %v7049_v29 = vsel %vm4802_vm7, %v6935_v48, 0.0  ;;  %v6410_v9 = vrot.slane %v15983_v12, %v19662_v10  ;;  %v6418_v11 = vrot.slane %v16088_v6, %v19662_v10  ;;  %v6658_v33 = vrot.slane %v15903_v7, %v19662_v10 }
 0x49c   : > { %v6702_v26 = vrot.slane %v16168_v41, %v19662_v10  ;;  %v6698_v6 = vrot.slane %v16015_v17, %v19662_v10  ;;  %v6794_v53 = vrot.slane %v16381_v46, %v19662_v10  ;;  %v6426_v7 = vrot.slane %v16120_v5, %v19662_v10  ;;  %v19670_v17 = vld [vmem:[#allocation97_spill] sm:$0xff] }
 0x49d   : > { %v16403_v58 = vpop.permute.xlu0 %6317  ;;  %v6915_v12 = vsel %vm4667_vm0, %v6410_v9, %v6406_v36  ;;  %v6710_v5 = vrot.slane %v19671_v57, %v19662_v10  ;;  %v19673_v9 = vld [vmem:[#allocation80_spill] sm:$0xff] }
 0x49e   : > { %v16445_v45 = vpop.permute.xlu1 %6296  ;;  %v6916_v34 = vsel %vm4669_vm1, %v6414_v13, %v6915_v12  ;;  %v6802_v36 = vrot.slane %v16403_v58, %v19662_v10 }
 0x49f   : > { %6392 = vperm.xlu1 %11236, %v16430_v32   ;;  %v6917_v48 = vsel %vm4671_vm2, %v6418_v11, %v6916_v34  ;;  %v6434_v11 = vrot.slane %v19673_v9, %v19662_v10 }
 0x4a1   : > { %v16426_v19 = vpop.permute.xlu0 %6323 }
 0x4a2   : > { %v16464_v31 = vpop.permute.xlu1 %6302 }
 0x4a3   : > { %6398 = vperm.xlu1 %11236, %v16453_v24  }
 0x4a5   : > { %v16449_v52 = vpop.permute.xlu0 %6329  ;;  %7068 = vadd.xlane.f32.xlu0 %v7067_v23  ;;  %v6965_v23 = vsel %vm4669_vm1, %v6638_v60, %v6964_v27  ;;  %v6758_v27 = vrot.slane %v16392_v42, %v19662_v10 }
 0x4a6   : > { %v16474_v43 = vpop.permute.xlu1 %6092  ;;  %v6966_v61 = vsel %vm4671_vm2, %v6642_v51, %v6965_v23 }
 0x4a7   : > { %v6967_v50 = vsel %vm4673_vm3, %v6646_v4, %v6966_v61  ;;  %v19672_v4 = vld [vmem:[#allocation82_spill] sm:$0xff] }
 0x4a8   : > { %v6968_v54 = vsel %vm4675_vm4, %v6650_v47, %v6967_v50  ;;  %v6706_v51 = vrot.slane %v19672_v4, %v19662_v10  ;;  %v6766_v50 = vrot.slane %v16421_v3, %v19662_v10  ;;  %19732 = vst [vmem:[#allocation82_spill] sm:$0xff] %v17046_v21 }
 0x4a9   : > { %v16467_v59 = vpop.permute.xlu0 %6119  ;;  %7047 = vadd.xlane.f32.xlu0 %v7046_v25  ;;  %v6694_v25 = vrot.slane %v16152_v39, %v19662_v10  ;;  %v6422_v39 = vrot.slane %v16104_v2, %v19662_v10 }
 0x4aa   : > { %v16480_v63 = vpop.permute.xlu1 %6098 }
 0x4ab   : > { %v6978_v2 = vsel %vm4667_vm0, %v6698_v6, %v6694_v25  ;;  %v6918_v61 = vsel %vm4673_vm3, %v6422_v39, %v6917_v48  ;;  %v6774_v39 = vrot.slane %v16445_v45, %v19662_v10  ;;  %v19677_v45 = vld [vmem:[#allocation108_spill] sm:$0xff] }
 0x4ac   : > { %v6979_v60 = vsel %vm4669_vm1, %v6702_v26, %v6978_v2  ;;  %v6919_v47 = vsel %vm4675_vm4, %v6426_v7, %v6918_v61  ;;  %v19674_v26 = vld [vmem:[#allocation105_spill] sm:$0xff]  ;;  %v6506_v2 = vrot.slane %v19677_v45, %v19662_v10  ;;  %v6782_v61 = vrot.slane %v16464_v31, %v19662_v10 }
 0x4ad   : > { %v16477_v38 = vpop.permute.xlu0 %6125  ;;  %7074 = vadd.xlane.f32.xlu0 %v7073_v40  ;;  %v6969_v40 = vsel %vm4677_vm5, %v6654_v35, %v6968_v54  ;;  %v6762_v35 = vrot.slane %v16266_v15, %v19662_v10  ;;  %v6980_v25 = vsel %vm4671_vm2, %v6706_v51, %v6979_v60  ;;  %v6718_v54 = vrot.slane %v19674_v26, %v19662_v10  ;;  %v19675_v7 = vld [vmem:[#allocation85_spill] sm:$0xff] }
 0x4ae   : > { %v16489_v18 = vpop.permute.xlu1 %6104  ;;  %v6970_v13 = vsel %vm4679_vm6, %v6658_v33, %v6969_v40  ;;  %v6981_v58 = vsel %vm4673_vm3, %v6710_v5, %v6980_v25  ;;  %v19676_v40 = vld [vmem:[#allocation157_spill] sm:$0xff] }
 0x4af   : > { %v6992_v15 = vsel %vm4667_vm0, %v6762_v35, %v6758_v27  ;;  %v6770_v48 = vrot.slane %v19676_v40, %v19662_v10  ;;  %v19678_v35 = vld [vmem:[#allocation30_spill] sm:$0xff] }
 0x4b0   : > { %v6993_v33 = vsel %vm4669_vm1, %v6766_v50, %v6992_v15 }
 0x4b1   : > { %v16483_v14 = vpop.permute.xlu0 %6131  ;;  %7050 = vadd.xlane.f32.xlu0 %v7049_v29  ;;  %v6430_v29 = vrot.slane %v19670_v17, %v19662_v10  ;;  %v6510_v17 = vrot.slane %v16480_v63, %v19662_v10  ;;  %v6994_v60 = vsel %vm4671_vm2, %v6770_v48, %v6993_v33  ;;  %v19680_v33 = vld [vmem:[#allocation161_spill] sm:$0xff] }
 0x4b2   : > { %v16499_v55 = vpop.permute.xlu1 %6110  ;;  %v6995_v27 = vsel %vm4673_vm3, %v6774_v39, %v6994_v60  ;;  %v6786_v39 = vrot.slane %v19680_v33, %v19662_v10 }
 0x4b5   : > { %v16493_v20 = vpop.permute.xlu0 %6137 }
 0x4b6   : > { %v6309_v62 = vpop.permute.xlu1 %6308 }
 0x4b7   : > { %v6790_v0 = vrot.slane %v6309_v62, %v19662_v10 }
 0x4b9   : > { %v16503_v1 = vpop.permute.xlu0 %6335  ;;  %v6999_v44 = vsel %vm4667_vm0, %v6794_v53, %v6790_v0  ;;  %v6920_v0 = vsel %vm4677_vm5, %v6430_v29, %v6919_v47  ;;  %v6502_v53 = vrot.slane %v16474_v43, %v19662_v10  ;;  %v6818_v43 = vrot.slane %v16449_v52, %v19662_v10 }
 0x4ba   : > { %v6315_v22 = vpop.permute.xlu1 %6314  ;;  %v6921_v5 = vsel %vm4679_vm6, %v6434_v11, %v6920_v0  ;;  %v6514_v11 = vrot.slane %v16326_v28, %v19662_v10  ;;  %v6526_v28 = vrot.slane %v16499_v55, %v19662_v10  ;;  %v6546_v55 = vrot.slane %v16477_v38, %v19662_v10 }
 0x4bb   : > { %v6798_v41 = vrot.slane %v6315_v22, %v19662_v10  ;;  %v6810_v22 = vrot.slane %v16426_v19, %v19662_v10  ;;  %v7064_v19 = vsel %vm4802_vm7, %v6970_v13, 0.0  ;;  %v19679_v13 = vld [vmem:[#allocation159_spill] sm:$0xff]  ;;  %v7043_v25 = vsel %vm4802_vm7, %v6921_v5, 0.0 }
 0x4bc   : > { %v6778_v9 = vrot.slane %v19679_v13, %v19662_v10  ;;  %v6554_v38 = vrot.slane %v16483_v14, %v19662_v10  ;;  %v6562_v5 = vrot.slane %v16493_v20, %v19662_v10 }
 0x4bd   : > { %v16522_v8 = vpop.permute.xlu0 %6341  ;;  %v7000_v23 = vsel %vm4669_vm1, %v6798_v41, %v6999_v44  ;;  %v6714_v41 = vrot.slane %v19675_v7, %v19662_v10 }
 0x4be   : > { %v6321_v62 = vpop.permute.xlu1 %6320  ;;  %v7001_v3 = vsel %vm4671_vm2, %v6802_v36, %v7000_v23  ;;  %v6936_v23 = vsel %vm4667_vm0, %v6506_v2, %v6502_v53  ;;  %v6518_v36 = vrot.slane %v16489_v18, %v19662_v10  ;;  %v6996_v26 = vsel %vm4675_vm4, %v6778_v9, %v6995_v27 }
 0x4bf   : > { %v6806_v42 = vrot.slane %v6321_v62, %v19662_v10  ;;  %v6982_v63 = vsel %vm4675_vm4, %v6714_v41, %v6981_v58  ;;  %v6937_v50 = vsel %vm4669_vm1, %v6510_v17, %v6936_v23 }
 0x4c0   : > { %v6983_v51 = vsel %vm4677_vm5, %v6718_v54, %v6982_v63  ;;  %v6938_v18 = vsel %vm4671_vm2, %v6514_v11, %v6937_v50 }
 0x4c1   : > { %v16546_v46 = vpop.permute.xlu0 %6347  ;;  %v7002_v12 = vsel %vm4673_vm3, %v6806_v42, %v7001_v3  ;;  %v6722_v42 = vrot.slane %v19678_v35, %v19662_v10  ;;  %v6538_v3 = vrot.slane %v16467_v59, %v19662_v10  ;;  %v6939_v54 = vsel %vm4673_vm3, %v6518_v36, %v6938_v18 }
 0x4c2   : > { %v6327_v34 = vpop.permute.xlu1 %6326  ;;  %v7003_v44 = vsel %vm4675_vm4, %v6810_v22, %v7002_v12  ;;  %v6997_v12 = vsel %vm4677_vm5, %v6782_v61, %v6996_v26  ;;  %v6522_v59 = vrot.slane %v16342_v16, %v19662_v10  ;;  %v6826_v61 = vrot.slane %v16503_v1, %v19662_v10 }
 0x4c3   : > { %v6814_v29 = vrot.slane %v6327_v34, %v19662_v10  ;;  %v6984_v58 = vsel %vm4679_vm6, %v6722_v42, %v6983_v51  ;;  %v6998_v40 = vsel %vm4679_vm6, %v6786_v39, %v6997_v12  ;;  %v6834_v35 = vrot.slane %v16522_v8, %v19662_v10 }
 0x4c4   : > { %v7070_v34 = vsel %vm4802_vm7, %v6984_v58, 0.0  ;;  %v6940_v48 = vsel %vm4675_vm4, %v6522_v59, %v6939_v54  ;;  %v6842_v1 = vrot.slane %v16546_v46, %v19662_v10 }
 0x4c5   : > { %v16576_v6 = vpop.permute.xlu0 %6353  ;;  %v7004_v57 = vsel %vm4677_vm5, %v6814_v29, %v7003_v44  ;;  %v6941_v16 = vsel %vm4677_vm5, %v6526_v28, %v6940_v48  ;;  %v6530_v29 = vrot.slane %v16360_v49, %v19662_v10 }
 0x4c6   : > { %v6117_v4 = vpop.permute.xlu1 %6116  ;;  %v7005_v52 = vsel %vm4679_vm6, %v6818_v43, %v7004_v57  ;;  %v7076_v43 = vsel %vm4802_vm7, %v6998_v40, 0.0 }
 0x4c7   : > { %7065 = vadd.xlane.f32.xlu1 %v7064_v19  ;;  %v7079_v62 = vsel %vm4802_vm7, %v7005_v52, 0.0  ;;  %v6534_v31 = vrot.slane %v6117_v4, %v19662_v10  ;;  %v6942_v44 = vsel %vm4679_vm6, %v6530_v29, %v6941_v16 }
 0x4c8   : > { %7080 = vadd.xlane.f32.xlu0 %v7079_v62  ;;  %v7052_v63 = vsel %vm4802_vm7, %v6942_v44, 0.0 }
 0x4c9   : > { %v16612_v47 = vpop.permute.xlu0 %6143  ;;  %v6943_v53 = vsel %vm4667_vm0, %v6538_v3, %v6534_v31  ;;  %v6850_v3 = vrot.slane %v16576_v6, %v19662_v10 }
 0x4ca   : > { %v6123_v0 = vpop.permute.xlu1 %6122  ;;  %v6570_v46 = vrot.slane %v16612_v47, %v19662_v10 }
 0x4cb   : > { %7044 = vadd.xlane.f32.xlu1 %v7043_v25  ;;  %v6542_v15 = vrot.slane %v6123_v0, %v19662_v10 }
 0x4cd   : > { %v6944_v22 = vsel %vm4669_vm1, %v6542_v15, %v6943_v53  ;;  %v16639_v7 = vpop.permute.xlu0 %6149 }
 0x4ce   : > { %v6129_v41 = vpop.permute.xlu1 %6128  ;;  %v6945_v45 = vsel %vm4671_vm2, %v6546_v55, %v6944_v22  ;;  %v6578_v53 = vrot.slane %v16639_v7, %v19662_v10 }
 0x4cf   : > { %7071 = vadd.xlane.f32.xlu1 %v7070_v34  ;;  %v6550_v17 = vrot.slane %v6129_v41, %v19662_v10 }
 0x4d1   : > { %v6946_v2 = vsel %vm4673_vm3, %v6550_v17, %v6945_v45  ;;  %v6156_v57 = vpop.permute.xlu0 %6155 }
 0x4d2   : > { %v6135_v19 = vpop.permute.xlu1 %6134  ;;  %v6947_v49 = vsel %vm4675_vm4, %v6554_v38, %v6946_v2  ;;  %v6586_v47 = vrot.slane %v6156_v57, %v19662_v10 }
 0x4d3   : > { %7077 = vadd.xlane.f32.xlu1 %v7076_v43  ;;  %v6558_v60 = vrot.slane %v6135_v19, %v19662_v10 }
 0x4d5   : > { %v6948_v27 = vsel %vm4677_vm5, %v6558_v60, %v6947_v49  ;;  %v6162_v51 = vpop.permute.xlu0 %6161 }
 0x4d6   : > { %v6333_v23 = vpop.permute.xlu1 %6332  ;;  %v6949_v14 = vsel %vm4679_vm6, %v6562_v5, %v6948_v27  ;;  %v6594_v16 = vrot.slane %v6162_v51, %v19662_v10 }
 0x4d7   : > { %7053 = vadd.xlane.f32.xlu1 %v7052_v63  ;;  %v7055_v4 = vsel %vm4802_vm7, %v6949_v14, 0.0  ;;  %v6822_v52 = vrot.slane %v6333_v23, %v19662_v10 }
 0x4d8   : > { %7056 = vadd.xlane.f32.xlu0 %v7055_v4 }
 0x4d9   : > { %v7006_v36 = vsel %vm4667_vm0, %v6826_v61, %v6822_v52  ;;  %v6360_v9 = vpop.permute.xlu0 %6359 }
 0x4da   : > { %v6339_v20 = vpop.permute.xlu1 %6338  ;;  %v6858_v44 = vrot.slane %v6360_v9, %v19662_v10 }
 0x4db   : > { %v6830_v50 = vrot.slane %v6339_v20, %v19662_v10 }
 0x4dd   : > { %v7007_v62 = vsel %vm4669_vm1, %v6830_v50, %v7006_v36  ;;  %v6366_v8 = vpop.permute.xlu0 %6365 }
 0x4de   : > { %v6345_v42 = vpop.permute.xlu1 %6344  ;;  %v7008_v11 = vsel %vm4671_vm2, %v6834_v35, %v7007_v62  ;;  %v6866_v27 = vrot.slane %v6366_v8, %v19662_v10 }
 0x4df   : > { %v6838_v13 = vrot.slane %v6345_v42, %v19662_v10 }
 0x4e1   : > { %v7009_v31 = vsel %vm4673_vm3, %v6838_v13, %v7008_v11  ;;  %v6372_v33 = vpop.permute.xlu0 %6371 }
 0x4e2   : > { %v6351_v25 = vpop.permute.xlu1 %6350  ;;  %v7010_v0 = vsel %vm4675_vm4, %v6842_v1, %v7009_v31  ;;  %v6874_v51 = vrot.slane %v6372_v33, %v19662_v10 }
 0x4e3   : > { %v6846_v18 = vrot.slane %v6351_v25, %v19662_v10 }
 0x4e5   : > { %v7011_v58 = vsel %vm4677_vm5, %v6846_v18, %v7010_v0  ;;  %v6378_v41 = vpop.permute.xlu0 %6377 }
 0x4e6   : > { %v6141_v26 = vpop.permute.xlu1 %6140  ;;  %v7012_v54 = vsel %vm4679_vm6, %v6850_v3, %v7011_v58  ;;  %v6882_v36 = vrot.slane %v6378_v41, %v19662_v10 }
 0x4e7   : > { %v7082_v28 = vsel %vm4802_vm7, %v7012_v54, 0.0  ;;  %v6566_v15 = vrot.slane %v6141_v26, %v19662_v10 }
 0x4e8   : > { %7083 = vadd.xlane.f32.xlu1 %v7082_v28 }
 0x4e9   : > { %v6950_v39 = vsel %vm4667_vm0, %v6570_v46, %v6566_v15  ;;  %v6168_v43 = vpop.permute.xlu0 %6167 }
 0x4ea   : > { %v6147_v12 = vpop.permute.xlu1 %6146  ;;  %v6602_v1 = vrot.slane %v6168_v43, %v19662_v10 }
 0x4eb   : > { %v6574_v6 = vrot.slane %v6147_v12, %v19662_v10 }
 0x4ed   : > { %v6951_v59 = vsel %vm4669_vm1, %v6574_v6, %v6950_v39  ;;  %v6174_v49 = vpop.permute.xlu0 %6173 }
 0x4ee   : > { %v6153_v22 = vpop.permute.xlu1 %6152  ;;  %v6952_v55 = vsel %vm4671_vm2, %v6578_v53, %v6951_v59  ;;  %v6610_v8 = vrot.slane %v6174_v49, %v19662_v10 }
 0x4ef   : > { %v6582_v34 = vrot.slane %v6153_v22, %v19662_v10 }
 0x4f1   : > { %v6953_v40 = vsel %vm4673_vm3, %v6582_v34, %v6952_v55  ;;  %v6180_v20 = vpop.permute.xlu0 %6179 }
 0x4f2   : > { %v6159_v48 = vpop.permute.xlu1 %6158  ;;  %v6954_v29 = vsel %vm4675_vm4, %v6586_v47, %v6953_v40  ;;  %v6618_v46 = vrot.slane %v6180_v20, %v19662_v10 }
 0x4f3   : > { %v6590_v17 = vrot.slane %v6159_v48, %v19662_v10 }
 0x4f5   : > { %v6955_v45 = vsel %vm4677_vm5, %v6590_v17, %v6954_v29  ;;  %v6186_v31 = vpop.permute.xlu0 %6185 }
 0x4f6   : > { %v6357_v7 = vpop.permute.xlu1 %6356  ;;  %v6956_v2 = vsel %vm4679_vm6, %v6594_v16, %v6955_v45  ;;  %v6626_v6 = vrot.slane %v6186_v31, %v19662_v10 }
 0x4f7   : > { %v7058_v38 = vsel %vm4802_vm7, %v6956_v2, 0.0  ;;  %v6854_v19 = vrot.slane %v6357_v7, %v19662_v10 }
 0x4f8   : > { %7059 = vadd.xlane.f32.xlu1 %v7058_v38 }
 0x4f9   : > { %v7013_v5 = vsel %vm4667_vm0, %v6858_v44, %v6854_v19  ;;  %v6384_v26 = vpop.permute.xlu0 %6383 }
 0x4fa   : > { %v6363_v60 = vpop.permute.xlu1 %6362  ;;  %v6890_v40 = vrot.slane %v6384_v26, %v19662_v10 }
 0x4fb   : > { %v6862_v57 = vrot.slane %v6363_v60, %v19662_v10 }
 0x4fd   : > { %v7014_v63 = vsel %vm4669_vm1, %v6862_v57, %v7013_v5  ;;  %v6390_v59 = vpop.permute.xlu0 %6389 }
 0x4fe   : > { %v6369_v23 = vpop.permute.xlu1 %6368  ;;  %v7015_v4 = vsel %vm4671_vm2, %v6866_v27, %v7014_v63  ;;  %v6898_v45 = vrot.slane %v6390_v59, %v19662_v10  ;;  %v19690_v59 = vld [vmem:[#allocation49_spill] sm:$0xff] }
 0x4ff   : > { %v6870_v14 = vrot.slane %v6369_v23, %v19662_v10 }
 0x501   : > { %v7016_v52 = vsel %vm4673_vm3, %v6870_v14, %v7015_v4  ;;  %v6396_v48 = vpop.permute.xlu0 %6395 }
 0x502   : > { %v6375_v61 = vpop.permute.xlu1 %6374  ;;  %v7017_v62 = vsel %vm4675_vm4, %v6874_v51, %v7016_v52  ;;  %v6906_v44 = vrot.slane %v6396_v48, %v19662_v10  ;;  %v19681_v52 = vld [vmem:[#allocation106_spill] sm:$0xff] }
 0x503   : > { %v6878_v50 = vrot.slane %v6375_v61, %v19662_v10  ;;  %v19682_v61 = vld [vmem:[#allocation21_spill] sm:$0xff] }
 0x505   : > { %v7018_v35 = vsel %vm4677_vm5, %v6878_v50, %v7017_v62  ;;  %v6402_v38 = vpop.permute.xlu0 %6401  ;;  %v19683_v50 = vld [vmem:[#allocation107_spill] sm:$0xff]  ;;  %v19684_v62 = vld [vmem:[#allocation114_spill] sm:$0xff] }
 0x506   : > { %v6165_v42 = vpop.permute.xlu1 %6164  ;;  %v7019_v13 = vsel %vm4679_vm6, %v6882_v36, %v7018_v35  ;;  %v6914_v5 = vrot.slane %v6402_v38, %v19662_v10 }
 0x507   : > { %v7085_v9 = vsel %vm4802_vm7, %v7019_v13, 0.0  ;;  %v6598_v11 = vrot.slane %v6165_v42, %v19662_v10  ;;  %v19685_v13 = vld [vmem:[#allocation109_spill] sm:$0xff] }
 0x508   : > { %7086 = vadd.xlane.f32.xlu0 %v7085_v9 }
 0x509   : > { %v6957_v3 = vsel %vm4667_vm0, %v6602_v1, %v6598_v11  ;;  %v19686_v11 = vld [vmem:[#allocation46_spill] sm:$0xff] }
 0x50a   : > { %v6171_v25 = vpop.permute.xlu1 %6170 }
 0x50b   : > { %v6606_v18 = vrot.slane %v6171_v25, %v19662_v10 }
 0x50d   : > { %v6958_v0 = vsel %vm4669_vm1, %v6606_v18, %v6957_v3  ;;  %v19687_v18 = vld [vmem:[#allocation111_spill] sm:$0xff] }
 0x50e   : > { %v6177_v58 = vpop.permute.xlu1 %6176  ;;  %v6959_v28 = vsel %vm4671_vm2, %v6610_v8, %v6958_v0  ;;  %v19688_v0 = vld [vmem:[#allocation52_spill] sm:$0xff] }
 0x50f   : > { %v6614_v54 = vrot.slane %v6177_v58, %v19662_v10 }
 0x511   : > { %v6960_v15 = vsel %vm4673_vm3, %v6614_v54, %v6959_v28 }
 0x512   : > { %v6183_v12 = vpop.permute.xlu1 %6182  ;;  %v6961_v39 = vsel %vm4675_vm4, %v6618_v46, %v6960_v15 }
 0x513   : > { %v6622_v33 = vrot.slane %v6183_v12, %v19662_v10  ;;  %v19689_v12 = vld [vmem:[#allocation69_spill] sm:$0xff] }
 0x515   : > { %v6962_v53 = vsel %vm4677_vm5, %v6622_v33, %v6961_v39 }
 0x516   : > { %v6381_v22 = vpop.permute.xlu1 %6380  ;;  %v6963_v34 = vsel %vm4679_vm6, %v6626_v6, %v6962_v53 }
 0x517   : > { %v7061_v55 = vsel %vm4802_vm7, %v6963_v34, 0.0  ;;  %v6886_v41 = vrot.slane %v6381_v22, %v19662_v10 }
 0x518   : > { %7062 = vadd.xlane.f32.xlu0 %v7061_v55 }
 0x519   : > { %v7020_v16 = vsel %vm4667_vm0, %v6890_v40, %v6886_v41 }
 0x51a   : > { %v6387_v47 = vpop.permute.xlu1 %6386 }
 0x51b   : > { %v6894_v17 = vrot.slane %v6387_v47, %v19662_v10  ;;  %v19691_v47 = vld [vmem:[#allocation23_spill] sm:$0xff] }
 0x51d   : > { %v7021_v29 = vsel %vm4669_vm1, %v6894_v17, %v7020_v16 }
 0x51e   : > { %v6393_v7 = vpop.permute.xlu1 %6392  ;;  %v7022_v43 = vsel %vm4671_vm2, %v6898_v45, %v7021_v29  ;;  %v19692_v29 = vld [vmem:[#allocation116_spill] sm:$0xff] }
 0x51f   : > { %v6902_v2 = vrot.slane %v6393_v7, %v19662_v10 }
 0x521   : > { %v7023_v19 = vsel %vm4673_vm3, %v6902_v2, %v7022_v43 }
 0x522   : > { %v6399_v60 = vpop.permute.xlu1 %6398  ;;  %v7024_v49 = vsel %vm4675_vm4, %v6906_v44, %v7023_v19 }
 0x523   : > { %v6910_v57 = vrot.slane %v6399_v60, %v19662_v10 }
 0x525   : > { %v7025_v63 = vsel %vm4677_vm5, %v6910_v57, %v7024_v49  ;;  %v19693_v57 = vld [vmem:[#allocation42_spill] sm:$0xff] }
 0x526   : > { %v7026_v27 = vsel %vm4679_vm6, %v6914_v5, %v7025_v63 }
 0x527   : > { %v7088_v23 = vsel %vm4802_vm7, %v7026_v27, 0.0  ;;  %v19694_v27 = vld [vmem:[#allocation47_spill] sm:$0xff] }
 0x528   : > { %7089 = vadd.xlane.f32.xlu1 %v7088_v23 }
 0x532   : > { %v7069_v4 = vpop.xlane.xlu0 %7068 }
 0x533   : > { %v7370_v42 = vrot.slane %v7069_v4, %v19681_v52  ;;  %v7366_v1 = vrot.slane %v7069_v4, %v19682_v61  ;;  %v7378_v25 = vrot.slane %v7069_v4, %v19683_v50  ;;  %v7374_v58 = vrot.slane %v7069_v4, %v19684_v62 }
 0x534   : > { %v7386_v26 = vrot.slane %v7069_v4, %v19685_v13  ;;  %v7382_v15 = vrot.slane %v7069_v4, %v19686_v11  ;;  %v7394_v6 = vrot.slane %v7069_v4, %v19687_v18  ;;  %v7390_v22 = vrot.slane %v7069_v4, %v19688_v0 }
 0x536   : > { %v7048_v28 = vpop.xlane.xlu0 %7047 }
 0x537   : > { %v7146_v55 = vrot.slane %v7048_v28, %v19681_v52  ;;  %v7142_v41 = vrot.slane %v7048_v28, %v19682_v61  ;;  %v7154_v17 = vrot.slane %v7048_v28, %v19683_v50  ;;  %v7150_v7 = vrot.slane %v7048_v28, %v19684_v62 }
 0x538   : > { %v7162_v43 = vrot.slane %v7048_v28, %v19685_v13  ;;  %v7158_v44 = vrot.slane %v7048_v28, %v19686_v11  ;;  %v7170_v49 = vrot.slane %v7048_v28, %v19687_v18 }
 0x53a   : > { %v16774_v19 = vpop.xlane.xlu0 %7074 }
 0x554   : > { %v7066_v14 = vpop.xlane.xlu1 %7065 }
 0x555   : > { %v7338_v51 = vrot.slane %v7066_v14, %v19681_v52  ;;  %v7334_v20 = vrot.slane %v7066_v14, %v19682_v61  ;;  %v7346_v36 = vrot.slane %v7066_v14, %v19683_v50  ;;  %v7342_v35 = vrot.slane %v7066_v14, %v19684_v62 }
 0x556   : > { %v7354_v9 = vrot.slane %v7066_v14, %v19685_v13  ;;  %v7350_v31 = vrot.slane %v7066_v14, %v19686_v11  ;;  %v7362_v3 = vrot.slane %v7066_v14, %v19687_v18  ;;  %v7358_v8 = vrot.slane %v7066_v14, %v19688_v0 }
 0x557   : > { %11901 = vrcp.f32 %v7338_v51  ;;  %v7166_v14 = vrot.slane %v7048_v28, %v19688_v0  ;;  %v7434_v51 = vrot.slane %v16774_v19, %v19681_v52 }
 0x558   : > { %11903 = vrcp.f32 %v7334_v20 }
 0x559   : > { %11905 = vrcp.f32 %v7346_v36  ;;  %v7430_v36 = vrot.slane %v16774_v19, %v19682_v61 }
 0x55a   : > { %11907 = vrcp.f32 %v7342_v35 }
 0x55b   : > { %11909 = vrcp.f32 %v7370_v42  ;;  %v16785_v42 = vpop.xlane.xlu1 %7044 }
 0x55c   : > { %11911 = vrcp.f32 %v7354_v9  ;;  %v19695_v9 = vld [vmem:[#allocation115_spill] sm:$0xff] }
 0x55d   : > { %11913 = vrcp.f32 %v7350_v31 }
 0x55e   : > { %11915 = vrcp.f32 %v7366_v1  ;;  %v7442_v1 = vrot.slane %v16774_v19, %v19683_v50 }
 0x55f   : > { %11917 = vrcp.f32 %v7378_v25 }
 0x560   : > { %11919 = vrcp.f32 %v7362_v3  ;;  %v19696_v3 = vld [vmem:[#allocation118_spill] sm:$0xff] }
 0x561   : > { %v11902_v54 = vpop.eup %11901  ;;  %11921 = vrcp.f32 %v7358_v8 }
 0x562   : > { %v11904_v46 = vpop.eup %11903  ;;  %v7862_v33 = vmul.f32 %v11902_v54, %v19689_v12  ;;  %11923 = vrcp.f32 %v7374_v58  ;;  %v7438_v58 = vrot.slane %v16774_v19, %v19684_v62  ;;  %v7450_v54 = vrot.slane %v16774_v19, %v19685_v13  ;;  %v19697_v12 = vld [vmem:[#allocation51_spill] sm:$0xff] }
 0x563   : > { %v11906_v39 = vpop.eup %11905  ;;  %v7860_v53 = vmul.f32 %v11904_v46, %v19690_v59  ;;  %11925 = vrcp.f32 %v7386_v26  ;;  %v19698_v59 = vld [vmem:[#allocation119_spill] sm:$0xff] }
 0x564   : > { %v11908_v34 = vpop.eup %11907  ;;  %8418 = vperm.xlu0 %11235, %v7862_v33   ;;  %11927 = vrcp.f32 %v7382_v15  ;;  %v7866_v48 = vmul.f32 %v11906_v39, %v19691_v47  ;;  %v7110_v15 = vrot.slane %v16785_v42, %v19682_v61  ;;  %v7122_v47 = vrot.slane %v16785_v42, %v19683_v50 }
 0x565   : > { %8413 = vperm.xlu1 %11236, %v7860_v53   ;;  %v11910_v40 = vpop.eup %11909  ;;  %11929 = vrcp.f32 %v7394_v6  ;;  %v7864_v45 = vmul.f32 %v11908_v34, %v19692_v29  ;;  %v7114_v6 = vrot.slane %v16785_v42, %v19681_v52  ;;  %v7118_v29 = vrot.slane %v16785_v42, %v19684_v62 }
 0x566   : > { %v11912_v16 = vpop.eup %11911  ;;  %11931 = vrcp.f32 %v7390_v22  ;;  %v7878_v33 = vmul.f32 %v11910_v40, %v19697_v12  ;;  %v7446_v22 = vrot.slane %v16774_v19, %v19686_v11  ;;  %v16813_v40 = vpop.xlane.xlu0 %7050 }
 0x567   : > { %v11914_v2 = vpop.eup %11913  ;;  %11933 = vrcp.f32 %v7146_v55  ;;  %v7870_v5 = vmul.f32 %v11912_v16, %v19693_v57  ;;  %v7458_v55 = vrot.slane %v16774_v19, %v19687_v18  ;;  %v7130_v57 = vrot.slane %v16785_v42, %v19685_v13 }
 0x568   : > { %8428 = vperm.xlu0 %11235, %v7866_v48   ;;  %v11916_v38 = vpop.eup %11915  ;;  %11935 = vrcp.f32 %v7142_v41  ;;  %v7868_v23 = vmul.f32 %v11914_v2, %v19694_v27 }
 0x569   : > { %8423 = vperm.xlu1 %11236, %v7864_v45   ;;  %v11918_v60 = vpop.eup %11917  ;;  %11937 = vrcp.f32 %v7154_v17  ;;  %v7876_v53 = vmul.f32 %v11916_v38, %v19698_v59  ;;  %v19699_v17 = vld [vmem:[#allocation41_spill] sm:$0xff] }
 0x56a   : > { %v11920_v63 = vpop.eup %11919  ;;  %11939 = vrcp.f32 %v7150_v7  ;;  %v7882_v16 = vmul.f32 %v11918_v60, %v19699_v17  ;;  %v19700_v7 = vld [vmem:[#allocation120_spill] sm:$0xff]  ;;  %v7190_v17 = vrot.slane %v16813_v40, %v19686_v11 }
 0x56b   : > { %v11922_v4 = vpop.eup %11921  ;;  %11941 = vrcp.f32 %v7162_v43  ;;  %v7874_v31 = vmul.f32 %v11920_v63, %v19695_v9  ;;  %v7454_v43 = vrot.slane %v16774_v19, %v19688_v0  ;;  %v7126_v19 = vrot.slane %v16785_v42, %v19686_v11 }
 0x56c   : > { %8438 = vperm.xlu0 %11235, %v7870_v5   ;;  %v11924_v20 = vpop.eup %11923  ;;  %11943 = vrcp.f32 %v7158_v44  ;;  %v7872_v8 = vmul.f32 %v11922_v4, %v19696_v3  ;;  %v7178_v44 = vrot.slane %v16813_v40, %v19681_v52  ;;  %v7174_v4 = vrot.slane %v16813_v40, %v19682_v61 }
 0x56d   : > { %8433 = vperm.xlu1 %11236, %v7868_v23   ;;  %v11926_v35 = vpop.eup %11925  ;;  %11945 = vrcp.f32 %v7170_v49  ;;  %v7880_v2 = vmul.f32 %v11924_v20, %v19700_v7  ;;  %v19701_v49 = vld [vmem:[#allocation68_spill] sm:$0xff]  ;;  %v19702_v23 = vld [vmem:[#allocation121_spill] sm:$0xff]  ;;  %v7186_v20 = vrot.slane %v16813_v40, %v19683_v50  ;;  %v7134_v3 = vrot.slane %v16785_v42, %v19688_v0 }
 0x56e   : > { %v11928_v25 = vpop.eup %11927  ;;  %11947 = vrcp.f32 %v7166_v14  ;;  %v7886_v63 = vmul.f32 %v11926_v35, %v19701_v49  ;;  %v7138_v35 = vrot.slane %v16785_v42, %v19687_v18 }
 0x56f   : > { %v11930_v26 = vpop.eup %11929  ;;  %11949 = vrcp.f32 %v7434_v51  ;;  %v7884_v14 = vmul.f32 %v11928_v25, %v19702_v23 }
 0x570   : > { %8448 = vperm.xlu0 %11235, %v7874_v31   ;;  %v11932_v28 = vpop.eup %11931  ;;  %11951 = vrcp.f32 %v7430_v36  ;;  %v16855_v31 = vpop.xlane.xlu1 %7071 }
 0x571   : > { %8443 = vperm.xlu1 %11236, %v7872_v8   ;;  %v16797_v46 = vpop.eup %11933  ;;  %11953 = vrcp.f32 %v7442_v1  ;;  %v19703_v1 = vld [vmem:[#allocation117_spill] sm:$0xff]  ;;  %v7402_v42 = vrot.slane %v16855_v31, %v19681_v52  ;;  %v7406_v49 = vrot.slane %v16855_v31, %v19684_v62 }
 0x572   : > { %v16802_v39 = vpop.eup %11935  ;;  %11955 = vrcp.f32 %v7438_v58  ;;  %v7890_v25 = vmul.f32 %v11930_v26, %v19703_v1  ;;  %v19704_v58 = vld [vmem:[#allocation122_spill] sm:$0xff] }
 0x573   : > { %v16807_v34 = vpop.eup %11937  ;;  %11957 = vrcp.f32 %v7450_v54  ;;  %v7888_v54 = vmul.f32 %v11932_v28, %v19704_v58  ;;  %v19705_v28 = vld [vmem:[#allocation124_spill] sm:$0xff] }
 0x574   : > { %8458 = vperm.xlu0 %11235, %v7878_v33   ;;  %v16811_v41 = vpop.eup %11939  ;;  %11959 = vrcp.f32 %v7110_v15  ;;  %v7182_v15 = vrot.slane %v16813_v40, %v19684_v62  ;;  %v7194_v33 = vrot.slane %v16813_v40, %v19685_v13  ;;  %v7078_v1 = vpop.xlane.xlu1 %7077 }
 0x575   : > { %8453 = vperm.xlu1 %11236, %v7876_v53   ;;  %v16817_v48 = vpop.eup %11941  ;;  %11961 = vrcp.f32 %v7114_v6  ;;  %v7398_v53 = vrot.slane %v16855_v31, %v19682_v61 }
 0x576   : > { %v16822_v45 = vpop.eup %11943  ;;  %11963 = vrcp.f32 %v7446_v22 }
 0x577   : > { %v16827_v38 = vpop.eup %11945  ;;  %11965 = vrcp.f32 %v7458_v55  ;;  %v19706_v55 = vld [vmem:[#allocation72_spill] sm:$0xff] }
 0x578   : > { %8468 = vperm.xlu0 %11235, %v7882_v16   ;;  %v16831_v60 = vpop.eup %11947  ;;  %11967 = vrcp.f32 %v7122_v47 }
 0x579   : > { %8463 = vperm.xlu1 %11236, %v7880_v2   ;;  %v16835_v5 = vpop.eup %11949  ;;  %11969 = vrcp.f32 %v7118_v29  ;;  %v7202_v29 = vrot.slane %v16813_v40, %v19687_v18  ;;  %v7410_v2 = vrot.slane %v16855_v31, %v19683_v50 }
 0x57a   : > { %v16840_v27 = vpop.eup %11951  ;;  %11971 = vrcp.f32 %v7454_v43 }
 0x57b   : > { %v16845_v51 = vpop.eup %11953  ;;  %11973 = vrcp.f32 %v7178_v44  ;;  %v19707_v44 = vld [vmem:[#allocation127_spill] sm:$0xff] }
 0x57c   : > { %8478 = vperm.xlu0 %11235, %v7886_v63   ;;  %v16849_v36 = vpop.eup %11955  ;;  %11975 = vrcp.f32 %v7130_v57 }
 0x57d   : > { %8473 = vperm.xlu1 %11236, %v7884_v14   ;;  %v16853_v9 = vpop.eup %11957  ;;  %11977 = vrcp.f32 %v7126_v19  ;;  %v19708_v19 = vld [vmem:[#allocation126_spill] sm:$0xff]  ;;  %v7198_v14 = vrot.slane %v16813_v40, %v19688_v0  ;;  %v7426_v40 = vrot.slane %v16855_v31, %v19687_v18 }
 0x57e   : > { %v11960_v8 = vpop.eup %11959  ;;  %11979 = vrcp.f32 %v7174_v4 }
 0x57f   : > { %v11962_v12 = vpop.eup %11961  ;;  %11981 = vrcp.f32 %v7186_v20  ;;  %v7748_v59 = vmul.f32 %v11960_v8, %v19705_v28  ;;  %v7418_v20 = vrot.slane %v16855_v31, %v19685_v13  ;;  %v19709_v8 = vld [vmem:[#allocation129_spill] sm:$0xff]  ;;  %v7466_v28 = vrot.slane %v7078_v1, %v19681_v52 }
 0x580   : > { %8488 = vperm.xlu0 %11235, %v7890_v25   ;;  %v16865_v6 = vpop.eup %11963  ;;  %11983 = vrcp.f32 %v7138_v35  ;;  %v7750_v47 = vmul.f32 %v11962_v12, %v19706_v55  ;;  %v7414_v25 = vrot.slane %v16855_v31, %v19686_v11  ;;  %v19711_v55 = vld [vmem:[#allocation55_spill] sm:$0xff] }
 0x581   : > { %8483 = vperm.xlu1 %11236, %v7888_v54   ;;  %v16869_v26 = vpop.eup %11965  ;;  %11985 = vrcp.f32 %v7134_v3 }
 0x582   : > { %v11968_v22 = vpop.eup %11967  ;;  %11987 = vrcp.f32 %v7182_v15  ;;  %v19710_v15 = vld [vmem:[#allocation128_spill] sm:$0xff] }
 0x583   : > { %v11970_v16 = vpop.eup %11969  ;;  %11989 = vrcp.f32 %v7194_v33  ;;  %v7754_v57 = vmul.f32 %v11968_v22, %v19707_v44  ;;  %v7422_v33 = vrot.slane %v16855_v31, %v19688_v0 }
 0x584   : > { %8133 = vperm.xlu0 %11235, %v7748_v59   ;;  %v16879_v7 = vpop.eup %11971  ;;  %11991 = vrcp.f32 %v7402_v42  ;;  %v7752_v23 = vmul.f32 %v11970_v16, %v19708_v19  ;;  %v19712_v16 = vld [vmem:[#allocation131_spill] sm:$0xff]  ;;  %v7478_v19 = vrot.slane %v7078_v1, %v19686_v11 }
 0x585   : > { %8138 = vperm.xlu1 %11236, %v7750_v47   ;;  %v16883_v43 = vpop.eup %11973  ;;  %11993 = vrcp.f32 %v7398_v53  ;;  %v7462_v53 = vrot.slane %v7078_v1, %v19682_v61 }
 0x586   : > { %v11976_v63 = vpop.eup %11975  ;;  %11995 = vrcp.f32 %v7190_v17  ;;  %v7474_v17 = vrot.slane %v7078_v1, %v19683_v50 }
 0x587   : > { %v11978_v4 = vpop.eup %11977  ;;  %11997 = vrcp.f32 %v7202_v29  ;;  %v7758_v58 = vmul.f32 %v11976_v63, %v19709_v8  ;;  %v7054_v63 = vpop.xlane.xlu1 %7053  ;;  %v19714_v8 = vld [vmem:[#allocation133_spill] sm:$0xff] }
 0x588   : > { %8148 = vperm.xlu0 %11235, %v7754_v57   ;;  %v16893_v35 = vpop.eup %11979  ;;  %11999 = vrcp.f32 %v7410_v2  ;;  %v7756_v12 = vmul.f32 %v11978_v4, %v19710_v15  ;;  %v7470_v2 = vrot.slane %v7078_v1, %v19684_v62  ;;  %v7482_v57 = vrot.slane %v7078_v1, %v19685_v13 }
 0x589   : > { %8143 = vperm.xlu1 %11236, %v7752_v23   ;;  %v16897_v3 = vpop.eup %11981  ;;  %12001 = vrcp.f32 %v7406_v49  ;;  %v7210_v15 = vrot.slane %v7054_v63, %v19681_v52 }
 0x58a   : > { %v11984_v54 = vpop.eup %11983  ;;  %12003 = vrcp.f32 %v7198_v14  ;;  %v19713_v14 = vld [vmem:[#allocation73_spill] sm:$0xff] }
 0x58b   : > { %v11986_v42 = vpop.eup %11985  ;;  %12005 = vrcp.f32 %v7418_v20  ;;  %v7762_v47 = vmul.f32 %v11984_v54, %v19711_v55  ;;  %v7490_v20 = vrot.slane %v7078_v1, %v19687_v18  ;;  %v7218_v55 = vrot.slane %v7054_v63, %v19683_v50 }
 0x58c   : > { %8158 = vperm.xlu0 %11235, %v7758_v58   ;;  %v16906_v59 = vpop.eup %11987  ;;  %12007 = vrcp.f32 %v7414_v25  ;;  %v7760_v29 = vmul.f32 %v11986_v42, %v19712_v16 }
 0x58d   : > { %8153 = vperm.xlu1 %11236, %v7756_v12   ;;  %v16909_v22 = vpop.eup %11989  ;;  %12009 = vrcp.f32 %v7426_v40  ;;  %v7486_v40 = vrot.slane %v7078_v1, %v19688_v0 }
 0x58e   : > { %v11992_v31 = vpop.eup %11991  ;;  %12011 = vrcp.f32 %v7422_v33  ;;  %v7206_v33 = vrot.slane %v7054_v63, %v19682_v61 }
 0x58f   : > { %v11994_v44 = vpop.eup %11993  ;;  %12013 = vrcp.f32 %v7466_v28  ;;  %v7894_v4 = vmul.f32 %v11992_v31, %v19713_v14  ;;  %v19715_v28 = vld [vmem:[#allocation37_spill] sm:$0xff]  ;;  %v7214_v31 = vrot.slane %v7054_v63, %v19684_v62  ;;  %v19717_v14 = vld [vmem:[#allocation123_spill] sm:$0xff] }
 0x590   : > { %8168 = vperm.xlu0 %11235, %v7762_v47   ;;  %v16916_v49 = vpop.eup %11995  ;;  %12015 = vrcp.f32 %v7462_v53  ;;  %v7892_v58 = vmul.f32 %v11994_v44, %v19714_v8  ;;  %v7081_v44 = vpop.xlane.xlu0 %7080  ;;  %v19718_v8 = vld [vmem:[#allocation137_spill] sm:$0xff] }
 0x591   : > { %8163 = vperm.xlu1 %11236, %v7760_v29   ;;  %v16919_v23 = vpop.eup %11997  ;;  %12017 = vrcp.f32 %v7474_v17  ;;  %v19716_v17 = vld [vmem:[#allocation135_spill] sm:$0xff]  ;;  %v7226_v29 = vrot.slane %v7054_v63, %v19685_v13 }
 0x592   : > { %v12000_v25 = vpop.eup %11999  ;;  %12019 = vrcp.f32 %v7470_v2 }
 0x593   : > { %v12002_v54 = vpop.eup %12001  ;;  %12021 = vrcp.f32 %v7482_v57  ;;  %v7898_v53 = vmul.f32 %v12000_v25, %v19715_v28  ;;  %v7222_v57 = vrot.slane %v7054_v63, %v19686_v11 }
 0x594   : > { %8498 = vperm.xlu0 %11235, %v7894_v4   ;;  %v16926_v12 = vpop.eup %12003  ;;  %12023 = vrcp.f32 %v7478_v19  ;;  %v7896_v1 = vmul.f32 %v12002_v54, %v19716_v17  ;;  %v19720_v17 = vld [vmem:[#allocation139_spill] sm:$0xff] }
 0x595   : > { %8493 = vperm.xlu1 %11236, %v7892_v58   ;;  %v12006_v42 = vpop.eup %12005  ;;  %12025 = vrcp.f32 %v7490_v20  ;;  %v7234_v20 = vrot.slane %v7054_v63, %v19687_v18 }
 0x596   : > { %v12008_v47 = vpop.eup %12007  ;;  %12027 = vrcp.f32 %v7486_v40  ;;  %v7902_v4 = vmul.f32 %v12006_v42, %v19717_v14  ;;  %v7230_v40 = vrot.slane %v7054_v63, %v19688_v0  ;;  %v7494_v42 = vrot.slane %v7081_v44, %v19682_v61 }
 0x597   : > { %v12010_v16 = vpop.eup %12009  ;;  %12029 = vrcp.f32 %v7210_v15  ;;  %v7900_v58 = vmul.f32 %v12008_v47, %v19718_v8  ;;  %v7498_v15 = vrot.slane %v7081_v44, %v19681_v52  ;;  %v7506_v47 = vrot.slane %v7081_v44, %v19683_v50  ;;  %v19721_v8 = vld [vmem:[#allocation43_spill] sm:$0xff] }
 0x598   : > { %8508 = vperm.xlu0 %11235, %v7898_v53   ;;  %v12012_v2 = vpop.eup %12011  ;;  %12031 = vrcp.f32 %v7206_v33  ;;  %v19719_v53 = vld [vmem:[#allocation125_spill] sm:$0xff] }
 0x599   : > { %8503 = vperm.xlu1 %11236, %v7896_v1   ;;  %v16935_v19 = vpop.eup %12013  ;;  %12033 = vrcp.f32 %v7218_v55  ;;  %v7906_v55 = vmul.f32 %v12010_v16, %v19719_v53  ;;  %v7904_v1 = vmul.f32 %v12012_v2, %v19720_v17  ;;  %v7510_v16 = vrot.slane %v7081_v44, %v19686_v11 }
 0x59a   : > { %v16939_v25 = vpop.eup %12015  ;;  %12035 = vrcp.f32 %v7214_v31  ;;  %v7502_v31 = vrot.slane %v7081_v44, %v19684_v62  ;;  %v7766_v2 = vmul.f32 %v16797_v46, %v19721_v8  ;;  %v19723_v8 = vld [vmem:[#allocation33_spill] sm:$0xff] }
 0x59b   : > { %v16943_v54 = vpop.eup %12017  ;;  %12037 = vrcp.f32 %v7226_v29 }
 0x59c   : > { %8518 = vperm.xlu0 %11235, %v7902_v4   ;;  %v16946_v33 = vpop.eup %12019  ;;  %12039 = vrcp.f32 %v7222_v57  ;;  %v7514_v57 = vrot.slane %v7081_v44, %v19685_v13  ;;  %v7057_v4 = vpop.xlane.xlu0 %7056 }
 0x59d   : > { %8513 = vperm.xlu1 %11236, %v7900_v58   ;;  %v16949_v28 = vpop.eup %12021  ;;  %12041 = vrcp.f32 %v7234_v20  ;;  %v7522_v58 = vrot.slane %v7081_v44, %v19687_v18  ;;  %v7238_v46 = vrot.slane %v7057_v4, %v19682_v61  ;;  %v7262_v32 = vrot.slane %v7057_v4, %v19688_v0 }
 0x59e   : > { %v16953_v63 = vpop.eup %12023  ;;  %12043 = vrcp.f32 %v7230_v40 }
 0x59f   : > { %v16957_v29 = vpop.eup %12025  ;;  %12045 = vrcp.f32 %v7498_v15  ;;  %v19722_v15 = vld [vmem:[#allocation141_spill] sm:$0xff] }
 0x5a0   : > { %8528 = vperm.xlu0 %11235, %v7906_v55   ;;  %v16960_v14 = vpop.eup %12027  ;;  %12047 = vrcp.f32 %v7494_v42  ;;  %v7764_v53 = vmul.f32 %v16802_v39, %v19722_v15  ;;  %v7518_v55 = vrot.slane %v7081_v44, %v19688_v0  ;;  %v7242_v42 = vrot.slane %v7057_v4, %v19681_v52 }
 0x5a1   : > { %8523 = vperm.xlu1 %11236, %v7904_v1   ;;  %v16963_v20 = vpop.eup %12029  ;;  %12049 = vrcp.f32 %v7506_v47  ;;  %v7770_v39 = vmul.f32 %v16807_v34, %v19723_v8  ;;  %v7250_v44 = vrot.slane %v7057_v4, %v19683_v50  ;;  %v7246_v15 = vrot.slane %v7057_v4, %v19684_v62  ;;  %v16994_v34 = vpop.xlane.xlu1 %7083 }
 0x5a2   : > { %v16968_v40 = vpop.eup %12031  ;;  %12051 = vrcp.f32 %v7502_v31  ;;  %v7550_v56 = vrot.slane %v16994_v34, %v19688_v0 }
 0x5a3   : > { %v16973_v17 = vpop.eup %12033  ;;  %12053 = vrcp.f32 %v7514_v57 }
 0x5a4   : > { %8178 = vperm.xlu0 %11235, %v7766_v2   ;;  %v16976_v1 = vpop.eup %12035  ;;  %12055 = vrcp.f32 %v7510_v16  ;;  %v19724_v2 = vld [vmem:[#allocation142_spill] sm:$0xff]  ;;  %v7258_v16 = vrot.slane %v7057_v4, %v19685_v13 }
 0x5a5   : > { %8173 = vperm.xlu1 %11236, %v7764_v53   ;;  %v16979_v47 = vpop.eup %12037  ;;  %12057 = vrcp.f32 %v7522_v58  ;;  %v7768_v57 = vmul.f32 %v16811_v41, %v19724_v2  ;;  %v7254_v58 = vrot.slane %v7057_v4, %v19686_v11  ;;  %v19725_v41 = vld [vmem:[#allocation28_spill] sm:$0xff]  ;;  %v7266_v2 = vrot.slane %v7057_v4, %v19687_v18 }
 0x5a6   : > { %v16984_v31 = vpop.eup %12039  ;;  %12059 = vrcp.f32 %v7518_v55  ;;  %v7774_v55 = vmul.f32 %v16817_v48, %v19725_v41  ;;  %v7526_v48 = vrot.slane %v16994_v34, %v19682_v61  ;;  %v7538_v4 = vrot.slane %v16994_v34, %v19683_v50  ;;  %v19728_v41 = vld [vmem:[#allocation145_spill] sm:$0xff] }
 0x5a7   : > { %v16989_v53 = vpop.eup %12041  ;;  %12061 = vrcp.f32 %v7242_v42  ;;  %v19726_v42 = vld [vmem:[#allocation144_spill] sm:$0xff] }
 0x5a8   : > { %8188 = vperm.xlu0 %11235, %v7770_v39   ;;  %v16992_v10 = vpop.eup %12043  ;;  %12063 = vrcp.f32 %v7238_v46  ;;  %v7772_v24 = vmul.f32 %v16822_v45, %v19726_v42  ;;  %v7530_v46 = vrot.slane %v16994_v34, %v19681_v52  ;;  %v19727_v45 = vld [vmem:[#allocation130_spill] sm:$0xff]  ;;  %v17033_v42 = vpop.xlane.xlu1 %7059 }
 0x5a9   : > { %8183 = vperm.xlu1 %11236, %v7768_v57   ;;  %v16997_v8 = vpop.eup %12045  ;;  %12065 = vrcp.f32 %v7250_v44 }
 0x5aa   : > { %v17002_v39 = vpop.eup %12047  ;;  %12067 = vrcp.f32 %v7246_v15  ;;  %v7778_v15 = vmul.f32 %v16827_v38, %v19727_v45  ;;  %v7546_v38 = vrot.slane %v16994_v34, %v19685_v13  ;;  %v19730_v45 = vld [vmem:[#allocation132_spill] sm:$0xff] }
 0x5ab   : > { %v17007_v57 = vpop.eup %12049  ;;  %12069 = vrcp.f32 %v7258_v16 }
 0x5ac   : > { %8198 = vperm.xlu0 %11235, %v7774_v55   ;;  %v17011_v37 = vpop.eup %12051  ;;  %12071 = vrcp.f32 %v7254_v58  ;;  %v7776_v55 = vmul.f32 %v16831_v60, %v19728_v41  ;;  %v7910_v41 = vmul.f32 %v16835_v5, %v19730_v45 }
 0x5ad   : > { %8193 = vperm.xlu1 %11236, %v7772_v24   ;;  %v17015_v44 = vpop.eup %12053  ;;  %12073 = vrcp.f32 %v7266_v2  ;;  %v7534_v24 = vrot.slane %v16994_v34, %v19684_v62 }
 0x5ae   : > { %v17021_v16 = vpop.eup %12055  ;;  %12075 = vrcp.f32 %v7262_v32  ;;  %v7542_v32 = vrot.slane %v16994_v34, %v19686_v11 }
 0x5af   : > { %v17027_v58 = vpop.eup %12057  ;;  %12077 = vrcp.f32 %v7530_v46  ;;  %v7554_v46 = vrot.slane %v16994_v34, %v19687_v18 }
 0x5b0   : > { %8208 = vperm.xlu0 %11235, %v7778_v15   ;;  %v17031_v2 = vpop.eup %12059  ;;  %12079 = vrcp.f32 %v7526_v48 }
 0x5b1   : > { %8203 = vperm.xlu1 %11236, %v7776_v55   ;;  %v17037_v60 = vpop.eup %12061  ;;  %12081 = vrcp.f32 %v7538_v4  ;;  %v19733_v55 = vld [vmem:[#allocation57_spill] sm:$0xff]  ;;  %v19734_v4 = vld [vmem:[#allocation134_spill] sm:$0xff] }
 0x5b2   : > { %19729 = vst [vmem:[#allocation97_spill] sm:$0xff] %v17037_v60  ;;  %v17043_v15 = vpop.eup %12063  ;;  %v7908_v48 = vmul.f32 %v16840_v27, %v19733_v55  ;;  %12083 = vrcp.f32 %v7534_v24  ;;  %v7914_v45 = vmul.f32 %v16845_v51, %v19734_v4  ;;  %v19735_v27 = vld [vmem:[#allocation34_spill] sm:$0xff]  ;;  %v19736_v55 = vld [vmem:[#allocation136_spill] sm:$0xff]  ;;  %v19737_v51 = vld [vmem:[#allocation25_spill] sm:$0xff] }
 0x5b3   : > { %19731 = vst [vmem:[#allocation103_spill] sm:$0xff] %v17043_v15  ;;  %v17053_v60 = vpop.eup %12065  ;;  %12085 = vrcp.f32 %v7546_v38  ;;  %v7274_v15 = vrot.slane %v17033_v42, %v19681_v52  ;;  %v7912_v24 = vmul.f32 %v16849_v36, %v19735_v27  ;;  %v7918_v34 = vmul.f32 %v16853_v9, %v19736_v55  ;;  %v19738_v4 = vld [vmem:[#allocation138_spill] sm:$0xff]  ;;  %v19740_v27 = vld [vmem:[#allocation84_spill] sm:$0xff] }
 0x5b4   : > { %8538 = vperm.xlu0 %11235, %v7910_v41   ;;  %v17060_v30 = vpop.eup %12067  ;;  %12087 = vrcp.f32 %v7542_v32  ;;  %v7270_v41 = vrot.slane %v17033_v42, %v19682_v61  ;;  %v7916_v38 = vmul.f32 %v16865_v6, %v19737_v51  ;;  %v7922_v21 = vmul.f32 %v16869_v26, %v19738_v4  ;;  %v19741_v32 = vld [vmem:[#allocation140_spill] sm:$0xff]  ;;  %v19742_v26 = vld [vmem:[#allocation54_spill] sm:$0xff] }
 0x5b5   : > { %8533 = vperm.xlu1 %11236, %v7908_v48   ;;  %v17068_v5 = vpop.eup %12069  ;;  %12089 = vrcp.f32 %v7554_v46  ;;  %v7282_v48 = vrot.slane %v17033_v42, %v19683_v50  ;;  %v7920_v9 = vmul.f32 %v16879_v7, %v19740_v27  ;;  %v17082_v55 = vmul.f32 %v16883_v43, %v19741_v32  ;;  %v19743_v4 = vld [vmem:[#allocation60_spill] sm:$0xff]  ;;  %v17100_v43 = vpop.xlane.xlu0 %7086  ;;  %v19745_v27 = vld [vmem:[#allocation58_spill] sm:$0xff] }
 0x5b6   : > { %v17076_v36 = vpop.eup %12071  ;;  %12091 = vrcp.f32 %v7550_v56  ;;  %v7278_v6 = vrot.slane %v17033_v42, %v19684_v62  ;;  %v17090_v46 = vmul.f32 %v16893_v35, %v19742_v26  ;;  %v7290_v7 = vrot.slane %v17033_v42, %v19685_v13  ;;  %v19746_v35 = vld [vmem:[#allocation143_spill] sm:$0xff]  ;;  %v19748_v26 = vld [vmem:[#allocation38_spill] sm:$0xff] }
 0x5b7   : > { %19739 = vst [vmem:[#allocation80_spill] sm:$0xff] %v17076_v36  ;;  %v17086_v51 = vpop.eup %12073  ;;  %v17094_v36 = vmul.f32 %v16897_v3, %v19743_v4  ;;  %12093 = vrcp.f32 %v7274_v15  ;;  %v17108_v32 = vmul.f32 %v16909_v22, %v19746_v35  ;;  %v7286_v3 = vrot.slane %v17033_v42, %v19686_v11  ;;  %v17131_v35 = vld [vmem:[%s12723_s26 + $0xe8] sm:$0xff]  }
 0x5b8   : > { %8548 = vperm.xlu0 %11235, %v7914_v45   ;;  %v17098_v56 = vpop.eup %12075  ;;  %v17104_v45 = vmul.f32 %v16906_v59, %v19745_v27  ;;  %12095 = vrcp.f32 %v7270_v41  ;;  %v17116_v4 = vmul.f32 %v16916_v49, %v19748_v26  ;;  %v7298_v59 = vrot.slane %v17033_v42, %v19687_v18  ;;  %v19750_v41 = vld [vmem:[#allocation39_spill] sm:$0xff]  ;;  %19751 = vst [vmem:[#allocation157_spill] sm:$0xff] %v17131_v35  ;;  %v17140_v26 = vld [vmem:[%s12723_s26 + $0xf0] sm:$0xff]  }
 0x5b9   : > { %19744 = vst [vmem:[#allocation105_spill] sm:$0xff] %v17098_v56  ;;  %8543 = vperm.xlu1 %11236, %v7912_v24   ;;  %v17112_v15 = vpop.eup %12077  ;;  %v19749_v24 = vld [vmem:[#allocation83_spill] sm:$0xff]  ;;  %12097 = vrcp.f32 %v7282_v48  ;;  %v17128_v27 = vmul.f32 %v16926_v12, %v19750_v41  ;;  %v7294_v49 = vrot.slane %v17033_v42, %v19688_v0  ;;  %19752 = vst [vmem:[#allocation108_spill] sm:$0xff] %v17140_v26 }
 0x5ba   : > { %19747 = vst [vmem:[#allocation85_spill] sm:$0xff] %v17112_v15  ;;  %v17120_v56 = vmul.f32 %v16919_v23, %v19749_v24  ;;  %v17124_v22 = vpop.eup %12079  ;;  %12099 = vrcp.f32 %v7278_v6  ;;  %v7558_v12 = vrot.slane %v17100_v43, %v19682_v61  ;;  %v19753_v6 = vld [vmem:[#allocation86_spill] sm:$0xff]  ;;  %v19755_v24 = vld [vmem:[#allocation76_spill] sm:$0xff]  ;;  %v17161_v35 = vld [vmem:[%s12723_s26 + $0xf8] sm:$0xff]  }
 0x5bb   : > { %v17136_v23 = vpop.eup %12081  ;;  %12101 = vrcp.f32 %v7290_v7  ;;  %v17149_v42 = vmul.f32 %v16935_v19, %v19753_v6  ;;  %v17158_v7 = vmul.f32 %v16939_v25, %v19755_v24  ;;  %19756 = vst [vmem:[#allocation159_spill] sm:$0xff] %v17161_v35  ;;  %v7566_v19 = vrot.slane %v17100_v43, %v19684_v62  ;;  %v19759_v26 = vld [vmem:[#allocation87_spill] sm:$0xff] }
 0x5bc   : > { %8558 = vperm.xlu0 %11235, %v7918_v34   ;;  %v17145_v41 = vpop.eup %12083  ;;  %12103 = vrcp.f32 %v7286_v3  ;;  %v7562_v34 = vrot.slane %v17100_v43, %v19681_v52  ;;  %v19758_v3 = vld [vmem:[#allocation89_spill] sm:$0xff]  ;;  %v7570_v25 = vrot.slane %v17100_v43, %v19683_v50 }
 0x5bd   : > { %8553 = vperm.xlu1 %11236, %v7916_v38   ;;  %v17154_v48 = vpop.eup %12085  ;;  %12105 = vrcp.f32 %v7298_v59  ;;  %v17170_v15 = vmul.f32 %v16943_v54, %v19758_v3  ;;  %v19760_v59 = vld [vmem:[#allocation77_spill] sm:$0xff]  ;;  %v7574_v54 = vrot.slane %v17100_v43, %v19686_v11 }
 0x5be   : > { %19754 = vst [vmem:[#allocation30_spill] sm:$0xff] %v17154_v48  ;;  %v17166_v6 = vpop.eup %12087  ;;  %v17174_v48 = vmul.f32 %v16946_v33, %v19759_v26  ;;  %12107 = vrcp.f32 %v7294_v49  ;;  %v17182_v38 = vmul.f32 %v16949_v28, %v19760_v59  ;;  %v17189_v33 = vpop.xlane.xlu0 %7062  ;;  %v19762_v49 = vld [vmem:[#allocation61_spill] sm:$0xff] }
 0x5bf   : > { %19757 = vst [vmem:[#allocation161_spill] sm:$0xff] %v17166_v6  ;;  %v17178_v24 = vpop.eup %12089  ;;  %12109 = vrcp.f32 %v7558_v12  ;;  %v17193_v26 = vmul.f32 %v16953_v63, %v19762_v49  ;;  %v7578_v12 = vrot.slane %v17100_v43, %v19685_v13  ;;  %v19765_v6 = vld [vmem:[#allocation75_spill] sm:$0xff]  ;;  %v7582_v63 = vrot.slane %v17100_v43, %v19688_v0 }
 0x5c0   : > { %8568 = vperm.xlu0 %11235, %v7922_v21   ;;  %19761 = vst [vmem:[#allocation106_spill] sm:$0xff] %v17182_v38  ;;  %v17187_v3 = vpop.eup %12091  ;;  %v19763_v21 = vld [vmem:[#allocation74_spill] sm:$0xff]  ;;  %12111 = vrcp.f32 %v7562_v34  ;;  %v17205_v35 = vmul.f32 %v16960_v14, %v19765_v6  ;;  %v19767_v34 = vld [vmem:[#allocation88_spill] sm:$0xff]  ;;  %v7586_v14 = vrot.slane %v17100_v43, %v19687_v18 }
 0x5c1   : > { %8563 = vperm.xlu1 %11236, %v7920_v9   ;;  %v17197_v28 = vmul.f32 %v16957_v29, %v19763_v21  ;;  %v17201_v59 = vpop.eup %12093  ;;  %v19766_v9 = vld [vmem:[#allocation22_spill] sm:$0xff]  ;;  %12113 = vrcp.f32 %v7566_v19  ;;  %v17217_v49 = vmul.f32 %v16968_v40, %v19767_v34  ;;  %v19768_v21 = vld [vmem:[#allocation56_spill] sm:$0xff]  ;;  %v19771_v34 = vld [vmem:[#allocation59_spill] sm:$0xff] }
 0x5c2   : > { %v17209_v38 = vmul.f32 %v16963_v20, %v19766_v9  ;;  %v17213_v29 = vpop.eup %12095  ;;  %12115 = vrcp.f32 %v7570_v25  ;;  %v17229_v19 = vld [vmem:[%s12723_s26 + $0x100] sm:$0xff]   ;;  %v19773_v40 = vld [vmem:[#allocation27_spill] sm:$0xff] }
 0x5c3   : > { %19764 = vst [vmem:[#allocation21_spill] sm:$0xff] %v17197_v28  ;;  %v17221_v28 = vmul.f32 %v16973_v17, %v19768_v21  ;;  %v17225_v20 = vpop.eup %12097  ;;  %19769 = vst [vmem:[#allocation107_spill] sm:$0xff] %v17229_v19  ;;  %12117 = vrcp.f32 %v7574_v54  ;;  %v7302_v17 = vrot.slane %v17189_v33, %v19682_v61  ;;  %v19770_v43 = vld [vmem:[#allocation44_spill] sm:$0xff]  ;;  %v7306_v21 = vrot.slane %v17189_v33, %v19681_v52  ;;  %v17255_v19 = vld [vmem:[%s12723_s26 + $0x108] sm:$0xff]  }
 0x5c4   : > { %8218 = vperm.xlu0 %11235, %v17082_v55   ;;  %v17235_v9 = vpop.eup %12099  ;;  %v17240_v25 = vmul.f32 %v16976_v1, %v19770_v43  ;;  %v17244_v55 = vmul.f32 %v16979_v47, %v19771_v34  ;;  %12119 = vrcp.f32 %v7578_v12  ;;  %v17252_v6 = vmul.f32 %v16984_v31, %v19773_v40  ;;  %19775 = vst [vmem:[#allocation46_spill] sm:$0xff] %v17255_v19  ;;  %v19776_v12 = vld [vmem:[#allocation29_spill] sm:$0xff]  ;;  %v17284_v34 = vpop.xlane.xlu1 %7089 }
 0x5c5   : > { %8213 = vperm.xlu1 %11236, %v17090_v46   ;;  %v17248_v54 = vpop.eup %12101  ;;  %12121 = vrcp.f32 %v7582_v63  ;;  %v7310_v1 = vrot.slane %v17189_v33, %v19684_v62  ;;  %v17264_v43 = vmul.f32 %v16989_v53, %v19776_v12  ;;  %v7314_v31 = vrot.slane %v17189_v33, %v19683_v50  ;;  %v19777_v63 = vld [vmem:[#allocation146_spill] sm:$0xff] }
 0x5c6   : > { %19772 = vst [vmem:[#allocation114_spill] sm:$0xff] %v17244_v55  ;;  %19774 = vst [vmem:[#allocation109_spill] sm:$0xff] %v17252_v6  ;;  %v17260_v47 = vpop.eup %12103  ;;  %12123 = vrcp.f32 %v7586_v14  ;;  %v17274_v46 = vmul.f32 %v16992_v10, %v19777_v63  ;;  %v19778_v6 = vld [vmem:[#allocation78_spill] sm:$0xff]  ;;  %v7318_v53 = vrot.slane %v17189_v33, %v19686_v11  ;;  %v19780_v14 = vld [vmem:[#allocation81_spill] sm:$0xff] }
 0x5c7   : > { %v17269_v40 = vpop.eup %12105  ;;  %v17278_v55 = vmul.f32 %v16997_v8, %v19778_v6  ;;  %12125 = vrcp.f32 %v7302_v17  ;;  %v17292_v10 = vld [vmem:[%s12723_s26 + $0x110] sm:$0xff]   ;;  %v7322_v8 = vrot.slane %v17189_v33, %v19685_v13  ;;  %v19783_v17 = vld [vmem:[#allocation65_spill] sm:$0xff]  ;;  %v19784_v63 = vld [vmem:[#allocation147_spill] sm:$0xff] }
 0x5c8   : > { %8228 = vperm.xlu0 %11235, %v17094_v36   ;;  %v17282_v12 = vpop.eup %12107  ;;  %v17289_v36 = vmul.f32 %v17002_v39, %v19780_v14  ;;  %19782 = vst [vmem:[#allocation69_spill] sm:$0xff] %v17292_v10  ;;  %12127 = vrcp.f32 %v7306_v21  ;;  %v17301_v19 = vmul.f32 %v17007_v57, %v19783_v17  ;;  %v7326_v39 = vrot.slane %v17189_v33, %v19688_v0  ;;  %v17326_v10 = vld [vmem:[%s12723_s26 + $0x118] sm:$0xff]  }
 0x5c9   : > { %19779 = vst [vmem:[#allocation111_spill] sm:$0xff] %v17278_v55  ;;  %8223 = vperm.xlu1 %11236, %v17104_v45   ;;  %v17297_v6 = vpop.eup %12109  ;;  %12129 = vrcp.f32 %v7310_v1  ;;  %v17310_v21 = vmul.f32 %v17011_v37, %v19784_v63  ;;  %v7330_v57 = vrot.slane %v17189_v33, %v19687_v18  ;;  %v19786_v1 = vld [vmem:[#allocation148_spill] sm:$0xff]  ;;  %19788 = vst [vmem:[#allocation23_spill] sm:$0xff] %v17326_v10  ;;  %v19792_v37 = vld [vmem:[#allocation97_spill] sm:$0xff] }
 0x5ca   : > { %19781 = vst [vmem:[#allocation52_spill] sm:$0xff] %v17289_v36  ;;  %v17306_v14 = vpop.eup %12111  ;;  %v19785_v36 = vld [vmem:[#allocation31_spill] sm:$0xff]  ;;  %12131 = vrcp.f32 %v7314_v31  ;;  %v17323_v45 = vmul.f32 %v17021_v16, %v19786_v1  ;;  %v7590_v16 = vrot.slane %v17284_v34, %v19682_v61  ;;  %v19795_v33 = vld [vmem:[#allocation62_spill] sm:$0xff] }
 0x5cb   : > { %v17314_v55 = vmul.f32 %v17015_v44, %v19785_v36  ;;  %v17318_v17 = vpop.eup %12113  ;;  %12133 = vrcp.f32 %v7318_v53  ;;  %v7594_v44 = vrot.slane %v17284_v34, %v19681_v52  ;;  %v19789_v36 = vld [vmem:[#allocation24_spill] sm:$0xff]  ;;  %v19790_v53 = vld [vmem:[#allocation149_spill] sm:$0xff]  ;;  %v19791_v52 = vld [vmem:[#allocation79_spill] sm:$0xff]  ;;  %v17361_v10 = vmul.f32 %v17053_v60, %v19795_v33 }
 0x5cc   : > { %8238 = vperm.xlu0 %11235, %v17108_v32   ;;  %19787 = vst [vmem:[#allocation49_spill] sm:$0xff] %v17323_v45  ;;  %v17331_v31 = vpop.eup %12115  ;;  %v17337_v32 = vmul.f32 %v17027_v58, %v19789_v36  ;;  %12135 = vrcp.f32 %v7322_v8  ;;  %v17345_v1 = vmul.f32 %v17031_v2, %v19790_v53  ;;  %v17349_v45 = vmul.f32 %v19792_v37, %v19791_v52  ;;  %v19793_v8 = vld [vmem:[#allocation36_spill] sm:$0xff]  ;;  %v19794_v36 = vld [vmem:[#allocation103_spill] sm:$0xff]  ;;  %v19797_v53 = vld [vmem:[#allocation45_spill] sm:$0xff] }
 0x5cd   : > { %8233 = vperm.xlu1 %11236, %v17116_v4   ;;  %v17341_v63 = vpop.eup %12117  ;;  %12137 = vrcp.f32 %v7326_v39  ;;  %v7598_v58 = vrot.slane %v17284_v34, %v19684_v62  ;;  %v17357_v61 = vmul.f32 %v19794_v36, %v19793_v8  ;;  %v7602_v2 = vrot.slane %v17284_v34, %v19683_v50  ;;  %v19796_v39 = vld [vmem:[#allocation64_spill] sm:$0xff] }
 0x5ce   : > { %v17353_v4 = vpop.eup %12119  ;;  %12139 = vrcp.f32 %v7330_v57  ;;  %v17370_v62 = vmul.f32 %v17060_v30, %v19796_v39  ;;  %v17374_v52 = vmul.f32 %v17068_v5, %v19797_v53  ;;  %v7606_v60 = vrot.slane %v17284_v34, %v19686_v11  ;;  %v17382_v50 = vld [vmem:[%s12723_s26] sm:$0xff]   ;;  %v19806_v11 = vld [vmem:[#allocation85_spill] sm:$0xff] }
 0x5cf   : > { %v17365_v37 = vpop.eup %12121  ;;  %12141 = vrcp.f32 %v7594_v44  ;;  %v19798_v33 = vld [vmem:[#allocation32_spill] sm:$0xff]  ;;  %v7610_v5 = vrot.slane %v17284_v34, %v19685_v13  ;;  %v19804_v13 = vld [vmem:[#allocation105_spill] sm:$0xff] }
 0x5d0   : > { %8248 = vperm.xlu0 %11235, %v17120_v56   ;;  %v17378_v57 = vpop.eup %12123  ;;  %v19799_v30 = vld [vmem:[#allocation80_spill] sm:$0xff]  ;;  %12143 = vrcp.f32 %v7590_v16  ;;  %v19807_v16 = vld [vmem:[#allocation150_spill] sm:$0xff] }
 0x5d1   : > { %8243 = vperm.xlu1 %11236, %v17128_v27   ;;  %v17387_v8 = vmul.f32 %v19799_v30, %v19798_v33  ;;  %v17391_v44 = vpop.eup %12125  ;;  %v19801_v36 = vld [vmem:[#allocation20_spill] sm:$0xff]  ;;  %12145 = vrcp.f32 %v7598_v58  ;;  %v7614_v27 = vrot.slane %v17284_v34, %v19688_v0  ;;  %v17403_v33 = vld [vmem:[%s12723_s26 + $0x8] sm:$0xff]   ;;  %v19803_v30 = vld [vmem:[#allocation70_spill] sm:$0xff] }
 0x5d2   : > { %v17396_v39 = vmul.f32 %v17086_v51, %v19801_v36  ;;  %v17400_v53 = vpop.eup %12127  ;;  %v17408_v56 = vmul.f32 %v19804_v13, %v19803_v30  ;;  %12147 = vrcp.f32 %v7602_v2  ;;  %v7618_v51 = vrot.slane %v17284_v34, %v19687_v18  ;;  %v19805_v58 = vld [vmem:[#allocation53_spill] sm:$0xff]  ;;  %v19808_v2 = vld [vmem:[#allocation40_spill] sm:$0xff]  ;;  %v19809_v34 = vld [vmem:[#allocation63_spill] sm:$0xff] }
 0x5d3   : > { %19800 = vst [vmem:[#allocation116_spill] sm:$0xff] %v17387_v8  ;;  %v17412_v36 = vpop.eup %12129  ;;  %v17422_v8 = vmul.f32 %v17124_v22, %v19807_v16  ;;  %12149 = vrcp.f32 %v7606_v60  ;;  %v17427_v18 = vmul.f32 %v17136_v23, %v19808_v2  ;;  %v19811_v13 = vld [vmem:[#allocation92_spill] sm:$0xff]  ;;  %v19812_v0 = vld [vmem:[#allocation30_spill] sm:$0xff]  ;;  %v19815_v23 = vld [vmem:[#allocation161_spill] sm:$0xff] }
 0x5d4   : > { %19802 = vst [vmem:[#allocation42_spill] sm:$0xff] %v17396_v39  ;;  %8578 = vperm.xlu0 %11235, %v17149_v42   ;;  %v17418_v39 = vmul.f32 %v19806_v11, %v19805_v58  ;;  %v12132_v30 = vpop.eup %12131  ;;  %v17431_v42 = vmul.f32 %v17145_v41, %v19809_v34  ;;  %v17435_v11 = vmul.f32 %v19812_v0, %v19811_v13  ;;  %12151 = vrcp.f32 %v7610_v5  ;;  %v17438_v16 = vld [vmem:[%s12723_s26 + $0x10] sm:$0xff]   ;;  %v19814_v58 = vld [vmem:[#allocation71_spill] sm:$0xff] }
 0x5d5   : > { %8573 = vperm.xlu1 %11236, %v17158_v7   ;;  %v12134_v22 = vpop.eup %12133  ;;  %v17444_v2 = vmul.f32 %v19815_v23, %v19814_v58  ;;  %12153 = vrcp.f32 %v7614_v27  ;;  %v19816_v34 = vld [vmem:[#allocation91_spill] sm:$0xff]  ;;  %v19819_v23 = vld [vmem:[#allocation152_spill] sm:$0xff] }
 0x5d6   : > { %19810 = vst [vmem:[#allocation47_spill] sm:$0xff] %v17431_v42  ;;  %19813 = vst [vmem:[#allocation115_spill] sm:$0xff] %v17435_v11  ;;  %v12136_v41 = vpop.eup %12135  ;;  %v17448_v42 = vmul.f32 %v17178_v24, %v19816_v34  ;;  %v19817_v0 = vld [vmem:[#allocation151_spill] sm:$0xff]  ;;  %12155 = vrcp.f32 %v7618_v51  ;;  %v19820_v34 = vld [vmem:[#allocation48_spill] sm:$0xff] }
 0x5d7   : > { %v17452_v5 = vmul.f32 %v17187_v3, %v19817_v0  ;;  %v19818_v13 = vld [vmem:[#allocation67_spill] sm:$0xff]  ;;  %v12138_v7 = vpop.eup %12137  ;;  %v17466_v3 = vmul.f32 %v17213_v29, %v19819_v23  ;;  %v19821_v51 = vld [vmem:[#allocation153_spill] sm:$0xff]  ;;  %v19824_v24 = vld [vmem:[#allocation154_spill] sm:$0xff] }
 0x5d8   : > { %v17456_v11 = vmul.f32 %v17201_v59, %v19818_v13  ;;  %8588 = vperm.xlu0 %11235, %v17170_v15   ;;  %v17460_v58 = vld [vmem:[%s12723_s26 + $0x18] sm:$0xff]   ;;  %v17470_v59 = vmul.f32 %v17225_v20, %v19820_v34  ;;  %v12140_v0 = vpop.eup %12139  ;;  %v17475_v15 = vmul.f32 %v17235_v9, %v19821_v51  ;;  %v19823_v13 = vld [vmem:[#allocation96_spill] sm:$0xff]  ;;  %v17483_v60 = vmul.f32 %v17260_v47, %v19824_v24  ;;  %v19833_v9 = vld [vmem:[#allocation158_spill] sm:$0xff] }
 0x5d9   : > { %8583 = vperm.xlu1 %11236, %v17174_v48   ;;  %v17479_v27 = vmul.f32 %v17248_v54, %v19823_v13  ;;  %v19825_v29 = vld [vmem:[#allocation95_spill] sm:$0xff]  ;;  %v12142_v20 = vpop.eup %12141  ;;  %v17490_v34 = vld [vmem:[%s12723_s26 + $0x120] sm:$0xff]   ;;  %v17503_v13 = vld [vmem:[%s12723_s26 + $0x128] sm:$0xff]  }
 0x5da   : > { %19822 = vst [vmem:[#allocation118_spill] sm:$0xff] %v17475_v15  ;;  %v17487_v23 = vmul.f32 %v17269_v40, %v19825_v29  ;;  %v19827_v51 = vld [vmem:[#allocation155_spill] sm:$0xff]  ;;  %v19829_v54 = vld [vmem:[#allocation156_spill] sm:$0xff]  ;;  %v12144_v24 = vpop.eup %12143 }
 0x5db   : > { %v17496_v15 = vmul.f32 %v17282_v12, %v19827_v51  ;;  %v17500_v47 = vmul.f32 %v17297_v6, %v19829_v54  ;;  %v17513_v12 = vmul.f32 %v17318_v17, %v19833_v9  ;;  %v12146_v51 = vpop.eup %12145  ;;  %v19836_v6 = vld [vmem:[#allocation100_spill] sm:$0xff] }
 0x5dc   : > { %19826 = vst [vmem:[#allocation51_spill] sm:$0xff] %v17487_v23  ;;  %v19831_v23 = vld [vmem:[#allocation66_spill] sm:$0xff]  ;;  %v17518_v54 = vmul.f32 %v17331_v31, %v19836_v6  ;;  %v19840_v29 = vld [vmem:[#allocation104_spill] sm:$0xff]  ;;  %v12148_v17 = vpop.eup %12147  ;;  %v19844_v6 = vld [vmem:[#allocation163_spill] sm:$0xff] }
 0x5dd   : > { %19828 = vst [vmem:[#allocation119_spill] sm:$0xff] %v17496_v15  ;;  %19830 = vst [vmem:[#allocation41_spill] sm:$0xff] %v17500_v47  ;;  %v17509_v48 = vmul.f32 %v17306_v14, %v19831_v23  ;;  %v19835_v15 = vld [vmem:[#allocation106_spill] sm:$0xff]  ;;  %v19838_v47 = vld [vmem:[#allocation160_spill] sm:$0xff]  ;;  %v17526_v14 = vmul.f32 %v17353_v4, %v19840_v29  ;;  %8593 = vperm.xlu1 %11236, %v17193_v26  }
 0x5de   : > { %19834 = vst [vmem:[#allocation68_spill] sm:$0xff] %v17513_v12  ;;  %8598 = vperm.xlu0 %11235, %v19835_v15   ;;  %19837 = vst [vmem:[#allocation121_spill] sm:$0xff] %v17518_v54  ;;  %v17522_v40 = vmul.f32 %v17341_v63, %v19838_v47  ;;  %v19842_v23 = vld [vmem:[#allocation162_spill] sm:$0xff]  ;;  %v17540_v63 = vmul.f32 %v17391_v44, %v19844_v6  ;;  %v17547_v29 = vld [vmem:[%s12723_s26 + $0x138] sm:$0xff]  }
 0x5df   : > { %19832 = vst [vmem:[#allocation120_spill] sm:$0xff] %v17509_v48  ;;  %19841 = vst [vmem:[#allocation122_spill] sm:$0xff] %v17526_v14  ;;  %v17530_v48 = vmul.f32 %v17365_v37, %v19842_v23  ;;  %v17534_v15 = vld [vmem:[%s12723_s26 + $0x130] sm:$0xff]   ;;  %v12150_v37 = vpop.eup %12149  ;;  %v19856_v14 = vld [vmem:[#allocation93_spill] sm:$0xff] }
 0x5e0   : > { %19839 = vst [vmem:[#allocation117_spill] sm:$0xff] %v17522_v40  ;;  %19845 = vst [vmem:[#allocation72_spill] sm:$0xff] %v17540_v63  ;;  %v19846_v4 = vld [vmem:[#allocation90_spill] sm:$0xff]  ;;  %v12152_v6 = vpop.eup %12151  ;;  %v17566_v26 = vmul.f32 %v12136_v41, %v19856_v14  ;;  %v19858_v23 = vld [vmem:[#allocation113_spill] sm:$0xff] }
 0x5e1   : > { %19843 = vst [vmem:[#allocation124_spill] sm:$0xff] %v17530_v48  ;;  %v17544_v47 = vmul.f32 %v17378_v57, %v19846_v4  ;;  %v19848_v31 = vld [vmem:[#allocation26_spill] sm:$0xff]  ;;  %v19854_v4 = vld [vmem:[#allocation112_spill] sm:$0xff]  ;;  %v17569_v40 = vmul.f32 %v12138_v7, %v19858_v23  ;;  %8603 = vperm.xlu1 %11236, %v17205_v35  }
 0x5e2   : > { %v17553_v9 = vmul.f32 %v17400_v53, %v19848_v31  ;;  %v19850_v48 = vld [vmem:[#allocation110_spill] sm:$0xff]  ;;  %19857 = vst [vmem:[#allocation131_spill] sm:$0xff] %v17566_v26  ;;  %v12154_v53 = vpop.eup %12153  ;;  %v19860_v31 = vld [vmem:[#allocation21_spill] sm:$0xff] }
 0x5e3   : > { %19847 = vst [vmem:[#allocation127_spill] sm:$0xff] %v17544_v47  ;;  %v17557_v44 = vmul.f32 %v17412_v36, %v19850_v48  ;;  %v19852_v63 = vld [vmem:[#allocation50_spill] sm:$0xff]  ;;  %v17563_v47 = vmul.f32 %v12134_v22, %v19854_v4  ;;  %19859 = vst [vmem:[#allocation73_spill] sm:$0xff] %v17569_v40  ;;  %8608 = vperm.xlu0 %11235, %v19860_v31   ;;  %v12156_v14 = vpop.eup %12155  ;;  %v19868_v40 = vld [vmem:[#allocation164_spill] sm:$0xff] }
 0x5e4   : > { %19849 = vst [vmem:[#allocation126_spill] sm:$0xff] %v17553_v9  ;;  %v17560_v57 = vmul.f32 %v12132_v30, %v19852_v63  ;;  %v17573_v9 = vld [vmem:[%s12723_s26 + $0x20] sm:$0xff]   ;;  %v17578_v30 = vld [vmem:[%s12723_s26 + $0x28] sm:$0xff]   ;;  %v19863_v63 = vld [vmem:[#allocation94_spill] sm:$0xff]  ;;  %v17595_v22 = vmul.f32 %v12144_v24, %v19868_v40 }
 0x5e5   : > { %19851 = vst [vmem:[#allocation129_spill] sm:$0xff] %v17557_v44  ;;  %19855 = vst [vmem:[#allocation55_spill] sm:$0xff] %v17563_v47  ;;  %v17582_v41 = vmul.f32 %v12140_v0, %v19863_v63  ;;  %v17587_v23 = vld [vmem:[%s12723_s26 + $0x30] sm:$0xff]   ;;  %v19870_v0 = vld [vmem:[#allocation165_spill] sm:$0xff]  ;;  %v8419_v47 = vpop.permute.xlu0 %8418  ;;  %8253 = vperm.xlu1 %11236, %v17217_v49  }
 0x5e6   : > { %19853 = vst [vmem:[#allocation128_spill] sm:$0xff] %v17560_v57  ;;  %19861 = vst [vmem:[#allocation133_spill] sm:$0xff] %v17573_v9  ;;  %v19866_v48 = vld [vmem:[#allocation98_spill] sm:$0xff]  ;;  %v17598_v63 = vmul.f32 %v12146_v51, %v19870_v0  ;;  %v17607_v4 = vld [vmem:[%s12723_s26 + $0x38] sm:$0xff]  }
 0x5e7   : > { %19862 = vst [vmem:[#allocation37_spill] sm:$0xff] %v17578_v30  ;;  %19864 = vst [vmem:[#allocation135_spill] sm:$0xff] %v17582_v41  ;;  %v17592_v36 = vmul.f32 %v12142_v20, %v19866_v48  ;;  %v19872_v41 = vld [vmem:[#allocation99_spill] sm:$0xff]  ;;  %v19874_v7 = vld [vmem:[#allocation166_spill] sm:$0xff]  ;;  %8258 = vperm.xlu0 %11235, %v17209_v38  }
 0x5e8   : > { %19865 = vst [vmem:[#allocation123_spill] sm:$0xff] %v17587_v23  ;;  %19869 = vst [vmem:[#allocation125_spill] sm:$0xff] %v17595_v22  ;;  %v17601_v35 = vmul.f32 %v12148_v17, %v19872_v41  ;;  %v17604_v26 = vmul.f32 %v12150_v37, %v19874_v7  ;;  %v19877_v48 = vld [vmem:[#allocation101_spill] sm:$0xff]  ;;  %v19879_v40 = vld [vmem:[#allocation167_spill] sm:$0xff] }
 0x5e9   : > { %19867 = vst [vmem:[#allocation137_spill] sm:$0xff] %v17592_v36  ;;  %19871 = vst [vmem:[#allocation139_spill] sm:$0xff] %v17598_v63  ;;  %v17612_v24 = vmul.f32 %v12152_v6, %v19877_v48  ;;  %v17615_v51 = vmul.f32 %v12154_v53, %v19879_v40  ;;  %v19881_v0 = vld [vmem:[#allocation82_spill] sm:$0xff]  ;;  %v19883_v37 = vld [vmem:[#allocation35_spill] sm:$0xff]  ;;  %8263 = vperm.xlu1 %11236, %v17240_v25  }
 0x5ea   : > { %19873 = vst [vmem:[#allocation43_spill] sm:$0xff] %v17601_v35  ;;  %19875 = vst [vmem:[#allocation141_spill] sm:$0xff] %v17604_v26  ;;  %v19882_v17 = vunpack.c.h.bf16 %v19881_v0  ;;  %v10170_v7 = vrot.slane %v8419_v47, %v19883_v37  ;;  %v8414_v26 = vpop.permute.xlu1 %8413  ;;  %v17622_v35 = vld [vmem:[%s12723_s26 + $0x140] sm:$0xff]   ;;  %v19885_v31 = vld [vmem:[#allocation102_spill] sm:$0xff]  ;;  %v19887_v53 = vunpack.c.l.bf16 %v19881_v0 }
 0x5eb   : > { %19876 = vst [vmem:[#allocation33_spill] sm:$0xff] %v17607_v4  ;;  %19878 = vst [vmem:[#allocation142_spill] sm:$0xff] %v17612_v24  ;;  %v17626_v6 = vmul.f32 %v12156_v14, %v19885_v31  ;;  %v10166_v40 = vrot.slane %v8414_v26, %v19883_v37  ;;  %v17634_v38 = vld [vmem:[%s12723_s26 + $0x148] sm:$0xff]   ;;  %v17639_v24 = vld [vmem:[%s12723_s26 + $0x150] sm:$0xff]   ;;  %8268 = vperm.xlu0 %11235, %v17221_v28  }
 0x5ec   : > { %19880 = vst [vmem:[#allocation28_spill] sm:$0xff] %v17615_v51  ;;  %v8828_v41 = vmul.f32 %v8419_v47, %v19882_v17  ;;  %19884 = vst [vmem:[#allocation144_spill] sm:$0xff] %v17622_v35  ;;  %v8827_v48 = vmul.f32 %v8414_v26, %v19887_v53  ;;  %v8429_v26 = vpop.permute.xlu0 %8428  ;;  %v17645_v53 = vld [vmem:[%s12723_s26 + $0x158] sm:$0xff]   ;;  %v17650_v17 = vld [vmem:[%s12723_s26 + $0x40] sm:$0xff]  }
 0x5ed   : > { %19886 = vst [vmem:[#allocation130_spill] sm:$0xff] %v17626_v6  ;;  %19888 = vst [vmem:[#allocation145_spill] sm:$0xff] %v17634_v38  ;;  %v10500_v14 = vsel %vm4667_vm0, %v10170_v7, %v10166_v40  ;;  %v19892_v63 = vld [vmem:[#allocation157_spill] sm:$0xff]  ;;  %v10178_v47 = vrot.slane %v8429_v26, %v19883_v37 }
 0x5ee   : > { %v9241_v51 = vrot.slane %v8828_v41, 4  ;;  %19889 = vst [vmem:[#allocation132_spill] sm:$0xff] %v17639_v24  ;;  %v9235_v0 = vrot.slane %v8827_v48, 4  ;;  %19890 = vst [vmem:[#allocation57_spill] sm:$0xff] %v17645_v53  ;;  %v19893_v31 = vunpack.c.h.bf16 %v19892_v63  ;;  %v8424_v36 = vpop.permute.xlu1 %8423  ;;  %v19894_v53 = vunpack.c.l.bf16 %v19892_v63  ;;  %v17670_v28 = vld [vmem:[%s12723_s26 + $0x48] sm:$0xff]   ;;  %v19897_v24 = vld [vmem:[#allocation108_spill] sm:$0xff] }
 0x5ef   : > { %19891 = vst [vmem:[#allocation134_spill] sm:$0xff] %v17650_v17  ;;  %v10174_v20 = vrot.slane %v8424_v36, %v19883_v37  ;;  %19896 = vst [vmem:[#allocation34_spill] sm:$0xff] %v17670_v28  ;;  %v19898_v17 = vunpack.c.h.bf16 %v19897_v24  ;;  %v19901_v25 = vld [vmem:[#allocation109_spill] sm:$0xff] }
 0x5f0   : > { %v9242_v6 = vadd.f32 %v9241_v51, %v8828_v41  ;;  %v8830_v22 = vmul.f32 %v8429_v26, %v19893_v31  ;;  %v9236_v49 = vadd.f32 %v9235_v0, %v8827_v48  ;;  %v8829_v57 = vmul.f32 %v8424_v36, %v19894_v53  ;;  %v8439_v36 = vpop.permute.xlu0 %8438  ;;  %v17676_v0 = vld [vmem:[%s12723_s26 + $0x50] sm:$0xff]   ;;  %8273 = vperm.xlu1 %11236, %v19901_v25  }
 0x5f1   : > { %v10501_v31 = vsel %vm4669_vm1, %v10174_v20, %v10500_v14  ;;  %v8832_v38 = vmul.f32 %v8439_v36, %v19898_v17  ;;  %v10186_v7 = vrot.slane %v8439_v36, %v19883_v37  ;;  %v19899_v48 = vld [vmem:[#allocation114_spill] sm:$0xff]  ;;  %v19900_v14 = vunpack.c.l.bf16 %v19897_v24 }
 0x5f2   : > { %v9243_v51 = vrot.slane %v9242_v6, 2  ;;  %v9253_v41 = vrot.slane %v8830_v22, 4  ;;  %v9237_v40 = vrot.slane %v9236_v49, 2  ;;  %v9247_v63 = vrot.slane %v8829_v57, 4  ;;  %v8434_v44 = vpop.permute.xlu1 %8433  ;;  %8278 = vperm.xlu0 %11235, %v19899_v48  }
 0x5f3   : > { %v10502_v20 = vsel %vm4671_vm2, %v10178_v47, %v10501_v31  ;;  %v8831_v4 = vmul.f32 %v8434_v44, %v19900_v14  ;;  %v19902_v14 = vld [vmem:[#allocation159_spill] sm:$0xff] }
 0x5f4   : > { %v9244_v26 = vadd.f32 %v9243_v51, %v9242_v6  ;;  %v9254_v53 = vadd.f32 %v9253_v41, %v8830_v22  ;;  %v9238_v28 = vadd.f32 %v9237_v40, %v9236_v49  ;;  %v9248_v35 = vadd.f32 %v9247_v63, %v8829_v57  ;;  %v8449_v57 = vpop.permute.xlu0 %8448  ;;  %8283 = vperm.xlu1 %11236, %v17274_v46  }
 0x5f5   : > { %v9265_v22 = vrot.slane %v8832_v38, 4  ;;  %v10182_v51 = vrot.slane %v8434_v44, %v19883_v37  ;;  %v9259_v49 = vrot.slane %v8831_v4, 4  ;;  %v19903_v23 = vunpack.c.h.bf16 %v19902_v14 }
 0x5f6   : > { %v9245_v54 = vrot.slane %v9244_v26, 1  ;;  %v9255_v6 = vrot.slane %v9254_v53, 2  ;;  %v9239_v17 = vrot.slane %v9238_v28, 1  ;;  %v9249_v41 = vrot.slane %v9248_v35, 2  ;;  %v8444_v31 = vpop.permute.xlu1 %8443  ;;  %8288 = vperm.xlu0 %11235, %v17264_v43  }
 0x5f7   : > { %v9266_v40 = vadd.f32 %v9265_v22, %v8832_v38  ;;  %v10503_v63 = vsel %vm4673_vm3, %v10182_v51, %v10502_v20  ;;  %v9260_v25 = vadd.f32 %v9259_v49, %v8831_v4  ;;  %v8834_v12 = vmul.f32 %v8449_v57, %v19903_v23  ;;  %v19905_v22 = vld [vmem:[#allocation111_spill] sm:$0xff] }
 0x5f8   : > { %v9246_v24 = vadd.f32 %v9245_v54, %v9244_v26  ;;  %v9256_v48 = vadd.f32 %v9255_v6, %v9254_v53  ;;  %v9240_v44 = vadd.f32 %v9239_v17, %v9238_v28  ;;  %v9250_v36 = vadd.f32 %v9249_v41, %v9248_v35  ;;  %v8459_v28 = vpop.permute.xlu0 %8458 }
 0x5f9   : > { %v9267_v9 = vrot.slane %v9266_v40, 2  ;;  %v10194_v47 = vrot.slane %v8449_v57, %v19883_v37  ;;  %v10504_v54 = vsel %vm4675_vm4, %v10186_v7, %v10503_v63  ;;  %v9261_v53 = vrot.slane %v9260_v25, 2  ;;  %v19906_v7 = vld [vmem:[#allocation107_spill] sm:$0xff] }
 0x5fa   : > { %v9257_v30 = vrot.slane %v9256_v48, 1  ;;  %v9844_v38 = vsel %vm4667_vm0, %v9246_v24, %v9240_v44  ;;  %v9251_v26 = vrot.slane %v9250_v36, 1  ;;  %v9277_v43 = vrot.slane %v8834_v12, 4  ;;  %v8454_v6 = vpop.permute.xlu1 %8453  ;;  %8618 = vperm.xlu0 %11235, %v19905_v22   ;;  %v19910_v22 = vld [vmem:[#allocation46_spill] sm:$0xff] }
 0x5fb   : > { %v9268_v4 = vadd.f32 %v9267_v9, %v9266_v40  ;;  %v19904_v20 = vunpack.c.l.bf16 %v19902_v14  ;;  %v10190_v46 = vrot.slane %v8444_v31, %v19883_v37  ;;  %v9262_v17 = vadd.f32 %v9261_v53, %v9260_v25 }
 0x5fc   : > { %v9258_v35 = vadd.f32 %v9257_v30, %v9256_v48  ;;  %v9252_v51 = vadd.f32 %v9251_v26, %v9250_v36  ;;  %v9278_v41 = vadd.f32 %v9277_v43, %v8834_v12  ;;  %v19907_v49 = vunpack.c.h.bf16 %v19906_v7  ;;  %v19908_v30 = vld [vmem:[#allocation52_spill] sm:$0xff]  ;;  %v8469_v36 = vpop.permute.xlu0 %8468 }
 0x5fd   : > { %v8833_v23 = vmul.f32 %v8444_v31, %v19904_v20  ;;  %8613 = vperm.xlu1 %11236, %v19908_v30   ;;  %v9269_v57 = vrot.slane %v9268_v4, 1  ;;  %v10505_v48 = vsel %vm4677_vm5, %v10190_v46, %v10504_v54  ;;  %v10202_v40 = vrot.slane %v8459_v28, %v19883_v37 }
 0x5fe   : > { %v8836_v9 = vmul.f32 %v8459_v28, %v19907_v49  ;;  %v9845_v63 = vsel %vm4669_vm1, %v9252_v51, %v9844_v38  ;;  %v9263_v12 = vrot.slane %v9262_v17, 1  ;;  %v9279_v31 = vrot.slane %v9278_v41, 2  ;;  %v8464_v43 = vpop.permute.xlu1 %8463  ;;  %8628 = vperm.xlu0 %11235, %v17301_v19  }
 0x5ff   : > { %v9271_v24 = vrot.slane %v8833_v23, 4  ;;  %v10506_v44 = vsel %vm4679_vm6, %v10194_v47, %v10505_v48  ;;  %v9270_v25 = vadd.f32 %v9269_v57, %v9268_v4  ;;  %v9846_v14 = vsel %vm4671_vm2, %v9258_v35, %v9845_v63 }
 0x600   : > { %10586 = vst.msk [vmem:[%s17711_s16 + $0x38] sm:$0xff] %vm4802_vm7, %v10506_v44  ;;  %v9289_v53 = vrot.slane %v8836_v9, 4  ;;  %v9264_v54 = vadd.f32 %v9263_v12, %v9262_v17  ;;  %v9280_v20 = vadd.f32 %v9279_v31, %v9278_v41  ;;  %v19909_v28 = vunpack.c.l.bf16 %v19906_v7  ;;  %v17733_v7 = vpop.permute.xlu0 %8478  ;;  %v19913_v44 = vld [vmem:[#allocation49_spill] sm:$0xff] }
 0x601   : > { %v9272_v26 = vadd.f32 %v9271_v24, %v8833_v23  ;;  %v10198_v46 = vrot.slane %v8454_v6, %v19883_v37  ;;  %8623 = vperm.xlu1 %11236, %v17310_v21   ;;  %v19911_v35 = vunpack.c.h.bf16 %v19910_v22  ;;  %v10210_v51 = vrot.slane %v8469_v36, %v19883_v37 }
 0x602   : > { %v8835_v38 = vmul.f32 %v8454_v6, %v19909_v28  ;;  %v9290_v4 = vadd.f32 %v9289_v53, %v8836_v9  ;;  %v9847_v49 = vsel %vm4673_vm3, %v9264_v54, %v9846_v14  ;;  %v9281_v19 = vrot.slane %v9280_v20, 1  ;;  %v8474_v9 = vpop.permute.xlu1 %8473  ;;  %8638 = vperm.xlu0 %11235, %v17314_v55  }
 0x603   : > { %v9273_v47 = vrot.slane %v9272_v26, 2  ;;  %v8838_v23 = vmul.f32 %v8469_v36, %v19911_v35  ;;  %v10507_v41 = vsel %vm4667_vm0, %v10202_v40, %v10198_v46  ;;  %v9848_v6 = vsel %vm4675_vm4, %v9270_v25, %v9847_v49  ;;  %v19914_v25 = vld [vmem:[#allocation69_spill] sm:$0xff] }
 0x604   : > { %v9283_v17 = vrot.slane %v8835_v38, 4  ;;  %v9291_v21 = vrot.slane %v9290_v4, 2  ;;  %v9282_v24 = vadd.f32 %v9281_v19, %v9280_v20  ;;  %v19912_v63 = vunpack.c.l.bf16 %v19910_v22 }
 0x605   : > { %v9274_v30 = vadd.f32 %v9273_v47, %v9272_v26  ;;  %v9301_v57 = vrot.slane %v8838_v23, 4  ;;  %v10206_v31 = vrot.slane %v8464_v43, %v19883_v37  ;;  %8633 = vperm.xlu1 %11236, %v19913_v44   ;;  %v19915_v26 = vunpack.c.h.bf16 %v19914_v25 }
 0x606   : > { %v9284_v48 = vadd.f32 %v9283_v17, %v8835_v38  ;;  %v8837_v12 = vmul.f32 %v8464_v43, %v19912_v63  ;;  %v9292_v36 = vadd.f32 %v9291_v21, %v9290_v4  ;;  %v10218_v20 = vrot.slane %v17733_v7, %v19883_v37  ;;  %v8489_v38 = vpop.permute.xlu0 %8488  ;;  %v8484_v35 = vpop.permute.xlu1 %8483  ;;  %8648 = vperm.xlu0 %11235, %v17337_v32  }
 0x607   : > { %v9275_v40 = vrot.slane %v9274_v30, 1  ;;  %v9302_v14 = vadd.f32 %v9301_v57, %v8838_v23  ;;  %v8840_v53 = vmul.f32 %v17733_v7, %v19915_v26  ;;  %v10508_v55 = vsel %vm4669_vm1, %v10206_v31, %v10507_v41 }
 0x608   : > { %v9285_v54 = vrot.slane %v9284_v48, 2  ;;  %v9295_v28 = vrot.slane %v8837_v12, 4  ;;  %v9293_v43 = vrot.slane %v9292_v36, 1  ;;  %v10509_v49 = vsel %vm4671_vm2, %v10210_v51, %v10508_v55 }
 0x609   : > { %v9276_v46 = vadd.f32 %v9275_v40, %v9274_v30  ;;  %v9303_v47 = vrot.slane %v9302_v14, 2  ;;  %v9313_v22 = vrot.slane %v8840_v53, 4  ;;  %v19916_v19 = vunpack.c.l.bf16 %v19914_v25  ;;  %8643 = vperm.xlu1 %11236, %v17345_v1  }
 0x60a   : > { %v9286_v4 = vadd.f32 %v9285_v54, %v9284_v48  ;;  %v9296_v23 = vadd.f32 %v9295_v28, %v8837_v12  ;;  %v9294_v7 = vadd.f32 %v9293_v43, %v9292_v36  ;;  %v17755_v32 = vpop.permute.xlu0 %8133  ;;  %v10214_v1 = vrot.slane %v8474_v9, %v19883_v37  ;;  %v19917_v12 = vld [vmem:[#allocation23_spill] sm:$0xff]  ;;  %v8139_v36 = vpop.permute.xlu1 %8138  ;;  %8298 = vperm.xlu0 %11235, %v17349_v45  }
 0x60b   : > { %v8839_v17 = vmul.f32 %v8474_v9, %v19916_v19  ;;  %v9849_v41 = vsel %vm4677_vm5, %v9276_v46, %v9848_v6  ;;  %v9304_v21 = vadd.f32 %v9303_v47, %v9302_v14  ;;  %v9314_v30 = vadd.f32 %v9313_v22, %v8840_v53 }
 0x60c   : > { %v9850_v57 = vsel %vm4679_vm6, %v9282_v24, %v9849_v41  ;;  %v9287_v63 = vrot.slane %v9286_v4, 1  ;;  %v9297_v31 = vrot.slane %v9296_v23, 2  ;;  %v19918_v6 = vunpack.c.h.bf16 %v19917_v12 }
 0x60d   : > { %v9307_v44 = vrot.slane %v8839_v17, 4  ;;  %9930 = vst [vmem:[%s17757_s20 + $0x38] sm:$0xff] %v9850_v57  ;;  %v9305_v51 = vrot.slane %v9304_v21, 1  ;;  %v9315_v48 = vrot.slane %v9314_v30, 2  ;;  %v10226_v26 = vrot.slane %v8489_v38, %v19883_v37  ;;  %8293 = vperm.xlu1 %11236, %v17357_v61  }
 0x60e   : > { %v8842_v40 = vmul.f32 %v8489_v38, %v19918_v6  ;;  %v9288_v24 = vadd.f32 %v9287_v63, %v9286_v4  ;;  %v9298_v14 = vadd.f32 %v9297_v31, %v9296_v23  ;;  %v10510_v28 = vsel %vm4673_vm3, %v10214_v1, %v10509_v49  ;;  %v17769_v22 = vpop.permute.xlu0 %8148  ;;  %v8144_v19 = vpop.permute.xlu1 %8143  ;;  %8308 = vperm.xlu0 %11235, %v17361_v10  }
 0x60f   : > { %v9308_v25 = vadd.f32 %v9307_v44, %v8839_v17  ;;  %v9306_v53 = vadd.f32 %v9305_v51, %v9304_v21  ;;  %v9316_v54 = vadd.f32 %v9315_v48, %v9314_v30  ;;  %v10511_v47 = vsel %vm4675_vm4, %v10218_v20, %v10510_v28 }
 0x610   : > { %v9325_v55 = vrot.slane %v8842_v40, 4  ;;  %v9851_v9 = vsel %vm4667_vm0, %v9294_v7, %v9288_v24  ;;  %v9299_v46 = vrot.slane %v9298_v14, 1  ;;  %v19919_v23 = vunpack.c.l.bf16 %v19917_v12 }
 0x611   : > { %v9309_v43 = vrot.slane %v9308_v25, 2  ;;  %v9317_v45 = vrot.slane %v9316_v54, 1  ;;  %v10222_v61 = vrot.slane %v8484_v35, %v19883_v37  ;;  %v19920_v41 = vunpack.c.l.bf16 %v17382_v50  ;;  %8303 = vperm.xlu1 %11236, %v17370_v62  }
 0x612   : > { %v9326_v4 = vadd.f32 %v9325_v55, %v8842_v40  ;;  %v8841_v38 = vmul.f32 %v8484_v35, %v19919_v23  ;;  %v9300_v49 = vadd.f32 %v9299_v46, %v9298_v14  ;;  %v9942_v20 = vrot.slane %v17755_v32, %v19883_v37  ;;  %v17784_v51 = vpop.permute.xlu0 %8158  ;;  %v8154_v6 = vpop.permute.xlu1 %8153  ;;  %8318 = vperm.xlu0 %11235, %v17374_v52  }
 0x613   : > { %v9310_v17 = vadd.f32 %v9309_v43, %v9308_v25  ;;  %v8771_v7 = vmul.f32 %v17755_v32, %v19920_v41  ;;  %v9318_v21 = vadd.f32 %v9317_v45, %v9316_v54  ;;  %v10512_v35 = vsel %vm4677_vm5, %v10222_v61, %v10511_v47  ;;  %v19923_v54 = vld [vmem:[#allocation116_spill] sm:$0xff]  ;;  %v19924_v61 = vld [vmem:[#allocation42_spill] sm:$0xff] }
 0x614   : > { %v9327_v30 = vrot.slane %v9326_v4, 2  ;;  %v9319_v57 = vrot.slane %v8841_v38, 4  ;;  %v9852_v63 = vsel %vm4669_vm1, %v9300_v49, %v9851_v9  ;;  %v10513_v31 = vsel %vm4679_vm6, %v10226_v26, %v10512_v35 }
 0x615   : > { %v9311_v10 = vrot.slane %v9310_v17, 1  ;;  %v8899_v44 = vrot.slane %v8771_v7, 4  ;;  %v9853_v48 = vsel %vm4671_vm2, %v9306_v53, %v9852_v63  ;;  %10587 = vst.msk [vmem:[%s17711_s16 + $0x40] sm:$0xff] %vm4802_vm7, %v10513_v31  ;;  %v19921_v62 = vunpack.c.h.bf16 %v17382_v50  ;;  %8313 = vperm.xlu1 %11236, %v19923_v54  }
 0x616   : > { %v9328_v1 = vadd.f32 %v9327_v30, %v9326_v4  ;;  %v9320_v12 = vadd.f32 %v9319_v57, %v8841_v38  ;;  %v9946_v14 = vrot.slane %v8139_v36, %v19883_v37  ;;  %v19922_v25 = vunpack.c.h.bf16 %v17403_v33  ;;  %v17801_v47 = vpop.permute.xlu0 %8168  ;;  %v17804_v38 = vpop.permute.xlu1 %8163  ;;  %8328 = vperm.xlu0 %11235, %v19924_v61  }
 0x617   : > { %v8772_v32 = vmul.f32 %v8139_v36, %v19921_v62  ;;  %v9312_v40 = vadd.f32 %v9311_v10, %v9310_v17  ;;  %v8900_v24 = vadd.f32 %v8899_v44, %v8771_v7  ;;  %v9954_v50 = vrot.slane %v17769_v22, %v19883_v37 }
 0x618   : > { %v8774_v26 = vmul.f32 %v17769_v22, %v19922_v25  ;;  %v9329_v53 = vrot.slane %v9328_v1, 1  ;;  %v9321_v28 = vrot.slane %v9320_v12, 2  ;;  %v10451_v52 = vsel %vm4667_vm0, %v9946_v14, %v9942_v20 }
 0x619   : > { %v8905_v55 = vrot.slane %v8772_v32, 4  ;;  %v9854_v9 = vsel %vm4673_vm3, %v9312_v40, %v9853_v48  ;;  %v8901_v46 = vrot.slane %v8900_v24, 2  ;;  %v19925_v22 = vunpack.c.l.bf16 %v17403_v33  ;;  %8323 = vperm.xlu1 %11236, %v17408_v56  }
 0x61a   : > { %v8917_v43 = vrot.slane %v8774_v26, 4  ;;  %v9330_v36 = vadd.f32 %v9329_v53, %v9328_v1  ;;  %v9855_v45 = vsel %vm4675_vm4, %v9318_v21, %v9854_v9  ;;  %v9322_v4 = vadd.f32 %v9321_v28, %v9320_v12  ;;  %v17817_v33 = vpop.permute.xlu0 %8498  ;;  %v17820_v12 = vpop.permute.xlu1 %8493  ;;  %8658 = vperm.xlu0 %11235, %v17418_v39  }
 0x61b   : > { %v8906_v23 = vadd.f32 %v8905_v55, %v8772_v32  ;;  %v8902_v49 = vadd.f32 %v8901_v46, %v8900_v24  ;;  %v8773_v41 = vmul.f32 %v8144_v19, %v19925_v22  ;;  %v9950_v7 = vrot.slane %v8144_v19, %v19883_v37 }
 0x61c   : > { %v8918_v17 = vadd.f32 %v8917_v43, %v8774_v26  ;;  %v9323_v20 = vrot.slane %v9322_v4, 1  ;;  %v19926_v57 = vunpack.c.h.bf16 %v17438_v16  ;;  %v9962_v35 = vrot.slane %v17784_v51, %v19883_v37 }
 0x61d   : > { %v8907_v30 = vrot.slane %v8906_v23, 2  ;;  %v8903_v63 = vrot.slane %v8902_v49, 1  ;;  %v8911_v31 = vrot.slane %v8773_v41, 4  ;;  %v10452_v44 = vsel %vm4669_vm1, %v9950_v7, %v10451_v52  ;;  %8653 = vperm.xlu1 %11236, %v17422_v8  }
 0x61e   : > { %v8776_v21 = vmul.f32 %v17784_v51, %v19926_v57  ;;  %v8919_v10 = vrot.slane %v8918_v17, 2  ;;  %v9324_v48 = vadd.f32 %v9323_v20, %v9322_v4  ;;  %v10453_v56 = vsel %vm4671_vm2, %v9954_v50, %v10452_v44  ;;  %v17829_v39 = vpop.permute.xlu0 %8508  ;;  %v17836_v43 = vpop.permute.xlu1 %8503  ;;  %8668 = vperm.xlu0 %11235, %v17427_v18  }
 0x61f   : > { %v8908_v19 = vadd.f32 %v8907_v30, %v8906_v23  ;;  %v8904_v62 = vadd.f32 %v8903_v63, %v8902_v49  ;;  %v8912_v51 = vadd.f32 %v8911_v31, %v8773_v41  ;;  %v19927_v40 = vunpack.c.l.bf16 %v17438_v16  ;;  %v19929_v23 = vld [vmem:[#allocation47_spill] sm:$0xff] }
 0x620   : > { %v8929_v1 = vrot.slane %v8776_v21, 4  ;;  %v8920_v32 = vadd.f32 %v8919_v10, %v8918_v17  ;;  %v9856_v14 = vsel %vm4677_vm5, %v9324_v48, %v9855_v45  ;;  %v9958_v54 = vrot.slane %v8154_v6, %v19883_v37 }
 0x621   : > { %v8775_v24 = vmul.f32 %v8154_v6, %v19927_v40  ;;  %v8909_v25 = vrot.slane %v8908_v19, 1  ;;  %v9857_v53 = vsel %vm4679_vm6, %v9330_v36, %v9856_v14  ;;  %v8913_v55 = vrot.slane %v8912_v51, 2  ;;  %8663 = vperm.xlu1 %11236, %v19929_v23  }
 0x622   : > { %v8930_v26 = vadd.f32 %v8929_v1, %v8776_v21  ;;  %v8921_v28 = vrot.slane %v8920_v32, 1  ;;  %9931 = vst [vmem:[%s17757_s20 + $0x40] sm:$0xff] %v9857_v53  ;;  %v10454_v16 = vsel %vm4673_vm3, %v9958_v54, %v10453_v56  ;;  %v19928_v8 = vunpack.c.h.bf16 %v17460_v58  ;;  %v17849_v57 = vpop.permute.xlu0 %8518  ;;  %v17856_v31 = vpop.permute.xlu1 %8513 }
 0x623   : > { %v8923_v50 = vrot.slane %v8775_v24, 4  ;;  %v8910_v9 = vadd.f32 %v8909_v25, %v8908_v19  ;;  %v8914_v36 = vadd.f32 %v8913_v55, %v8912_v51  ;;  %v9970_v4 = vrot.slane %v17801_v47, %v19883_v37 }
 0x624   : > { %v8931_v46 = vrot.slane %v8930_v26, 2  ;;  %v8778_v52 = vmul.f32 %v17801_v47, %v19928_v8  ;;  %v8922_v6 = vadd.f32 %v8921_v28, %v8920_v32  ;;  %v10455_v22 = vsel %vm4675_vm4, %v9962_v35, %v10454_v16 }
 0x625   : > { %v8924_v45 = vadd.f32 %v8923_v50, %v8775_v24  ;;  %v9795_v61 = vsel %vm4667_vm0, %v8910_v9, %v8904_v62  ;;  %v8915_v41 = vrot.slane %v8914_v36, 1  ;;  %v19930_v20 = vunpack.c.l.bf16 %v17460_v58  ;;  %v19932_v58 = vld [vmem:[#allocation115_spill] sm:$0xff]  ;;  %8673 = vperm.xlu1 %11236, %v17444_v2  }
 0x626   : > { %v8932_v49 = vadd.f32 %v8931_v46, %v8930_v26  ;;  %v8941_v17 = vrot.slane %v8778_v52, 4  ;;  %v9966_v30 = vrot.slane %v17804_v38, %v19883_v37  ;;  %v19931_v63 = vunpack.c.h.bf16 %v17490_v34  ;;  %8678 = vperm.xlu0 %11235, %v19932_v58   ;;  %v17868_v25 = vpop.permute.xlu0 %8528  ;;  %v17873_v28 = vpop.permute.xlu1 %8523 }
 0x627   : > { %v8925_v7 = vrot.slane %v8924_v45, 2  ;;  %v8777_v18 = vmul.f32 %v17804_v38, %v19930_v20  ;;  %v10234_v35 = vrot.slane %v17817_v33, %v19883_v37  ;;  %v8916_v44 = vadd.f32 %v8915_v41, %v8914_v36 }
 0x628   : > { %v8933_v47 = vrot.slane %v8932_v49, 1  ;;  %v8942_v21 = vadd.f32 %v8941_v17, %v8778_v52  ;;  %v8844_v10 = vmul.f32 %v17817_v33, %v19931_v63  ;;  %v10456_v38 = vsel %vm4677_vm5, %v9966_v30, %v10455_v22 }
 0x629   : > { %v8926_v48 = vadd.f32 %v8925_v7, %v8924_v45  ;;  %v8935_v19 = vrot.slane %v8777_v18, 4  ;;  %v10457_v62 = vsel %vm4679_vm6, %v9970_v4, %v10456_v38  ;;  %v9796_v51 = vsel %vm4669_vm1, %v8916_v44, %v9795_v61  ;;  %8683 = vperm.xlu1 %11236, %v17452_v5  }
 0x62a   : > { %v8934_v1 = vadd.f32 %v8933_v47, %v8932_v49  ;;  %v8943_v56 = vrot.slane %v8942_v21, 2  ;;  %v9337_v32 = vrot.slane %v8844_v10, 4  ;;  %10579 = vst.msk [vmem:[%s17711_s16] sm:$0xff] %vm4802_vm7, %v10457_v62  ;;  %v19933_v24 = vunpack.c.l.bf16 %v17490_v34  ;;  %8688 = vperm.xlu0 %11235, %v17448_v42   ;;  %v17884_v4 = vpop.permute.xlu0 %8178  ;;  %v17890_v22 = vpop.permute.xlu1 %8173 }
 0x62b   : > { %v8927_v40 = vrot.slane %v8926_v48, 1  ;;  %v8936_v33 = vadd.f32 %v8935_v19, %v8777_v18  ;;  %v9797_v26 = vsel %vm4671_vm2, %v8922_v6, %v9796_v51  ;;  %v10230_v53 = vrot.slane %v17820_v12, %v19883_v37 }
 0x62c   : > { %v8843_v14 = vmul.f32 %v17820_v12, %v19933_v24  ;;  %v8944_v2 = vadd.f32 %v8943_v56, %v8942_v21  ;;  %v9338_v54 = vadd.f32 %v9337_v32, %v8844_v10  ;;  %v19934_v34 = vunpack.c.h.bf16 %v17503_v13  ;;  %v19938_v32 = vld [vmem:[#allocation118_spill] sm:$0xff] }
 0x62d   : > { %v8928_v55 = vadd.f32 %v8927_v40, %v8926_v48  ;;  %v8937_v50 = vrot.slane %v8936_v33, 2  ;;  %v10514_v52 = vsel %vm4667_vm0, %v10234_v35, %v10230_v53  ;;  %v10242_v12 = vrot.slane %v17829_v39, %v19883_v37  ;;  %8333 = vperm.xlu1 %11236, %v17466_v3  }
 0x62e   : > { %v9331_v9 = vrot.slane %v8843_v14, 4  ;;  %v8846_v46 = vmul.f32 %v17829_v39, %v19934_v34  ;;  %v8945_v16 = vrot.slane %v8944_v2, 1  ;;  %v9339_v8 = vrot.slane %v9338_v54, 2  ;;  %8338 = vperm.xlu0 %11235, %v17456_v11   ;;  %v17902_v58 = vpop.permute.xlu0 %8188  ;;  %v17905_v19 = vpop.permute.xlu1 %8183 }
 0x62f   : > { %v9798_v6 = vsel %vm4673_vm3, %v8928_v55, %v9797_v26  ;;  %v8938_v36 = vadd.f32 %v8937_v50, %v8936_v33  ;;  %v19935_v5 = vunpack.c.l.bf16 %v17503_v13  ;;  %v10238_v20 = vrot.slane %v17836_v43, %v19883_v37 }
 0x630   : > { %v9332_v42 = vadd.f32 %v9331_v9, %v8843_v14  ;;  %v9349_v45 = vrot.slane %v8846_v46, 4  ;;  %v8946_v23 = vadd.f32 %v8945_v16, %v8944_v2  ;;  %v9799_v61 = vsel %vm4675_vm4, %v8934_v1, %v9798_v6 }
 0x631   : > { %v9340_v49 = vadd.f32 %v9339_v8, %v9338_v54  ;;  %v8845_v17 = vmul.f32 %v17836_v43, %v19935_v5  ;;  %v8939_v39 = vrot.slane %v8938_v36, 1  ;;  %v19936_v47 = vunpack.c.h.bf16 %v17534_v15  ;;  %8343 = vperm.xlu1 %11236, %v19938_v32  }
 0x632   : > { %v9333_v41 = vrot.slane %v9332_v42, 2  ;;  %v9350_v7 = vadd.f32 %v9349_v45, %v8846_v46  ;;  %v10250_v21 = vrot.slane %v17849_v57, %v19883_v37  ;;  %v10515_v35 = vsel %vm4669_vm1, %v10238_v20, %v10514_v52  ;;  %8348 = vperm.xlu0 %11235, %v17470_v59   ;;  %v17925_v34 = vpop.permute.xlu1 %8193 }
 0x633   : > { %v9341_v18 = vrot.slane %v9340_v49, 1  ;;  %v9343_v30 = vrot.slane %v8845_v17, 4  ;;  %v8848_v13 = vmul.f32 %v17849_v57, %v19936_v47  ;;  %v8940_v63 = vadd.f32 %v8939_v39, %v8938_v36  ;;  %v19944_v47 = vld [vmem:[#allocation119_spill] sm:$0xff] }
 0x634   : > { %v9334_v10 = vadd.f32 %v9333_v41, %v9332_v42  ;;  %v9351_v11 = vrot.slane %v9350_v7, 2  ;;  %v10516_v48 = vsel %vm4671_vm2, %v10242_v12, %v10515_v35  ;;  %v19937_v56 = vunpack.c.l.bf16 %v17534_v15  ;;  %v17920_v15 = vpop.permute.xlu0 %8198 }
 0x635   : > { %v9342_v43 = vadd.f32 %v9341_v18, %v9340_v49  ;;  %v9344_v44 = vadd.f32 %v9343_v30, %v8845_v17  ;;  %v9361_v3 = vrot.slane %v8848_v13, 4  ;;  %v9800_v38 = vsel %vm4677_vm5, %v8940_v63, %v9799_v61  ;;  %8353 = vperm.xlu1 %11236, %v17483_v60  }
 0x636   : > { %v9335_v57 = vrot.slane %v9334_v10, 1  ;;  %v9352_v1 = vadd.f32 %v9351_v11, %v9350_v7  ;;  %v8847_v62 = vmul.f32 %v17856_v31, %v19937_v56  ;;  %v9801_v51 = vsel %vm4679_vm6, %v8946_v23, %v9800_v38  ;;  %8358 = vperm.xlu0 %11235, %v17479_v27   ;;  %v19941_v23 = vld [vmem:[#allocation133_spill] sm:$0xff]  ;;  %v17943_v41 = vpop.permute.xlu1 %8203  ;;  %v19943_v7 = vld [vmem:[#allocation51_spill] sm:$0xff] }
 0x637   : > { %v9345_v40 = vrot.slane %v9344_v44, 2  ;;  %v9362_v33 = vadd.f32 %v9361_v3, %v8848_v13  ;;  %v10246_v24 = vrot.slane %v17856_v31, %v19883_v37  ;;  %9923 = vst [vmem:[%s17757_s20] sm:$0xff] %v9801_v51  ;;  %v19939_v2 = vunpack.c.h.bf16 %v17547_v29  ;;  %v19948_v51 = vld [vmem:[#allocation41_spill] sm:$0xff] }
 0x638   : > { %v9336_v14 = vadd.f32 %v9335_v57, %v9334_v10  ;;  %v9353_v59 = vrot.slane %v9352_v1, 1  ;;  %v9355_v26 = vrot.slane %v8847_v62, 4  ;;  %v10258_v9 = vrot.slane %v17868_v25, %v19883_v37  ;;  %v17939_v5 = vpop.permute.xlu0 %8208 }
 0x639   : > { %v8850_v54 = vmul.f32 %v17868_v25, %v19939_v2  ;;  %v9346_v53 = vadd.f32 %v9345_v40, %v9344_v44  ;;  %v9363_v55 = vrot.slane %v9362_v33, 2  ;;  %v10517_v50 = vsel %vm4673_vm3, %v10246_v24, %v10516_v48  ;;  %8363 = vperm.xlu1 %11236, %v19944_v47  }
 0x63a   : > { %v9858_v31 = vsel %vm4667_vm0, %v9342_v43, %v9336_v14  ;;  %v9354_v46 = vadd.f32 %v9353_v59, %v9352_v1  ;;  %v9356_v16 = vadd.f32 %v9355_v26, %v8847_v62  ;;  %v10518_v6 = vsel %vm4675_vm4, %v10250_v21, %v10517_v50  ;;  %8368 = vperm.xlu0 %11235, %v19943_v7   ;;  %v19946_v1 = vld [vmem:[#allocation37_spill] sm:$0xff]  ;;  %v17963_v32 = vpop.permute.xlu1 %8533  ;;  %v19949_v59 = vld [vmem:[#allocation120_spill] sm:$0xff] }
 0x63b   : > { %v9373_v8 = vrot.slane %v8850_v54, 4  ;;  %v9347_v52 = vrot.slane %v9346_v53, 1  ;;  %v9364_v12 = vadd.f32 %v9363_v55, %v9362_v33  ;;  %v19940_v36 = vunpack.c.l.bf16 %v17547_v29 }
 0x63c   : > { %v9357_v25 = vrot.slane %v9356_v16, 2  ;;  %v10254_v27 = vrot.slane %v17873_v28, %v19883_v37  ;;  %v19942_v61 = vunpack.c.h.bf16 %v19941_v23  ;;  %v9978_v29 = vrot.slane %v17884_v4, %v19883_v37  ;;  %v17953_v44 = vpop.permute.xlu0 %8538 }
 0x63d   : > { %v8849_v42 = vmul.f32 %v17873_v28, %v19940_v36  ;;  %v9374_v45 = vadd.f32 %v9373_v8, %v8850_v54  ;;  %v9348_v60 = vadd.f32 %v9347_v52, %v9346_v53  ;;  %v9365_v17 = vrot.slane %v9364_v12, 1  ;;  %8698 = vperm.xlu1 %11236, %v19949_v59  }
 0x63e   : > { %v8780_v49 = vmul.f32 %v17884_v4, %v19942_v61  ;;  %v9358_v20 = vadd.f32 %v9357_v25, %v9356_v16  ;;  %v10519_v28 = vsel %vm4677_vm5, %v10254_v27, %v10518_v6  ;;  %v19945_v48 = vunpack.c.l.bf16 %v19941_v23  ;;  %8693 = vperm.xlu0 %11235, %v19948_v51   ;;  %v19951_v6 = vld [vmem:[#allocation68_spill] sm:$0xff]  ;;  %v19954_v61 = vld [vmem:[#allocation121_spill] sm:$0xff] }
 0x63f   : > { %v9367_v39 = vrot.slane %v8849_v42, 4  ;;  %v9375_v18 = vrot.slane %v9374_v45, 2  ;;  %v9859_v13 = vsel %vm4669_vm1, %v9348_v60, %v9858_v31  ;;  %v9366_v21 = vadd.f32 %v9365_v17, %v9364_v12  ;;  %v17977_v12 = vpop.permute.xlu1 %8543 }
 0x640   : > { %v8953_v30 = vrot.slane %v8780_v49, 4  ;;  %v10520_v10 = vsel %vm4679_vm6, %v10258_v9, %v10519_v28  ;;  %v9860_v11 = vsel %vm4671_vm2, %v9354_v46, %v9859_v13  ;;  %v9359_v4 = vrot.slane %v9358_v20, 1  ;;  %v17974_v46 = vpop.permute.xlu0 %8548 }
 0x641   : > { %v9368_v63 = vadd.f32 %v9367_v39, %v8849_v42  ;;  %v9376_v35 = vadd.f32 %v9375_v18, %v9374_v45  ;;  %10588 = vst.msk [vmem:[%s17711_s16 + $0x48] sm:$0xff] %vm4802_vm7, %v10520_v10  ;;  %v8779_v38 = vmul.f32 %v17890_v22, %v19945_v48  ;;  %v9974_v57 = vrot.slane %v17890_v22, %v19883_v37  ;;  %v19952_v45 = vld [vmem:[#allocation123_spill] sm:$0xff] }
 0x642   : > { %v8954_v43 = vadd.f32 %v8953_v30, %v8780_v49  ;;  %v19947_v56 = vunpack.c.h.bf16 %v19946_v1  ;;  %v9360_v40 = vadd.f32 %v9359_v4, %v9358_v20  ;;  %v9986_v14 = vrot.slane %v17902_v58, %v19883_v37  ;;  %8703 = vperm.xlu0 %11235, %v19951_v6   ;;  %8708 = vperm.xlu1 %11236, %v19954_v61  }
 0x643   : > { %v9369_v3 = vrot.slane %v9368_v63, 2  ;;  %v9377_v33 = vrot.slane %v9376_v35, 1  ;;  %v8947_v2 = vrot.slane %v8779_v38, 4  ;;  %v10458_v22 = vsel %vm4667_vm0, %v9978_v29, %v9974_v57  ;;  %v19958_v57 = vld [vmem:[#allocation33_spill] sm:$0xff] }
 0x644   : > { %v8782_v62 = vmul.f32 %v17902_v58, %v19947_v56  ;;  %v8955_v24 = vrot.slane %v8954_v43, 2  ;;  %v9861_v53 = vsel %vm4673_vm3, %v9360_v40, %v9860_v11  ;;  %v19950_v9 = vunpack.c.l.bf16 %v19946_v1  ;;  %v17989_v28 = vpop.permute.xlu0 %8558 }
 0x645   : > { %v9370_v26 = vadd.f32 %v9369_v3, %v9368_v63  ;;  %v9378_v55 = vadd.f32 %v9377_v33, %v9376_v35  ;;  %v9862_v16 = vsel %vm4675_vm4, %v9366_v21, %v9861_v53  ;;  %v8948_v8 = vadd.f32 %v8947_v2, %v8779_v38  ;;  %v17993_v21 = vpop.permute.xlu1 %8553  ;;  %v19955_v63 = vld [vmem:[#allocation117_spill] sm:$0xff] }
 0x646   : > { %v8965_v54 = vrot.slane %v8782_v62, 4  ;;  %v8956_v50 = vadd.f32 %v8955_v24, %v8954_v43  ;;  %v8781_v31 = vmul.f32 %v17905_v19, %v19950_v9  ;;  %v9982_v25 = vrot.slane %v17905_v19, %v19883_v37  ;;  %8713 = vperm.xlu0 %11235, %v19955_v63   ;;  %v19957_v43 = vld [vmem:[#allocation122_spill] sm:$0xff]  ;;  %v19961_v9 = vld [vmem:[#allocation72_spill] sm:$0xff] }
 0x647   : > { %v9371_v58 = vrot.slane %v9370_v26, 1  ;;  %v19953_v27 = vunpack.c.h.bf16 %v19952_v45  ;;  %v8949_v60 = vrot.slane %v8948_v8, 2  ;;  %v9994_v39 = vrot.slane %v17920_v15, %v19883_v37  ;;  %8718 = vperm.xlu1 %11236, %v19957_v43  }
 0x648   : > { %v8966_v52 = vadd.f32 %v8965_v54, %v8782_v62  ;;  %v8957_v36 = vrot.slane %v8956_v50, 1  ;;  %v8959_v42 = vrot.slane %v8781_v31, 4  ;;  %v10459_v20 = vsel %vm4669_vm1, %v9982_v25, %v10458_v22  ;;  %v18009_v24 = vpop.permute.xlu0 %8568 }
 0x649   : > { %v8784_v23 = vmul.f32 %v17920_v15, %v19953_v27  ;;  %v9372_v49 = vadd.f32 %v9371_v58, %v9370_v26  ;;  %v8950_v30 = vadd.f32 %v8949_v60, %v8948_v8  ;;  %v10460_v13 = vsel %vm4671_vm2, %v9986_v14, %v10459_v20  ;;  %v18012_v22 = vpop.permute.xlu1 %8563 }
 0x64a   : > { %v8967_v17 = vrot.slane %v8966_v52, 2  ;;  %v8958_v29 = vadd.f32 %v8957_v36, %v8956_v50  ;;  %v8960_v7 = vadd.f32 %v8959_v42, %v8781_v31  ;;  %v19956_v4 = vunpack.c.l.bf16 %v19952_v45  ;;  %v19963_v42 = vld [vmem:[#allocation144_spill] sm:$0xff] }
 0x64b   : > { %v8977_v18 = vrot.slane %v8784_v23, 4  ;;  %v9863_v19 = vsel %vm4677_vm5, %v9372_v49, %v9862_v16  ;;  %v8951_v3 = vrot.slane %v8950_v30, 1  ;;  %v9990_v38 = vrot.slane %v17925_v34, %v19883_v37  ;;  %8373 = vperm.xlu1 %11236, %v19961_v9  }
 0x64c   : > { %v8968_v47 = vadd.f32 %v8967_v17, %v8966_v52  ;;  %v9864_v15 = vsel %vm4679_vm6, %v9378_v55, %v9863_v19  ;;  %v8961_v10 = vrot.slane %v8960_v7, 2  ;;  %v8783_v35 = vmul.f32 %v17925_v34, %v19956_v4  ;;  %v19960_v34 = vld [vmem:[#allocation124_spill] sm:$0xff]  ;;  %v18026_v27 = vpop.permute.xlu0 %8218 }
 0x64d   : > { %v8978_v11 = vadd.f32 %v8977_v18, %v8784_v23  ;;  %9932 = vst [vmem:[%s17757_s20 + $0x48] sm:$0xff] %v9864_v15  ;;  %v19959_v1 = vunpack.c.h.bf16 %v19958_v57  ;;  %v10002_v33 = vrot.slane %v17939_v5, %v19883_v37  ;;  %v8952_v14 = vadd.f32 %v8951_v3, %v8950_v30  ;;  %8723 = vperm.xlu0 %11235, %v19960_v34   ;;  %v18031_v17 = vpop.permute.xlu1 %8213  ;;  %v19966_v18 = vld [vmem:[#allocation129_spill] sm:$0xff] }
 0x64e   : > { %v8969_v48 = vrot.slane %v8968_v47, 1  ;;  %v8962_v62 = vadd.f32 %v8961_v10, %v8960_v7  ;;  %v8971_v40 = vrot.slane %v8783_v35, 4  ;;  %v10461_v26 = vsel %vm4673_vm3, %v9990_v38, %v10460_v13 }
 0x64f   : > { %v8786_v56 = vmul.f32 %v17939_v5, %v19959_v1  ;;  %v8979_v51 = vrot.slane %v8978_v11, 2  ;;  %v10462_v50 = vsel %vm4675_vm4, %v9994_v39, %v10461_v26  ;;  %v9802_v5 = vsel %vm4667_vm0, %v8958_v29, %v8952_v14  ;;  %8383 = vperm.xlu1 %11236, %v19966_v18  }
 0x650   : > { %v8970_v59 = vadd.f32 %v8969_v48, %v8968_v47  ;;  %v8963_v54 = vrot.slane %v8962_v62, 1  ;;  %v8972_v55 = vadd.f32 %v8971_v40, %v8783_v35  ;;  %v19962_v16 = vunpack.c.l.bf16 %v19958_v57  ;;  %v18048_v43 = vpop.permute.xlu0 %8228 }
 0x651   : > { %v8989_v2 = vrot.slane %v8786_v56, 4  ;;  %v8980_v53 = vadd.f32 %v8979_v51, %v8978_v11  ;;  %v9998_v8 = vrot.slane %v17943_v41, %v19883_v37  ;;  %v19964_v25 = vunpack.c.h.bf16 %v19963_v42  ;;  %v19968_v11 = vld [vmem:[#allocation145_spill] sm:$0xff]  ;;  %v18052_v1 = vpop.permute.xlu1 %8223 }
 0x652   : > { %v8785_v58 = vmul.f32 %v17943_v41, %v19962_v16  ;;  %v8964_v52 = vadd.f32 %v8963_v54, %v8962_v62  ;;  %v8973_v36 = vrot.slane %v8972_v55, 2  ;;  %v10266_v60 = vrot.slane %v17953_v44, %v19883_v37  ;;  %v19965_v41 = vld [vmem:[#allocation126_spill] sm:$0xff] }
 0x653   : > { %v8990_v31 = vadd.f32 %v8989_v2, %v8786_v56  ;;  %v8981_v6 = vrot.slane %v8980_v53, 1  ;;  %v8852_v45 = vmul.f32 %v17953_v44, %v19964_v25  ;;  %v10463_v49 = vsel %vm4677_vm5, %v9998_v8, %v10462_v50  ;;  %8378 = vperm.xlu0 %11235, %v19965_v41   ;;  %v19970_v56 = vld [vmem:[#allocation128_spill] sm:$0xff]  ;;  %v19973_v8 = vld [vmem:[#allocation131_spill] sm:$0xff] }
 0x654   : > { %v8983_v61 = vrot.slane %v8785_v58, 4  ;;  %v9803_v39 = vsel %vm4669_vm1, %v8964_v52, %v9802_v5  ;;  %v8974_v7 = vadd.f32 %v8973_v36, %v8972_v55  ;;  %v10464_v20 = vsel %vm4679_vm6, %v10002_v33, %v10463_v49  ;;  %v19971_v33 = vld [vmem:[#allocation55_spill] sm:$0xff]  ;;  %v18063_v50 = vpop.permute.xlu0 %8238 }
 0x655   : > { %v8991_v23 = vrot.slane %v8990_v31, 2  ;;  %v8982_v29 = vadd.f32 %v8981_v6, %v8980_v53  ;;  %v9804_v19 = vsel %vm4671_vm2, %v8970_v59, %v9803_v39  ;;  %10580 = vst.msk [vmem:[%s17711_s16 + $0x8] sm:$0xff] %vm4802_vm7, %v10464_v20  ;;  %v9385_v13 = vrot.slane %v8852_v45, 4  ;;  %8393 = vperm.xlu1 %11236, %v19971_v33  }
 0x656   : > { %v8984_v47 = vadd.f32 %v8983_v61, %v8785_v58  ;;  %v8975_v44 = vrot.slane %v8974_v7, 1  ;;  %v19967_v63 = vunpack.c.l.bf16 %v19963_v42  ;;  %v10262_v10 = vrot.slane %v17963_v32, %v19883_v37  ;;  %v18066_v58 = vpop.permute.xlu1 %8233  ;;  %v19974_v42 = vld [vmem:[#allocation132_spill] sm:$0xff] }
 0x657   : > { %v8992_v30 = vadd.f32 %v8991_v23, %v8990_v31  ;;  %v19969_v4 = vunpack.c.h.bf16 %v19968_v11  ;;  %v9386_v38 = vadd.f32 %v9385_v13, %v8852_v45  ;;  %v10274_v57 = vrot.slane %v17974_v46, %v19883_v37  ;;  %8388 = vperm.xlu0 %11235, %v19970_v56  }
 0x658   : > { %v8851_v15 = vmul.f32 %v17963_v32, %v19967_v63  ;;  %v8985_v48 = vrot.slane %v8984_v47, 2  ;;  %v8976_v62 = vadd.f32 %v8975_v44, %v8974_v7  ;;  %v10521_v32 = vsel %vm4667_vm0, %v10266_v60, %v10262_v10  ;;  %v18077_v20 = vpop.permute.xlu0 %8248  ;;  %v19978_v63 = vld [vmem:[#allocation135_spill] sm:$0xff] }
 0x659   : > { %v8854_v35 = vmul.f32 %v17974_v46, %v19969_v4  ;;  %v8993_v3 = vrot.slane %v8992_v30, 1  ;;  %v9387_v26 = vrot.slane %v9386_v38, 2  ;;  %v19972_v2 = vunpack.c.l.bf16 %v19968_v11  ;;  %v19979_v4 = vld [vmem:[#allocation137_spill] sm:$0xff] }
 0x65a   : > { %v9379_v51 = vrot.slane %v8851_v15, 4  ;;  %v8986_v59 = vadd.f32 %v8985_v48, %v8984_v47  ;;  %v9805_v46 = vsel %vm4673_vm3, %v8976_v62, %v9804_v19  ;;  %v10270_v55 = vrot.slane %v17977_v12, %v19883_v37  ;;  %v18083_v44 = vpop.permute.xlu1 %8243 }
 0x65b   : > { %v9397_v40 = vrot.slane %v8854_v35, 4  ;;  %v8994_v14 = vadd.f32 %v8993_v3, %v8992_v30  ;;  %v8853_v34 = vmul.f32 %v17977_v12, %v19972_v2  ;;  %v9806_v9 = vsel %vm4675_vm4, %v8982_v29, %v9805_v46  ;;  %8398 = vperm.xlu0 %11235, %v19973_v8   ;;  %v19976_v12 = vld [vmem:[#allocation73_spill] sm:$0xff] }
 0x65c   : > { %v9380_v54 = vadd.f32 %v9379_v51, %v8851_v15  ;;  %v8987_v5 = vrot.slane %v8986_v59, 1  ;;  %v9388_v31 = vadd.f32 %v9387_v26, %v9386_v38  ;;  %v10522_v36 = vsel %vm4669_vm1, %v10270_v55, %v10521_v32  ;;  %8403 = vperm.xlu1 %11236, %v19976_v12   ;;  %v19980_v38 = vld [vmem:[#allocation57_spill] sm:$0xff]  ;;  %v18096_v33 = vpop.permute.xlu0 %8578 }
 0x65d   : > { %v9398_v53 = vadd.f32 %v9397_v40, %v8854_v35  ;;  %v9391_v16 = vrot.slane %v8853_v34, 4  ;;  %v19975_v25 = vunpack.c.h.bf16 %v19974_v42  ;;  %v10282_v60 = vrot.slane %v17989_v28, %v19883_v37 }
 0x65e   : > { %v9381_v52 = vrot.slane %v9380_v54, 2  ;;  %v8988_v23 = vadd.f32 %v8987_v5, %v8986_v59  ;;  %v9389_v61 = vrot.slane %v9388_v31, 1  ;;  %v10523_v7 = vsel %vm4671_vm2, %v10274_v57, %v10522_v36  ;;  %v19985_v36 = vld [vmem:[#allocation134_spill] sm:$0xff] }
 0x65f   : > { %v9399_v6 = vrot.slane %v9398_v53, 2  ;;  %v8856_v45 = vmul.f32 %v17989_v28, %v19975_v25  ;;  %v9392_v49 = vadd.f32 %v9391_v16, %v8853_v34  ;;  %v19977_v47 = vunpack.c.l.bf16 %v19974_v42  ;;  %8408 = vperm.xlu0 %11235, %v19978_v63   ;;  %v19982_v34 = vld [vmem:[#allocation125_spill] sm:$0xff] }
 0x660   : > { %v9382_v41 = vadd.f32 %v9381_v52, %v9380_v54  ;;  %v9807_v18 = vsel %vm4677_vm5, %v8988_v23, %v9806_v9  ;;  %v9390_v19 = vadd.f32 %v9389_v61, %v9388_v31  ;;  %8738 = vperm.xlu1 %11236, %v19979_v4   ;;  %v10278_v48 = vrot.slane %v17993_v21, %v19883_v37  ;;  %v18105_v9 = vpop.permute.xlu1 %8573 }
 0x661   : > { %v9400_v39 = vadd.f32 %v9399_v6, %v9398_v53  ;;  %v9409_v29 = vrot.slane %v8856_v45, 4  ;;  %v9393_v30 = vrot.slane %v9392_v49, 2  ;;  %v8855_v13 = vmul.f32 %v17993_v21, %v19977_v47 }
 0x662   : > { %v9808_v28 = vsel %vm4679_vm6, %v8994_v14, %v9807_v18  ;;  %v9383_v15 = vrot.slane %v9382_v41, 1  ;;  %v19981_v57 = vunpack.c.h.bf16 %v19980_v38  ;;  %v10290_v40 = vrot.slane %v18009_v24, %v19883_v37  ;;  %v19988_v18 = vld [vmem:[#allocation141_spill] sm:$0xff] }
 0x663   : > { %v9401_v10 = vrot.slane %v9400_v39, 1  ;;  %v9410_v11 = vadd.f32 %v9409_v29, %v8856_v45  ;;  %9924 = vst [vmem:[%s17757_s20 + $0x8] sm:$0xff] %v9808_v28  ;;  %v9394_v35 = vadd.f32 %v9393_v30, %v9392_v49  ;;  %v9403_v3 = vrot.slane %v8855_v13, 4  ;;  %8733 = vperm.xlu0 %11235, %v19982_v34  }
 0x664   : > { %v8858_v56 = vmul.f32 %v18009_v24, %v19981_v57  ;;  %v9384_v62 = vadd.f32 %v9383_v15, %v9382_v41  ;;  %v10524_v26 = vsel %vm4673_vm3, %v10278_v48, %v10523_v7  ;;  %v19983_v53 = vunpack.c.l.bf16 %v19980_v38  ;;  %v19984_v24 = vld [vmem:[#allocation139_spill] sm:$0xff]  ;;  %v18120_v7 = vpop.permute.xlu0 %8588  ;;  %v19990_v15 = vld [vmem:[#allocation34_spill] sm:$0xff] }
 0x665   : > { %v9402_v51 = vadd.f32 %v9401_v10, %v9400_v39  ;;  %v9411_v32 = vrot.slane %v9410_v11, 2  ;;  %v9395_v14 = vrot.slane %v9394_v35, 1  ;;  %v9404_v59 = vadd.f32 %v9403_v3, %v8855_v13  ;;  %8743 = vperm.xlu1 %11236, %v19984_v24  }
 0x666   : > { %v9421_v2 = vrot.slane %v8858_v56, 4  ;;  %v9865_v21 = vsel %vm4667_vm0, %v9390_v19, %v9384_v62  ;;  %v10525_v54 = vsel %vm4675_vm4, %v10282_v60, %v10524_v26  ;;  %v8857_v55 = vmul.f32 %v18012_v22, %v19983_v53  ;;  %v19987_v60 = vld [vmem:[#allocation43_spill] sm:$0xff] }
 0x667   : > { %v9412_v46 = vadd.f32 %v9411_v32, %v9410_v11  ;;  %v9396_v5 = vadd.f32 %v9395_v14, %v9394_v35  ;;  %v9405_v31 = vrot.slane %v9404_v59, 2  ;;  %v10286_v8 = vrot.slane %v18012_v22, %v19883_v37  ;;  %8748 = vperm.xlu0 %11235, %v19987_v60   ;;  %v18135_v35 = vpop.permute.xlu1 %8583  ;;  %v19994_v14 = vld [vmem:[#allocation28_spill] sm:$0xff] }
 0x668   : > { %v9422_v16 = vadd.f32 %v9421_v2, %v8858_v56  ;;  %v9415_v6 = vrot.slane %v8857_v55, 4  ;;  %v19986_v42 = vunpack.c.h.bf16 %v19985_v36  ;;  %v10010_v45 = vrot.slane %v18026_v27, %v19883_v37  ;;  %v19992_v56 = vld [vmem:[#allocation142_spill] sm:$0xff]  ;;  %v18145_v53 = vpop.permute.xlu0 %8598 }
 0x669   : > { %v9413_v52 = vrot.slane %v9412_v46, 1  ;;  %v9866_v12 = vsel %vm4669_vm1, %v9396_v5, %v9865_v21  ;;  %v9406_v23 = vadd.f32 %v9405_v31, %v9404_v59  ;;  %v10526_v49 = vsel %vm4677_vm5, %v10286_v8, %v10525_v54  ;;  %8753 = vperm.xlu1 %11236, %v19988_v18   ;;  %v19996_v8 = vld [vmem:[#allocation130_spill] sm:$0xff] }
 0x66a   : > { %v8788_v25 = vmul.f32 %v18026_v27, %v19986_v42  ;;  %v9423_v61 = vrot.slane %v9422_v16, 2  ;;  %v9867_v22 = vsel %vm4671_vm2, %v9402_v51, %v9866_v12  ;;  %v9416_v39 = vadd.f32 %v9415_v6, %v8857_v55 }
 0x66b   : > { %v9414_v41 = vadd.f32 %v9413_v52, %v9412_v46  ;;  %v10527_v29 = vsel %vm4679_vm6, %v10290_v40, %v10526_v49  ;;  %v9407_v19 = vrot.slane %v9406_v23, 1  ;;  %v19989_v47 = vunpack.c.l.bf16 %v19985_v36  ;;  %8758 = vperm.xlu0 %11235, %v19992_v56  }
 0x66c   : > { %v9424_v27 = vadd.f32 %v9423_v61, %v9422_v16  ;;  %10589 = vst.msk [vmem:[%s17711_s16 + $0x50] sm:$0xff] %vm4802_vm7, %v10527_v29  ;;  %v9001_v30 = vrot.slane %v8788_v25, 4  ;;  %v9417_v63 = vrot.slane %v9416_v39, 2  ;;  %v10006_v28 = vrot.slane %v18031_v17, %v19883_v37 }
 0x66d   : > { %v8787_v13 = vmul.f32 %v18031_v17, %v19989_v47  ;;  %v19991_v10 = vunpack.c.h.bf16 %v19990_v15  ;;  %v10018_v4 = vrot.slane %v18048_v43, %v19883_v37  ;;  %v9408_v3 = vadd.f32 %v9407_v19, %v9406_v23  ;;  %8763 = vperm.xlu1 %11236, %v19994_v14  }
 0x66e   : > { %v9425_v48 = vrot.slane %v9424_v27, 1  ;;  %v9002_v38 = vadd.f32 %v9001_v30, %v8788_v25  ;;  %v9418_v62 = vadd.f32 %v9417_v63, %v9416_v39  ;;  %v10465_v51 = vsel %vm4667_vm0, %v10010_v45, %v10006_v28  ;;  %v18155_v25 = vpop.permute.xlu1 %8593  ;;  %v19997_v45 = vld [vmem:[#allocation127_spill] sm:$0xff]  ;;  %v18168_v63 = vpop.permute.xlu0 %8608 }
 0x66f   : > { %v8790_v11 = vmul.f32 %v18048_v43, %v19991_v10  ;;  %v8995_v57 = vrot.slane %v8787_v13, 4  ;;  %v19993_v17 = vunpack.c.l.bf16 %v19990_v15  ;;  %v9868_v43 = vsel %vm4673_vm3, %v9408_v3, %v9867_v22  ;;  %8768 = vperm.xlu0 %11235, %v19996_v8   ;;  %v12187_v10 = vld [vmem:[%s12723_s26 + $0x58] sm:$0xff]  }
 0x670   : > { %v9426_v59 = vadd.f32 %v9425_v48, %v9424_v27  ;;  %v9003_v26 = vrot.slane %v9002_v38, 2  ;;  %v9869_v34 = vsel %vm4675_vm4, %v9414_v41, %v9868_v43  ;;  %v9419_v21 = vrot.slane %v9418_v62, 1 }
 0x671   : > { %v9013_v32 = vrot.slane %v8790_v11, 4  ;;  %v8789_v40 = vmul.f32 %v18052_v1, %v19993_v17  ;;  %v8996_v2 = vadd.f32 %v8995_v57, %v8787_v13  ;;  %v10014_v5 = vrot.slane %v18052_v1, %v19883_v37  ;;  %8728 = vperm.xlu1 %11236, %v19997_v45  }
 0x672   : > { %v9004_v55 = vadd.f32 %v9003_v26, %v9002_v38  ;;  %v19995_v31 = vunpack.c.h.bf16 %v17676_v0  ;;  %v9420_v52 = vadd.f32 %v9419_v21, %v9418_v62  ;;  %v10026_v42 = vrot.slane %v18063_v50, %v19883_v37  ;;  %v18174_v57 = vpop.permute.xlu1 %8603 }
 0x673   : > { %v9014_v46 = vadd.f32 %v9013_v32, %v8790_v11  ;;  %v9007_v54 = vrot.slane %v8789_v40, 4  ;;  %v8997_v24 = vrot.slane %v8996_v2, 2  ;;  %v10466_v1 = vsel %vm4669_vm1, %v10014_v5, %v10465_v51 }
 0x674   : > { %v8792_v16 = vmul.f32 %v18063_v50, %v19995_v31  ;;  %v9005_v12 = vrot.slane %v9004_v55, 1  ;;  %v9870_v49 = vsel %vm4677_vm5, %v9420_v52, %v9869_v34  ;;  %v10467_v22 = vsel %vm4671_vm2, %v10018_v4, %v10466_v1 }
 0x675   : > { %v9015_v6 = vrot.slane %v9014_v46, 2  ;;  %v9008_v36 = vadd.f32 %v9007_v54, %v8789_v40  ;;  %v8998_v23 = vadd.f32 %v8997_v24, %v8996_v2  ;;  %v9871_v39 = vsel %vm4679_vm6, %v9426_v59, %v9870_v49  ;;  %v12188_v2 = vld [vmem:[%s12723_s26 + $0x160] sm:$0xff]   ;;  %v18185_v54 = vpop.permute.xlu0 %8258 }
 0x676   : > { %v9025_v61 = vrot.slane %v8792_v16, 4  ;;  %v9006_v29 = vadd.f32 %v9005_v12, %v9004_v55  ;;  %9933 = vst [vmem:[%s17757_s20 + $0x50] sm:$0xff] %v9871_v39  ;;  %v19998_v30 = vunpack.c.l.bf16 %v17676_v0  ;;  %v10022_v13 = vrot.slane %v18066_v58, %v19883_v37  ;;  %v12189_v12 = vld [vmem:[%s12723_s26 + $0x168] sm:$0xff]  }
 0x677   : > { %v9016_v60 = vadd.f32 %v9015_v6, %v9014_v46  ;;  %v9009_v41 = vrot.slane %v9008_v36, 2  ;;  %v8999_v50 = vrot.slane %v8998_v23, 1  ;;  %v8026_v11 = vunpack.c.h.bf16 %v12187_v10  ;;  %v18191_v6 = vpop.permute.xlu1 %8253 }
 0x678   : > { %v9026_v18 = vadd.f32 %v9025_v61, %v8792_v16  ;;  %v8791_v47 = vmul.f32 %v18066_v58, %v19998_v30  ;;  %v10034_v4 = vrot.slane %v18077_v20, %v19883_v37  ;;  %v10468_v0 = vsel %vm4673_vm3, %v10022_v13, %v10467_v22 }
 0x679   : > { %v9017_v19 = vrot.slane %v9016_v60, 1  ;;  %v9010_v27 = vadd.f32 %v9009_v41, %v9008_v36  ;;  %v9000_v28 = vadd.f32 %v8999_v50, %v8998_v23  ;;  %v8794_v62 = vmul.f32 %v18077_v20, %v8026_v11 }
 0x67a   : > { %v9027_v15 = vrot.slane %v9026_v18, 2  ;;  %v9019_v38 = vrot.slane %v8791_v47, 4  ;;  %v8025_v51 = vunpack.c.l.bf16 %v12187_v10  ;;  %v10469_v40 = vsel %vm4675_vm4, %v10026_v42, %v10468_v0 }
 0x67b   : > { %v9018_v3 = vadd.f32 %v9017_v19, %v9016_v60  ;;  %v9011_v48 = vrot.slane %v9010_v27, 1  ;;  %v9809_v56 = vsel %vm4667_vm0, %v9006_v29, %v9000_v28  ;;  %v10030_v14 = vrot.slane %v18083_v44, %v19883_v37 }
 0x67c   : > { %v9028_v58 = vadd.f32 %v9027_v15, %v9026_v18  ;;  %v9020_v17 = vadd.f32 %v9019_v38, %v8791_v47  ;;  %v9037_v59 = vrot.slane %v8794_v62, 4  ;;  %v8793_v26 = vmul.f32 %v18083_v44, %v8025_v51 }
 0x67d   : > { %v9012_v32 = vadd.f32 %v9011_v48, %v9010_v27  ;;  %v8092_v34 = vunpack.c.h.bf16 %v12188_v2  ;;  %v10470_v20 = vsel %vm4677_vm5, %v10030_v14, %v10469_v40  ;;  %v10298_v31 = vrot.slane %v18096_v33, %v19883_v37  ;;  %v18203_v27 = vpop.permute.xlu0 %8268  ;;  %v12190_v40 = vld [vmem:[%s12723_s26 + $0x170] sm:$0xff]  }
 0x67e   : > { %v9029_v43 = vrot.slane %v9028_v58, 1  ;;  %v9021_v46 = vrot.slane %v9020_v17, 2  ;;  %v9038_v24 = vadd.f32 %v9037_v59, %v8794_v62  ;;  %v9031_v5 = vrot.slane %v8793_v26, 4 }
 0x67f   : > { %v9810_v21 = vsel %vm4669_vm1, %v9012_v32, %v9809_v56  ;;  %v10471_v44 = vsel %vm4679_vm6, %v10034_v4, %v10470_v20  ;;  %v8860_v8 = vmul.f32 %v18096_v33, %v8092_v34  ;;  %v8091_v52 = vunpack.c.l.bf16 %v12188_v2 }
 0x680   : > { %v9030_v55 = vadd.f32 %v9029_v43, %v9028_v58  ;;  %v9022_v16 = vadd.f32 %v9021_v46, %v9020_v17  ;;  %v9811_v36 = vsel %vm4671_vm2, %v9018_v3, %v9810_v21  ;;  %v9039_v42 = vrot.slane %v9038_v24, 2  ;;  %10581 = vst.msk [vmem:[%s17711_s16 + $0x10] sm:$0xff] %vm4802_vm7, %v10471_v44 }
 0x681   : > { %v9032_v45 = vadd.f32 %v9031_v5, %v8793_v26  ;;  %v8094_v23 = vunpack.c.h.bf16 %v12189_v12  ;;  %v9433_v61 = vrot.slane %v8860_v8, 4  ;;  %v8859_v49 = vmul.f32 %v18105_v9, %v8091_v52  ;;  %v18215_v2 = vpop.permute.xlu0 %8278 }
 0x682   : > { %v9023_v1 = vrot.slane %v9022_v16, 1  ;;  %v10294_v60 = vrot.slane %v18105_v9, %v19883_v37  ;;  %v9040_v41 = vadd.f32 %v9039_v42, %v9038_v24  ;;  %v10306_v39 = vrot.slane %v18120_v7, %v19883_v37 }
 0x683   : > { %v9033_v33 = vrot.slane %v9032_v45, 2  ;;  %v8862_v22 = vmul.f32 %v18120_v7, %v8094_v23  ;;  %v9434_v50 = vadd.f32 %v9433_v61, %v8860_v8  ;;  %v9427_v18 = vrot.slane %v8859_v49, 4  ;;  %v18209_v7 = vpop.permute.xlu1 %8263 }
 0x684   : > { %v9024_v29 = vadd.f32 %v9023_v1, %v9022_v16  ;;  %v8093_v19 = vunpack.c.l.bf16 %v12189_v12  ;;  %v9041_v30 = vrot.slane %v9040_v41, 1  ;;  %v10302_v28 = vrot.slane %v18135_v35, %v19883_v37 }
 0x685   : > { %v9034_v47 = vadd.f32 %v9033_v33, %v9032_v45  ;;  %v9445_v13 = vrot.slane %v8862_v22, 4  ;;  %v9435_v15 = vrot.slane %v9434_v50, 2  ;;  %v9428_v10 = vadd.f32 %v9427_v18, %v8859_v49 }
 0x686   : > { %v9812_v9 = vsel %vm4673_vm3, %v9024_v29, %v9811_v36  ;;  %v8861_v11 = vmul.f32 %v18135_v35, %v8093_v19  ;;  %v9042_v4 = vadd.f32 %v9041_v30, %v9040_v41  ;;  %v10528_v48 = vsel %vm4667_vm0, %v10298_v31, %v10294_v60  ;;  %v18234_v29 = vpop.permute.xlu0 %8288 }
 0x687   : > { %v9035_v3 = vrot.slane %v9034_v47, 1  ;;  %v9446_v38 = vadd.f32 %v9445_v13, %v8862_v22  ;;  %v9813_v0 = vsel %vm4675_vm4, %v9030_v55, %v9812_v9  ;;  %v9436_v56 = vadd.f32 %v9435_v15, %v9434_v50  ;;  %v18223_v16 = vpop.permute.xlu1 %8273 }
 0x688   : > { %v9429_v58 = vrot.slane %v9428_v10, 2  ;;  %v9439_v62 = vrot.slane %v8861_v11, 4  ;;  %v10529_v17 = vsel %vm4669_vm1, %v10302_v28, %v10528_v48  ;;  %v8096_v14 = vunpack.c.h.bf16 %v12190_v40  ;;  %v12192_v28 = vld [vmem:[%s12723_s26 + $0x60] sm:$0xff]  }
 0x689   : > { %v9036_v51 = vadd.f32 %v9035_v3, %v9034_v47  ;;  %v9447_v32 = vrot.slane %v9446_v38, 2  ;;  %v9437_v35 = vrot.slane %v9436_v56, 1  ;;  %v8095_v26 = vunpack.c.l.bf16 %v12190_v40 }
 0x68a   : > { %v9430_v43 = vadd.f32 %v9429_v58, %v9428_v10  ;;  %v9440_v59 = vadd.f32 %v9439_v62, %v8861_v11  ;;  %v8864_v46 = vmul.f32 %v18145_v53, %v8096_v14  ;;  %v10314_v20 = vrot.slane %v18145_v53, %v19883_v37  ;;  %v12191_v53 = vld [vmem:[%s12723_s26 + $0x178] sm:$0xff]   ;;  %v18254_v14 = vpop.permute.xlu0 %8618 }
 0x68b   : > { %v9814_v34 = vsel %vm4677_vm5, %v9036_v51, %v9813_v0  ;;  %v9448_v21 = vadd.f32 %v9447_v32, %v9446_v38  ;;  %v10530_v31 = vsel %vm4671_vm2, %v10306_v39, %v10529_v17  ;;  %v8863_v52 = vmul.f32 %v18155_v25, %v8095_v26  ;;  %v18241_v15 = vpop.permute.xlu1 %8283  ;;  %v12193_v26 = vld [vmem:[%s12723_s26 + $0x68] sm:$0xff]  }
 0x68c   : > { %v9815_v55 = vsel %vm4679_vm6, %v9042_v4, %v9814_v34  ;;  %v9431_v24 = vrot.slane %v9430_v43, 1  ;;  %v9441_v5 = vrot.slane %v9440_v59, 2  ;;  %v9457_v8 = vrot.slane %v8864_v46, 4 }
 0x68d   : > { %9925 = vst [vmem:[%s17757_s20 + $0x10] sm:$0xff] %v9815_v55  ;;  %v9449_v44 = vrot.slane %v9448_v21, 1  ;;  %v10310_v36 = vrot.slane %v18155_v25, %v19883_v37  ;;  %v9438_v42 = vadd.f32 %v9437_v35, %v9436_v56  ;;  %v8098_v23 = vunpack.c.h.bf16 %v12191_v53 }
 0x68e   : > { %v9432_v45 = vadd.f32 %v9431_v24, %v9430_v43  ;;  %v9442_v12 = vadd.f32 %v9441_v5, %v9440_v59  ;;  %v9458_v1 = vadd.f32 %v9457_v8, %v8864_v46  ;;  %v9451_v61 = vrot.slane %v8863_v52, 4 }
 0x68f   : > { %v10531_v49 = vsel %vm4673_vm3, %v10310_v36, %v10530_v31  ;;  %v10322_v60 = vrot.slane %v18168_v63, %v19883_v37  ;;  %v9450_v41 = vadd.f32 %v9449_v44, %v9448_v21  ;;  %v8866_v22 = vmul.f32 %v18168_v63, %v8098_v23 }
 0x690   : > { %v9443_v33 = vrot.slane %v9442_v12, 1  ;;  %v8097_v39 = vunpack.c.l.bf16 %v12191_v53  ;;  %v9459_v25 = vrot.slane %v9458_v1, 2  ;;  %v9452_v50 = vadd.f32 %v9451_v61, %v8863_v52 }
 0x691   : > { %v10532_v18 = vsel %vm4675_vm4, %v10314_v20, %v10531_v49  ;;  %v10318_v19 = vrot.slane %v18174_v57, %v19883_v37  ;;  %v9469_v47 = vrot.slane %v8866_v22, 4  ;;  %v8028_v9 = vunpack.c.h.bf16 %v12192_v28 }
 0x692   : > { %v9444_v30 = vadd.f32 %v9443_v33, %v9442_v12  ;;  %v8865_v13 = vmul.f32 %v18174_v57, %v8097_v39  ;;  %v9872_v63 = vsel %vm4667_vm0, %v9438_v42, %v9432_v45  ;;  %v9460_v10 = vadd.f32 %v9459_v25, %v9458_v1 }
 0x693   : > { %v9453_v11 = vrot.slane %v9452_v50, 2  ;;  %v10533_v4 = vsel %vm4677_vm5, %v10318_v19, %v10532_v18  ;;  %v9470_v48 = vadd.f32 %v9469_v47, %v8866_v22  ;;  %v8796_v57 = vmul.f32 %v18185_v54, %v8028_v9  ;;  %v12194_v19 = vld [vmem:[%s12723_s26 + $0x70] sm:$0xff]  }
 0x694   : > { %v9873_v3 = vsel %vm4669_vm1, %v9444_v30, %v9872_v63  ;;  %v9463_v38 = vrot.slane %v8865_v13, 4  ;;  %v10534_v0 = vsel %vm4679_vm6, %v10322_v60, %v10533_v4  ;;  %v9461_v56 = vrot.slane %v9460_v10, 1  ;;  %v18268_v60 = vpop.permute.xlu0 %8628 }
 0x695   : > { %v9454_v58 = vadd.f32 %v9453_v11, %v9452_v50  ;;  %10590 = vst.msk [vmem:[%s17711_s16 + $0x58] sm:$0xff] %vm4802_vm7, %v10534_v0  ;;  %v10042_v62 = vrot.slane %v18185_v54, %v19883_v37  ;;  %v9471_v51 = vrot.slane %v9470_v48, 2  ;;  %v8027_v17 = vunpack.c.l.bf16 %v12192_v28  ;;  %v18259_v54 = vpop.permute.xlu1 %8613 }
 0x696   : > { %v9464_v32 = vadd.f32 %v9463_v38, %v8865_v13  ;;  %v10038_v40 = vrot.slane %v18191_v6, %v19883_v37  ;;  %v9874_v35 = vsel %vm4671_vm2, %v9450_v41, %v9873_v3  ;;  %v9049_v59 = vrot.slane %v8796_v57, 4 }
 0x697   : > { %v9455_v43 = vrot.slane %v9454_v58, 1  ;;  %v8030_v34 = vunpack.c.h.bf16 %v12193_v26  ;;  %v9462_v21 = vadd.f32 %v9461_v56, %v9460_v10  ;;  %v9472_v46 = vadd.f32 %v9471_v51, %v9470_v48 }
 0x698   : > { %v9465_v20 = vrot.slane %v9464_v32, 2  ;;  %v8795_v55 = vmul.f32 %v18191_v6, %v8027_v17  ;;  %v9050_v5 = vadd.f32 %v9049_v59, %v8796_v57  ;;  %v10472_v31 = vsel %vm4667_vm0, %v10042_v62, %v10038_v40  ;;  %v18285_v62 = vpop.permute.xlu0 %8638 }
 0x699   : > { %v9456_v24 = vadd.f32 %v9455_v43, %v9454_v58  ;;  %v8798_v44 = vmul.f32 %v18203_v27, %v8030_v34  ;;  %v9473_v8 = vrot.slane %v9472_v46, 1  ;;  %v8029_v42 = vunpack.c.l.bf16 %v12193_v26  ;;  %v18274_v47 = vpop.permute.xlu1 %8623 }
 0x69a   : > { %v9466_v52 = vadd.f32 %v9465_v20, %v9464_v32  ;;  %v9043_v36 = vrot.slane %v8795_v55, 4  ;;  %v9051_v12 = vrot.slane %v9050_v5, 2  ;;  %v10046_v6 = vrot.slane %v18209_v7, %v19883_v37 }
 0x69b   : > { %v9875_v45 = vsel %vm4673_vm3, %v9456_v24, %v9874_v35  ;;  %v9061_v53 = vrot.slane %v8798_v44, 4  ;;  %v9474_v23 = vadd.f32 %v9473_v8, %v9472_v46  ;;  %v10050_v49 = vrot.slane %v18203_v27, %v19883_v37 }
 0x69c   : > { %v9467_v1 = vrot.slane %v9466_v52, 1  ;;  %v9044_v61 = vadd.f32 %v9043_v36, %v8795_v55  ;;  %v9876_v41 = vsel %vm4675_vm4, %v9462_v21, %v9875_v45  ;;  %v9052_v33 = vadd.f32 %v9051_v12, %v9050_v5 }
 0x69d   : > { %v9062_v22 = vadd.f32 %v9061_v53, %v8798_v44  ;;  %v8797_v39 = vmul.f32 %v18209_v7, %v8029_v42  ;;  %v10473_v18 = vsel %vm4669_vm1, %v10046_v6, %v10472_v31  ;;  %v8032_v30 = vunpack.c.h.bf16 %v12194_v19  ;;  %v18291_v34 = vpop.permute.xlu1 %8633  ;;  %v12196_v53 = vld [vmem:[%s12723_s26 + $0x180] sm:$0xff]   ;;  %v18301_v6 = vpop.permute.xlu0 %8648 }
 0x69e   : > { %v9468_v25 = vadd.f32 %v9467_v1, %v9466_v52  ;;  %v9045_v50 = vrot.slane %v9044_v61, 2  ;;  %v9053_v13 = vrot.slane %v9052_v33, 1  ;;  %v8031_v9 = vunpack.c.l.bf16 %v12194_v19 }
 0x69f   : > { %v9063_v28 = vrot.slane %v9062_v22, 2  ;;  %v9055_v27 = vrot.slane %v8797_v39, 4  ;;  %v8800_v11 = vmul.f32 %v18215_v2, %v8032_v30  ;;  %v10058_v7 = vrot.slane %v18215_v2, %v19883_v37  ;;  %v12195_v2 = vld [vmem:[%s12723_s26 + $0x78] sm:$0xff]  }
 0x6a0   : > { %v9877_v63 = vsel %vm4677_vm5, %v9468_v25, %v9876_v41  ;;  %v9046_v10 = vadd.f32 %v9045_v50, %v9044_v61  ;;  %v9054_v3 = vadd.f32 %v9053_v13, %v9052_v33  ;;  %v8799_v58 = vmul.f32 %v18223_v16, %v8031_v9 }
 0x6a1   : > { %v9878_v4 = vsel %vm4679_vm6, %v9474_v23, %v9877_v63  ;;  %v9064_v48 = vadd.f32 %v9063_v28, %v9062_v22  ;;  %v9056_v38 = vadd.f32 %v9055_v27, %v8797_v39  ;;  %v9073_v56 = vrot.slane %v8800_v11, 4  ;;  %v18306_v39 = vpop.permute.xlu1 %8643 }
 0x6a2   : > { %9934 = vst [vmem:[%s17757_s20 + $0x58] sm:$0xff] %v9878_v4  ;;  %v9047_v0 = vrot.slane %v9046_v10, 1  ;;  %v10054_v57 = vrot.slane %v18223_v16, %v19883_v37  ;;  %v10474_v17 = vsel %vm4671_vm2, %v10050_v49, %v10473_v18  ;;  %v8034_v40 = vunpack.c.h.bf16 %v12195_v2 }
 0x6a3   : > { %v9065_v51 = vrot.slane %v9064_v48, 1  ;;  %v9057_v32 = vrot.slane %v9056_v38, 2  ;;  %v9074_v43 = vadd.f32 %v9073_v56, %v8800_v11  ;;  %v9067_v59 = vrot.slane %v8799_v58, 4 }
 0x6a4   : > { %v9048_v35 = vadd.f32 %v9047_v0, %v9046_v10  ;;  %v10066_v26 = vrot.slane %v18234_v29, %v19883_v37  ;;  %v10475_v16 = vsel %vm4673_vm3, %v10054_v57, %v10474_v17  ;;  %v8802_v46 = vmul.f32 %v18234_v29, %v8034_v40 }
 0x6a5   : > { %v9058_v21 = vadd.f32 %v9057_v32, %v9056_v38  ;;  %v8033_v20 = vunpack.c.l.bf16 %v12195_v2  ;;  %v9066_v24 = vadd.f32 %v9065_v51, %v9064_v48  ;;  %v9075_v5 = vrot.slane %v9074_v43, 2  ;;  %v18316_v38 = vpop.permute.xlu0 %8298  ;;  %v18323_v2 = vpop.permute.xlu1 %8293 }
 0x6a6   : > { %v9816_v55 = vsel %vm4667_vm0, %v9054_v3, %v9048_v35  ;;  %v9068_v31 = vadd.f32 %v9067_v59, %v8799_v58  ;;  %v9085_v8 = vrot.slane %v8802_v46, 4  ;;  %v10062_v36 = vrot.slane %v18241_v15, %v19883_v37  ;;  %v12197_v3 = vld [vmem:[%s12723_s26 + $0x188] sm:$0xff]  }
 0x6a7   : > { %v9059_v44 = vrot.slane %v9058_v21, 1  ;;  %v8801_v52 = vmul.f32 %v18241_v15, %v8033_v20  ;;  %v9076_v42 = vadd.f32 %v9075_v5, %v9074_v43  ;;  %v10476_v12 = vsel %vm4675_vm4, %v10058_v7, %v10475_v16 }
 0x6a8   : > { %v9069_v45 = vrot.slane %v9068_v31, 2  ;;  %v8100_v29 = vunpack.c.h.bf16 %v12196_v53  ;;  %v9086_v1 = vadd.f32 %v9085_v8, %v8802_v46  ;;  %v10477_v49 = vsel %vm4677_vm5, %v10062_v36, %v10476_v12 }
 0x6a9   : > { %v9060_v23 = vadd.f32 %v9059_v44, %v9058_v21  ;;  %v9079_v61 = vrot.slane %v8801_v52, 4  ;;  %v9077_v41 = vrot.slane %v9076_v42, 1  ;;  %v10478_v22 = vsel %vm4679_vm6, %v10066_v26, %v10477_v49 }
 0x6aa   : > { %v9070_v33 = vadd.f32 %v9069_v45, %v9068_v31  ;;  %v8868_v15 = vmul.f32 %v18254_v14, %v8100_v29  ;;  %v9087_v50 = vrot.slane %v9086_v1, 2  ;;  %10582 = vst.msk [vmem:[%s17711_s16 + $0x18] sm:$0xff] %vm4802_vm7, %v10478_v22  ;;  %v8099_v19 = vunpack.c.l.bf16 %v12196_v53 }
 0x6ab   : > { %v9817_v25 = vsel %vm4669_vm1, %v9060_v23, %v9816_v55  ;;  %v9080_v18 = vadd.f32 %v9079_v61, %v8801_v52  ;;  %v10330_v28 = vrot.slane %v18254_v14, %v19883_v37  ;;  %v9078_v27 = vadd.f32 %v9077_v41, %v9076_v42  ;;  %v18332_v52 = vpop.permute.xlu0 %8308 }
 0x6ac   : > { %v9071_v30 = vrot.slane %v9070_v33, 1  ;;  %v9481_v13 = vrot.slane %v8868_v15, 4  ;;  %v9088_v9 = vadd.f32 %v9087_v50, %v9086_v1  ;;  %v8867_v10 = vmul.f32 %v18259_v54, %v8099_v19  ;;  %v18338_v1 = vpop.permute.xlu1 %8303  ;;  %v12199_v50 = vld [vmem:[%s12723_s26 + $0x198] sm:$0xff]  }
 0x6ad   : > { %v9081_v63 = vrot.slane %v9080_v18, 2  ;;  %v9818_v11 = vsel %vm4671_vm2, %v9066_v24, %v9817_v25  ;;  %v8102_v48 = vunpack.c.h.bf16 %v12197_v3  ;;  %v10326_v57 = vrot.slane %v18259_v54, %v19883_v37 }
 0x6ae   : > { %v9072_v7 = vadd.f32 %v9071_v30, %v9070_v33  ;;  %v9482_v4 = vadd.f32 %v9481_v13, %v8868_v15  ;;  %v9089_v0 = vrot.slane %v9088_v9, 1  ;;  %v9475_v58 = vrot.slane %v8867_v10, 4 }
 0x6af   : > { %v9082_v56 = vadd.f32 %v9081_v63, %v9080_v18  ;;  %v8870_v51 = vmul.f32 %v18268_v60, %v8102_v48  ;;  %v10338_v32 = vrot.slane %v18268_v60, %v19883_v37  ;;  %v8101_v17 = vunpack.c.l.bf16 %v12197_v3  ;;  %v12198_v60 = vld [vmem:[%s12723_s26 + $0x190] sm:$0xff]  }
 0x6b0   : > { %v9483_v14 = vrot.slane %v9482_v4, 2  ;;  %v9819_v40 = vsel %vm4673_vm3, %v9072_v7, %v9818_v11  ;;  %v9090_v35 = vadd.f32 %v9089_v0, %v9088_v9  ;;  %v9476_v59 = vadd.f32 %v9475_v58, %v8867_v10  ;;  %v18351_v11 = vpop.permute.xlu0 %8318  ;;  %v18355_v58 = vpop.permute.xlu1 %8313 }
 0x6b1   : > { %v9083_v43 = vrot.slane %v9082_v56, 1  ;;  %v9493_v21 = vrot.slane %v8870_v51, 4  ;;  %v8869_v16 = vmul.f32 %v18274_v47, %v8101_v17  ;;  %v10334_v54 = vrot.slane %v18274_v47, %v19883_v37 }
 0x6b2   : > { %v9484_v26 = vadd.f32 %v9483_v14, %v9482_v4  ;;  %v9477_v20 = vrot.slane %v9476_v59, 2  ;;  %v10535_v55 = vsel %vm4667_vm0, %v10330_v28, %v10326_v57  ;;  %v8104_v24 = vunpack.c.h.bf16 %v12198_v60 }
 0x6b3   : > { %v9084_v46 = vadd.f32 %v9083_v43, %v9082_v56  ;;  %v9820_v5 = vsel %vm4675_vm4, %v9078_v27, %v9819_v40  ;;  %v9494_v44 = vadd.f32 %v9493_v21, %v8870_v51  ;;  %v9487_v8 = vrot.slane %v8869_v16, 4 }
 0x6b4   : > { %v9485_v31 = vrot.slane %v9484_v26, 1  ;;  %v9478_v42 = vadd.f32 %v9477_v20, %v9476_v59  ;;  %v8872_v47 = vmul.f32 %v18285_v62, %v8104_v24  ;;  %v8103_v45 = vunpack.c.l.bf16 %v12198_v60 }
 0x6b5   : > { %v9821_v36 = vsel %vm4677_vm5, %v9084_v46, %v9820_v5  ;;  %v9495_v53 = vrot.slane %v9494_v44, 2  ;;  %v9488_v29 = vadd.f32 %v9487_v8, %v8869_v16  ;;  %v10536_v23 = vsel %vm4669_vm1, %v10334_v54, %v10535_v55 }
 0x6b6   : > { %v9822_v12 = vsel %vm4679_vm6, %v9090_v35, %v9821_v36  ;;  %v9486_v61 = vadd.f32 %v9485_v31, %v9484_v26  ;;  %v9479_v49 = vrot.slane %v9478_v42, 1  ;;  %v9505_v41 = vrot.slane %v8872_v47, 4  ;;  %v12200_v35 = vld [vmem:[%s12723_s26 + $0x80] sm:$0xff]  }
 0x6b7   : > { %9926 = vst [vmem:[%s17757_s20 + $0x18] sm:$0xff] %v9822_v12  ;;  %v8871_v33 = vmul.f32 %v18291_v34, %v8103_v45  ;;  %v9496_v22 = vadd.f32 %v9495_v53, %v9494_v44  ;;  %v9489_v15 = vrot.slane %v9488_v29, 2  ;;  %v10342_v25 = vrot.slane %v18291_v34, %v19883_v37 }
 0x6b8   : > { %v8106_v18 = vunpack.c.h.bf16 %v12199_v50  ;;  %v9480_v19 = vadd.f32 %v9479_v49, %v9478_v42  ;;  %v9506_v30 = vadd.f32 %v9505_v41, %v8872_v47  ;;  %v10346_v13 = vrot.slane %v18285_v62, %v19883_v37  ;;  %v18374_v47 = vpop.permute.xlu1 %8323 }
 0x6b9   : > { %v9499_v28 = vrot.slane %v8871_v33, 4  ;;  %v9490_v27 = vadd.f32 %v9489_v15, %v9488_v29  ;;  %v10537_v9 = vsel %vm4671_vm2, %v10338_v32, %v10536_v23  ;;  %v10354_v10 = vrot.slane %v18301_v6, %v19883_v37  ;;  %v12201_v29 = vld [vmem:[%s12723_s26 + $0x88] sm:$0xff]  }
 0x6ba   : > { %v8874_v63 = vmul.f32 %v18301_v6, %v8106_v18  ;;  %v9507_v7 = vrot.slane %v9506_v30, 2  ;;  %v10538_v4 = vsel %vm4673_vm3, %v10342_v25, %v10537_v9  ;;  %v8105_v3 = vunpack.c.l.bf16 %v12199_v50 }
 0x6bb   : > { %v9500_v34 = vadd.f32 %v9499_v28, %v8871_v33  ;;  %v9879_v48 = vsel %vm4667_vm0, %v9486_v61, %v9480_v19  ;;  %v9497_v62 = vrot.slane %v9496_v22, 1  ;;  %v9491_v0 = vrot.slane %v9490_v27, 1 }
 0x6bc   : > { %v9517_v56 = vrot.slane %v8874_v63, 4  ;;  %v9508_v57 = vadd.f32 %v9507_v7, %v9506_v30  ;;  %v8873_v51 = vmul.f32 %v18306_v39, %v8105_v3  ;;  %v10350_v6 = vrot.slane %v18306_v39, %v19883_v37  ;;  %v18365_v39 = vpop.permute.xlu0 %8328 }
 0x6bd   : > { %v9501_v14 = vrot.slane %v9500_v34, 2  ;;  %v9492_v32 = vadd.f32 %v9491_v0, %v9490_v27  ;;  %v10539_v40 = vsel %vm4675_vm4, %v10346_v13, %v10538_v4  ;;  %v8036_v43 = vunpack.c.h.bf16 %v12200_v35  ;;  %v18390_v4 = vpop.permute.xlu1 %8653 }
 0x6be   : > { %v9518_v17 = vadd.f32 %v9517_v56, %v8874_v63  ;;  %v9509_v59 = vrot.slane %v9508_v57, 1  ;;  %v9511_v21 = vrot.slane %v8873_v51, 4  ;;  %v10540_v16 = vsel %vm4677_vm5, %v10350_v6, %v10539_v40 }
 0x6bf   : > { %v9502_v26 = vadd.f32 %v9501_v14, %v9500_v34  ;;  %v9498_v54 = vadd.f32 %v9497_v62, %v9496_v22  ;;  %v10541_v20 = vsel %vm4679_vm6, %v10354_v10, %v10540_v16  ;;  %v8804_v55 = vmul.f32 %v18316_v38, %v8036_v43 }
 0x6c0   : > { %v9519_v46 = vrot.slane %v9518_v17, 2  ;;  %v9880_v60 = vsel %vm4669_vm1, %v9492_v32, %v9879_v48  ;;  %v9512_v5 = vadd.f32 %v9511_v21, %v8873_v51  ;;  %10591 = vst.msk [vmem:[%s17711_s16 + $0x60] sm:$0xff] %vm4802_vm7, %v10541_v20  ;;  %v10074_v31 = vrot.slane %v18316_v38, %v19883_v37  ;;  %v18384_v13 = vpop.permute.xlu0 %8658 }
 0x6c1   : > { %v9503_v24 = vrot.slane %v9502_v26, 1  ;;  %v9097_v8 = vrot.slane %v8804_v55, 4  ;;  %v8035_v36 = vunpack.c.l.bf16 %v12200_v35  ;;  %v10070_v42 = vrot.slane %v18323_v2, %v19883_v37 }
 0x6c2   : > { %v9520_v44 = vadd.f32 %v9519_v46, %v9518_v17  ;;  %v9510_v45 = vadd.f32 %v9509_v59, %v9508_v57  ;;  %v9513_v53 = vrot.slane %v9512_v5, 2  ;;  %v8038_v23 = vunpack.c.h.bf16 %v12201_v29 }
 0x6c3   : > { %v9504_v12 = vadd.f32 %v9503_v24, %v9502_v26  ;;  %v9881_v61 = vsel %vm4671_vm2, %v9498_v54, %v9880_v60  ;;  %v9098_v41 = vadd.f32 %v9097_v8, %v8804_v55  ;;  %v8803_v33 = vmul.f32 %v18323_v2, %v8035_v36  ;;  %v12203_v24 = vld [vmem:[%s12723_s26 + $0x98] sm:$0xff]  }
 0x6c4   : > { %v9521_v49 = vrot.slane %v9520_v44, 1  ;;  %v9514_v38 = vadd.f32 %v9513_v53, %v9512_v5  ;;  %v8806_v22 = vmul.f32 %v18332_v52, %v8038_v23  ;;  %v10082_v15 = vrot.slane %v18332_v52, %v19883_v37  ;;  %v12202_v52 = vld [vmem:[%s12723_s26 + $0x90] sm:$0xff]   ;;  %v18399_v26 = vpop.permute.xlu0 %8668 }
 0x6c5   : > { %v8037_v25 = vunpack.c.l.bf16 %v12201_v29  ;;  %v9882_v50 = vsel %vm4673_vm3, %v9504_v12, %v9881_v61  ;;  %v9099_v18 = vrot.slane %v9098_v41, 2  ;;  %v9091_v19 = vrot.slane %v8803_v33, 4 }
 0x6c6   : > { %v10479_v30 = vsel %vm4667_vm0, %v10074_v31, %v10070_v42  ;;  %v9515_v28 = vrot.slane %v9514_v38, 1  ;;  %v9109_v27 = vrot.slane %v8806_v22, 4  ;;  %v10078_v9 = vrot.slane %v18338_v1, %v19883_v37  ;;  %v18407_v31 = vpop.permute.xlu1 %8663 }
 0x6c7   : > { %v8805_v2 = vmul.f32 %v18338_v1, %v8037_v25  ;;  %v9522_v63 = vadd.f32 %v9521_v49, %v9520_v44  ;;  %v9100_v10 = vadd.f32 %v9099_v18, %v9098_v41  ;;  %v9092_v7 = vadd.f32 %v9091_v19, %v8803_v33  ;;  %v12204_v18 = vld [vmem:[%s12723_s26 + $0x1a0] sm:$0xff]  }
 0x6c8   : > { %v8040_v34 = vunpack.c.h.bf16 %v12202_v52  ;;  %v9883_v3 = vsel %vm4675_vm4, %v9510_v45, %v9882_v50  ;;  %v9516_v48 = vadd.f32 %v9515_v28, %v9514_v38  ;;  %v9110_v62 = vadd.f32 %v9109_v27, %v8806_v22  ;;  %v18414_v22 = vpop.permute.xlu0 %8678 }
 0x6c9   : > { %v9103_v0 = vrot.slane %v8805_v2, 4  ;;  %v9093_v56 = vrot.slane %v9092_v7, 2  ;;  %v10480_v57 = vsel %vm4669_vm1, %v10078_v9, %v10479_v30  ;;  %v8039_v51 = vunpack.c.l.bf16 %v12202_v52 }
 0x6ca   : > { %v8808_v14 = vmul.f32 %v18351_v11, %v8040_v34  ;;  %v9884_v1 = vsel %vm4677_vm5, %v9516_v48, %v9883_v3  ;;  %v9101_v6 = vrot.slane %v9100_v10, 1  ;;  %v9111_v32 = vrot.slane %v9110_v62, 2 }
 0x6cb   : > { %v9104_v17 = vadd.f32 %v9103_v0, %v8805_v2  ;;  %v9885_v40 = vsel %vm4679_vm6, %v9522_v63, %v9884_v1  ;;  %v9094_v35 = vadd.f32 %v9093_v56, %v9092_v7  ;;  %v10090_v59 = vrot.slane %v18351_v11, %v19883_v37  ;;  %v18421_v2 = vpop.permute.xlu1 %8673  ;;  %v12205_v1 = vld [vmem:[%s12723_s26 + $0x1a8] sm:$0xff]  }
 0x6cc   : > { %v9121_v43 = vrot.slane %v8808_v14, 4  ;;  %9935 = vst [vmem:[%s17757_s20 + $0x60] sm:$0xff] %v9885_v40  ;;  %v9112_v21 = vadd.f32 %v9111_v32, %v9110_v62  ;;  %v8807_v54 = vmul.f32 %v18355_v58, %v8039_v51  ;;  %v10086_v46 = vrot.slane %v18355_v58, %v19883_v37  ;;  %v18434_v32 = vpop.permute.xlu0 %8688 }
 0x6cd   : > { %v9105_v16 = vrot.slane %v9104_v17, 2  ;;  %v9095_v20 = vrot.slane %v9094_v35, 1  ;;  %v10481_v60 = vsel %vm4671_vm2, %v10082_v15, %v10480_v57  ;;  %v8042_v5 = vunpack.c.h.bf16 %v12203_v24 }
 0x6ce   : > { %v9122_v55 = vadd.f32 %v9121_v43, %v8808_v14  ;;  %v9102_v44 = vadd.f32 %v9101_v6, %v9100_v10  ;;  %v9113_v11 = vrot.slane %v9112_v21, 1  ;;  %v9115_v36 = vrot.slane %v8807_v54, 4 }
 0x6cf   : > { %v9106_v8 = vadd.f32 %v9105_v16, %v9104_v17  ;;  %v9096_v42 = vadd.f32 %v9095_v20, %v9094_v35  ;;  %v8810_v12 = vmul.f32 %v18365_v39, %v8042_v5  ;;  %v8041_v53 = vunpack.c.l.bf16 %v12203_v24 }
 0x6d0   : > { %v9123_v45 = vrot.slane %v9122_v55, 2  ;;  %v9116_v58 = vadd.f32 %v9115_v36, %v8807_v54  ;;  %v10482_v23 = vsel %vm4673_vm3, %v10086_v46, %v10481_v60  ;;  %v10098_v61 = vrot.slane %v18365_v39, %v19883_v37  ;;  %v18439_v54 = vpop.permute.xlu1 %8683 }
 0x6d1   : > { %v9107_v29 = vrot.slane %v9106_v8, 1  ;;  %v9114_v49 = vadd.f32 %v9113_v11, %v9112_v21  ;;  %v9133_v33 = vrot.slane %v8810_v12, 4  ;;  %v8809_v38 = vmul.f32 %v18374_v47, %v8041_v53 }
 0x6d2   : > { %v9124_v41 = vadd.f32 %v9123_v45, %v9122_v55  ;;  %v9117_v25 = vrot.slane %v9116_v58, 2  ;;  %v10094_v50 = vrot.slane %v18374_v47, %v19883_v37  ;;  %v8108_v19 = vunpack.c.h.bf16 %v12204_v18 }
 0x6d3   : > { %v9108_v15 = vadd.f32 %v9107_v29, %v9106_v8  ;;  %v9823_v30 = vsel %vm4667_vm0, %v9102_v44, %v9096_v42  ;;  %v9134_v28 = vadd.f32 %v9133_v33, %v8810_v12  ;;  %v10483_v27 = vsel %vm4675_vm4, %v10090_v59, %v10482_v23  ;;  %v12206_v29 = vld [vmem:[%s12723_s26 + $0x1b0] sm:$0xff]  }
 0x6d4   : > { %v9127_v39 = vrot.slane %v8809_v38, 4  ;;  %v9125_v9 = vrot.slane %v9124_v41, 1  ;;  %v9118_v63 = vadd.f32 %v9117_v25, %v9116_v58  ;;  %v10484_v10 = vsel %vm4677_vm5, %v10094_v50, %v10483_v27  ;;  %v18449_v58 = vpop.permute.xlu0 %8338  ;;  %v18454_v50 = vpop.permute.xlu1 %8333 }
 0x6d5   : > { %v8876_v7 = vmul.f32 %v18384_v13, %v8108_v19  ;;  %v9824_v47 = vsel %vm4669_vm1, %v9108_v15, %v9823_v30  ;;  %v9135_v52 = vrot.slane %v9134_v28, 2  ;;  %v10362_v3 = vrot.slane %v18384_v13, %v19883_v37 }
 0x6d6   : > { %v9128_v34 = vadd.f32 %v9127_v39, %v8809_v38  ;;  %v9119_v48 = vrot.slane %v9118_v63, 1  ;;  %v10485_v62 = vsel %vm4679_vm6, %v10098_v61, %v10484_v10  ;;  %v8107_v56 = vunpack.c.l.bf16 %v12204_v18 }
 0x6d7   : > { %v9529_v0 = vrot.slane %v8876_v7, 4  ;;  %v9136_v57 = vadd.f32 %v9135_v52, %v9134_v28  ;;  %10583 = vst.msk [vmem:[%s17711_s16 + $0x20] sm:$0xff] %vm4802_vm7, %v10485_v62  ;;  %v10358_v51 = vrot.slane %v18390_v4, %v19883_v37  ;;  %v8110_v6 = vunpack.c.h.bf16 %v12205_v1 }
 0x6d8   : > { %v9129_v14 = vrot.slane %v9128_v34, 2  ;;  %v9126_v17 = vadd.f32 %v9125_v9, %v9124_v41  ;;  %v9120_v40 = vadd.f32 %v9119_v48, %v9118_v63  ;;  %v8875_v13 = vmul.f32 %v18390_v4, %v8107_v56 }
 0x6d9   : > { %v9530_v35 = vadd.f32 %v9529_v0, %v8876_v7  ;;  %v9825_v43 = vsel %vm4671_vm2, %v9114_v49, %v9824_v47  ;;  %v9137_v59 = vrot.slane %v9136_v57, 1  ;;  %v8878_v16 = vmul.f32 %v18399_v26, %v8110_v6  ;;  %v12207_v47 = vld [vmem:[%s12723_s26 + $0x1b8] sm:$0xff]   ;;  %v18465_v0 = vpop.permute.xlu0 %8348 }
 0x6da   : > { %v9130_v21 = vadd.f32 %v9129_v14, %v9128_v34  ;;  %v9523_v20 = vrot.slane %v8875_v13, 4  ;;  %v10370_v55 = vrot.slane %v18399_v26, %v19883_v37  ;;  %v8109_v60 = vunpack.c.l.bf16 %v12205_v1 }
 0x6db   : > { %v9531_v46 = vrot.slane %v9530_v35, 2  ;;  %v9826_v24 = vsel %vm4673_vm3, %v9120_v40, %v9825_v43  ;;  %v10542_v4 = vsel %vm4667_vm0, %v10362_v3, %v10358_v51  ;;  %v9541_v44 = vrot.slane %v8878_v16, 4 }
 0x6dc   : > { %v9131_v5 = vrot.slane %v9130_v21, 1  ;;  %v9138_v11 = vadd.f32 %v9137_v59, %v9136_v57  ;;  %v9524_v36 = vadd.f32 %v9523_v20, %v8875_v13  ;;  %v8877_v42 = vmul.f32 %v18407_v31, %v8109_v60  ;;  %v12208_v60 = vld [vmem:[%s12723_s26 + $0xa0] sm:$0xff]  }
 0x6dd   : > { %v9532_v8 = vadd.f32 %v9531_v46, %v9530_v35  ;;  %v9542_v12 = vadd.f32 %v9541_v44, %v8878_v16  ;;  %v10366_v53 = vrot.slane %v18407_v31, %v19883_v37  ;;  %v8112_v26 = vunpack.c.h.bf16 %v12206_v29 }
 0x6de   : > { %v9132_v45 = vadd.f32 %v9131_v5, %v9130_v21  ;;  %v9827_v23 = vsel %vm4675_vm4, %v9126_v17, %v9826_v24  ;;  %v9525_v49 = vrot.slane %v9524_v36, 2  ;;  %v9535_v41 = vrot.slane %v8877_v42, 4  ;;  %v18472_v17 = vpop.permute.xlu1 %8343 }
 0x6df   : > { %v9533_v61 = vrot.slane %v9532_v8, 1  ;;  %v9543_v38 = vrot.slane %v9542_v12, 2  ;;  %v8880_v15 = vmul.f32 %v18414_v22, %v8112_v26  ;;  %v8111_v25 = vunpack.c.l.bf16 %v12206_v29 }
 0x6e0   : > { %v9828_v33 = vsel %vm4677_vm5, %v9132_v45, %v9827_v23  ;;  %v9526_v18 = vadd.f32 %v9525_v49, %v9524_v36  ;;  %v9536_v19 = vadd.f32 %v9535_v41, %v8877_v42  ;;  %v10378_v30 = vrot.slane %v18414_v22, %v19883_v37 }
 0x6e1   : > { %v9829_v31 = vsel %vm4679_vm6, %v9138_v11, %v9828_v33  ;;  %v9544_v28 = vadd.f32 %v9543_v38, %v9542_v12  ;;  %v10543_v27 = vsel %vm4669_vm1, %v10366_v53, %v10542_v4  ;;  %v9553_v39 = vrot.slane %v8880_v15, 4 }
 0x6e2   : > { %9927 = vst [vmem:[%s17757_s20 + $0x20] sm:$0xff] %v9829_v31  ;;  %v8879_v9 = vmul.f32 %v18421_v2, %v8111_v25  ;;  %v9527_v63 = vrot.slane %v9526_v18, 1  ;;  %v9537_v10 = vrot.slane %v9536_v19, 2  ;;  %v10374_v7 = vrot.slane %v18421_v2, %v19883_v37  ;;  %v18488_v26 = vpop.permute.xlu1 %8353  ;;  %v12209_v25 = vld [vmem:[%s12723_s26 + $0xa8] sm:$0xff]  }
 0x6e3   : > { %v8114_v52 = vunpack.c.h.bf16 %v12207_v47  ;;  %v9534_v34 = vadd.f32 %v9533_v61, %v9532_v8  ;;  %v9545_v3 = vrot.slane %v9544_v28, 1  ;;  %v9554_v48 = vadd.f32 %v9553_v39, %v8880_v15  ;;  %v18480_v8 = vpop.permute.xlu0 %8358 }
 0x6e4   : > { %v9547_v62 = vrot.slane %v8879_v9, 4  ;;  %v9538_v22 = vadd.f32 %v9537_v10, %v9536_v19  ;;  %v10544_v56 = vsel %vm4671_vm2, %v10370_v55, %v10543_v27  ;;  %v10386_v14 = vrot.slane %v18434_v32, %v19883_v37 }
 0x6e5   : > { %v8882_v57 = vmul.f32 %v18434_v32, %v8114_v52  ;;  %v9555_v51 = vrot.slane %v9554_v48, 2  ;;  %v10545_v2 = vsel %vm4673_vm3, %v10374_v7, %v10544_v56  ;;  %v8113_v6 = vunpack.c.l.bf16 %v12207_v47 }
 0x6e6   : > { %v9548_v1 = vadd.f32 %v9547_v62, %v8879_v9  ;;  %v9528_v40 = vadd.f32 %v9527_v63, %v9526_v18  ;;  %v9546_v35 = vadd.f32 %v9545_v3, %v9544_v28  ;;  %v9539_v13 = vrot.slane %v9538_v22, 1  ;;  %v18506_v62 = vpop.permute.xlu1 %8363 }
 0x6e7   : > { %v9565_v43 = vrot.slane %v8882_v57, 4  ;;  %v9556_v59 = vadd.f32 %v9555_v51, %v9554_v48  ;;  %v8881_v16 = vmul.f32 %v18439_v54, %v8113_v6  ;;  %v10382_v46 = vrot.slane %v18439_v54, %v19883_v37  ;;  %v18498_v63 = vpop.permute.xlu0 %8368 }
 0x6e8   : > { %v9549_v21 = vrot.slane %v9548_v1, 2  ;;  %v9540_v32 = vadd.f32 %v9539_v13, %v9538_v22  ;;  %v10546_v55 = vsel %vm4675_vm4, %v10378_v30, %v10545_v2  ;;  %v8044_v24 = vunpack.c.h.bf16 %v12208_v60 }
 0x6e9   : > { %v9566_v20 = vadd.f32 %v9565_v43, %v8882_v57  ;;  %v9557_v5 = vrot.slane %v9556_v59, 1  ;;  %v9559_v44 = vrot.slane %v8881_v16, 4  ;;  %v10547_v11 = vsel %vm4677_vm5, %v10382_v46, %v10546_v55 }
 0x6ea   : > { %v9550_v4 = vadd.f32 %v9549_v21, %v9548_v1  ;;  %v9886_v36 = vsel %vm4667_vm0, %v9534_v34, %v9528_v40  ;;  %v10548_v54 = vsel %vm4679_vm6, %v10386_v14, %v10547_v11  ;;  %v8812_v45 = vmul.f32 %v18449_v58, %v8044_v24  ;;  %v12210_v14 = vld [vmem:[%s12723_s26 + $0xb0] sm:$0xff]   ;;  %v18521_v11 = vpop.permute.xlu1 %8698 }
 0x6eb   : > { %v9567_v42 = vrot.slane %v9566_v20, 2  ;;  %v9887_v12 = vsel %vm4669_vm1, %v9540_v32, %v9886_v36  ;;  %v9560_v29 = vadd.f32 %v9559_v44, %v8881_v16  ;;  %10592 = vst.msk [vmem:[%s17711_s16 + $0x68] sm:$0xff] %vm4802_vm7, %v10548_v54  ;;  %v10106_v49 = vrot.slane %v18449_v58, %v19883_v37  ;;  %v18514_v46 = vpop.permute.xlu0 %8693  ;;  %v12211_v54 = vld [vmem:[%s12723_s26 + $0xb8] sm:$0xff]  }
 0x6ec   : > { %v9551_v53 = vrot.slane %v9550_v4, 1  ;;  %v9145_v61 = vrot.slane %v8812_v45, 4  ;;  %v8043_v41 = vunpack.c.l.bf16 %v12208_v60  ;;  %v9558_v33 = vadd.f32 %v9557_v5, %v9556_v59 }
 0x6ed   : > { %v9568_v23 = vadd.f32 %v9567_v42, %v9566_v20  ;;  %v9561_v15 = vrot.slane %v9560_v29, 2  ;;  %v8046_v31 = vunpack.c.h.bf16 %v12209_v25  ;;  %v9888_v18 = vsel %vm4671_vm2, %v9546_v35, %v9887_v12 }
 0x6ee   : > { %v9552_v38 = vadd.f32 %v9551_v53, %v9550_v4  ;;  %v9146_v30 = vadd.f32 %v9145_v61, %v8812_v45  ;;  %v8811_v28 = vmul.f32 %v18454_v50, %v8043_v41  ;;  %v10102_v39 = vrot.slane %v18454_v50, %v19883_v37 }
 0x6ef   : > { %v9569_v19 = vrot.slane %v9568_v23, 1  ;;  %v9562_v27 = vadd.f32 %v9561_v15, %v9560_v29  ;;  %v8814_v9 = vmul.f32 %v18465_v0, %v8046_v31  ;;  %v8045_v58 = vunpack.c.l.bf16 %v12209_v25  ;;  %v18529_v31 = vpop.permute.xlu0 %8703 }
 0x6f0   : > { %v9889_v10 = vsel %vm4673_vm3, %v9552_v38, %v9888_v18  ;;  %v9147_v7 = vrot.slane %v9146_v30, 2  ;;  %v9139_v47 = vrot.slane %v8811_v28, 4  ;;  %v10114_v52 = vrot.slane %v18465_v0, %v19883_v37 }
 0x6f1   : > { %v9563_v34 = vrot.slane %v9562_v27, 1  ;;  %v9157_v3 = vrot.slane %v8814_v9, 4  ;;  %v8813_v48 = vmul.f32 %v18472_v17, %v8045_v58  ;;  %v10110_v50 = vrot.slane %v18472_v17, %v19883_v37 }
 0x6f2   : > { %v9570_v22 = vadd.f32 %v9569_v19, %v9568_v23  ;;  %v9148_v56 = vadd.f32 %v9147_v7, %v9146_v30  ;;  %v9140_v57 = vadd.f32 %v9139_v47, %v8811_v28  ;;  %v8048_v51 = vunpack.c.h.bf16 %v12210_v14 }
 0x6f3   : > { %v9564_v1 = vadd.f32 %v9563_v34, %v9562_v27  ;;  %v10486_v2 = vsel %vm4667_vm0, %v10106_v49, %v10102_v39  ;;  %v9158_v6 = vadd.f32 %v9157_v3, %v8814_v9  ;;  %v9151_v0 = vrot.slane %v8813_v48, 4  ;;  %v12212_v9 = vld [vmem:[%s12723_s26 + $0x1c0] sm:$0xff]  }
 0x6f4   : > { %v9890_v40 = vsel %vm4675_vm4, %v9558_v33, %v9889_v10  ;;  %v9141_v35 = vrot.slane %v9140_v57, 2  ;;  %v8816_v13 = vmul.f32 %v18480_v8, %v8048_v51  ;;  %v8047_v43 = vunpack.c.l.bf16 %v12210_v14  ;;  %v18537_v10 = vpop.permute.xlu1 %8708 }
 0x6f5   : > { %v9891_v17 = vsel %vm4677_vm5, %v9564_v1, %v9890_v40  ;;  %v9159_v59 = vrot.slane %v9158_v6, 2  ;;  %v9152_v21 = vadd.f32 %v9151_v0, %v8813_v48  ;;  %v10487_v16 = vsel %vm4669_vm1, %v10110_v50, %v10486_v2 }
 0x6f6   : > { %v9892_v32 = vsel %vm4679_vm6, %v9570_v22, %v9891_v17  ;;  %v9149_v20 = vrot.slane %v9148_v56, 1  ;;  %v9142_v55 = vadd.f32 %v9141_v35, %v9140_v57  ;;  %v9169_v60 = vrot.slane %v8816_v13, 4 }
 0x6f7   : > { %9936 = vst [vmem:[%s17757_s20 + $0x68] sm:$0xff] %v9892_v32  ;;  %v9160_v24 = vadd.f32 %v9159_v59, %v9158_v6  ;;  %v9153_v5 = vrot.slane %v9152_v21, 2  ;;  %v8815_v4 = vmul.f32 %v18488_v26, %v8047_v43  ;;  %v10118_v44 = vrot.slane %v18488_v26, %v19883_v37  ;;  %v18544_v6 = vpop.permute.xlu0 %8713 }
 0x6f8   : > { %v9143_v36 = vrot.slane %v9142_v55, 1  ;;  %v9170_v42 = vadd.f32 %v9169_v60, %v8816_v13  ;;  %v8050_v45 = vunpack.c.h.bf16 %v12211_v54  ;;  %v10122_v53 = vrot.slane %v18480_v8, %v19883_v37  ;;  %v12213_v13 = vld [vmem:[%s12723_s26 + $0x1c8] sm:$0xff]  }
 0x6f9   : > { %v9154_v12 = vadd.f32 %v9153_v5, %v9152_v21  ;;  %v10488_v29 = vsel %vm4671_vm2, %v10114_v52, %v10487_v16  ;;  %v9163_v23 = vrot.slane %v8815_v4, 4  ;;  %v9150_v61 = vadd.f32 %v9149_v20, %v9148_v56  ;;  %v18551_v16 = vpop.permute.xlu1 %8718 }
 0x6fa   : > { %v9171_v49 = vrot.slane %v9170_v42, 2  ;;  %v8818_v41 = vmul.f32 %v18498_v63, %v8050_v45  ;;  %v8049_v33 = vunpack.c.l.bf16 %v12211_v54  ;;  %v9161_v26 = vrot.slane %v9160_v24, 1 }
 0x6fb   : > { %v9155_v38 = vrot.slane %v9154_v12, 1  ;;  %v9164_v15 = vadd.f32 %v9163_v23, %v8815_v4  ;;  %v10489_v25 = vsel %vm4673_vm3, %v10118_v44, %v10488_v29  ;;  %v9144_v18 = vadd.f32 %v9143_v36, %v9142_v55  ;;  %v8724_v23 = vpop.permute.xlu0 %8723 }
 0x6fc   : > { %v9172_v19 = vadd.f32 %v9171_v49, %v9170_v42  ;;  %v9181_v30 = vrot.slane %v8818_v41, 4  ;;  %v8817_v8 = vmul.f32 %v18506_v62, %v8049_v33  ;;  %v10130_v27 = vrot.slane %v18498_v63, %v19883_v37 }
 0x6fd   : > { %v9165_v28 = vrot.slane %v9164_v15, 2  ;;  %v10126_v39 = vrot.slane %v18506_v62, %v19883_v37  ;;  %v8115_v58 = vunpack.c.l.bf16 %v12212_v9  ;;  %v9156_v7 = vadd.f32 %v9155_v38, %v9154_v12 }
 0x6fe   : > { %v9182_v47 = vadd.f32 %v9181_v30, %v8818_v41  ;;  %v10490_v52 = vsel %vm4675_vm4, %v10122_v53, %v10489_v25  ;;  %v9175_v34 = vrot.slane %v8817_v8, 4  ;;  %v9162_v3 = vadd.f32 %v9161_v26, %v9160_v24  ;;  %v12214_v41 = vld [vmem:[%s12723_s26 + $0x1d0] sm:$0xff]   ;;  %v18565_v25 = vpop.permute.xlu1 %8373 }
 0x6ff   : > { %v9166_v48 = vadd.f32 %v9165_v28, %v9164_v15  ;;  %v10491_v50 = vsel %vm4677_vm5, %v10126_v39, %v10490_v52  ;;  %v8883_v63 = vmul.f32 %v18514_v46, %v8115_v58  ;;  %v9830_v22 = vsel %vm4667_vm0, %v9150_v61, %v9144_v18 }
 0x700   : > { %v9173_v62 = vrot.slane %v9172_v19, 1  ;;  %v9183_v56 = vrot.slane %v9182_v47, 2  ;;  %v9176_v57 = vadd.f32 %v9175_v34, %v8817_v8  ;;  %v10492_v51 = vsel %vm4679_vm6, %v10130_v27, %v10491_v50  ;;  %v8379_v50 = vpop.permute.xlu0 %8378 }
 0x701   : > { %v9167_v14 = vrot.slane %v9166_v48, 1  ;;  %v9571_v1 = vrot.slane %v8883_v63, 4  ;;  %v8116_v2 = vunpack.c.h.bf16 %v12212_v9  ;;  %v9831_v0 = vsel %vm4669_vm1, %v9156_v7, %v9830_v22  ;;  %10584 = vst.msk [vmem:[%s17711_s16 + $0x28] sm:$0xff] %vm4802_vm7, %v10492_v51 }
 0x702   : > { %v9184_v40 = vadd.f32 %v9183_v56, %v9182_v47  ;;  %v9177_v35 = vrot.slane %v9176_v57, 2  ;;  %v8117_v43 = vunpack.c.l.bf16 %v12213_v13  ;;  %v9174_v60 = vadd.f32 %v9173_v62, %v9172_v19 }
 0x703   : > { %v9168_v17 = vadd.f32 %v9167_v14, %v9166_v48  ;;  %v9572_v59 = vadd.f32 %v9571_v1, %v8883_v63  ;;  %v8884_v21 = vmul.f32 %v18521_v11, %v8116_v2  ;;  %v9832_v24 = vsel %vm4671_vm2, %v9162_v3, %v9831_v0  ;;  %v18578_v3 = vld [vmem:[%s12723_s26 + $0x1d8] sm:$0xff]   ;;  %v12216_v2 = vld [vmem:[%s12723_s26 + $0xc0] sm:$0xff]  }
 0x704   : > { %v9185_v32 = vrot.slane %v9184_v40, 1  ;;  %v9178_v20 = vadd.f32 %v9177_v35, %v9176_v57  ;;  %v8885_v55 = vmul.f32 %v18529_v31, %v8117_v43  ;;  %v10390_v5 = vrot.slane %v18514_v46, %v19883_v37  ;;  %v8384_v57 = vpop.permute.xlu1 %8383 }
 0x705   : > { %v9577_v4 = vrot.slane %v8884_v21, 4  ;;  %v9833_v44 = vsel %vm4673_vm3, %v9168_v17, %v9832_v24  ;;  %v9573_v42 = vrot.slane %v9572_v59, 2  ;;  %v10394_v53 = vrot.slane %v18521_v11, %v19883_v37 }
 0x706   : > { %v9179_v36 = vrot.slane %v9178_v20, 1  ;;  %v9583_v54 = vrot.slane %v8885_v55, 4  ;;  %v9186_v45 = vadd.f32 %v9185_v32, %v9184_v40  ;;  %v8118_v29 = vunpack.c.h.bf16 %v12213_v13 }
 0x707   : > { %v9578_v12 = vadd.f32 %v9577_v4, %v8884_v21  ;;  %v8119_v33 = vunpack.c.l.bf16 %v12214_v41  ;;  %v9834_v46 = vsel %vm4675_vm4, %v9174_v60, %v9833_v44  ;;  %v10398_v38 = vrot.slane %v18529_v31, %v19883_v37 }
 0x708   : > { %v9180_v61 = vadd.f32 %v9179_v36, %v9178_v20  ;;  %v9584_v49 = vadd.f32 %v9583_v54, %v8885_v55  ;;  %v8886_v15 = vmul.f32 %v18537_v10, %v8118_v29  ;;  %v9574_v11 = vadd.f32 %v9573_v42, %v9572_v59  ;;  %v8389_v55 = vpop.permute.xlu0 %8388 }
 0x709   : > { %v9579_v26 = vrot.slane %v9578_v12, 2  ;;  %v8887_v30 = vmul.f32 %v18544_v6, %v8119_v33  ;;  %v10549_v27 = vsel %vm4667_vm0, %v10394_v53, %v10390_v5  ;;  %v10402_v31 = vrot.slane %v18537_v10, %v19883_v37  ;;  %v12217_v5 = vld [vmem:[%s12723_s26 + $0xc8] sm:$0xff]  }
 0x70a   : > { %v9835_v18 = vsel %vm4677_vm5, %v9180_v61, %v9834_v46  ;;  %v9585_v19 = vrot.slane %v9584_v49, 2  ;;  %v9589_v39 = vrot.slane %v8886_v15, 4  ;;  %v8120_v7 = vunpack.c.h.bf16 %v12214_v41 }
 0x70b   : > { %v9836_v8 = vsel %vm4679_vm6, %v9186_v45, %v9835_v18  ;;  %v9580_v28 = vadd.f32 %v9579_v26, %v9578_v12  ;;  %v9595_v58 = vrot.slane %v8887_v30, 4  ;;  %v10550_v47 = vsel %vm4669_vm1, %v10398_v38, %v10549_v27  ;;  %v8394_v45 = vpop.permute.xlu1 %8393 }
 0x70c   : > { %9928 = vst [vmem:[%s17757_s20 + $0x28] sm:$0xff] %v9836_v8  ;;  %v9586_v9 = vadd.f32 %v9585_v19, %v9584_v49  ;;  %v9590_v52 = vadd.f32 %v9589_v39, %v8886_v15  ;;  %v10406_v34 = vrot.slane %v18544_v6, %v19883_v37  ;;  %v8121_v48 = vunpack.c.l.bf16 %v18578_v3  ;;  %v8399_v8 = vpop.permute.xlu0 %8398 }
 0x70d   : > { %v9575_v63 = vrot.slane %v9574_v11, 1  ;;  %v9581_v22 = vrot.slane %v9580_v28, 1  ;;  %v9596_v62 = vadd.f32 %v9595_v58, %v8887_v30  ;;  %v8888_v10 = vmul.f32 %v18551_v16, %v8120_v7  ;;  %v12218_v7 = vld [vmem:[%s12723_s26 + $0xd0] sm:$0xff]  }
 0x70e   : > { %v9587_v56 = vrot.slane %v9586_v9, 1  ;;  %v10551_v14 = vsel %vm4671_vm2, %v10402_v31, %v10550_v47  ;;  %v10410_v51 = vrot.slane %v18551_v16, %v19883_v37  ;;  %v8889_v1 = vmul.f32 %v8724_v23, %v8121_v48 }
 0x70f   : > { %v8051_v6 = vunpack.c.l.bf16 %v12216_v2  ;;  %v9591_v0 = vrot.slane %v9590_v52, 2  ;;  %v10552_v40 = vsel %vm4673_vm3, %v10406_v34, %v10551_v14  ;;  %v10414_v35 = vrot.slane %v8724_v23, %v19883_v37 }
 0x710   : > { %v9576_v13 = vadd.f32 %v9575_v63, %v9574_v11  ;;  %v9582_v43 = vadd.f32 %v9581_v22, %v9580_v28  ;;  %v9597_v17 = vrot.slane %v9596_v62, 2  ;;  %v9588_v21 = vadd.f32 %v9587_v56, %v9586_v9 }
 0x711   : > { %v8819_v59 = vmul.f32 %v18565_v25, %v8051_v6  ;;  %v9601_v32 = vrot.slane %v8888_v10, 4  ;;  %v8052_v20 = vunpack.c.h.bf16 %v12216_v2  ;;  %v10553_v16 = vsel %vm4675_vm4, %v10410_v51, %v10552_v40 }
 0x712   : > { %v9607_v60 = vrot.slane %v8889_v1, 4  ;;  %v8053_v4 = vunpack.c.l.bf16 %v12217_v5  ;;  %v18591_v44 = vadd.f32 %v9591_v0, %v9590_v52  ;;  %v18594_v36 = vsel %vm4677_vm5, %v10414_v35, %v10553_v16  ;;  %v8404_v52 = vpop.permute.xlu1 %8403  ;;  %v8409_v35 = vpop.permute.xlu0 %8408 }
 0x713   : > { %v9187_v24 = vrot.slane %v8819_v59, 4  ;;  %v8820_v42 = vmul.f32 %v8379_v50, %v8052_v20  ;;  %v10138_v54 = vrot.slane %v8379_v50, %v19883_v37  ;;  %v9893_v12 = vsel %vm4667_vm0, %v9582_v43, %v9576_v13 }
 0x714   : > { %v18598_v53 = vadd.f32 %v9597_v17, %v9596_v62  ;;  %v8821_v23 = vmul.f32 %v8384_v57, %v8053_v4  ;;  %v18601_v61 = vsel %vm4669_vm1, %v9588_v21, %v9893_v12  ;;  %v18603_v49 = vadd.f32 %v9601_v32, %v8888_v10 }
 0x715   : > { %v9188_v29 = vadd.f32 %v9187_v24, %v8819_v59  ;;  %v10134_v41 = vrot.slane %v18565_v25, %v19883_v37  ;;  %v9193_v33 = vrot.slane %v8820_v42, 4  ;;  %v18607_v46 = vadd.f32 %v9607_v60, %v8889_v1  ;;  %v12219_v59 = vld [vmem:[%s12723_s26 + $0xd8] sm:$0xff]  }
 0x716   : > { %v9199_v38 = vrot.slane %v8821_v23, 4  ;;  %v10142_v15 = vrot.slane %v8384_v57, %v19883_v37  ;;  %v9593_v18 = vrot.slane %v18591_v44, 1  ;;  %v8054_v30 = vunpack.c.h.bf16 %v12217_v5  ;;  %v8739_v60 = vpop.permute.xlu1 %8738 }
 0x717   : > { %v9189_v26 = vrot.slane %v9188_v29, 2  ;;  %v9194_v11 = vadd.f32 %v9193_v33, %v8820_v42  ;;  %v10493_v19 = vsel %vm4667_vm0, %v10138_v54, %v10134_v41  ;;  %v9599_v28 = vrot.slane %v18598_v53, 1 }
 0x718   : > { %v9200_v39 = vadd.f32 %v9199_v38, %v8821_v23  ;;  %v10146_v25 = vrot.slane %v8389_v55, %v19883_v37  ;;  %v9603_v9 = vrot.slane %v18603_v49, 2  ;;  %v8822_v58 = vmul.f32 %v8389_v55, %v8054_v30  ;;  %v8734_v30 = vpop.permute.xlu0 %8733 }
 0x719   : > { %v9190_v27 = vadd.f32 %v9189_v26, %v9188_v29  ;;  %v9195_v31 = vrot.slane %v9194_v11, 2  ;;  %v8055_v47 = vunpack.c.l.bf16 %v12218_v7  ;;  %v9609_v34 = vrot.slane %v18607_v46, 2 }
 0x71a   : > { %v9201_v50 = vrot.slane %v9200_v39, 2  ;;  %v10494_v63 = vsel %vm4669_vm1, %v10142_v15, %v10493_v19  ;;  %v9205_v62 = vrot.slane %v8822_v58, 4  ;;  %v10150_v51 = vrot.slane %v8394_v45, %v19883_v37 }
 0x71b   : > { %v9191_v48 = vrot.slane %v9190_v27, 1  ;;  %v9196_v22 = vadd.f32 %v9195_v31, %v9194_v11  ;;  %v10495_v56 = vsel %vm4671_vm2, %v10146_v25, %v10494_v63  ;;  %v8823_v10 = vmul.f32 %v8394_v45, %v8055_v47 }
 0x71c   : > { %v9202_v14 = vadd.f32 %v9201_v50, %v9200_v39  ;;  %v8056_v1 = vunpack.c.h.bf16 %v12218_v7  ;;  %v9206_v6 = vadd.f32 %v9205_v62, %v8822_v58  ;;  %v10154_v40 = vrot.slane %v8399_v8, %v19883_v37  ;;  %v12220_v39 = vld [vmem:[%s12723_s26 + $0x1e0] sm:$0xff]  }
 0x71d   : > { %v9192_v57 = vadd.f32 %v9191_v48, %v9190_v27  ;;  %v9197_v2 = vrot.slane %v9196_v22, 1  ;;  %v9211_v0 = vrot.slane %v8823_v10, 4  ;;  %v10496_v43 = vsel %vm4673_vm3, %v10150_v51, %v10495_v56  ;;  %v8744_v48 = vpop.permute.xlu1 %8743 }
 0x71e   : > { %v9203_v13 = vrot.slane %v9202_v14, 1  ;;  %v8824_v17 = vmul.f32 %v8399_v8, %v8056_v1  ;;  %v8057_v21 = vunpack.c.l.bf16 %v12219_v59  ;;  %v9207_v20 = vrot.slane %v9206_v6, 2 }
 0x71f   : > { %v9198_v32 = vadd.f32 %v9197_v2, %v9196_v22  ;;  %v9212_v55 = vadd.f32 %v9211_v0, %v8823_v10  ;;  %v10497_v16 = vsel %vm4675_vm4, %v10154_v40, %v10496_v43  ;;  %v10158_v42 = vrot.slane %v8404_v52, %v19883_v37 }
 0x720   : > { %v9204_v24 = vadd.f32 %v9203_v13, %v9202_v14  ;;  %v9217_v5 = vrot.slane %v8824_v17, 4  ;;  %v8825_v4 = vmul.f32 %v8404_v52, %v8057_v21  ;;  %v9208_v45 = vadd.f32 %v9207_v20, %v9206_v6  ;;  %v12221_v13 = vld [vmem:[%s12723_s26 + $0x1e8] sm:$0xff]  }
 0x721   : > { %v9837_v54 = vsel %vm4667_vm0, %v9198_v32, %v9192_v57  ;;  %v9213_v12 = vrot.slane %v9212_v55, 2  ;;  %v8058_v29 = vunpack.c.h.bf16 %v12219_v59  ;;  %v10498_v26 = vsel %vm4677_vm5, %v10158_v42, %v10497_v16 }
 0x722   : > { %v9838_v23 = vsel %vm4669_vm1, %v9204_v24, %v9837_v54  ;;  %v9218_v41 = vadd.f32 %v9217_v5, %v8824_v17  ;;  %v9223_v33 = vrot.slane %v8825_v4, 4  ;;  %v9209_v38 = vrot.slane %v9208_v45, 1  ;;  %v8749_v17 = vpop.permute.xlu0 %8748  ;;  %v8754_v5 = vpop.permute.xlu1 %8753 }
 0x723   : > { %v9214_v15 = vadd.f32 %v9213_v12, %v9212_v55  ;;  %v8826_v11 = vmul.f32 %v8409_v35, %v8058_v29  ;;  %v10162_v19 = vrot.slane %v8409_v35, %v19883_v37  ;;  %v8124_v25 = vunpack.c.h.bf16 %v12220_v39 }
 0x724   : > { %v9219_v8 = vrot.slane %v9218_v41, 2  ;;  %v9224_v27 = vadd.f32 %v9223_v33, %v8825_v4  ;;  %v10426_v31 = vrot.slane %v8739_v60, %v19883_v37  ;;  %v9210_v58 = vadd.f32 %v9209_v38, %v9208_v45 }
 0x725   : > { %v9215_v7 = vrot.slane %v9214_v15, 1  ;;  %v9229_v47 = vrot.slane %v8826_v11, 4  ;;  %v10499_v52 = vsel %vm4679_vm6, %v10162_v19, %v10498_v26  ;;  %v8892_v22 = vmul.f32 %v8739_v60, %v8124_v25 }
 0x726   : > { %v9220_v50 = vadd.f32 %v9219_v8, %v9218_v41  ;;  %v9225_v63 = vrot.slane %v9224_v27, 2  ;;  %10585 = vst.msk [vmem:[%s17711_s16 + $0x30] sm:$0xff] %vm4802_vm7, %v10499_v52  ;;  %v8123_v62 = vunpack.c.l.bf16 %v12220_v39  ;;  %v9839_v56 = vsel %vm4671_vm2, %v9210_v58, %v9838_v23  ;;  %v12222_v8 = vld [vmem:[%s12723_s26 + $0x1f0] sm:$0xff]   ;;  %v8759_v39 = vpop.permute.xlu0 %8758 }
 0x727   : > { %v9216_v10 = vadd.f32 %v9215_v7, %v9214_v15  ;;  %v9230_v57 = vadd.f32 %v9229_v47, %v8826_v11  ;;  %v10422_v14 = vrot.slane %v8734_v30, %v19883_v37  ;;  %v9625_v2 = vrot.slane %v8892_v22, 4 }
 0x728   : > { %v9221_v51 = vrot.slane %v9220_v50, 1  ;;  %v9226_v1 = vadd.f32 %v9225_v63, %v9224_v27  ;;  %v8891_v6 = vmul.f32 %v8734_v30, %v8123_v62  ;;  %v8125_v43 = vunpack.c.l.bf16 %v12221_v13  ;;  %v8764_v63 = vpop.permute.xlu1 %8763 }
 0x729   : > { %v9840_v0 = vsel %vm4673_vm3, %v9216_v10, %v9839_v56  ;;  %v9231_v40 = vrot.slane %v9230_v57, 2  ;;  %v10556_v35 = vsel %vm4667_vm0, %v10426_v31, %v10422_v14  ;;  %v9626_v32 = vadd.f32 %v9625_v2, %v8892_v22 }
 0x72a   : > { %v9222_v59 = vadd.f32 %v9221_v51, %v9220_v50  ;;  %v9227_v21 = vrot.slane %v9226_v1, 1  ;;  %v9619_v20 = vrot.slane %v8891_v6, 4  ;;  %v8893_v16 = vmul.f32 %v8744_v48, %v8125_v43 }
 0x72b   : > { %v9232_v55 = vadd.f32 %v9231_v40, %v9230_v57  ;;  %v10430_v60 = vrot.slane %v8744_v48, %v19883_v37  ;;  %v8126_v24 = vunpack.c.h.bf16 %v12221_v13  ;;  %v9627_v54 = vrot.slane %v9626_v32, 2  ;;  %v12223_v40 = vld [vmem:[%s12723_s26 + $0x1f8] sm:$0xff]   ;;  %s10876_s26 = sshll.u32 %s12505_s7, 11  ;;  %s10596_s7 = scalar_lea.sflag [#allocation5], %s12711_s21 }
 0x72c   : > { %v9841_v4 = vsel %vm4675_vm4, %v9222_v59, %v9840_v0  ;;  %v9228_v42 = vadd.f32 %v9227_v21, %v9226_v1  ;;  %v9620_v45 = vadd.f32 %v9619_v20, %v8891_v6  ;;  %v9631_v29 = vrot.slane %v8893_v16, 4  ;;  %s18696_s24 = scalar_lea.hbm %s18755_s8, %s10876_s26 }
 0x72d   : > { %v9233_v12 = vrot.slane %v9232_v55, 1  ;;  %v10557_v23 = vsel %vm4669_vm1, %v10430_v60, %v10556_v35  ;;  %v8894_v41 = vmul.f32 %v8749_v17, %v8126_v24  ;;  %v9628_v26 = vadd.f32 %v9627_v54, %v9626_v32 }
 0x72e   : > { %v9842_v33 = vsel %vm4677_vm5, %v9228_v42, %v9841_v4  ;;  %v9621_v38 = vrot.slane %v9620_v45, 2  ;;  %v10434_v15 = vrot.slane %v8749_v17, %v19883_v37  ;;  %v9632_v19 = vadd.f32 %v9631_v29, %v8893_v16 }
 0x72f   : > { %v9234_v11 = vadd.f32 %v9233_v12, %v9232_v55  ;;  %v9637_v30 = vrot.slane %v8894_v41, 4  ;;  %v8127_v27 = vunpack.c.l.bf16 %v12222_v8  ;;  %v9629_v25 = vrot.slane %v9628_v26, 1 }
 0x730   : > { %v9622_v31 = vadd.f32 %v9621_v38, %v9620_v45  ;;  %v10558_v58 = vsel %vm4671_vm2, %v10434_v15, %v10557_v23  ;;  %v10438_v7 = vrot.slane %v8754_v5, %v19883_v37  ;;  %v9633_v52 = vrot.slane %v9632_v19, 2 }
 0x731   : > { %v9843_v47 = vsel %vm4679_vm6, %v9234_v11, %v9842_v33  ;;  %v9638_v48 = vadd.f32 %v9637_v30, %v8894_v41  ;;  %v8895_v50 = vmul.f32 %v8754_v5, %v8127_v27  ;;  %v18651_v22 = vadd.f32 %v9603_v9, %v18603_v49  ;;  %v8769_v9 = vpop.permute.xlu0 %8768  ;;  %v8729_v5 = vpop.permute.xlu1 %8728 }
 0x732   : > { %9929 = vst [vmem:[%s17757_s20 + $0x30] sm:$0xff] %v9843_v47  ;;  %v9630_v62 = vadd.f32 %v9629_v25, %v9628_v26  ;;  %v9623_v56 = vrot.slane %v9622_v31, 1  ;;  %v8128_v10 = vunpack.c.h.bf16 %v12222_v8  ;;  %v9634_v57 = vadd.f32 %v9633_v52, %v9632_v19 }
 0x733   : > { %v9639_v14 = vrot.slane %v9638_v48, 2  ;;  %v9643_v51 = vrot.slane %v8895_v50, 4  ;;  %v10442_v1 = vrot.slane %v8759_v39, %v19883_v37  ;;  %v10559_v6 = vsel %vm4673_vm3, %v10438_v7, %v10558_v58 }
 0x734   : > { %v9624_v2 = vadd.f32 %v9623_v56, %v9622_v31  ;;  %v8896_v0 = vmul.f32 %v8759_v39, %v8128_v10  ;;  %v8129_v35 = vunpack.c.l.bf16 %v12223_v40  ;;  %v9635_v13 = vrot.slane %v9634_v57, 1 }
 0x735   : > { %v9640_v43 = vadd.f32 %v9639_v14, %v9638_v48  ;;  %v9644_v17 = vadd.f32 %v9643_v51, %v8895_v50  ;;  %v10446_v49 = vrot.slane %v8764_v63, %v19883_v37  ;;  %v9610_v59 = vadd.f32 %v9609_v34, %v18607_v46 }
 0x736   : > { %v9649_v21 = vrot.slane %v8896_v0, 4  ;;  %v10560_v32 = vsel %vm4675_vm4, %v10442_v1, %v10559_v6  ;;  %v8897_v20 = vmul.f32 %v8764_v63, %v8129_v35  ;;  %v9900_v55 = vsel %vm4667_vm0, %v9630_v62, %v9624_v2 }
 0x737   : > { %v9641_v16 = vrot.slane %v9640_v43, 1  ;;  %v9645_v60 = vrot.slane %v9644_v17, 2  ;;  %v8130_v24 = vunpack.c.h.bf16 %v12223_v40  ;;  %v10450_v54 = vrot.slane %v8769_v9, %v19883_v37 }
 0x738   : > { %v9650_v4 = vadd.f32 %v9649_v21, %v8896_v0  ;;  %v9655_v42 = vrot.slane %v8897_v20, 4  ;;  %v8122_v45 = vunpack.c.h.bf16 %v18578_v3  ;;  %v9636_v12 = vadd.f32 %v9635_v13, %v9634_v57 }
 0x739   : > { %v9646_v29 = vadd.f32 %v9645_v60, %v9644_v17  ;;  %v10561_v46 = vsel %vm4677_vm5, %v10446_v49, %v10560_v32  ;;  %v8898_v34 = vmul.f32 %v8769_v9, %v8130_v24  ;;  %v9642_v38 = vadd.f32 %v9641_v16, %v9640_v43 }
 0x73a   : > { %v9651_v23 = vrot.slane %v9650_v4, 2  ;;  %v9656_v41 = vadd.f32 %v9655_v42, %v8897_v20  ;;  %v10562_v33 = vsel %vm4679_vm6, %v10450_v54, %v10561_v46  ;;  %v8890_v26 = vmul.f32 %v8729_v5, %v8122_v45 }
 0x73b   : > { %v9647_v15 = vrot.slane %v9646_v29, 1  ;;  %v9661_v11 = vrot.slane %v8898_v34, 4  ;;  %10594 = vst.msk [vmem:[%s17711_s16 + $0x78] sm:$0xff] %vm4802_vm7, %v10562_v33  ;;  %v10418_v19 = vrot.slane %v8729_v5, %v19883_v37  ;;  %v9594_v3 = vadd.f32 %v9593_v18, %v18591_v44 }
 0x73c   : > { %v9652_v30 = vadd.f32 %v9651_v23, %v9650_v4  ;;  %v9657_v8 = vrot.slane %v9656_v41, 2  ;;  %v9613_v27 = vrot.slane %v8890_v26, 4  ;;  %v9605_v39 = vrot.slane %v18651_v22, 1 }
 0x73d   : > { %v9901_v25 = vsel %vm4669_vm1, %v9636_v12, %v9900_v55  ;;  %v9662_v31 = vadd.f32 %v9661_v11, %v8898_v34  ;;  %v10555_v58 = vsel %vm4679_vm6, %v10418_v19, %v18594_v36  ;;  %v9648_v7 = vadd.f32 %v9647_v15, %v9646_v29 }
 0x73e   : > { %v9653_v47 = vrot.slane %v9652_v30, 1  ;;  %v9658_v52 = vadd.f32 %v9657_v8, %v9656_v41  ;;  %v9614_v48 = vadd.f32 %v9613_v27, %v8890_v26  ;;  %10593 = vst.msk [vmem:[%s17711_s16 + $0x70] sm:$0xff] %vm4802_vm7, %v10555_v58  ;;  %v9600_v37 = vadd.f32 %v9599_v28, %v18598_v53 }
 0x73f   : > { %v9611_v44 = vrot.slane %v9610_v59, 1  ;;  %v9902_v18 = vsel %vm4671_vm2, %v9642_v38, %v9901_v25  ;;  %v9663_v50 = vrot.slane %v9662_v31, 2  ;;  %v9895_v36 = vsel %vm4671_vm2, %v9594_v3, %v18601_v61 }
 0x740   : > { %v9654_v63 = vadd.f32 %v9653_v47, %v9652_v30  ;;  %v9659_v62 = vrot.slane %v9658_v52, 1  ;;  %v9615_v56 = vrot.slane %v9614_v48, 2  ;;  %v9606_v57 = vadd.f32 %v9605_v39, %v18651_v22 }
 0x741   : > { %v9664_v10 = vadd.f32 %v9663_v50, %v9662_v31  ;;  %v9903_v14 = vsel %vm4673_vm3, %v9648_v7, %v9902_v18  ;;  %v9896_v53 = vsel %vm4673_vm3, %v9600_v37, %v9895_v36  ;;  %v9612_v28 = vadd.f32 %v9611_v44, %v9610_v59 }
 0x742   : > { %v9660_v51 = vadd.f32 %v9659_v62, %v9658_v52  ;;  %v9616_v1 = vadd.f32 %v9615_v56, %v9614_v48  ;;  %v9904_v2 = vsel %vm4675_vm4, %v9654_v63, %v9903_v14  ;;  %v9897_v22 = vsel %vm4675_vm4, %v9606_v57, %v9896_v53 }
 0x743   : > { %v9665_v6 = vrot.slane %v9664_v10, 1  ;;  %v9898_v13 = vsel %vm4677_vm5, %v9612_v28, %v9897_v22 }
 0x744   : > { %v9617_v61 = vrot.slane %v9616_v1, 1  ;;  %v9905_v40 = vsel %vm4677_vm5, %v9660_v51, %v9904_v2 }
 0x745   : > { %v9666_v0 = vadd.f32 %v9665_v6, %v9664_v10 }
 0x746   : > { %v9618_v35 = vadd.f32 %v9617_v61, %v9616_v1 }
 0x747   : > { %v9906_v43 = vsel %vm4679_vm6, %v9666_v0, %v9905_v40 }
 0x748   : > { %9938 = vst [vmem:[%s17757_s20 + $0x78] sm:$0xff] %v9906_v43  ;;  %v9899_v17 = vsel %vm4679_vm6, %v9618_v35, %v9898_v13 }
 0x749   : > { %9937 = vst [vmem:[%s17757_s20 + $0x70] sm:$0xff] %v9899_v17 }
 0x74a   : > { %12353 = shalt.err (!%p12350_p9)
}
 0x74b   : > { %s12354_s4 = scalar_lea.hbm %s18696_s24, 2048  ;;  %s12358_s0 = scalar_lea.hbm %s18755_s8, 4096 }
 0x74c   : > { %p12355_p0 = scmp.ne.s32.totalorder %s18696_s24, %s12354_s4  ;;  %p12359_p2 = scmp.lt.u32.totalorder %s18696_s24, %s18755_s8 }
 0x74d   : > { %p12360_p12 = scmp.lt.u32.totalorder %s12358_s0, %s12354_s4  ;;  %p12362_p13 = scmp.lt.u32.totalorder %s12354_s4, %s18696_s24 }
 0x74e   : > { %p12356_p8 = pnand %p12355_p0, %p19999_p6 }
 0x74f   : > { %p12361_p1 = por %p12360_p12, %p12359_p2 }
 0x750   : > { %p12357_p11 = pneg %p12356_p8 }
 0x751   : > { %p12363_p10 = por %p12362_p13, %p12361_p1 }
 0x753   : > { %p12364_p4 = pnand %p12363_p10, %p12357_p11 }
 0x755   : > { %12367 = shalt.err (!%p12364_p4)
}
 0x756   : > { %s12429_s16 = smov 128   ;;  %s12430_s10 = smov 8  }
 0x757   : > { %11169 = dma.vmem_to_hbm [thread:$0]  (%p19999_p6), %s18698_s30, 2048, %s18696_s24, %s10596_s7, %s12429_s16, %s12429_s16, %s12430_s10  }
 0x758 PF: > { %s10633_s20 = sand.u32 1, %s12406_s11   ;;  %p20000_p5 = scmp.ne.s32.totalorder %s19081_s17, 0 }
 0x759   : > { %p20001_p3 = scmp.ge.s32.totalorder %s12418_s14, 2  ;;  %s10634_s26 = scalar_lea.sflag [#allocation5], %s10633_s20 }
 0x75b   : > { %p11186_p7 = pnand %p20001_p3, %p20000_p5 }
 0x75d   : > { %12401 = dma.done.wait (!%p11186_p7), %s10634_s26, 2048  }
 0x75e   : > { %12403 = vsyncadd (!%p11186_p7), %s10634_s26, 4294965248  ;;  %s20002_s14 = sld [smem:[#allocation18_spill]]  ;;  %s20003_s29 = sld [smem:[#allocation17_spill]] }
 0x75f   : > { %s20004_s13 = sld [smem:[#allocation19_spill]]  ;;  %s20005_s11 = smov %s12410_s12 }
 0x764   : > { %p29_p9 = scmp.ge.s32.totalorder %s20002_s14, 4   ;;  %s20006_s12 = smov %s20003_s29 }
 0x766   :  { %31 = sbr.rel (!%p29_p9) target bundleno = 12 (0xc), region = 130 }
 0x76d   :  { %10647 = vsyncpa [#allocation4], 1 }
 0x76e   :  { %10649 = vsyncpa [#allocation4 + $0x1], 1 }
 0x76f   :  { %10650 = vsyncpa [#allocation7], 1 }
 0x770   :  { %10652 = vsyncpa [#allocation7 + $0x1], 1 }
 0x771   :  { %10653 = vsyncpa [#allocation10], 1 }
 0x772   :  { %10654 = vsyncpa [#allocation5], 1 }
 0x773   :  { %10656 = vsyncpa [#allocation5 + $0x1], 1 }

</bundles_post_ra>
